<compile_context>
chip_gen: v6e
topology: v6e:2x2x1
jax: 0.10.0
libtpu: 0.0.40
codegen_flags: <defaults>
</compile_context>

<pallas_src>
import functools

import jax
import jax.numpy as jnp
import numpy as np
from jax.experimental import pallas as pl
from jax.experimental.pallas import tpu as pltpu

PAD = 18          # = max dilation; common zero padding for every branch
BN_EPS = 1e-5
LANE = 128
SUBLANE = 8


def _round_up(x, m):
    return (x + m - 1) // m * m


# --------------------------------------------------------------------------- kernel
def _aspp_kernel(x_hbm, wf_ref, bias_ref, o_ref, slab, sem, *, tr, wo, taps):
    """One (batch n, row-tile r) grid step.

    x_hbm : (N, H_t + 2*PAD, Wp_slab, Cin_p)    compute dtype, HBM (pl.ANY)
    wf    : (NTAPS, Cin_p, Co_p)                fused branch weights, VMEM resident
    bias  : (N, 1, Co_p)                        fused per-image bias (f32), VMEM resident
    o_ref : (1, tr, wo, Co_p)                   output row tile
    slab  : (2, tr + 2*PAD, Wp_slab, Cin_p)     VMEM double buffer (scratch)
    sem   : DMA semaphores, shape (2,)
    """
    n = pl.program_id(0)
    r = pl.program_id(1)
    num_r = pl.num_programs(1)
    rows = tr + 2 * PAD

    def slab_copy(row_tile, slot):
        return pltpu.make_async_copy(
            x_hbm.at[n, pl.ds(row_tile * tr, rows)],
            slab.at[slot],
            sem.at[slot])

    # Prime the double buffer at the first row tile of every image.  The row axis is
    # "arbitrary" (sequential per core) so this prefetch chain is well defined; the
    # batch axis is "parallel" (megacore-shardable).
    @pl.when(r == 0)
    def _():
        slab_copy(0, 0).start()

    slot = r % 2

    # Prefetch the next row tile of the same image while this one computes.
    @pl.when(r + 1 < num_r)
    def _():
        slab_copy(r + 1, 1 - slot).start()

    # Wait for the current haloed slab.
    slab_copy(r, slot).wait()

    # Branches + 1x1 fuse conv + BN are pre-folded into one stacked weight tensor
    # (coincident centre taps merged), so the whole step is a single f32 accumulation
    # over NTAPS shifted-window matmuls.
    cin_p = slab.shape[-1]
    acc = None
    for t, (r0, c0) in enumerate(taps):
        patch = slab[slot, r0:r0 + tr, c0:c0 + wo, :].reshape(tr * wo, cin_p)
        part = jnp.dot(patch, wf_ref[t], preferred_element_type=jnp.float32)
        acc = part if acc is None else acc + part          # init from first tap

    y = jnp.maximum(acc + bias_ref[n], 0.0)                # fused bias + BN + ReLU
    # TODO(synk): nn.Dropout(0.5) is an inference-mode identity here (no RNG mask).
    o_ref[...] = y.reshape(1, tr, wo, -1).astype(o_ref.dtype)


# ------------------------------------------------------------------------ wrapper
def _fold_params(x_nhwc, params, compute_dtype):
    """Fold conv_out (1x1 fuse) + BatchNorm into the branch weights, fold the
    global-pool branch + every bias into one per-image bias vector (all in f32), and
    merge the four coincident centre taps into a single weight matrix."""
    f32 = jnp.float32
    co = params["w1"].shape[1]
    s = (params["gamma"] / jnp.sqrt(params["rvar"] + BN_EPS)).astype(f32)     # (Co,)
    wout = params["wout"].astype(f32)                                         # (5Co, Co)
    wb = [wout[i * co:(i + 1) * co] * s[None, :] for i in range(5)]           # (Co, Co)

    w1f = params["w1"].astype(f32) @ wb[0]                                    # (Cin, Co)
    w2f = jnp.einsum("hwio,op->hwip", params["w2"].astype(f32), wb[1])
    w3f = jnp.einsum("hwio,op->hwip", params["w3"].astype(f32), wb[2])
    w4f = jnp.einsum("hwio,op->hwip", params["w4"].astype(f32), wb[3])

    bias_const = (params["b1"] @ wb[0] + params["b2"] @ wb[1]
                  + params["b3"] @ wb[2] + params["b4"] @ wb[3]
                  + params["bout"] * s + params["beta"] - params["rmean"] * s)

    # Branch 5 (global avg pool -> 1x1 conv -> bilinear upsample of a 1x1 map, i.e.
    # a broadcast) is spatially constant: compute it in XLA and fold it into a
    # per-image bias.  This removes the only cross-tile dependency from the kernel.
    xm = jnp.mean(x_nhwc.astype(f32), axis=(1, 2))                            # (N, Cin)
    x5 = xm @ params["w5"].astype(f32) + params["b5"]                         # (N, Co)
    bias = bias_const[None, :] + x5 @ wb[4]                                   # (N, Co)

    # Tap stacking: the 1x1 branch and the centre taps of all three dilated 3x3
    # branches read the identical patch -> pre-sum them (in f32) into one tap.
    mats = [w1f + w2f[1, 1] + w3f[1, 1] + w4f[1, 1]]
    taps = [(PAD, PAD)]
    for wbr, d in ((w2f, 6), (w3f, 12), (w4f, 18)):
        for ky in range(3):
            for kx in range(3):
                if ky == 1 and kx == 1:
                    continue
                mats.append(wbr[ky, kx])
                taps.append((PAD + (ky - 1) * d, PAD + (kx - 1) * d))
    wf = jnp.stack(mats, axis=0)                                              # (25,Cin,Co)
    return wf.astype(compute_dtype), bias.astype(f32), tuple(taps)


def _default_vmem_limit_bytes():
    # ~104 MiB on the 128-MiB-VMEM chips (v5e/v6e), ~54 MiB on v7x (64 MiB VMEM).
    try:
        cap = pltpu.get_tpu_info().vmem_capacity_bytes
    except Exception:
        cap = 64 * 1024 * 1024
    return min(int(cap * 0.85), 104 * 1024 * 1024)


def aspp_forward_nhwc(x_nhwc, params, *, row_tile=32, compute_dtype=jnp.bfloat16,
                      out_dtype=jnp.float32, vmem_limit_bytes=None):
    """x_nhwc: (N, H, W, Cin). Returns (N, H, W, Cout) in out_dtype (default f32).

    row_tile is the VMEM-budget knob: per step the kernel holds
    2 * (row_tile + 36) * Wp_slab * Cin_p * 2 bytes of input slab (bf16) plus one
    copy of the fused weight stack.  Larger row_tile cuts halo re-reads of the input
    and keeps the matmul M dimension (row_tile * W) >= 512 on realistic feature maps.
    """
    n, h, w, cin = x_nhwc.shape
    co = params["w1"].shape[1]
    cin_p = _round_up(cin, LANE)                 # lane-dense K for the MXU
    co_p = _round_up(co, LANE)                   # lane-dense output (no masked stores)
    w_p = _round_up(w, SUBLANE)                  # sublane-dense output width
    tr = min(row_tile, _round_up(h, SUBLANE))
    h_t = _round_up(h, tr)
    num_r = h_t // tr
    rows = tr + 2 * PAD
    wp_slab = _round_up(w_p + 2 * PAD, SUBLANE)  # sublane-dense slab width

    wf, bias, taps = _fold_params(x_nhwc, params, compute_dtype)
    wf = jnp.pad(wf, ((0, 0), (0, cin_p - cin), (0, co_p - co)))
    bias = jnp.pad(bias, ((0, 0), (0, co_p - co))).reshape(n, 1, co_p)

    # Pad: channels to Cin_p, rows by PAD (plus extra bottom rows to H_t), cols by PAD
    # on the left and to Wp_slab on the right.
    # TODO(synk): fold this pad + cast into the slab DMA to avoid the padded HBM copy.
    xp = jnp.pad(x_nhwc.astype(compute_dtype),
                 ((0, 0), (PAD, PAD + h_t - h), (PAD, wp_slab - w - PAD),
                  (0, cin_p - cin)))

    if vmem_limit_bytes is None:
        vmem_limit_bytes = _default_vmem_limit_bytes()

    kernel = functools.partial(_aspp_kernel, tr=tr, wo=w_p, taps=taps)

    out = pl.pallas_call(
        kernel,
        out_shape=jax.ShapeDtypeStruct((n, h_t, w_p, co_p), out_dtype),
        grid_spec=pltpu.PrefetchScalarGridSpec(
            num_scalar_prefetch=0,
            grid=(n, num_r),
            in_specs=[
                pl.BlockSpec(memory_space=pl.ANY),                    # input, HBM
                pl.BlockSpec(memory_space=pltpu.MemorySpace.VMEM),    # weights, resident
                pl.BlockSpec(memory_space=pltpu.MemorySpace.VMEM),    # bias, resident
            ],
            out_specs=pl.BlockSpec((1, tr, w_p, co_p), lambda b, r: (b, r, 0, 0)),
            scratch_shapes=[
                pltpu.VMEM((2, rows, wp_slab, cin_p), compute_dtype),  # haloed slab x2
                pltpu.SemaphoreType.DMA((2,)),
            ]),
        compiler_params=pltpu.CompilerParams(
            dimension_semantics=("parallel", "arbitrary"),
            vmem_limit_bytes=vmem_limit_bytes),
    )(xp, wf, bias)

    return out[:, :h, :w, :co]


def aspp_forward(x_nchw, params, **kwargs):
    """NCHW interface matching the PyTorch module.  Callers that can produce/consume
    NHWC should use aspp_forward_nhwc directly and skip both transposes."""
    x_nhwc = jnp.transpose(x_nchw, (0, 2, 3, 1))
    y = aspp_forward_nhwc(x_nhwc, params, **kwargs)
    return jnp.transpose(y, (0, 3, 1, 2))


# ------------------------------------------------------------------ params / reference
def init_params(key, in_channels, out_channels):
    ks = jax.random.split(key, 16)
    f = lambda k, shape, s=0.1: (s * jax.random.normal(k, shape)).astype(jnp.float32)
    ci, co = in_channels, out_channels
    return {
        "w1": f(ks[0], (ci, co)),        "b1": f(ks[1], (co,)),
        "w2": f(ks[2], (3, 3, ci, co)),  "b2": f(ks[3], (co,)),
        "w3": f(ks[4], (3, 3, ci, co)),  "b3": f(ks[5], (co,)),
        "w4": f(ks[6], (3, 3, ci, co)),  "b4": f(ks[7], (co,)),
        "w5": f(ks[8], (ci, co)),        "b5": f(ks[9], (co,)),
        "wout": f(ks[10], (5 * co, co)), "bout": f(ks[11], (co,)),
        "gamma": 1.0 + f(ks[12], (co,)), "beta": f(ks[13], (co,)),
        "rmean": f(ks[14], (co,)),
        "rvar": 1.0 + 0.1 * jax.random.uniform(ks[15], (co,), dtype=jnp.float32),
    }


def aspp_reference(x, p):
    """Pure-JAX f32 reference matching the PyTorch module (eval mode), NCHW."""
    def conv1x1(x, w, b):
        return jnp.einsum("nchw,co->nohw", x, w) + b.reshape(1, -1, 1, 1)

    def conv3x3(x, w, b, d):
        wk = jnp.transpose(w, (3, 2, 0, 1))  # OIHW
        y = jax.lax.conv_general_dilated(
            x, wk, window_strides=(1, 1), padding=[(d, d), (d, d)],
            rhs_dilation=(d, d), dimension_numbers=("NCHW", "OIHW", "NCHW"))
        return y + b.reshape(1, -1, 1, 1)

    x1 = conv1x1(x, p["w1"], p["b1"])
    x2 = conv3x3(x, p["w2"], p["b2"], 6)
    x3 = conv3x3(x, p["w3"], p["b3"], 12)
    x4 = conv3x3(x, p["w4"], p["b4"], 18)
    x5 = jnp.mean(x, axis=(2, 3), keepdims=True)
    x5 = conv1x1(x5, p["w5"], p["b5"])
    x5 = jnp.broadcast_to(x5, x1.shape)
    cat = jnp.concatenate([x1, x2, x3, x4, x5], axis=1)
    y = conv1x1(cat, p["wout"], p["bout"])
    y = ((y - p["rmean"].reshape(1, -1, 1, 1))
         / jnp.sqrt(p["rvar"].reshape(1, -1, 1, 1) + BN_EPS)
         * p["gamma"].reshape(1, -1, 1, 1)
         + p["beta"].reshape(1, -1, 1, 1))
    return jnp.maximum(y, 0.0)


if __name__ == "__main__":
    key = jax.random.PRNGKey(0)
    k_x, k_p = jax.random.split(key)

    N, Cin, Cout, H, W = 2, 4, 8, 16, 16
    x = jax.random.normal(k_x, (N, Cin, H, W), dtype=jnp.float32)
    params = init_params(k_p, Cin, Cout)

    out = jax.block_until_ready(aspp_forward(x, params))
    ref = jax.block_until_ready(aspp_reference(x, params))

    assert out.shape == (N, Cout, H, W), out.shape
    # bf16 inputs/weights with f32 accumulation -> slightly looser tolerance than f32.
    np.testing.assert_allclose(np.asarray(out), np.asarray(ref), rtol=2e-2, atol=2e-2)

    print("KERNEL_OK")
</pallas_src>

<mosaic_0001>
module attributes {stable_mosaic.version = 11 : i64} {
  func.func @_aspp_kernel(%arg0: i32, %arg1: i32, %arg2: memref<2x52x56x128xbf16, #tpu.memory_space<any>>, %arg3: memref<25x128x128xbf16, #tpu.memory_space<vmem>>, %arg4: memref<2x1x128xf32, #tpu.memory_space<vmem>>, %arg5: memref<1x16x16x128xf32, #tpu.memory_space<vmem>>, %arg6: memref<2x52x56x128xbf16, #tpu.memory_space<vmem>>, %arg7: memref<2x!tpu.dma_semaphore, #tpu.memory_space<semaphore_mem>>) attributes {dimension_semantics = [#tpu.dimension_semantics<parallel>, #tpu.dimension_semantics<arbitrary>], iteration_bounds = array<i64: 2, 1>, scalar_prefetch = 0 : i64, scratch_operands = 2 : i64, tpu.core_type = #tpu.core_type<tc>, window_params = [{}, {pipeline_mode = #tpu.pipeline_mode<synchronous>, transform_indices = @transform_1, window_bounds = array<i64: 25, 128, 128>}, {pipeline_mode = #tpu.pipeline_mode<synchronous>, transform_indices = @transform_2, window_bounds = array<i64: 2, 1, 128>}, {transform_indices = @transform_3, window_bounds = array<i64: 1, 16, 16, 128>}]} {
    %c0_i32 = arith.constant 0 : i32
    %0 = arith.cmpi eq, %arg1, %c0_i32 : i32
    %1 = arith.extui %0 : i1 to i32
    %c0_i32_0 = arith.constant 0 : i32
    %2 = arith.cmpi ne, %1, %c0_i32_0 : i32
    scf.if %2 {
      %c0_i32_167 = arith.constant 0 : i32
      %c0_i32_168 = arith.constant 0 : i32
      %c0_i32_169 = arith.constant 0 : i32
      %c0_i32_170 = arith.constant 0 : i32
      %c0_i32_171 = arith.constant 0 : i32
      %232 = tpu.memref_slice %arg2[%arg0, %c0_i32_169, %c0_i32_170, %c0_i32_171] : memref<2x52x56x128xbf16, #tpu.memory_space<any>> -> memref<1x52x56x128xbf16, #tpu.memory_space<any>>
      %233 = tpu.memref_squeeze %232 : memref<1x52x56x128xbf16, #tpu.memory_space<any>> -> memref<52x56x128xbf16, #tpu.memory_space<any>>
      %c0_i32_172 = arith.constant 0 : i32
      %c0_i32_173 = arith.constant 0 : i32
      %c0_i32_174 = arith.constant 0 : i32
      %234 = tpu.memref_slice %arg6[%c0_i32_167, %c0_i32_172, %c0_i32_173, %c0_i32_174] : memref<2x52x56x128xbf16, #tpu.memory_space<vmem>> -> memref<1x52x56x128xbf16, #tpu.memory_space<vmem>>
      %235 = tpu.memref_squeeze %234 : memref<1x52x56x128xbf16, #tpu.memory_space<vmem>> -> memref<52x56x128xbf16, #tpu.memory_space<vmem>>
      %236 = tpu.memref_slice %arg7[%c0_i32_168] : memref<2x!tpu.dma_semaphore, #tpu.memory_space<semaphore_mem>> -> memref<1x!tpu.dma_semaphore, #tpu.memory_space<semaphore_mem>>
      %237 = tpu.memref_squeeze %236 : memref<1x!tpu.dma_semaphore, #tpu.memory_space<semaphore_mem>> -> memref<!tpu.dma_semaphore, #tpu.memory_space<semaphore_mem>>
      tpu.enqueue_dma source(%233 : memref<52x56x128xbf16, #tpu.memory_space<any>>) target(%235 : memref<52x56x128xbf16, #tpu.memory_space<vmem>>) target_semaphore(%237 : memref<!tpu.dma_semaphore, #tpu.memory_space<semaphore_mem>>)
    } else {
    }
    %c2_i32 = arith.constant 2 : i32
    %c0_i32_1 = arith.constant 0 : i32
    %3 = arith.cmpi eq, %c2_i32, %c0_i32_1 : i32
    %c1_i32 = arith.constant 1 : i32
    %4 = arith.select %3, %c1_i32, %c2_i32 : i32
    %5 = arith.remsi %arg1, %4 : i32
    %c0_i32_2 = arith.constant 0 : i32
    %6 = arith.cmpi ne, %5, %c0_i32_2 : i32
    %c0_i32_3 = arith.constant 0 : i32
    %7 = arith.cmpi slt, %5, %c0_i32_3 : i32
    %c0_i32_4 = arith.constant 0 : i32
    %8 = arith.cmpi slt, %4, %c0_i32_4 : i32
    %9 = arith.xori %7, %8 : i1
    %10 = arith.andi %9, %6 : i1
    %11 = arith.addi %5, %4 : i32
    %12 = arith.select %10, %11, %5 : i32
    %c1_i32_5 = arith.constant 1 : i32
    %13 = arith.addi %arg1, %c1_i32_5 : i32
    %c1_i32_6 = arith.constant 1 : i32
    %14 = arith.cmpi slt, %13, %c1_i32_6 : i32
    %15 = arith.extui %14 : i1 to i32
    %c0_i32_7 = arith.constant 0 : i32
    %16 = arith.cmpi ne, %15, %c0_i32_7 : i32
    scf.if %16 {
      %c1_i32_167 = arith.constant 1 : i32
      %232 = arith.addi %arg1, %c1_i32_167 : i32
      %c1_i32_168 = arith.constant 1 : i32
      %233 = arith.subi %c1_i32_168, %12 : i32
      %c16_i32_169 = arith.constant 16 : i32
      %234 = arith.muli %232, %c16_i32_169 : i32
      %c0_i32_170 = arith.constant 0 : i32
      %c0_i32_171 = arith.constant 0 : i32
      %235 = tpu.memref_slice %arg2[%arg0, %234, %c0_i32_170, %c0_i32_171] : memref<2x52x56x128xbf16, #tpu.memory_space<any>> -> memref<1x52x56x128xbf16, #tpu.memory_space<any>>
      %236 = tpu.memref_squeeze %235 : memref<1x52x56x128xbf16, #tpu.memory_space<any>> -> memref<52x56x128xbf16, #tpu.memory_space<any>>
      %c0_i32_172 = arith.constant 0 : i32
      %c0_i32_173 = arith.constant 0 : i32
      %c0_i32_174 = arith.constant 0 : i32
      %237 = tpu.memref_slice %arg6[%233, %c0_i32_172, %c0_i32_173, %c0_i32_174] : memref<2x52x56x128xbf16, #tpu.memory_space<vmem>> -> memref<1x52x56x128xbf16, #tpu.memory_space<vmem>>
      %238 = tpu.memref_squeeze %237 : memref<1x52x56x128xbf16, #tpu.memory_space<vmem>> -> memref<52x56x128xbf16, #tpu.memory_space<vmem>>
      %239 = tpu.memref_slice %arg7[%233] : memref<2x!tpu.dma_semaphore, #tpu.memory_space<semaphore_mem>> -> memref<1x!tpu.dma_semaphore, #tpu.memory_space<semaphore_mem>>
      %240 = tpu.memref_squeeze %239 : memref<1x!tpu.dma_semaphore, #tpu.memory_space<semaphore_mem>> -> memref<!tpu.dma_semaphore, #tpu.memory_space<semaphore_mem>>
      tpu.enqueue_dma source(%236 : memref<52x56x128xbf16, #tpu.memory_space<any>>) target(%238 : memref<52x56x128xbf16, #tpu.memory_space<vmem>>) target_semaphore(%240 : memref<!tpu.dma_semaphore, #tpu.memory_space<semaphore_mem>>)
    } else {
    }
    %c16_i32 = arith.constant 16 : i32
    %17 = arith.muli %arg1, %c16_i32 : i32
    %c0_i32_8 = arith.constant 0 : i32
    %c0_i32_9 = arith.constant 0 : i32
    %18 = tpu.memref_slice %arg2[%arg0, %17, %c0_i32_8, %c0_i32_9] : memref<2x52x56x128xbf16, #tpu.memory_space<any>> -> memref<1x52x56x128xbf16, #tpu.memory_space<any>>
    %19 = tpu.memref_squeeze %18 : memref<1x52x56x128xbf16, #tpu.memory_space<any>> -> memref<52x56x128xbf16, #tpu.memory_space<any>>
    %c0_i32_10 = arith.constant 0 : i32
    %c0_i32_11 = arith.constant 0 : i32
    %c0_i32_12 = arith.constant 0 : i32
    %20 = tpu.memref_slice %arg6[%12, %c0_i32_10, %c0_i32_11, %c0_i32_12] : memref<2x52x56x128xbf16, #tpu.memory_space<vmem>> -> memref<1x52x56x128xbf16, #tpu.memory_space<vmem>>
    %21 = tpu.memref_squeeze %20 : memref<1x52x56x128xbf16, #tpu.memory_space<vmem>> -> memref<52x56x128xbf16, #tpu.memory_space<vmem>>
    %22 = tpu.memref_slice %arg7[%12] : memref<2x!tpu.dma_semaphore, #tpu.memory_space<semaphore_mem>> -> memref<1x!tpu.dma_semaphore, #tpu.memory_space<semaphore_mem>>
    %23 = tpu.memref_squeeze %22 : memref<1x!tpu.dma_semaphore, #tpu.memory_space<semaphore_mem>> -> memref<!tpu.dma_semaphore, #tpu.memory_space<semaphore_mem>>
    tpu.wait_dma2 semaphore(%23 : memref<!tpu.dma_semaphore, #tpu.memory_space<semaphore_mem>>) src(%19 : memref<52x56x128xbf16, #tpu.memory_space<any>>) dst(%21 : memref<52x56x128xbf16, #tpu.memory_space<vmem>>)
    %24 = arith.index_cast %12 : i32 to index
    %c18 = arith.constant 18 : index
    %c18_13 = arith.constant 18 : index
    %c0 = arith.constant 0 : index
    %25 = vector.load %arg6[%24, %c18, %c18_13, %c0] : memref<2x52x56x128xbf16, #tpu.memory_space<vmem>>, vector<1x16x16x128xbf16>
    %26 = vector.shape_cast %25 : vector<1x16x16x128xbf16> to vector<16x16x128xbf16>
    %27 = vector.shape_cast %26 : vector<16x16x128xbf16> to vector<256x128xbf16>
    %c0_14 = arith.constant 0 : index
    %c0_15 = arith.constant 0 : index
    %c0_16 = arith.constant 0 : index
    %28 = vector.load %arg3[%c0_14, %c0_15, %c0_16] : memref<25x128x128xbf16, #tpu.memory_space<vmem>>, vector<1x128x128xbf16>
    %29 = vector.shape_cast %28 : vector<1x128x128xbf16> to vector<128x128xbf16>
    %cst = arith.constant dense<0.000000e+00> : vector<256x128xf32>
    %30 = tpu.matmul %27, %29, %cst {dimension_numbers = #tpu.dot_dimension_numbers<[1], [0], [0], [1], [0, 0, 1, 1], [], []>} : vector<256x128xbf16>, vector<128x128xbf16>, vector<256x128xf32> -> vector<256x128xf32>
    %31 = arith.index_cast %12 : i32 to index
    %c12 = arith.constant 12 : index
    %c12_17 = arith.constant 12 : index
    %c0_18 = arith.constant 0 : index
    %32 = vector.load %arg6[%31, %c12, %c12_17, %c0_18] : memref<2x52x56x128xbf16, #tpu.memory_space<vmem>>, vector<1x16x16x128xbf16>
    %33 = vector.shape_cast %32 : vector<1x16x16x128xbf16> to vector<16x16x128xbf16>
    %34 = vector.shape_cast %33 : vector<16x16x128xbf16> to vector<256x128xbf16>
    %c1 = arith.constant 1 : index
    %c0_19 = arith.constant 0 : index
    %c0_20 = arith.constant 0 : index
    %35 = vector.load %arg3[%c1, %c0_19, %c0_20] : memref<25x128x128xbf16, #tpu.memory_space<vmem>>, vector<1x128x128xbf16>
    %36 = vector.shape_cast %35 : vector<1x128x128xbf16> to vector<128x128xbf16>
    %cst_21 = arith.constant dense<0.000000e+00> : vector<256x128xf32>
    %37 = tpu.matmul %34, %36, %cst_21 {dimension_numbers = #tpu.dot_dimension_numbers<[1], [0], [0], [1], [0, 0, 1, 1], [], []>} : vector<256x128xbf16>, vector<128x128xbf16>, vector<256x128xf32> -> vector<256x128xf32>
    %38 = arith.addf %30, %37 : vector<256x128xf32>
    %39 = arith.index_cast %12 : i32 to index
    %c12_22 = arith.constant 12 : index
    %c18_23 = arith.constant 18 : index
    %c0_24 = arith.constant 0 : index
    %40 = vector.load %arg6[%39, %c12_22, %c18_23, %c0_24] : memref<2x52x56x128xbf16, #tpu.memory_space<vmem>>, vector<1x16x16x128xbf16>
    %41 = vector.shape_cast %40 : vector<1x16x16x128xbf16> to vector<16x16x128xbf16>
    %42 = vector.shape_cast %41 : vector<16x16x128xbf16> to vector<256x128xbf16>
    %c2 = arith.constant 2 : index
    %c0_25 = arith.constant 0 : index
    %c0_26 = arith.constant 0 : index
    %43 = vector.load %arg3[%c2, %c0_25, %c0_26] : memref<25x128x128xbf16, #tpu.memory_space<vmem>>, vector<1x128x128xbf16>
    %44 = vector.shape_cast %43 : vector<1x128x128xbf16> to vector<128x128xbf16>
    %cst_27 = arith.constant dense<0.000000e+00> : vector<256x128xf32>
    %45 = tpu.matmul %42, %44, %cst_27 {dimension_numbers = #tpu.dot_dimension_numbers<[1], [0], [0], [1], [0, 0, 1, 1], [], []>} : vector<256x128xbf16>, vector<128x128xbf16>, vector<256x128xf32> -> vector<256x128xf32>
    %46 = arith.addf %38, %45 : vector<256x128xf32>
    %47 = arith.index_cast %12 : i32 to index
    %c12_28 = arith.constant 12 : index
    %c24 = arith.constant 24 : index
    %c0_29 = arith.constant 0 : index
    %48 = vector.load %arg6[%47, %c12_28, %c24, %c0_29] : memref<2x52x56x128xbf16, #tpu.memory_space<vmem>>, vector<1x16x16x128xbf16>
    %49 = vector.shape_cast %48 : vector<1x16x16x128xbf16> to vector<16x16x128xbf16>
    %50 = vector.shape_cast %49 : vector<16x16x128xbf16> to vector<256x128xbf16>
    %c3 = arith.constant 3 : index
    %c0_30 = arith.constant 0 : index
    %c0_31 = arith.constant 0 : index
    %51 = vector.load %arg3[%c3, %c0_30, %c0_31] : memref<25x128x128xbf16, #tpu.memory_space<vmem>>, vector<1x128x128xbf16>
    %52 = vector.shape_cast %51 : vector<1x128x128xbf16> to vector<128x128xbf16>
    %cst_32 = arith.constant dense<0.000000e+00> : vector<256x128xf32>
    %53 = tpu.matmul %50, %52, %cst_32 {dimension_numbers = #tpu.dot_dimension_numbers<[1], [0], [0], [1], [0, 0, 1, 1], [], []>} : vector<256x128xbf16>, vector<128x128xbf16>, vector<256x128xf32> -> vector<256x128xf32>
    %54 = arith.addf %46, %53 : vector<256x128xf32>
    %55 = arith.index_cast %12 : i32 to index
    %c18_33 = arith.constant 18 : index
    %c12_34 = arith.constant 12 : index
    %c0_35 = arith.constant 0 : index
    %56 = vector.load %arg6[%55, %c18_33, %c12_34, %c0_35] : memref<2x52x56x128xbf16, #tpu.memory_space<vmem>>, vector<1x16x16x128xbf16>
    %57 = vector.shape_cast %56 : vector<1x16x16x128xbf16> to vector<16x16x128xbf16>
    %58 = vector.shape_cast %57 : vector<16x16x128xbf16> to vector<256x128xbf16>
    %c4 = arith.constant 4 : index
    %c0_36 = arith.constant 0 : index
    %c0_37 = arith.constant 0 : index
    %59 = vector.load %arg3[%c4, %c0_36, %c0_37] : memref<25x128x128xbf16, #tpu.memory_space<vmem>>, vector<1x128x128xbf16>
    %60 = vector.shape_cast %59 : vector<1x128x128xbf16> to vector<128x128xbf16>
    %cst_38 = arith.constant dense<0.000000e+00> : vector<256x128xf32>
    %61 = tpu.matmul %58, %60, %cst_38 {dimension_numbers = #tpu.dot_dimension_numbers<[1], [0], [0], [1], [0, 0, 1, 1], [], []>} : vector<256x128xbf16>, vector<128x128xbf16>, vector<256x128xf32> -> vector<256x128xf32>
    %62 = arith.addf %54, %61 : vector<256x128xf32>
    %63 = arith.index_cast %12 : i32 to index
    %c18_39 = arith.constant 18 : index
    %c24_40 = arith.constant 24 : index
    %c0_41 = arith.constant 0 : index
    %64 = vector.load %arg6[%63, %c18_39, %c24_40, %c0_41] : memref<2x52x56x128xbf16, #tpu.memory_space<vmem>>, vector<1x16x16x128xbf16>
    %65 = vector.shape_cast %64 : vector<1x16x16x128xbf16> to vector<16x16x128xbf16>
    %66 = vector.shape_cast %65 : vector<16x16x128xbf16> to vector<256x128xbf16>
    %c5 = arith.constant 5 : index
    %c0_42 = arith.constant 0 : index
    %c0_43 = arith.constant 0 : index
    %67 = vector.load %arg3[%c5, %c0_42, %c0_43] : memref<25x128x128xbf16, #tpu.memory_space<vmem>>, vector<1x128x128xbf16>
    %68 = vector.shape_cast %67 : vector<1x128x128xbf16> to vector<128x128xbf16>
    %cst_44 = arith.constant dense<0.000000e+00> : vector<256x128xf32>
    %69 = tpu.matmul %66, %68, %cst_44 {dimension_numbers = #tpu.dot_dimension_numbers<[1], [0], [0], [1], [0, 0, 1, 1], [], []>} : vector<256x128xbf16>, vector<128x128xbf16>, vector<256x128xf32> -> vector<256x128xf32>
    %70 = arith.addf %62, %69 : vector<256x128xf32>
    %71 = arith.index_cast %12 : i32 to index
    %c24_45 = arith.constant 24 : index
    %c12_46 = arith.constant 12 : index
    %c0_47 = arith.constant 0 : index
    %72 = vector.load %arg6[%71, %c24_45, %c12_46, %c0_47] : memref<2x52x56x128xbf16, #tpu.memory_space<vmem>>, vector<1x16x16x128xbf16>
    %73 = vector.shape_cast %72 : vector<1x16x16x128xbf16> to vector<16x16x128xbf16>
    %74 = vector.shape_cast %73 : vector<16x16x128xbf16> to vector<256x128xbf16>
    %c6 = arith.constant 6 : index
    %c0_48 = arith.constant 0 : index
    %c0_49 = arith.constant 0 : index
    %75 = vector.load %arg3[%c6, %c0_48, %c0_49] : memref<25x128x128xbf16, #tpu.memory_space<vmem>>, vector<1x128x128xbf16>
    %76 = vector.shape_cast %75 : vector<1x128x128xbf16> to vector<128x128xbf16>
    %cst_50 = arith.constant dense<0.000000e+00> : vector<256x128xf32>
    %77 = tpu.matmul %74, %76, %cst_50 {dimension_numbers = #tpu.dot_dimension_numbers<[1], [0], [0], [1], [0, 0, 1, 1], [], []>} : vector<256x128xbf16>, vector<128x128xbf16>, vector<256x128xf32> -> vector<256x128xf32>
    %78 = arith.addf %70, %77 : vector<256x128xf32>
    %79 = arith.index_cast %12 : i32 to index
    %c24_51 = arith.constant 24 : index
    %c18_52 = arith.constant 18 : index
    %c0_53 = arith.constant 0 : index
    %80 = vector.load %arg6[%79, %c24_51, %c18_52, %c0_53] : memref<2x52x56x128xbf16, #tpu.memory_space<vmem>>, vector<1x16x16x128xbf16>
    %81 = vector.shape_cast %80 : vector<1x16x16x128xbf16> to vector<16x16x128xbf16>
    %82 = vector.shape_cast %81 : vector<16x16x128xbf16> to vector<256x128xbf16>
    %c7 = arith.constant 7 : index
    %c0_54 = arith.constant 0 : index
    %c0_55 = arith.constant 0 : index
    %83 = vector.load %arg3[%c7, %c0_54, %c0_55] : memref<25x128x128xbf16, #tpu.memory_space<vmem>>, vector<1x128x128xbf16>
    %84 = vector.shape_cast %83 : vector<1x128x128xbf16> to vector<128x128xbf16>
    %cst_56 = arith.constant dense<0.000000e+00> : vector<256x128xf32>
    %85 = tpu.matmul %82, %84, %cst_56 {dimension_numbers = #tpu.dot_dimension_numbers<[1], [0], [0], [1], [0, 0, 1, 1], [], []>} : vector<256x128xbf16>, vector<128x128xbf16>, vector<256x128xf32> -> vector<256x128xf32>
    %86 = arith.addf %78, %85 : vector<256x128xf32>
    %87 = arith.index_cast %12 : i32 to index
    %c24_57 = arith.constant 24 : index
    %c24_58 = arith.constant 24 : index
    %c0_59 = arith.constant 0 : index
    %88 = vector.load %arg6[%87, %c24_57, %c24_58, %c0_59] : memref<2x52x56x128xbf16, #tpu.memory_space<vmem>>, vector<1x16x16x128xbf16>
    %89 = vector.shape_cast %88 : vector<1x16x16x128xbf16> to vector<16x16x128xbf16>
    %90 = vector.shape_cast %89 : vector<16x16x128xbf16> to vector<256x128xbf16>
    %c8 = arith.constant 8 : index
    %c0_60 = arith.constant 0 : index
    %c0_61 = arith.constant 0 : index
    %91 = vector.load %arg3[%c8, %c0_60, %c0_61] : memref<25x128x128xbf16, #tpu.memory_space<vmem>>, vector<1x128x128xbf16>
    %92 = vector.shape_cast %91 : vector<1x128x128xbf16> to vector<128x128xbf16>
    %cst_62 = arith.constant dense<0.000000e+00> : vector<256x128xf32>
    %93 = tpu.matmul %90, %92, %cst_62 {dimension_numbers = #tpu.dot_dimension_numbers<[1], [0], [0], [1], [0, 0, 1, 1], [], []>} : vector<256x128xbf16>, vector<128x128xbf16>, vector<256x128xf32> -> vector<256x128xf32>
    %94 = arith.addf %86, %93 : vector<256x128xf32>
    %95 = arith.index_cast %12 : i32 to index
    %c6_63 = arith.constant 6 : index
    %c6_64 = arith.constant 6 : index
    %c0_65 = arith.constant 0 : index
    %96 = vector.load %arg6[%95, %c6_63, %c6_64, %c0_65] : memref<2x52x56x128xbf16, #tpu.memory_space<vmem>>, vector<1x16x16x128xbf16>
    %97 = vector.shape_cast %96 : vector<1x16x16x128xbf16> to vector<16x16x128xbf16>
    %98 = vector.shape_cast %97 : vector<16x16x128xbf16> to vector<256x128xbf16>
    %c9 = arith.constant 9 : index
    %c0_66 = arith.constant 0 : index
    %c0_67 = arith.constant 0 : index
    %99 = vector.load %arg3[%c9, %c0_66, %c0_67] : memref<25x128x128xbf16, #tpu.memory_space<vmem>>, vector<1x128x128xbf16>
    %100 = vector.shape_cast %99 : vector<1x128x128xbf16> to vector<128x128xbf16>
    %cst_68 = arith.constant dense<0.000000e+00> : vector<256x128xf32>
    %101 = tpu.matmul %98, %100, %cst_68 {dimension_numbers = #tpu.dot_dimension_numbers<[1], [0], [0], [1], [0, 0, 1, 1], [], []>} : vector<256x128xbf16>, vector<128x128xbf16>, vector<256x128xf32> -> vector<256x128xf32>
    %102 = arith.addf %94, %101 : vector<256x128xf32>
    %103 = arith.index_cast %12 : i32 to index
    %c6_69 = arith.constant 6 : index
    %c18_70 = arith.constant 18 : index
    %c0_71 = arith.constant 0 : index
    %104 = vector.load %arg6[%103, %c6_69, %c18_70, %c0_71] : memref<2x52x56x128xbf16, #tpu.memory_space<vmem>>, vector<1x16x16x128xbf16>
    %105 = vector.shape_cast %104 : vector<1x16x16x128xbf16> to vector<16x16x128xbf16>
    %106 = vector.shape_cast %105 : vector<16x16x128xbf16> to vector<256x128xbf16>
    %c10 = arith.constant 10 : index
    %c0_72 = arith.constant 0 : index
    %c0_73 = arith.constant 0 : index
    %107 = vector.load %arg3[%c10, %c0_72, %c0_73] : memref<25x128x128xbf16, #tpu.memory_space<vmem>>, vector<1x128x128xbf16>
    %108 = vector.shape_cast %107 : vector<1x128x128xbf16> to vector<128x128xbf16>
    %cst_74 = arith.constant dense<0.000000e+00> : vector<256x128xf32>
    %109 = tpu.matmul %106, %108, %cst_74 {dimension_numbers = #tpu.dot_dimension_numbers<[1], [0], [0], [1], [0, 0, 1, 1], [], []>} : vector<256x128xbf16>, vector<128x128xbf16>, vector<256x128xf32> -> vector<256x128xf32>
    %110 = arith.addf %102, %109 : vector<256x128xf32>
    %111 = arith.index_cast %12 : i32 to index
    %c6_75 = arith.constant 6 : index
    %c30 = arith.constant 30 : index
    %c0_76 = arith.constant 0 : index
    %112 = vector.load %arg6[%111, %c6_75, %c30, %c0_76] : memref<2x52x56x128xbf16, #tpu.memory_space<vmem>>, vector<1x16x16x128xbf16>
    %113 = vector.shape_cast %112 : vector<1x16x16x128xbf16> to vector<16x16x128xbf16>
    %114 = vector.shape_cast %113 : vector<16x16x128xbf16> to vector<256x128xbf16>
    %c11 = arith.constant 11 : index
    %c0_77 = arith.constant 0 : index
    %c0_78 = arith.constant 0 : index
    %115 = vector.load %arg3[%c11, %c0_77, %c0_78] : memref<25x128x128xbf16, #tpu.memory_space<vmem>>, vector<1x128x128xbf16>
    %116 = vector.shape_cast %115 : vector<1x128x128xbf16> to vector<128x128xbf16>
    %cst_79 = arith.constant dense<0.000000e+00> : vector<256x128xf32>
    %117 = tpu.matmul %114, %116, %cst_79 {dimension_numbers = #tpu.dot_dimension_numbers<[1], [0], [0], [1], [0, 0, 1, 1], [], []>} : vector<256x128xbf16>, vector<128x128xbf16>, vector<256x128xf32> -> vector<256x128xf32>
    %118 = arith.addf %110, %117 : vector<256x128xf32>
    %119 = arith.index_cast %12 : i32 to index
    %c18_80 = arith.constant 18 : index
    %c6_81 = arith.constant 6 : index
    %c0_82 = arith.constant 0 : index
    %120 = vector.load %arg6[%119, %c18_80, %c6_81, %c0_82] : memref<2x52x56x128xbf16, #tpu.memory_space<vmem>>, vector<1x16x16x128xbf16>
    %121 = vector.shape_cast %120 : vector<1x16x16x128xbf16> to vector<16x16x128xbf16>
    %122 = vector.shape_cast %121 : vector<16x16x128xbf16> to vector<256x128xbf16>
    %c12_83 = arith.constant 12 : index
    %c0_84 = arith.constant 0 : index
    %c0_85 = arith.constant 0 : index
    %123 = vector.load %arg3[%c12_83, %c0_84, %c0_85] : memref<25x128x128xbf16, #tpu.memory_space<vmem>>, vector<1x128x128xbf16>
    %124 = vector.shape_cast %123 : vector<1x128x128xbf16> to vector<128x128xbf16>
    %cst_86 = arith.constant dense<0.000000e+00> : vector<256x128xf32>
    %125 = tpu.matmul %122, %124, %cst_86 {dimension_numbers = #tpu.dot_dimension_numbers<[1], [0], [0], [1], [0, 0, 1, 1], [], []>} : vector<256x128xbf16>, vector<128x128xbf16>, vector<256x128xf32> -> vector<256x128xf32>
    %126 = arith.addf %118, %125 : vector<256x128xf32>
    %127 = arith.index_cast %12 : i32 to index
    %c18_87 = arith.constant 18 : index
    %c30_88 = arith.constant 30 : index
    %c0_89 = arith.constant 0 : index
    %128 = vector.load %arg6[%127, %c18_87, %c30_88, %c0_89] : memref<2x52x56x128xbf16, #tpu.memory_space<vmem>>, vector<1x16x16x128xbf16>
    %129 = vector.shape_cast %128 : vector<1x16x16x128xbf16> to vector<16x16x128xbf16>
    %130 = vector.shape_cast %129 : vector<16x16x128xbf16> to vector<256x128xbf16>
    %c13 = arith.constant 13 : index
    %c0_90 = arith.constant 0 : index
    %c0_91 = arith.constant 0 : index
    %131 = vector.load %arg3[%c13, %c0_90, %c0_91] : memref<25x128x128xbf16, #tpu.memory_space<vmem>>, vector<1x128x128xbf16>
    %132 = vector.shape_cast %131 : vector<1x128x128xbf16> to vector<128x128xbf16>
    %cst_92 = arith.constant dense<0.000000e+00> : vector<256x128xf32>
    %133 = tpu.matmul %130, %132, %cst_92 {dimension_numbers = #tpu.dot_dimension_numbers<[1], [0], [0], [1], [0, 0, 1, 1], [], []>} : vector<256x128xbf16>, vector<128x128xbf16>, vector<256x128xf32> -> vector<256x128xf32>
    %134 = arith.addf %126, %133 : vector<256x128xf32>
    %135 = arith.index_cast %12 : i32 to index
    %c30_93 = arith.constant 30 : index
    %c6_94 = arith.constant 6 : index
    %c0_95 = arith.constant 0 : index
    %136 = vector.load %arg6[%135, %c30_93, %c6_94, %c0_95] : memref<2x52x56x128xbf16, #tpu.memory_space<vmem>>, vector<1x16x16x128xbf16>
    %137 = vector.shape_cast %136 : vector<1x16x16x128xbf16> to vector<16x16x128xbf16>
    %138 = vector.shape_cast %137 : vector<16x16x128xbf16> to vector<256x128xbf16>
    %c14 = arith.constant 14 : index
    %c0_96 = arith.constant 0 : index
    %c0_97 = arith.constant 0 : index
    %139 = vector.load %arg3[%c14, %c0_96, %c0_97] : memref<25x128x128xbf16, #tpu.memory_space<vmem>>, vector<1x128x128xbf16>
    %140 = vector.shape_cast %139 : vector<1x128x128xbf16> to vector<128x128xbf16>
    %cst_98 = arith.constant dense<0.000000e+00> : vector<256x128xf32>
    %141 = tpu.matmul %138, %140, %cst_98 {dimension_numbers = #tpu.dot_dimension_numbers<[1], [0], [0], [1], [0, 0, 1, 1], [], []>} : vector<256x128xbf16>, vector<128x128xbf16>, vector<256x128xf32> -> vector<256x128xf32>
    %142 = arith.addf %134, %141 : vector<256x128xf32>
    %143 = arith.index_cast %12 : i32 to index
    %c30_99 = arith.constant 30 : index
    %c18_100 = arith.constant 18 : index
    %c0_101 = arith.constant 0 : index
    %144 = vector.load %arg6[%143, %c30_99, %c18_100, %c0_101] : memref<2x52x56x128xbf16, #tpu.memory_space<vmem>>, vector<1x16x16x128xbf16>
    %145 = vector.shape_cast %144 : vector<1x16x16x128xbf16> to vector<16x16x128xbf16>
    %146 = vector.shape_cast %145 : vector<16x16x128xbf16> to vector<256x128xbf16>
    %c15 = arith.constant 15 : index
    %c0_102 = arith.constant 0 : index
    %c0_103 = arith.constant 0 : index
    %147 = vector.load %arg3[%c15, %c0_102, %c0_103] : memref<25x128x128xbf16, #tpu.memory_space<vmem>>, vector<1x128x128xbf16>
    %148 = vector.shape_cast %147 : vector<1x128x128xbf16> to vector<128x128xbf16>
    %cst_104 = arith.constant dense<0.000000e+00> : vector<256x128xf32>
    %149 = tpu.matmul %146, %148, %cst_104 {dimension_numbers = #tpu.dot_dimension_numbers<[1], [0], [0], [1], [0, 0, 1, 1], [], []>} : vector<256x128xbf16>, vector<128x128xbf16>, vector<256x128xf32> -> vector<256x128xf32>
    %150 = arith.addf %142, %149 : vector<256x128xf32>
    %151 = arith.index_cast %12 : i32 to index
    %c30_105 = arith.constant 30 : index
    %c30_106 = arith.constant 30 : index
    %c0_107 = arith.constant 0 : index
    %152 = vector.load %arg6[%151, %c30_105, %c30_106, %c0_107] : memref<2x52x56x128xbf16, #tpu.memory_space<vmem>>, vector<1x16x16x128xbf16>
    %153 = vector.shape_cast %152 : vector<1x16x16x128xbf16> to vector<16x16x128xbf16>
    %154 = vector.shape_cast %153 : vector<16x16x128xbf16> to vector<256x128xbf16>
    %c16 = arith.constant 16 : index
    %c0_108 = arith.constant 0 : index
    %c0_109 = arith.constant 0 : index
    %155 = vector.load %arg3[%c16, %c0_108, %c0_109] : memref<25x128x128xbf16, #tpu.memory_space<vmem>>, vector<1x128x128xbf16>
    %156 = vector.shape_cast %155 : vector<1x128x128xbf16> to vector<128x128xbf16>
    %cst_110 = arith.constant dense<0.000000e+00> : vector<256x128xf32>
    %157 = tpu.matmul %154, %156, %cst_110 {dimension_numbers = #tpu.dot_dimension_numbers<[1], [0], [0], [1], [0, 0, 1, 1], [], []>} : vector<256x128xbf16>, vector<128x128xbf16>, vector<256x128xf32> -> vector<256x128xf32>
    %158 = arith.addf %150, %157 : vector<256x128xf32>
    %159 = arith.index_cast %12 : i32 to index
    %c0_111 = arith.constant 0 : index
    %c0_112 = arith.constant 0 : index
    %c0_113 = arith.constant 0 : index
    %160 = vector.load %arg6[%159, %c0_111, %c0_112, %c0_113] : memref<2x52x56x128xbf16, #tpu.memory_space<vmem>>, vector<1x16x16x128xbf16>
    %161 = vector.shape_cast %160 : vector<1x16x16x128xbf16> to vector<16x16x128xbf16>
    %162 = vector.shape_cast %161 : vector<16x16x128xbf16> to vector<256x128xbf16>
    %c17 = arith.constant 17 : index
    %c0_114 = arith.constant 0 : index
    %c0_115 = arith.constant 0 : index
    %163 = vector.load %arg3[%c17, %c0_114, %c0_115] : memref<25x128x128xbf16, #tpu.memory_space<vmem>>, vector<1x128x128xbf16>
    %164 = vector.shape_cast %163 : vector<1x128x128xbf16> to vector<128x128xbf16>
    %cst_116 = arith.constant dense<0.000000e+00> : vector<256x128xf32>
    %165 = tpu.matmul %162, %164, %cst_116 {dimension_numbers = #tpu.dot_dimension_numbers<[1], [0], [0], [1], [0, 0, 1, 1], [], []>} : vector<256x128xbf16>, vector<128x128xbf16>, vector<256x128xf32> -> vector<256x128xf32>
    %166 = arith.addf %158, %165 : vector<256x128xf32>
    %167 = arith.index_cast %12 : i32 to index
    %c0_117 = arith.constant 0 : index
    %c18_118 = arith.constant 18 : index
    %c0_119 = arith.constant 0 : index
    %168 = vector.load %arg6[%167, %c0_117, %c18_118, %c0_119] : memref<2x52x56x128xbf16, #tpu.memory_space<vmem>>, vector<1x16x16x128xbf16>
    %169 = vector.shape_cast %168 : vector<1x16x16x128xbf16> to vector<16x16x128xbf16>
    %170 = vector.shape_cast %169 : vector<16x16x128xbf16> to vector<256x128xbf16>
    %c18_120 = arith.constant 18 : index
    %c0_121 = arith.constant 0 : index
    %c0_122 = arith.constant 0 : index
    %171 = vector.load %arg3[%c18_120, %c0_121, %c0_122] : memref<25x128x128xbf16, #tpu.memory_space<vmem>>, vector<1x128x128xbf16>
    %172 = vector.shape_cast %171 : vector<1x128x128xbf16> to vector<128x128xbf16>
    %cst_123 = arith.constant dense<0.000000e+00> : vector<256x128xf32>
    %173 = tpu.matmul %170, %172, %cst_123 {dimension_numbers = #tpu.dot_dimension_numbers<[1], [0], [0], [1], [0, 0, 1, 1], [], []>} : vector<256x128xbf16>, vector<128x128xbf16>, vector<256x128xf32> -> vector<256x128xf32>
    %174 = arith.addf %166, %173 : vector<256x128xf32>
    %175 = arith.index_cast %12 : i32 to index
    %c0_124 = arith.constant 0 : index
    %c36 = arith.constant 36 : index
    %c0_125 = arith.constant 0 : index
    %176 = vector.load %arg6[%175, %c0_124, %c36, %c0_125] : memref<2x52x56x128xbf16, #tpu.memory_space<vmem>>, vector<1x16x16x128xbf16>
    %177 = vector.shape_cast %176 : vector<1x16x16x128xbf16> to vector<16x16x128xbf16>
    %178 = vector.shape_cast %177 : vector<16x16x128xbf16> to vector<256x128xbf16>
    %c19 = arith.constant 19 : index
    %c0_126 = arith.constant 0 : index
    %c0_127 = arith.constant 0 : index
    %179 = vector.load %arg3[%c19, %c0_126, %c0_127] : memref<25x128x128xbf16, #tpu.memory_space<vmem>>, vector<1x128x128xbf16>
    %180 = vector.shape_cast %179 : vector<1x128x128xbf16> to vector<128x128xbf16>
    %cst_128 = arith.constant dense<0.000000e+00> : vector<256x128xf32>
    %181 = tpu.matmul %178, %180, %cst_128 {dimension_numbers = #tpu.dot_dimension_numbers<[1], [0], [0], [1], [0, 0, 1, 1], [], []>} : vector<256x128xbf16>, vector<128x128xbf16>, vector<256x128xf32> -> vector<256x128xf32>
    %182 = arith.addf %174, %181 : vector<256x128xf32>
    %183 = arith.index_cast %12 : i32 to index
    %c18_129 = arith.constant 18 : index
    %c0_130 = arith.constant 0 : index
    %c0_131 = arith.constant 0 : index
    %184 = vector.load %arg6[%183, %c18_129, %c0_130, %c0_131] : memref<2x52x56x128xbf16, #tpu.memory_space<vmem>>, vector<1x16x16x128xbf16>
    %185 = vector.shape_cast %184 : vector<1x16x16x128xbf16> to vector<16x16x128xbf16>
    %186 = vector.shape_cast %185 : vector<16x16x128xbf16> to vector<256x128xbf16>
    %c20 = arith.constant 20 : index
    %c0_132 = arith.constant 0 : index
    %c0_133 = arith.constant 0 : index
    %187 = vector.load %arg3[%c20, %c0_132, %c0_133] : memref<25x128x128xbf16, #tpu.memory_space<vmem>>, vector<1x128x128xbf16>
    %188 = vector.shape_cast %187 : vector<1x128x128xbf16> to vector<128x128xbf16>
    %cst_134 = arith.constant dense<0.000000e+00> : vector<256x128xf32>
    %189 = tpu.matmul %186, %188, %cst_134 {dimension_numbers = #tpu.dot_dimension_numbers<[1], [0], [0], [1], [0, 0, 1, 1], [], []>} : vector<256x128xbf16>, vector<128x128xbf16>, vector<256x128xf32> -> vector<256x128xf32>
    %190 = arith.addf %182, %189 : vector<256x128xf32>
    %191 = arith.index_cast %12 : i32 to index
    %c18_135 = arith.constant 18 : index
    %c36_136 = arith.constant 36 : index
    %c0_137 = arith.constant 0 : index
    %192 = vector.load %arg6[%191, %c18_135, %c36_136, %c0_137] : memref<2x52x56x128xbf16, #tpu.memory_space<vmem>>, vector<1x16x16x128xbf16>
    %193 = vector.shape_cast %192 : vector<1x16x16x128xbf16> to vector<16x16x128xbf16>
    %194 = vector.shape_cast %193 : vector<16x16x128xbf16> to vector<256x128xbf16>
    %c21 = arith.constant 21 : index
    %c0_138 = arith.constant 0 : index
    %c0_139 = arith.constant 0 : index
    %195 = vector.load %arg3[%c21, %c0_138, %c0_139] : memref<25x128x128xbf16, #tpu.memory_space<vmem>>, vector<1x128x128xbf16>
    %196 = vector.shape_cast %195 : vector<1x128x128xbf16> to vector<128x128xbf16>
    %cst_140 = arith.constant dense<0.000000e+00> : vector<256x128xf32>
    %197 = tpu.matmul %194, %196, %cst_140 {dimension_numbers = #tpu.dot_dimension_numbers<[1], [0], [0], [1], [0, 0, 1, 1], [], []>} : vector<256x128xbf16>, vector<128x128xbf16>, vector<256x128xf32> -> vector<256x128xf32>
    %198 = arith.addf %190, %197 : vector<256x128xf32>
    %199 = arith.index_cast %12 : i32 to index
    %c36_141 = arith.constant 36 : index
    %c0_142 = arith.constant 0 : index
    %c0_143 = arith.constant 0 : index
    %200 = vector.load %arg6[%199, %c36_141, %c0_142, %c0_143] : memref<2x52x56x128xbf16, #tpu.memory_space<vmem>>, vector<1x16x16x128xbf16>
    %201 = vector.shape_cast %200 : vector<1x16x16x128xbf16> to vector<16x16x128xbf16>
    %202 = vector.shape_cast %201 : vector<16x16x128xbf16> to vector<256x128xbf16>
    %c22 = arith.constant 22 : index
    %c0_144 = arith.constant 0 : index
    %c0_145 = arith.constant 0 : index
    %203 = vector.load %arg3[%c22, %c0_144, %c0_145] : memref<25x128x128xbf16, #tpu.memory_space<vmem>>, vector<1x128x128xbf16>
    %204 = vector.shape_cast %203 : vector<1x128x128xbf16> to vector<128x128xbf16>
    %cst_146 = arith.constant dense<0.000000e+00> : vector<256x128xf32>
    %205 = tpu.matmul %202, %204, %cst_146 {dimension_numbers = #tpu.dot_dimension_numbers<[1], [0], [0], [1], [0, 0, 1, 1], [], []>} : vector<256x128xbf16>, vector<128x128xbf16>, vector<256x128xf32> -> vector<256x128xf32>
    %206 = arith.addf %198, %205 : vector<256x128xf32>
    %207 = arith.index_cast %12 : i32 to index
    %c36_147 = arith.constant 36 : index
    %c18_148 = arith.constant 18 : index
    %c0_149 = arith.constant 0 : index
    %208 = vector.load %arg6[%207, %c36_147, %c18_148, %c0_149] : memref<2x52x56x128xbf16, #tpu.memory_space<vmem>>, vector<1x16x16x128xbf16>
    %209 = vector.shape_cast %208 : vector<1x16x16x128xbf16> to vector<16x16x128xbf16>
    %210 = vector.shape_cast %209 : vector<16x16x128xbf16> to vector<256x128xbf16>
    %c23 = arith.constant 23 : index
    %c0_150 = arith.constant 0 : index
    %c0_151 = arith.constant 0 : index
    %211 = vector.load %arg3[%c23, %c0_150, %c0_151] : memref<25x128x128xbf16, #tpu.memory_space<vmem>>, vector<1x128x128xbf16>
    %212 = vector.shape_cast %211 : vector<1x128x128xbf16> to vector<128x128xbf16>
    %cst_152 = arith.constant dense<0.000000e+00> : vector<256x128xf32>
    %213 = tpu.matmul %210, %212, %cst_152 {dimension_numbers = #tpu.dot_dimension_numbers<[1], [0], [0], [1], [0, 0, 1, 1], [], []>} : vector<256x128xbf16>, vector<128x128xbf16>, vector<256x128xf32> -> vector<256x128xf32>
    %214 = arith.addf %206, %213 : vector<256x128xf32>
    %215 = arith.index_cast %12 : i32 to index
    %c36_153 = arith.constant 36 : index
    %c36_154 = arith.constant 36 : index
    %c0_155 = arith.constant 0 : index
    %216 = vector.load %arg6[%215, %c36_153, %c36_154, %c0_155] : memref<2x52x56x128xbf16, #tpu.memory_space<vmem>>, vector<1x16x16x128xbf16>
    %217 = vector.shape_cast %216 : vector<1x16x16x128xbf16> to vector<16x16x128xbf16>
    %218 = vector.shape_cast %217 : vector<16x16x128xbf16> to vector<256x128xbf16>
    %c24_156 = arith.constant 24 : index
    %c0_157 = arith.constant 0 : index
    %c0_158 = arith.constant 0 : index
    %219 = vector.load %arg3[%c24_156, %c0_157, %c0_158] : memref<25x128x128xbf16, #tpu.memory_space<vmem>>, vector<1x128x128xbf16>
    %220 = vector.shape_cast %219 : vector<1x128x128xbf16> to vector<128x128xbf16>
    %cst_159 = arith.constant dense<0.000000e+00> : vector<256x128xf32>
    %221 = tpu.matmul %218, %220, %cst_159 {dimension_numbers = #tpu.dot_dimension_numbers<[1], [0], [0], [1], [0, 0, 1, 1], [], []>} : vector<256x128xbf16>, vector<128x128xbf16>, vector<256x128xf32> -> vector<256x128xf32>
    %222 = arith.addf %214, %221 : vector<256x128xf32>
    %223 = arith.index_cast %arg0 : i32 to index
    %c0_160 = arith.constant 0 : index
    %c0_161 = arith.constant 0 : index
    %224 = vector.load %arg4[%223, %c0_160, %c0_161] : memref<2x1x128xf32, #tpu.memory_space<vmem>>, vector<1x1x128xf32>
    %225 = vector.shape_cast %224 : vector<1x1x128xf32> to vector<1x128xf32>
    %226 = vector.broadcast %225 : vector<1x128xf32> to vector<256x128xf32>
    %227 = arith.addf %222, %226 : vector<256x128xf32>
    %cst_162 = arith.constant 0.000000e+00 : f32
    %228 = vector.broadcast %cst_162 : f32 to vector<256x128xf32>
    %229 = arith.maximumf %227, %228 : vector<256x128xf32>
    %230 = vector.shape_cast %229 : vector<256x128xf32> to vector<1x16x16x128xf32>
    %c0_163 = arith.constant 0 : index
    %c0_164 = arith.constant 0 : index
    %c0_165 = arith.constant 0 : index
    %c0_166 = arith.constant 0 : index
    %231 = vector.load %arg5[%c0_163, %c0_164, %c0_165, %c0_166] : memref<1x16x16x128xf32, #tpu.memory_space<vmem>>, vector<1x16x16x128xf32>
    tpu.vector_store %arg5[%c0_163, %c0_164, %c0_165, %c0_166], %230 {strides = array<i32>} : memref<1x16x16x128xf32, #tpu.memory_space<vmem>>, vector<1x16x16x128xf32>,
    return
  }
  func.func @transform_1(%arg0: i32, %arg1: i32) -> (i32, i32, i32) {
    %c0_i32 = arith.constant 0 : i32
    %c0_i32_0 = arith.constant 0 : i32
    %c0_i32_1 = arith.constant 0 : i32
    %c0_i32_2 = arith.constant 0 : i32
    return %c0_i32, %c0_i32_0, %c0_i32_1 : i32, i32, i32
  }
  func.func @transform_2(%arg0: i32, %arg1: i32) -> (i32, i32, i32) {
    %c0_i32 = arith.constant 0 : i32
    %c0_i32_0 = arith.constant 0 : i32
    %c0_i32_1 = arith.constant 0 : i32
    %c0_i32_2 = arith.constant 0 : i32
    return %c0_i32, %c0_i32_0, %c0_i32_1 : i32, i32, i32
  }
  func.func @transform_3(%arg0: i32, %arg1: i32) -> (i32, i32, i32, i32) {
    %c0_i32 = arith.constant 0 : i32
    %c0_i32_0 = arith.constant 0 : i32
    %c0_i32_1 = arith.constant 0 : i32
    return %arg0, %arg1, %c0_i32, %c0_i32_0 : i32, i32, i32, i32
  }
}

</mosaic_0001>

<bundles_post_ra>
// kernel: tpu_custom_call.1
= control target key start
LH: loop header
LB: loop body
LE: loop exit
PB: predicated region body
PF: predicated region fallthrough
CT: control target
= control target key end

     0   :  { %8 = vsyncpa [#allocation5], 0  ;;  %s22471_s0 = inlined_call_operand.hbm [shape: bf16[2,52,56,128], index: 0, kind: input, shape index: {}]   ;;  %s22472_s1 = inlined_call_operand.hbm [shape: bf16[25,128,128], index: 1, kind: input, shape index: {}]   ;;  %s22473_s2 = inlined_call_operand.hbm [shape: f32[2,1,128], index: 2, kind: input, shape index: {}]   ;;  %s22474_s3 = inlined_call_operand.hbm [shape: f32[2,16,16,128], index: 3, kind: output, shape index: {}]  }
   0x1   :  { %9 = vsyncpa [#allocation8], 0 }
   0x2   :  { %10 = vsyncpa [#allocation6], 0 }
   0x3   :  { %12 = vsyncpa [#allocation6 + $0x1], 0  ;;  %s16999_s12 = smov 0   ;;  %s17001_s13 = smov 0  }
   0x4   :  { %s17003_s14 = smov 0   ;;  %s17005_s15 = smov 0  }
   0x5   :  { %s17007_s16 = smov 0   ;;  %s17009_s17 = smov 0  }
   0x6 LB: > { %s12743_s18 = sadd.s32 4294967295, %s16967_s17   ;;  %s12744_s19 = sadd.s32 4294967294, %s16967_s17   ;;  %s16967_s17 = sphi %s17009_s17, %s18_s17   ;;  %s16963_s16 = sphi %s17007_s16, %s23236_s16   ;;  %s16959_s15 = sphi %s17005_s15, %s23235_s15   ;;  %s16955_s14 = sphi %s17003_s14, %s23234_s14   ;;  %s16951_s13 = sphi %s17001_s13, %s23233_s13   ;;  %s16947_s12 = sphi %s16999_s12, %s23232_s12  }
   0x7   : > { %s30_s20 = sadd.s32 1, %s16963_s16  ;;  %s81_s21 = sadd.s32 1, %s16955_s14 }
   0x8   : > { %p32_p0 = scmp.ge.s32.totalorder %s30_s20, 2  ;;  %p91_p1 = scmp.ne.s32.totalorder %s16955_s14, %s16951_s13 }
   0x9   : > { %p92_p2 = scmp.eq.s32.totalorder %s12743_s18, 1  ;;  %p97_p3 = scmp.ne.s32.totalorder %s16951_s13, %s16947_s12 }
   0xa   : > { %s23238_s20 = smov (%p32_p0, %s30_s20), 0  ;;  %p98_p5 = scmp.eq.s32.totalorder %s12744_s19, 1 }
   0xb   : > { %p17039_p4 = por %p92_p2, %p91_p1  ;;  %s76_s23 = ssub.s32 %s16963_s16, %s23238_s20 }
   0xc   : > { %p12745_p6 = scmp.ge.s32.totalorder %s16967_s17, 1  ;;  %p79_p7 = scmp.eq.s32.totalorder %s76_s23, 0 }
   0xd   : > { %s22533_s22 = scalar_select %p17039_p4, 1, 0 }
   0xe   : > { %p17046_p8 = por %p98_p5, %p97_p3  ;;  %p105_p9 = scmp.lt.s32.totalorder %s16967_s17, 3 }
   0xf   : > { %s17052_s25 = scalar_select %p79_p7, %s16955_s14, %s81_s21  }
  0x10   : > { %s22534_s24 = scalar_select %p17046_p8, 1, 0 }
  0x11   : > { %p17054_p10 = pnand %p12745_p6, %p105_p9  ;;  %p17058_p11 = scmp.eq.s32.totalorder %s12743_s18, 0 }
  0x12   : > { %s16969_s28 = smov [#allocation4]   ;;  %s16970_s4 = smov [#allocation7]  }
  0x13   : > { %p16422_p12 = pneg %p17054_p10  ;;  %s117_s29 = sshll.u32 %s16969_s28, 4  ;;  %s118_s29 = int_to_ptr.vmem [resolvable:$true] %s117_s29 }
  0x14   : > { %s130_s5 = sshll.u32 %s16970_s4, 4  ;;  %s16818_s6 = scalar_lea.vmem %s118_s29, 25600  ;;  %s131_s5 = int_to_ptr.vmem [resolvable:$true] %s130_s5 }
  0x15   : > { %p17066_p13 = pnand %p17058_p11, %p16422_p12  ;;  %p16819_p1 = scmp.ne.s32.totalorder %s118_s29, %s16818_s6 }
  0x16   : > { %p16826_p5 = scmp.lt.s32.totalorder %s118_s29, %s118_s29  ;;  %p16827_p6 = scmp.lt.s32.totalorder %s16818_s6, %s16818_s6 }
  0x17   : > { %p16809_p0 = pneg %p17066_p13 }
  0x18   : > { %p16828_p7 = por %p16827_p6, %p16826_p5 }
  0x19   : > { %p16821_p2 = pnand %p16819_p1, %p16809_p0 }
  0x1b   : > { %p16822_p3 = pneg %p16821_p2 }
  0x1d   : > { %p16829_p9 = pnand %p16828_p7, %p16822_p3 }
  0x1f   : > { %16832 = shalt.err (!%p16829_p9)
}
  0x20   : > { %s16971_s7 = smov 64   ;;  %s16972_s8 = smov 4  }
  0x21   : > { %16425 = dma.hbm_to_vmem [thread:$0]  (!%p17066_p13), %s22472_s1, 25600, %s118_s29, [#allocation5], %s16971_s7, %s16971_s7, %s16972_s8  }
  0x22   : > { %s16844_s11 = scalar_lea.vmem %s131_s5, 32  ;;  %p16852_p8 = scmp.lt.s32.totalorder %s131_s5, %s131_s5 }
  0x23   : > { %p16845_p12 = scmp.ne.s32.totalorder %s131_s5, %s16844_s11  ;;  %p16853_p4 = scmp.lt.s32.totalorder %s16844_s11, %s16844_s11 }
  0x25   : > { %p16847_p1 = pnand %p16845_p12, %p16809_p0  ;;  %p16854_p5 = por %p16853_p4, %p16852_p8 }
  0x27   : > { %p16848_p2 = pneg %p16847_p1 }
  0x29   : > { %p16855_p3 = pnand %p16854_p5, %p16848_p2 }
  0x2b   : > { %16858 = shalt.err (!%p16855_p3)
}
  0x2c   : > { %s16973_s18 = smov 16   ;;  %s16974_s19 = smov 1  }
  0x2d   : > { %16428 = dma.hbm_to_vmem [thread:$0]  (!%p17066_p13), %s22473_s2, 32, %s131_s5, [#allocation8], %s16973_s18, %s16973_s18, %s16974_s19  }
  0x2e   : > { %146 = sbr.rel (%p17054_p10) target bundleno = 1148 (0x47c), region = 28 }
  0x33   : > { %16932 = dma.done.wait (%p17058_p11), [#allocation5], 25600  }
  0x34   : > { %16934 = vsyncadd (%p17058_p11), [#allocation5], 4294941696 }
  0x35   : > { %16936 = dma.done.wait (%p17058_p11), [#allocation8], 32  }
  0x36   : > { %16938 = vsyncadd (%p17058_p11), [#allocation8], 4294967264  ;;  %s164_s28 = sand.u32 1, %s16951_s13   ;;  %s14594_s29 = smul.u32 23296, %s16959_s15 }
  0x37   : > { %s12751_s26 = sshll.u32 %s164_s28, 8  ;;  %s16975_s6 = smov [#allocation2]  }
  0x38   : > { %s175_s5 = scalar_lea.hbm %s22471_s0, %s14594_s29  ;;  %s183_s7 = sshll.u32 %s16975_s6, 4  ;;  %s184_s7 = int_to_ptr.vmem [resolvable:$true] %s183_s7 }
  0x39   : > { %s16859_s8 = scalar_lea.hbm %s175_s5, 23296  ;;  %s16861_s27 = scalar_lea.hbm %s22471_s0, 46592 }
  0x3a   : > { %p16860_p4 = scmp.ne.s32.totalorder %s175_s5, %s16859_s8  ;;  %p16862_p8 = scmp.lt.s32.totalorder %s175_s5, %s22471_s0 }
  0x3b   : > { %p16863_p10 = scmp.lt.s32.totalorder %s16861_s27, %s16859_s8 }
  0x3d   : > { %p16864_p11 = por %p16863_p10, %p16862_p8 }
  0x3f   : > { %p16865_p13 = pnand %p16864_p11, %p16860_p4 }
  0x41   : > { %16868 = shalt.err (!%p16865_p13)  }
  0x42   : > { %s16869_s19 = scalar_lea.vmem %s184_s7, 23296  ;;  %s16873_s21 = scalar_lea.vmem %s184_s7, 46592 }
  0x43   : > { %p16870_p0 = scmp.ne.s32.totalorder %s184_s7, %s16869_s19  ;;  %p16874_p6 = scmp.lt.s32.totalorder %s184_s7, %s184_s7 }
  0x44   : > { %p16875_p7 = scmp.lt.s32.totalorder %s16873_s21, %s16869_s19 }
  0x46   : > { %p16876_p9 = por %p16875_p7, %p16874_p6 }
  0x48   : > { %p16877_p12 = pnand %p16876_p9, %p16870_p0 }
  0x4a   : > { %16880 = shalt.err (!%p16877_p12)  }
  0x4b   : > { %186 = dma.hbm_to_vmem [thread:$0]  %s175_s5, 23296, %s184_s7, [#allocation3] }
  0x4c   : > { %s17111_s23 = scalar_lea.vmem [#allocation9], %s12751_s26 }
  0x4d   : > { %16939 = dma.done.wait [#allocation3], 23296 }
  0x4e   : > { %16940 = vsyncadd [#allocation3], 4294944000  ;;  %v16495_v0 = vld [vmem:[#allocation4 + $0x78] sm:$0xff]   ;;  %v16496_v1 = vld [vmem:[#allocation4 + $0x70] sm:$0xff]   ;;  %vm562_vm0 = vcmask 1041408   ;;  %vm563_vm1 = vcmask 1045508  }
  0x4f   : > { %15196 = vmatprep.subr.bf16.mxu0 %v16495_v0  ;;  %16396 = vmatprep.subr.bf16.mxu1 %v16495_v0  ;;  %v16497_v2 = vld [vmem:[#allocation4 + $0x68] sm:$0xff]   ;;  %vm17113_vm2 = vmor %vm562_vm0, %vm563_vm1  ;;  %v22538_v3 = vmov 0  ;;  %v16498_v4 = vld [vmem:[#allocation4 + $0x60] sm:$0xff]   ;;  %vm332_vm3 = vcmask 1042432   ;;  %vm333_vm4 = vcmask 1046532   ;;  %vm4524_vm6 = vcmask 1040384  }
  0x50   : > { %15197 = vmatpush3.bf16.msra.mxu0 %v16495_v0  ;;  %16404 = vmatpush3.bf16.msra.mxu1 %v16495_v0  ;;  %v22539_v3 = vsel %vm17113_vm2, 4294967295, %v22538_v3  ;;  %v12818_v5 = vld [vmem:[#allocation2 + $0x154] sm:$0xc]  ;;  %v12819_v6 = vld [vmem:[#allocation2 + $0x158] sm:$0xf]  ;;  %v16501_v36 = vld [vmem:[#allocation4 + $0x48] sm:$0xff]  }
  0x51   : > { %15198 = vmatprep.subr.bf16.mxu0 %v16496_v1  ;;  %16397 = vmatprep.subr.bf16.mxu1 %v16496_v1  ;;  %22540 = vst [vmem:[#allocation20_spill] sm:$0xff] %v22539_v3  ;;  %v12820_v7 = vld [vmem:[#allocation2 + $0x15c] sm:$0x3]  ;;  %v12866_v8 = vrot.slane %v12818_v5, 10  ;;  %v567_v9 = vrot.slane %v12819_v6, 6  ;;  %v16500_v26 = vld [vmem:[#allocation4 + $0x50] sm:$0xff]   ;;  %vm17212_vm5 = vmor %vm332_vm3, %vm333_vm4 }
  0x52   : > { %v570_v10 = vrot.slane %v12820_v7, 6  ;;  %v12842_v11 = vld [vmem:[#allocation2 + $0x234] sm:$0xc]  ;;  %v12843_v12 = vld [vmem:[#allocation2 + $0x238] sm:$0xf]  ;;  %v16502_v60 = vld [vmem:[#allocation4 + $0x40] sm:$0xff]  }
  0x53   : > { %v12844_v13 = vld [vmem:[#allocation2 + $0x23c] sm:$0x3]  ;;  %v12874_v14 = vrot.slane %v12842_v11, 10  ;;  %v568_v15 = vsel %vm17113_vm2, %v12866_v8, %v567_v9  ;;  %v569_v16 = vrot.slane %v567_v9, 4  ;;  %v623_v17 = vrot.slane %v12843_v12, 6  ;;  %s12487_s29 = scalar_lea.vmem [#allocation7], %s16959_s15 }
  0x54   : > { %15199 = vmatpush3.bf16.msra.mxu0 %v16496_v1  ;;  %16405 = vmatpush3.bf16.msra.mxu1 %v16496_v1  ;;  %v626_v18 = vrot.slane %v12844_v13, 6  ;;  %v17119_v19 = vld [vmem:[#allocation2 + $0x170] sm:$0xc]  ;;  %v16499_v20 = vld [vmem:[#allocation4 + $0x58] sm:$0xff]   ;;  %v12822_v24 = vld [vmem:[#allocation2 + $0x174] sm:$0xf] }
  0x55   : > { %15200 = vmatprep.subr.bf16.mxu0 %v16497_v2  ;;  %16398 = vmatprep.subr.bf16.mxu1 %v16497_v2  ;;  %v571_v21 = vsel %vm17113_vm2, %v569_v16, %v570_v10  ;;  %v624_v22 = vsel %vm17113_vm2, %v12874_v14, %v623_v17  ;;  %v625_v23 = vrot.slane %v623_v17, 4  ;;  %v12846_v25 = vld [vmem:[#allocation2 + $0x254] sm:$0xf]  ;;  %v12823_v28 = vld [vmem:[#allocation2 + $0x178] sm:$0x3]  ;;  %v12867_v29 = vrot.slane %v17119_v19, 10 }
  0x56   : > { %v12882_v27 = vcombine.low %v568_v15, %v571_v21  ;;  %v12845_v31 = vld [vmem:[#allocation2 + $0x250] sm:$0xc]  ;;  %v574_v33 = vrot.slane %v12822_v24, 6  ;;  %v12847_v34 = vld [vmem:[#allocation2 + $0x258] sm:$0x3]  ;;  %v630_v35 = vrot.slane %v12846_v25, 6 }
  0x57   : > { %v627_v30 = vsel %vm17113_vm2, %v625_v23, %v626_v18  ;;  %v12824_v37 = vld [vmem:[#allocation2 + $0x18c] sm:$0xc]  ;;  %v12825_v38 = vld [vmem:[#allocation2 + $0x190] sm:$0xf]  ;;  %v577_v39 = vrot.slane %v12823_v28, 6  ;;  %v12875_v44 = vrot.slane %v12845_v31, 10 }
  0x58   : > { %15201 = vmatpush3.bf16.msra.mxu0 %v16497_v2  ;;  %16406 = vmatpush3.bf16.msra.mxu1 %v16497_v2  ;;  %v12890_v32 = vcombine.low %v624_v22, %v627_v30  ;;  %v12826_v40 = vld [vmem:[#allocation2 + $0x194] sm:$0x3]  ;;  %v581_v41 = vrot.slane %v12825_v38, 6  ;;  %v12848_v42 = vld [vmem:[#allocation2 + $0x26c] sm:$0xc]  ;;  %v576_v43 = vrot.slane %v574_v33, 4  ;;  %v575_v1 = vsel %vm17113_vm2, %v12867_v29, %v574_v33 }
  0x59   : > { %15202 = vmatprep.subr.bf16.mxu0 %v16498_v4  ;;  %16399 = vmatprep.subr.bf16.mxu1 %v16498_v4  ;;  %v12849_v45 = vld [vmem:[#allocation2 + $0x270] sm:$0xf]  ;;  %v12850_v46 = vld [vmem:[#allocation2 + $0x274] sm:$0x3]  ;;  %v632_v47 = vrot.slane %v630_v35, 4  ;;  %v633_v48 = vrot.slane %v12847_v34, 6 }
  0x5a   : > { %15212 = vmatprep.mubr.bf16.mxu0 %v12882_v27  ;;  %15228 = vmatprep.mubr.bf16.mxu1 %v12890_v32  ;;  %v12868_v49 = vrot.slane %v12824_v37, 10  ;;  %v637_v50 = vrot.slane %v12849_v45, 6  ;;  %v17128_v51 = vld [vmem:[#allocation2 + $0x1a8] sm:$0xc]  ;;  %v584_v52 = vrot.slane %v12826_v40, 6  ;;  %v12876_v53 = vrot.slane %v12848_v42, 10 }
  0x5b   : > { %v17130_v54 = vld [vmem:[#allocation2 + $0x1ac] sm:$0xf]  ;;  %v17132_v55 = vld [vmem:[#allocation2 + $0x1b0] sm:$0x3]  ;;  %v583_v56 = vrot.slane %v581_v41, 4  ;;  %v640_v57 = vrot.slane %v12850_v46, 6  ;;  %v578_v2 = vsel %vm17113_vm2, %v576_v43, %v577_v39  ;;  %v634_v5 = vsel %vm17113_vm2, %v632_v47, %v633_v48 }
  0x5c   : > { %15203 = vmatpush3.bf16.msra.mxu0 %v16498_v4  ;;  %16407 = vmatpush3.bf16.msra.mxu1 %v16498_v4  ;;  %v17134_v58 = vld [vmem:[#allocation2 + $0x288] sm:$0xc]  ;;  %v17136_v59 = vld [vmem:[#allocation2 + $0x28c] sm:$0xf]  ;;  %v639_v61 = vrot.slane %v637_v50, 4  ;;  %v12869_v62 = vrot.slane %v17128_v51, 10  ;;  %v631_v4 = vsel %vm17113_vm2, %v12875_v44, %v630_v35  ;;  %v12883_v11 = vcombine.low %v575_v1, %v578_v2 }
  0x5d   : > { %15204 = vmatprep.subr.bf16.mxu0 %v16499_v20  ;;  %16400 = vmatprep.subr.bf16.mxu1 %v16499_v20  ;;  %v588_v63 = vrot.slane %v17130_v54, 6  ;;  %v591_v0 = vrot.slane %v17132_v55, 6  ;;  %v12853_v6 = vld [vmem:[#allocation2 + $0x290] sm:$0x3]  ;;  %v16503_v7 = vld [vmem:[#allocation4 + $0x38] sm:$0xff]   ;;  %v12877_v9 = vrot.slane %v17134_v58, 10  ;;  %v12891_v12 = vcombine.low %v631_v4, %v634_v5 }
  0x5e   : > { %v16504_v8 = vld [vmem:[#allocation4 + $0xb8] sm:$0xff]   ;;  %v644_v10 = vrot.slane %v17136_v59, 6  ;;  %v12830_v13 = vld [vmem:[#allocation2 + $0x1c4] sm:$0xc]  ;;  %v12831_v14 = vld [vmem:[#allocation2 + $0x1c8] sm:$0xf]  ;;  %v582_v15 = vsel %vm17113_vm2, %v12868_v49, %v581_v41  ;;  %v585_v16 = vsel %vm17113_vm2, %v583_v56, %v584_v52  ;;  %v638_v23 = vsel %vm17113_vm2, %v12876_v53, %v637_v50 }
  0x5f   : > { %v590_v17 = vrot.slane %v588_v63, 4  ;;  %v12832_v18 = vld [vmem:[#allocation2 + $0x1cc] sm:$0x3]  ;;  %v595_v19 = vrot.slane %v12831_v14, 6  ;;  %v16505_v21 = vld [vmem:[#allocation4 + $0x30] sm:$0xff]   ;;  %v641_v24 = vsel %vm17113_vm2, %v639_v61, %v640_v57  ;;  %v12870_v29 = vrot.slane %v12830_v13, 10 }
  0x60   : > { %15205 = vmatpush3.bf16.msra.mxu0 %v16499_v20  ;;  %16408 = vmatpush3.bf16.msra.mxu1 %v16499_v20  ;;  %v12854_v20 = vld [vmem:[#allocation2 + $0x2a4] sm:$0xc]  ;;  %v16506_v22 = vld [vmem:[#allocation4 + $0xb0] sm:$0xff]   ;;  %v646_v25 = vrot.slane %v644_v10, 4  ;;  %v12855_v27 = vld [vmem:[#allocation2 + $0x2a8] sm:$0xf]  ;;  %v12884_v34 = vcombine.low %v582_v15, %v585_v16  ;;  %v12892_v39 = vcombine.low %v638_v23, %v641_v24  ;;  %v589_v40 = vsel %vm17113_vm2, %v12869_v62, %v588_v63 }
  0x61   : > { %15206 = vmatprep.subr.bf16.mxu0 %v16500_v26  ;;  %16401 = vmatprep.subr.bf16.mxu1 %v16500_v26  ;;  %v12856_v28 = vld [vmem:[#allocation2 + $0x2ac] sm:$0x3]  ;;  %v598_v30 = vrot.slane %v12832_v18, 6  ;;  %v12878_v31 = vrot.slane %v12854_v20, 10  ;;  %v651_v32 = vrot.slane %v12855_v27, 6  ;;  %v597_v35 = vrot.slane %v595_v19, 4 }
  0x62   : > { %v17159_v33 = vld [vmem:[#allocation2 + $0x1e0] sm:$0xc]  ;;  %v17161_v37 = vld [vmem:[#allocation2 + $0x1e4] sm:$0xf]  ;;  %v17163_v38 = vld [vmem:[#allocation2 + $0x1e8] sm:$0x3]  ;;  %v645_v45 = vsel %vm17113_vm2, %v12877_v9, %v644_v10  ;;  %v592_v52 = vsel %vm17113_vm2, %v590_v17, %v591_v0  ;;  %v596_v57 = vsel %vm17113_vm2, %v12870_v29, %v595_v19 }
  0x63   : > { %v653_v41 = vrot.slane %v651_v32, 4  ;;  %v602_v42 = vrot.slane %v17161_v37, 6  ;;  %v12857_v43 = vld [vmem:[#allocation2 + $0x2c0] sm:$0xc]  ;;  %v12858_v44 = vld [vmem:[#allocation2 + $0x2c4] sm:$0xf]  ;;  %v599_v55 = vsel %vm17113_vm2, %v597_v35, %v598_v30  ;;  %v12885_v62 = vcombine.low %v589_v40, %v592_v52 }
  0x64   : > { %15207 = vmatpush3.bf16.msra.mxu0 %v16500_v26  ;;  %16409 = vmatpush3.bf16.msra.mxu1 %v16500_v26  ;;  %v647_v26 = vrot.slane %v12853_v6, 6  ;;  %v16507_v46 = vld [vmem:[#allocation4 + $0x28] sm:$0xff]   ;;  %v12871_v48 = vrot.slane %v17159_v33, 10  ;;  %v605_v49 = vrot.slane %v17163_v38, 6  ;;  %v658_v51 = vrot.slane %v12858_v44, 6  ;;  %v16509_v0 = vld [vmem:[#allocation4 + $0x20] sm:$0xff]  }
  0x65   : > { %15208 = vmatprep.subr.bf16.mxu0 %v16501_v36  ;;  %16402 = vmatprep.subr.bf16.mxu1 %v16501_v36  ;;  %v16508_v47 = vld [vmem:[#allocation4 + $0xa8] sm:$0xff]   ;;  %v604_v54 = vrot.slane %v602_v42, 4  ;;  %v12879_v56 = vrot.slane %v12857_v43, 10  ;;  %v12836_v1 = vld [vmem:[#allocation2 + $0x1fc] sm:$0xc]  ;;  %v12886_v9 = vcombine.low %v596_v57, %v599_v55  ;;  %v16513_v44 = vld [vmem:[#allocation4 + $0x10] sm:$0xff]  }
  0x66   : > { %v12859_v50 = vld [vmem:[#allocation2 + $0x2c8] sm:$0x3]  ;;  %v648_v53 = vsel %vm17113_vm2, %v646_v25, %v647_v26  ;;  %v660_v58 = vrot.slane %v658_v51, 4  ;;  %v12837_v2 = vld [vmem:[#allocation2 + $0x200] sm:$0xf]  ;;  %v12872_v5 = vrot.slane %v12836_v1, 10  ;;  %v603_v19 = vsel %vm17113_vm2, %v12871_v48, %v602_v42 }
  0x67   : > { %v661_v59 = vrot.slane %v12859_v50, 6  ;;  %v12893_v63 = vcombine.low %v645_v45, %v648_v53  ;;  %v12838_v4 = vld [vmem:[#allocation2 + $0x204] sm:$0x3]  ;;  %v609_v6 = vrot.slane %v12837_v2, 6  ;;  %v12839_v18 = vld [vmem:[#allocation2 + $0x218] sm:$0xc]  ;;  %v606_v20 = vsel %vm17113_vm2, %v604_v54, %v605_v49 }
  0x68   : > { %15209 = vmatpush3.bf16.msra.mxu0 %v16501_v36  ;;  %16410 = vmatpush3.bf16.msra.mxu1 %v16501_v36  ;;  %v654_v36 = vrot.slane %v12856_v28, 6  ;;  %v12862_v13 = vld [vmem:[#allocation2 + $0x2e4] sm:$0x3]  ;;  %v12840_v23 = vld [vmem:[#allocation2 + $0x21c] sm:$0xf]  ;;  %v12873_v25 = vrot.slane %v12839_v18, 10  ;;  %v12887_v42 = vcombine.low %v603_v19, %v606_v20 }
  0x69   : > { %15210 = vmatprep.subr.bf16.mxu0 %v16502_v60  ;;  %16403 = vmatprep.subr.bf16.mxu1 %v16502_v60  ;;  %v611_v14 = vrot.slane %v609_v6, 4  ;;  %v668_v17 = vrot.slane %v12862_v13, 6  ;;  %v12841_v24 = vld [vmem:[#allocation2 + $0x220] sm:$0x3]  ;;  %v662_v26 = vsel %vm17113_vm2, %v660_v58, %v661_v59  ;;  %v610_v27 = vsel %vm17113_vm2, %v12872_v5, %v609_v6  ;;  %v12863_v30 = vld [vmem:[#allocation2 + $0x2f8] sm:$0xc] }
  0x6a   : > { %v655_v61 = vsel %vm17113_vm2, %v653_v41, %v654_v36  ;;  %v616_v29 = vrot.slane %v12840_v23, 6  ;;  %v12865_v35 = vld [vmem:[#allocation2 + $0x300] sm:$0x3]  ;;  %v12881_v36 = vrot.slane %v12863_v30, 10  ;;  %v16514_v45 = vld [vmem:[#allocation4 + $0x90] sm:$0xff]   ;;  %v22541_v55 = vmov 0 }
  0x6b   : > { %v675_v41 = vrot.slane %v12865_v35, 6  ;;  %v12755_v52 = vld [vmem:[#allocation2 + $0x204] sm:$0xf]  ;;  %v12930_v59 = vld [vmem:[#allocation2 + $0x158] sm:$0xe]  ;;  %v22542_v55 = vsel %vm17212_vm5, 4294967295, %v22541_v55 }
  0x6c   : > { %15211 = vmatpush3.bf16.msra.mxu0 %v16502_v60  ;;  %16411 = vmatpush3.bf16.msra.mxu1 %v16502_v60  ;;  %v652_v60 = vsel %vm17113_vm2, %v12878_v31, %v651_v32  ;;  %v12864_v31 = vld [vmem:[#allocation2 + $0x2fc] sm:$0xf]  ;;  %v618_v40 = vrot.slane %v616_v29, 4  ;;  %v617_v49 = vsel %vm17113_vm2, %v12873_v25, %v616_v29  ;;  %v337_v58 = vrot.slane %v12755_v52, 5  ;;  %22543 = vst [vmem:[#allocation21_spill] sm:$0xff] %v22542_v55  ;;  %v16517_v18 = vld [vmem:[#allocation4] sm:$0xff]  }
  0x6d   : > { %15244 = vmatprep.subr.bf16.mxu1 %v16503_v7  ;;  %15292 = vmatprep.subr.bf16.mxu0 %v16504_v8  ;;  %v12894_v10 = vcombine.low %v652_v60, %v655_v61  ;;  %v16512_v32 = vld [vmem:[#allocation4 + $0x98] sm:$0xff]   ;;  %v672_v37 = vrot.slane %v12864_v31, 6  ;;  %v17914_v3 = vld [vmem:[#allocation2 + $0x304] sm:$0xf]  ;;  %vm4525_vm7 = vcmask 1044484   ;;  %s14595_s26 = sshll.u32 %s16959_s15, 12 }
  0x6e   : > { %v17216_v61 = vld [vmem:[#allocation2 + $0x15c] sm:$0xf]  ;;  %v339_v1 = vrot.slane %v337_v58, 4  ;;  %v12764_v52 = vld [vmem:[#allocation2 + $0x258] sm:$0xf]  ;;  %22561 = vst [vmem:[#allocation34_spill] sm:$0xff] %v17914_v3  ;;  %vm18292_vm8 = vmor %vm4524_vm6, %vm4525_vm7  ;;  %s22418_s6 = scalar_lea.hbm %s22474_s3, %s14595_s26 }
  0x6f   : > { %15213 = vmatmul.mubr.bf16.vlgmr.msra.gmra.mxu0 %v12883_v11  ;;  %15229 = vmatmul.mubr.bf16.vlgmr.msra.gmra.mxu1 %v12891_v12  ;;  %v612_v11 = vrot.slane %v12838_v4, 6  ;;  %v12861_v12 = vld [vmem:[#allocation2 + $0x2e0] sm:$0xf]  ;;  %v673_v50 = vsel %vm17113_vm2, %v12881_v36, %v672_v37  ;;  %v1338_v2 = vrot.slane %v17216_v61, 5  ;;  %v12757_v5 = vld [vmem:[#allocation2 + $0x21c] sm:$0xe] }
  0x70   : > { %15245 = vmatpush3.bf16.msra.mxu1 %v16503_v7  ;;  %15293 = vmatpush3.bf16.msra.mxu0 %v16504_v8  ;;  %v12860_v7 = vld [vmem:[#allocation2 + $0x2dc] sm:$0xc]  ;;  %v16510_v8 = vld [vmem:[#allocation4 + $0xa0] sm:$0xff]   ;;  %v665_v16 = vrot.slane %v12861_v12, 6  ;;  %s12608_s30 = sshll.u32 %s17111_s23, 4  ;;  %s22426_s15 = scalar_lea.sflag [#allocation6], %s164_s28  ;;  %s22420_s30 = int_to_ptr.vmem [resolvable:$true] %s12608_s30 }
  0x71   : > { %15246 = vmatprep.subr.bf16.mxu1 %v16505_v21  ;;  %15294 = vmatprep.subr.bf16.mxu0 %v16506_v22  ;;  %v12880_v15 = vrot.slane %v12860_v7, 10  ;;  %v613_v33 = vsel %vm17113_vm2, %v611_v14, %v612_v11  ;;  %v12803_v11 = vrot.slane %v12757_v5, 9  ;;  %v1340_v14 = vrot.slane %v1338_v2, 4  ;;  %v17998_v3 = vld [vmem:[#allocation2 + $0x3c0] sm:$0xe]  ;;  %s16881_s7 = scalar_lea.vmem %s22420_s30, 4096 }
  0x72   : > { %15216 = vmatprep.mubr.bf16.mxu0 %v12884_v34  ;;  %15232 = vmatprep.mubr.bf16.mxu1 %v12892_v39  ;;  %v667_v28 = vrot.slane %v665_v16, 4  ;;  %v619_v34 = vrot.slane %v12841_v24, 6  ;;  %p16882_p1 = scmp.ne.s32.totalorder %s22420_s30, %s16881_s7  ;;  %p23230_p2 = scmp.ne.s32.totalorder %s22533_s22, 0 }
  0x73   : > { %v666_v38 = vsel %vm17113_vm2, %v12880_v15, %v665_v16  ;;  %v12933_v16 = vld [vmem:[#allocation2 + $0x174] sm:$0xe]  ;;  %s16976_s8 = smov [#allocation9]  }
  0x74   : > { %15247 = vmatpush3.bf16.msra.mxu1 %v16505_v21  ;;  %15295 = vmatpush3.bf16.msra.mxu0 %v16506_v22  ;;  %v659_v21 = vsel %vm17113_vm2, %v12879_v56, %v658_v51  ;;  %v16511_v22 = vld [vmem:[#allocation4 + $0x18] sm:$0xff]   ;;  %v669_v39 = vsel %vm17113_vm2, %v667_v28, %v668_v17  ;;  %v12754_v51 = vld [vmem:[#allocation2 + $0x200] sm:$0xe]  ;;  %v620_v53 = vsel %vm17113_vm2, %v618_v40, %v619_v34  ;;  %v12756_v56 = vld [vmem:[#allocation2 + $0x208] sm:$0x1]  ;;  %p16883_p5 = pnand %p16882_p1, %p23230_p2  ;;  %s16885_s9 = sshll.u32 %s16976_s8, 4  ;;  %s16886_s9 = int_to_ptr.vmem [resolvable:$false] %s16885_s9 }
  0x75   : > { %15248 = vmatprep.subr.bf16.mxu1 %v16507_v46  ;;  %15296 = vmatprep.subr.bf16.mxu0 %v16508_v47  ;;  %v12895_v43 = vcombine.low %v659_v21, %v662_v26  ;;  %v12896_v48 = vcombine.low %v666_v38, %v669_v39  ;;  %v12802_v57 = vrot.slane %v12754_v51, 9  ;;  %v340_v60 = vrot.slane %v12756_v56, 5  ;;  %v17223_v17 = vld [vmem:[#allocation2 + $0x178] sm:$0xf]  ;;  %v12935_v21 = vld [vmem:[#allocation2 + $0x17c] sm:$0x1]  ;;  %p16888_p4 = scmp.lt.s32.totalorder %s22420_s30, %s16886_s9 }
  0x76   : > { %v12889_v6 = vcombine.low %v617_v49, %v620_v53  ;;  %v1345_v23 = vrot.slane %v17223_v17, 5  ;;  %v1348_v26 = vrot.slane %v12935_v21, 5  ;;  %v12762_v34 = vld [vmem:[#allocation2 + $0x240] sm:$0x1]  ;;  %v12936_v40 = vld [vmem:[#allocation2 + $0x190] sm:$0xe]  ;;  %p16884_p3 = pneg %p16883_p5 }
  0x77   : > { %15217 = vmatmul.mubr.bf16.gmra.mxu0 %v12885_v62  ;;  %15233 = vmatmul.mubr.bf16.gmra.mxu1 %v12893_v63  ;;  %v12932_v62 = vld [vmem:[#allocation2 + $0x160] sm:$0x1]  ;;  %v12978_v63 = vrot.slane %v12930_v59, 9  ;;  %v338_v12 = vsel %vm17212_vm5, %v12802_v57, %v337_v58  ;;  %v341_v13 = vsel %vm17212_vm5, %v339_v1, %v340_v60  ;;  %v12763_v51 = vld [vmem:[#allocation2 + $0x254] sm:$0xe]  ;;  %v358_v58 = vrot.slane %v12764_v52, 5 }
  0x78   : > { %15249 = vmatpush3.bf16.msra.mxu1 %v16507_v46  ;;  %15297 = vmatpush3.bf16.msra.mxu0 %v16508_v47  ;;  %v674_v46 = vrot.slane %v672_v37, 4  ;;  %v12888_v47 = vcombine.low %v610_v27, %v613_v33  ;;  %v1341_v4 = vrot.slane %v12932_v62, 5  ;;  %v16518_v27 = vld [vmem:[#allocation4 + $0x80] sm:$0xff]   ;;  %v1347_v28 = vrot.slane %v1345_v23, 4  ;;  %v12761_v33 = vld [vmem:[#allocation2 + $0x23c] sm:$0xf] }
  0x79   : > { %15250 = vmatprep.subr.bf16.mxu1 %v16509_v0  ;;  %15298 = vmatprep.subr.bf16.mxu0 %v16510_v8  ;;  %v1339_v19 = vsel %vm17212_vm5, %v12978_v63, %v1338_v2  ;;  %v12906_v29 = vcombine.low %v338_v12, %v341_v13  ;;  %v16519_v37 = vld [vmem:[#allocation4 + $0xf8] sm:$0xff]   ;;  %v351_v39 = vrot.slane %v12761_v33, 5  ;;  %v12805_v57 = vrot.slane %v12763_v51, 9  ;;  %v17247_v1 = vld [vmem:[#allocation2 + $0x1b0] sm:$0xf]  ;;  %v16525_v51 = vld [vmem:[#allocation4 + $0xe0] sm:$0xff]  }
  0x7a   : > { %15220 = vmatprep.mubr.bf16.mxu0 %v12886_v9  ;;  %15236 = vmatprep.mubr.bf16.mxu1 %v12894_v10  ;;  %v676_v54 = vsel %vm17113_vm2, %v674_v46, %v675_v41  ;;  %v12758_v9 = vld [vmem:[#allocation2 + $0x220] sm:$0xf]  ;;  %v12759_v10 = vld [vmem:[#allocation2 + $0x224] sm:$0x1]  ;;  %v1342_v24 = vsel %vm17212_vm5, %v1340_v14, %v1341_v4  ;;  %v17236_v41 = vld [vmem:[#allocation2 + $0x194] sm:$0xf] }
  0x7b   : > { %v12897_v7 = vcombine.low %v673_v50, %v676_v54  ;;  %v344_v15 = vrot.slane %v12758_v9, 5  ;;  %v347_v20 = vrot.slane %v12759_v10, 5  ;;  %v12994_v30 = vcombine.low %v1339_v19, %v1342_v24  ;;  %v12765_v56 = vld [vmem:[#allocation2 + $0x25c] sm:$0x1]  ;;  %v16522_v12 = vld [vmem:[#allocation4 + $0x130] sm:$0xff]   ;;  %s16887_s10 = scalar_lea.vmem %s16886_s9, 8192 }
  0x7c   : > { %15251 = vmatpush3.bf16.msra.mxu1 %v16509_v0  ;;  %15299 = vmatpush3.bf16.msra.mxu0 %v16510_v8  ;;  %v16515_v0 = vld [vmem:[#allocation4 + $0x8] sm:$0xff]   ;;  %v12980_v46 = vrot.slane %v12936_v40, 9  ;;  %v353_v49 = vrot.slane %v351_v39, 4  ;;  %v361_v63 = vrot.slane %v12765_v56, 5  ;;  %v360_v5 = vrot.slane %v358_v58, 4  ;;  %v16526_v56 = vld [vmem:[#allocation4 + $0x120] sm:$0xff]   ;;  %p16889_p8 = scmp.lt.s32.totalorder %s16887_s10, %s16881_s7 }
  0x7d   : > { %15252 = vmatprep.subr.bf16.mxu1 %v16511_v22  ;;  %15300 = vmatprep.subr.bf16.mxu0 %v16512_v32  ;;  %v16516_v8 = vld [vmem:[#allocation4 + $0x88] sm:$0xff]   ;;  %v346_v25 = vrot.slane %v344_v15, 4  ;;  %v345_v31 = vsel %vm17212_vm5, %v12803_v11, %v344_v15  ;;  %v1359_v10 = vrot.slane %v17247_v1, 5  ;;  %v359_v13 = vsel %vm17212_vm5, %v12805_v57, %v358_v58  ;;  %v12766_v15 = vld [vmem:[#allocation2 + $0x270] sm:$0xe] }
  0x7e   : > { %v362_v14 = vsel %vm17212_vm5, %v360_v5, %v361_v63  ;;  %v12767_v19 = vld [vmem:[#allocation2 + $0x274] sm:$0xf]  ;;  %v12806_v21 = vrot.slane %v12766_v15, 9  ;;  %v12769_v33 = vld [vmem:[#allocation2 + $0x28c] sm:$0xe]  ;;  %p16890_p10 = por %p16889_p8, %p16888_p4 }
  0x7f   : > { %15221 = vmatmul.mubr.bf16.gmra.mxu0 %v12887_v42  ;;  %15237 = vmatmul.mubr.bf16.gmra.mxu1 %v12895_v43  ;;  %v348_v35 = vsel %vm17212_vm5, %v346_v25, %v347_v20  ;;  %v1349_v42 = vsel %vm17212_vm5, %v1347_v28, %v1348_v26  ;;  %v16520_v43 = vld [vmem:[#allocation4 + $0x138] sm:$0xff]   ;;  %v365_v24 = vrot.slane %v12767_v19, 5  ;;  %v12942_v26 = vld [vmem:[#allocation2 + $0x1c8] sm:$0xe]  ;;  %v12909_v28 = vcombine.low %v359_v13, %v362_v14  ;;  %v12775_v19 = vld [vmem:[#allocation2 + $0x2c4] sm:$0xe] }
  0x80   : > { %15253 = vmatpush3.bf16.msra.mxu1 %v16511_v22  ;;  %15301 = vmatpush3.bf16.msra.mxu0 %v16512_v32  ;;  %v12979_v22 = vrot.slane %v12933_v16, 9  ;;  %v12760_v32 = vld [vmem:[#allocation2 + $0x238] sm:$0xe]  ;;  %v12907_v59 = vcombine.low %v345_v31, %v348_v35  ;;  %v12768_v20 = vld [vmem:[#allocation2 + $0x278] sm:$0x1]  ;;  %v12982_v31 = vrot.slane %v12942_v26, 9  ;;  %p16891_p11 = pnand %p16890_p10, %p16884_p3 }
  0x81   : > { %15254 = vmatprep.subr.bf16.mxu1 %v16513_v44  ;;  %15302 = vmatprep.subr.bf16.mxu0 %v16514_v45  ;;  %v12804_v38 = vrot.slane %v12760_v32, 9  ;;  %v368_v25 = vrot.slane %v12768_v20, 5  ;;  %v366_v35 = vsel %vm17212_vm5, %v12806_v21, %v365_v24  ;;  %v12772_v63 = vld [vmem:[#allocation2 + $0x2a8] sm:$0xe]  ;;  %v16528_v21 = vld [vmem:[#allocation4 + $0x118] sm:$0xff]  }
  0x82   : > { %15224 = vmatprep.mubr.bf16.mxu0 %v12888_v47  ;;  %15240 = vmatprep.mubr.bf16.mxu1 %v12896_v48  ;;  %v1346_v36 = vsel %vm17212_vm5, %v12979_v22, %v1345_v23  ;;  %v1352_v47 = vrot.slane %v17236_v41, 5  ;;  %v16523_v22 = vld [vmem:[#allocation4 + $0xe8] sm:$0xff]  }
  0x83   : > { %v352_v48 = vsel %vm17212_vm5, %v12804_v38, %v351_v39  ;;  %v12995_v60 = vcombine.low %v1346_v36, %v1349_v42  ;;  %v16524_v23 = vld [vmem:[#allocation4 + $0x128] sm:$0xff]   ;;  %v367_v36 = vrot.slane %v365_v24, 4  ;;  %v12770_v38 = vld [vmem:[#allocation2 + $0x290] sm:$0xf]  ;;  %v12771_v39 = vld [vmem:[#allocation2 + $0x294] sm:$0x1] }
  0x84   : > { %15255 = vmatpush3.bf16.msra.mxu1 %v16513_v44  ;;  %15303 = vmatpush3.bf16.msra.mxu0 %v16514_v45  ;;  %v354_v44 = vrot.slane %v12762_v34, 5  ;;  %v12938_v45 = vld [vmem:[#allocation2 + $0x198] sm:$0x1]  ;;  %v1353_v53 = vsel %vm17212_vm5, %v12980_v46, %v1352_v47  ;;  %v1354_v54 = vrot.slane %v1352_v47, 4  ;;  %v375_v47 = vrot.slane %v12771_v39, 5 }
  0x85   : > { %15256 = vmatprep.subr.bf16.mxu1 %v16515_v0  ;;  %15304 = vmatprep.subr.bf16.mxu0 %v16516_v8  ;;  %v1355_v50 = vrot.slane %v12938_v45, 5  ;;  %v12945_v45 = vld [vmem:[#allocation2 + $0x1e4] sm:$0xe]  ;;  %v369_v46 = vsel %vm17212_vm5, %v367_v36, %v368_v25  ;;  %v12776_v20 = vld [vmem:[#allocation2 + $0x2c8] sm:$0xf] }
  0x86   : > { %v355_v62 = vsel %vm17212_vm5, %v353_v49, %v354_v44  ;;  %v372_v44 = vrot.slane %v12770_v38, 5  ;;  %v12947_v49 = vld [vmem:[#allocation2 + $0x1ec] sm:$0x1]  ;;  %v12910_v52 = vcombine.low %v366_v35, %v369_v46  ;;  %v12953_v36 = vld [vmem:[#allocation2 + $0x224] sm:$0x1] }
  0x87   : > { %15225 = vmatmul.mubr.bf16.gmra.mxu0 %v12889_v6  ;;  %15241 = vmatmul.mubr.bf16.gmra.mxu1 %v12897_v7  ;;  %v12908_v2 = vcombine.low %v352_v48, %v355_v62  ;;  %v1356_v4 = vsel %vm17212_vm5, %v1354_v54, %v1355_v50  ;;  %v12941_v6 = vld [vmem:[#allocation2 + $0x1b4] sm:$0x1]  ;;  %v17269_v48 = vld [vmem:[#allocation2 + $0x1e8] sm:$0xf]  ;;  %v12983_v50 = vrot.slane %v12945_v45, 9 }
  0x88   : > { %15257 = vmatpush3.bf16.msra.mxu1 %v16515_v0  ;;  %15305 = vmatpush3.bf16.msra.mxu0 %v16516_v8  ;;  %v12939_v0 = vld [vmem:[#allocation2 + $0x1ac] sm:$0xe]  ;;  %v16521_v7 = vld [vmem:[#allocation4 + $0xf0] sm:$0xff]   ;;  %v12996_v8 = vcombine.low %v1353_v53, %v1356_v4  ;;  %v1362_v11 = vrot.slane %v12941_v6, 5  ;;  %v374_v54 = vrot.slane %v372_v44, 4  ;;  %v1373_v58 = vrot.slane %v17269_v48, 5 }
  0x89   : > { %15258 = vmatprep.subr.bf16.mxu1 %v16517_v18  ;;  %15306 = vmatprep.subr.bf16.mxu0 %v16518_v27  ;;  %v12981_v9 = vrot.slane %v12939_v0, 9  ;;  %v12773_v0 = vld [vmem:[#allocation2 + $0x2ac] sm:$0xf]  ;;  %v12808_v6 = vrot.slane %v12772_v63, 9 }
  0x8a   : > { %15260 = vmatprep.mubr.bf16.mxu1 %v12906_v29  ;;  %15308 = vmatprep.mubr.bf16.mxu0 %v12994_v30  ;;  %v12944_v30 = vld [vmem:[#allocation2 + $0x1d0] sm:$0x1]  ;;  %v376_v62 = vsel %vm17212_vm5, %v374_v54, %v375_v47  ;;  %v1374_v4 = vsel %vm17212_vm5, %v12983_v50, %v1373_v58  ;;  %v1375_v5 = vrot.slane %v1373_v58, 4  ;;  %v12777_v26 = vld [vmem:[#allocation2 + $0x2cc] sm:$0x1]  ;;  %v1390_v47 = vrot.slane %v12953_v36, 5 }
  0x8b   : > { %v1360_v16 = vsel %vm17212_vm5, %v12981_v9, %v1359_v10  ;;  %v16527_v9 = vld [vmem:[#allocation4 + $0xd8] sm:$0xff]  }
  0x8c   : > { %15259 = vmatpush3.bf16.msra.mxu1 %v16517_v18  ;;  %15307 = vmatpush3.bf16.msra.mxu0 %v16518_v27  ;;  %v1361_v18 = vrot.slane %v1359_v10, 4  ;;  %v17258_v27 = vld [vmem:[#allocation2 + $0x1cc] sm:$0xf]  ;;  %v379_v10 = vrot.slane %v12773_v0, 5  ;;  %v12956_v0 = vld [vmem:[#allocation2 + $0x240] sm:$0x1] }
  0x8d   : > { %15340 = vmatprep.subr.bf16.mxu1 %v16519_v37  ;;  %15388 = vmatprep.subr.bf16.mxu0 %v16520_v43  ;;  %v1366_v32 = vrot.slane %v17258_v27, 5 }
  0x8e   : > { %v1363_v29 = vsel %vm17212_vm5, %v1361_v18, %v1362_v11 }
  0x8f   : > { %15261 = vmatmul.mubr.bf16.vlgmr.msra.gmra.mxu1 %v12907_v59  ;;  %15309 = vmatmul.mubr.bf16.vlgmr.msra.gmra.mxu0 %v12995_v60  ;;  %v12997_v34 = vcombine.low %v1360_v16, %v1363_v29  ;;  %v1367_v40 = vsel %vm17212_vm5, %v12982_v31, %v1366_v32  ;;  %v1368_v42 = vrot.slane %v1366_v32, 4  ;;  %v1376_v59 = vrot.slane %v12947_v49, 5  ;;  %v12778_v49 = vld [vmem:[#allocation2 + $0x2e0] sm:$0xe] }
  0x90   : > { %15341 = vmatpush3.bf16.msra.mxu1 %v16519_v37  ;;  %15389 = vmatpush3.bf16.msra.mxu0 %v16520_v43  ;;  %v1369_v37 = vrot.slane %v12944_v30, 5  ;;  %v12807_v43 = vrot.slane %v12769_v33, 9  ;;  %v12809_v30 = vrot.slane %v12775_v19, 9  ;;  %v386_v31 = vrot.slane %v12776_v20, 5  ;;  %v17289_v33 = vld [vmem:[#allocation2 + $0x220] sm:$0xf] }
  0x91   : > { %15264 = vmatprep.mubr.bf16.mxu1 %v12908_v2  ;;  %15312 = vmatprep.mubr.bf16.mxu0 %v12996_v8  ;;  %v12774_v2 = vld [vmem:[#allocation2 + $0x2b0] sm:$0x1]  ;;  %v17280_v8 = vld [vmem:[#allocation2 + $0x204] sm:$0xf]  ;;  %v1377_v16 = vsel %vm17212_vm5, %v1375_v5, %v1376_v59  ;;  %v389_v32 = vrot.slane %v12777_v26, 5  ;;  %v1387_v38 = vrot.slane %v17289_v33, 5 }
  0x92   : > { %15342 = vmatprep.subr.bf16.mxu1 %v16521_v7  ;;  %15390 = vmatprep.subr.bf16.mxu0 %v16522_v12  ;;  %v1370_v53 = vsel %vm17212_vm5, %v1368_v42, %v1369_v37  ;;  %v373_v60 = vsel %vm17212_vm5, %v12807_v43, %v372_v44  ;;  %v382_v11 = vrot.slane %v12774_v2, 5  ;;  %v1380_v14 = vrot.slane %v17280_v8, 5  ;;  %v16530_v43 = vld [vmem:[#allocation4 + $0x110] sm:$0xff]   ;;  %v12781_v5 = vld [vmem:[#allocation2 + $0x2fc] sm:$0xe]  ;;  %v16533_v20 = vld [vmem:[#allocation4 + $0xc0] sm:$0xff]  }
  0x93   : > { %v12998_v57 = vcombine.low %v1367_v40, %v1370_v53  ;;  %v12911_v15 = vcombine.low %v373_v60, %v376_v62  ;;  %v12999_v24 = vcombine.low %v1374_v4, %v1377_v16  ;;  %v388_v42 = vrot.slane %v386_v31, 4  ;;  %v12780_v53 = vld [vmem:[#allocation2 + $0x2e8] sm:$0x1]  ;;  %v12954_v60 = vld [vmem:[#allocation2 + $0x238] sm:$0xe] }
  0x94   : > { %15343 = vmatpush3.bf16.msra.mxu1 %v16521_v7  ;;  %15391 = vmatpush3.bf16.msra.mxu0 %v16522_v12  ;;  %v12948_v7 = vld [vmem:[#allocation2 + $0x200] sm:$0xe]  ;;  %v12950_v12 = vld [vmem:[#allocation2 + $0x208] sm:$0x1]  ;;  %v1382_v29 = vrot.slane %v1380_v14, 4  ;;  %v387_v45 = vsel %vm17212_vm5, %v12809_v30, %v386_v31  ;;  %v1389_v46 = vrot.slane %v1387_v38, 4 }
  0x95   : > { %15344 = vmatprep.subr.bf16.mxu1 %v16523_v22  ;;  %15392 = vmatprep.subr.bf16.mxu0 %v16524_v23  ;;  %v12984_v13 = vrot.slane %v12948_v7, 9  ;;  %v1383_v18 = vrot.slane %v12950_v12, 5  ;;  %v390_v50 = vsel %vm17212_vm5, %v388_v42, %v389_v32  ;;  %v12810_v54 = vrot.slane %v12778_v49, 9  ;;  %v17304_v62 = vld [vmem:[#allocation2 + $0x23c] sm:$0xf]  ;;  %v16534_v30 = vld [vmem:[#allocation4 + $0x100] sm:$0xff]  }
  0x96   : > { %v396_v59 = vrot.slane %v12780_v53, 5  ;;  %v12913_v63 = vcombine.low %v387_v45, %v390_v50  ;;  %v12986_v2 = vrot.slane %v12954_v60, 9  ;;  %v1394_v4 = vrot.slane %v17304_v62, 5  ;;  %v12957_v19 = vld [vmem:[#allocation2 + $0x254] sm:$0xe] }
  0x97   : > { %15265 = vmatmul.mubr.bf16.gmra.mxu1 %v12909_v28  ;;  %15313 = vmatmul.mubr.bf16.gmra.mxu0 %v12997_v34  ;;  %v1381_v25 = vsel %vm17212_vm5, %v12984_v13, %v1380_v14  ;;  %v12951_v28 = vld [vmem:[#allocation2 + $0x21c] sm:$0xe]  ;;  %v16529_v34 = vld [vmem:[#allocation4 + $0xd0] sm:$0xff]   ;;  %v1384_v40 = vsel %vm17212_vm5, %v1382_v29, %v1383_v18  ;;  %v1397_v12 = vrot.slane %v12956_v0, 5  ;;  %v12782_v13 = vld [vmem:[#allocation2 + $0x300] sm:$0xf] }
  0x98   : > { %15268 = vmatprep.mubr.bf16.mxu1 %v12910_v52  ;;  %15316 = vmatprep.mubr.bf16.mxu0 %v12998_v57  ;;  %v12985_v37 = vrot.slane %v12951_v28, 9  ;;  %v13000_v44 = vcombine.low %v1381_v25, %v1384_v40  ;;  %v12779_v52 = vld [vmem:[#allocation2 + $0x2e4] sm:$0xf]  ;;  %v1391_v57 = vsel %vm17212_vm5, %v1389_v46, %v1390_v47  ;;  %v12811_v16 = vrot.slane %v12781_v5, 9  ;;  %v17322_v40 = vld [vmem:[#allocation4 + $0x178] sm:$0xff]  }
  0x99   : > { %15345 = vmatpush3.bf16.msra.mxu1 %v16523_v22  ;;  %15393 = vmatpush3.bf16.msra.mxu0 %v16524_v23  ;;  %v380_v22 = vsel %vm17212_vm5, %v12808_v6, %v379_v10  ;;  %v381_v23 = vrot.slane %v379_v10, 4  ;;  %v393_v58 = vrot.slane %v12779_v52, 5  ;;  %v16532_v6 = vld [vmem:[#allocation4 + $0x108] sm:$0xff]   ;;  %v12783_v14 = vld [vmem:[#allocation2 + $0x304] sm:$0x1]  ;;  %v400_v18 = vrot.slane %v12782_v13, 5 }
  0x9a   : > { %15346 = vmatprep.subr.bf16.mxu1 %v16525_v51  ;;  %15394 = vmatprep.subr.bf16.mxu0 %v16526_v56  ;;  %v12987_v25 = vrot.slane %v12957_v19, 9  ;;  %v12960_v45 = vld [vmem:[#allocation2 + $0x270] sm:$0xe]  ;;  %v17326_v46 = vld [vmem:[#allocation2 + $0x274] sm:$0xf]  ;;  %v17335_v5 = vld [vmem:[#allocation4 + $0x1b8] sm:$0xff]  }
  0x9b   : > { %v383_v35 = vsel %vm17212_vm5, %v381_v23, %v382_v11  ;;  %v394_v10 = vsel %vm17212_vm5, %v12810_v54, %v393_v58  ;;  %v395_v11 = vrot.slane %v393_v58, 4  ;;  %v12959_v23 = vld [vmem:[#allocation2 + $0x25c] sm:$0x1]  ;;  %v402_v29 = vrot.slane %v400_v18, 4  ;;  %v12962_v50 = vld [vmem:[#allocation2 + $0x278] sm:$0x1] }
  0x9c   : > { %v12912_v39 = vcombine.low %v380_v22, %v383_v35  ;;  %v17313_v22 = vld [vmem:[#allocation2 + $0x258] sm:$0xf]  ;;  %v1404_v35 = vrot.slane %v12959_v23, 5  ;;  %v401_v36 = vsel %vm17212_vm5, %v12811_v16, %v400_v18  ;;  %v1408_v52 = vrot.slane %v17326_v46, 5  ;;  %v12787_v58 = vld [vmem:[#allocation2 + $0x334] sm:$0xe] }
  0x9d   : > { %15347 = vmatpush3.bf16.msra.mxu1 %v16525_v51  ;;  %15395 = vmatpush3.bf16.msra.mxu0 %v16526_v56  ;;  %v1388_v51 = vsel %vm17212_vm5, %v12985_v37, %v1387_v38  ;;  %v16531_v56 = vld [vmem:[#allocation4 + $0xc8] sm:$0xff]   ;;  %v1401_v32 = vrot.slane %v17313_v22, 5  ;;  %v12784_v37 = vld [vmem:[#allocation2 + $0x318] sm:$0xe]  ;;  %v12785_v38 = vld [vmem:[#allocation2 + $0x31c] sm:$0xf] }
  0x9e   : > { %15348 = vmatprep.subr.bf16.mxu1 %v16527_v9  ;;  %15396 = vmatprep.subr.bf16.mxu0 %v16528_v21  ;;  %v13001_v7 = vcombine.low %v1388_v51, %v1391_v57  ;;  %v407_v47 = vrot.slane %v12785_v38, 5  ;;  %v12988_v51 = vrot.slane %v12960_v45, 9  ;;  %v1411_v57 = vrot.slane %v12962_v50, 5  ;;  %v12793_v45 = vld [vmem:[#allocation2 + $0x36c] sm:$0xe] }
  0x9f   : > { %15269 = vmatmul.mubr.bf16.gmra.mxu1 %v12911_v15  ;;  %15317 = vmatmul.mubr.bf16.gmra.mxu0 %v12999_v24  ;;  %v1396_v15 = vrot.slane %v1394_v4, 4  ;;  %v403_v24 = vrot.slane %v12783_v14, 5  ;;  %v1402_v42 = vsel %vm17212_vm5, %v12987_v25, %v1401_v32  ;;  %v12965_v14 = vld [vmem:[#allocation2 + $0x294] sm:$0x1] }
  0xa0   : > { %15272 = vmatprep.mubr.bf16.mxu1 %v12912_v39  ;;  %15320 = vmatprep.mubr.bf16.mxu0 %v13000_v44  ;;  %v12786_v39 = vld [vmem:[#allocation2 + $0x320] sm:$0x1]  ;;  %v12812_v44 = vrot.slane %v12784_v37, 9  ;;  %v1409_v0 = vsel %vm17212_vm5, %v12988_v51, %v1408_v52  ;;  %v1418_v25 = vrot.slane %v12965_v14, 5  ;;  %v17354_v37 = vld [vmem:[#allocation2 + $0x2ac] sm:$0xf] }
  0xa1   : > { %15349 = vmatpush3.bf16.msra.mxu1 %v16527_v9  ;;  %15397 = vmatpush3.bf16.msra.mxu0 %v16528_v21  ;;  %v1395_v9 = vsel %vm17212_vm5, %v12986_v2, %v1394_v4  ;;  %v397_v21 = vsel %vm17212_vm5, %v395_v11, %v396_v59  ;;  %v1398_v28 = vsel %vm17212_vm5, %v1396_v15, %v1397_v12  ;;  %v410_v49 = vrot.slane %v12786_v39, 5  ;;  %v12788_v59 = vld [vmem:[#allocation2 + $0x338] sm:$0xf]  ;;  %v12789_v2 = vld [vmem:[#allocation2 + $0x33c] sm:$0x1] }
  0xa2   : > { %15350 = vmatprep.subr.bf16.mxu1 %v16529_v34  ;;  %15398 = vmatprep.subr.bf16.mxu0 %v16530_v43  ;;  %v12914_v26 = vcombine.low %v394_v10, %v397_v21  ;;  %v13002_v31 = vcombine.low %v1395_v9, %v1398_v28  ;;  %v12963_v4 = vld [vmem:[#allocation2 + $0x28c] sm:$0xe]  ;;  %v414_v10 = vrot.slane %v12788_v59, 5  ;;  %v417_v11 = vrot.slane %v12789_v2, 5  ;;  %v17337_v12 = vld [vmem:[#allocation2 + $0x290] sm:$0xf] }
  0xa3   : > { %v12989_v9 = vrot.slane %v12963_v4, 9  ;;  %v1415_v15 = vrot.slane %v17337_v12, 5  ;;  %v12794_v51 = vld [vmem:[#allocation2 + $0x370] sm:$0xf]  ;;  %v12969_v59 = vld [vmem:[#allocation2 + $0x2c4] sm:$0xe] }
  0xa4   : > { %v12991_v2 = vrot.slane %v12969_v59, 9 }
  0xa5   : > { %15351 = vmatpush3.bf16.msra.mxu1 %v16529_v34  ;;  %15399 = vmatpush3.bf16.msra.mxu0 %v16530_v43  ;;  %v404_v34 = vsel %vm17212_vm5, %v402_v29, %v403_v24  ;;  %v1403_v43 = vrot.slane %v1401_v32, 4  ;;  %v1416_v24 = vsel %vm17212_vm5, %v12989_v9, %v1415_v15  ;;  %v1417_v23 = vrot.slane %v1415_v15, 4  ;;  %v12791_v29 = vld [vmem:[#allocation2 + $0x354] sm:$0xf]  ;;  %v12796_v15 = vld [vmem:[#allocation2 + $0x388] sm:$0xe] }
  0xa6   : > { %15352 = vmatprep.subr.bf16.mxu1 %v16531_v56  ;;  %15400 = vmatprep.subr.bf16.mxu0 %v16532_v6  ;;  %v12915_v53 = vcombine.low %v401_v36, %v404_v34  ;;  %v12966_v34 = vld [vmem:[#allocation2 + $0x2a8] sm:$0xe] }
  0xa7   : > { %15273 = vmatmul.mubr.bf16.gmra.mxu1 %v12913_v63  ;;  %15321 = vmatmul.mubr.bf16.gmra.mxu0 %v13001_v7  ;;  %v1405_v54 = vsel %vm17212_vm5, %v1403_v43, %v1404_v35  ;;  %v409_v63 = vrot.slane %v407_v47, 4  ;;  %v12813_v7 = vrot.slane %v12787_v58, 9  ;;  %v1419_v32 = vsel %vm17212_vm5, %v1417_v23, %v1418_v25  ;;  %v12972_v23 = vld [vmem:[#allocation2 + $0x2e0] sm:$0xe]  ;;  %v17374_v25 = vld [vmem:[#allocation2 + $0x2e4] sm:$0xf] }
  0xa8   : > { %15276 = vmatprep.mubr.bf16.mxu1 %v12914_v26  ;;  %15324 = vmatprep.mubr.bf16.mxu0 %v13002_v31  ;;  %v13003_v60 = vcombine.low %v1402_v42, %v1405_v54  ;;  %v12790_v26 = vld [vmem:[#allocation2 + $0x350] sm:$0xe]  ;;  %v421_v35 = vrot.slane %v12791_v29, 5  ;;  %v13005_v39 = vcombine.low %v1416_v24, %v1419_v32  ;;  %v12968_v42 = vld [vmem:[#allocation2 + $0x2b0] sm:$0x1]  ;;  %v12990_v43 = vrot.slane %v12966_v34, 9 }
  0xa9   : > { %15353 = vmatpush3.bf16.msra.mxu1 %v16531_v56  ;;  %15401 = vmatpush3.bf16.msra.mxu0 %v16532_v6  ;;  %v408_v56 = vsel %vm17212_vm5, %v12812_v44, %v407_v47  ;;  %v1410_v6 = vrot.slane %v1408_v52, 4  ;;  %v411_v13 = vsel %vm17212_vm5, %v409_v63, %v410_v49  ;;  %v415_v19 = vsel %vm17212_vm5, %v12813_v7, %v414_v10  ;;  %v12795_v52 = vld [vmem:[#allocation2 + $0x374] sm:$0x1]  ;;  %v17363_v63 = vld [vmem:[#allocation2 + $0x2c8] sm:$0xf] }
  0xaa   : > { %15354 = vmatprep.subr.bf16.mxu1 %v16533_v20  ;;  %15402 = vmatprep.subr.bf16.mxu0 %v16534_v30  ;;  %v12916_v16 = vcombine.low %v408_v56, %v411_v13  ;;  %v12814_v31 = vrot.slane %v12790_v26, 9  ;;  %v1422_v44 = vrot.slane %v17354_v37, 5  ;;  %v423_v49 = vrot.slane %v421_v35, 4  ;;  %v12974_v29 = vld [vmem:[#allocation2 + $0x2e8] sm:$0x1] }
  0xab   : > { %v1412_v18 = vsel %vm17212_vm5, %v1410_v6, %v1411_v57  ;;  %v1425_v50 = vrot.slane %v12968_v42, 5  ;;  %v12815_v57 = vrot.slane %v12793_v45, 9  ;;  %v428_v58 = vrot.slane %v12794_v51, 5  ;;  %v12800_v34 = vld [vmem:[#allocation2 + $0x3a8] sm:$0xf] }
  0xac   : > { %v13004_v21 = vcombine.low %v1409_v0, %v1412_v18  ;;  %v422_v47 = vsel %vm17212_vm5, %v12814_v31, %v421_v35  ;;  %v1424_v54 = vrot.slane %v1422_v44, 4  ;;  %v431_v56 = vrot.slane %v12795_v52, 5  ;;  %v12971_v0 = vld [vmem:[#allocation2 + $0x2cc] sm:$0x1]  ;;  %v12798_v18 = vld [vmem:[#allocation2 + $0x390] sm:$0x1] }
  0xad   : > { %15355 = vmatpush3.bf16.msra.mxu1 %v16533_v20  ;;  %15403 = vmatpush3.bf16.msra.mxu0 %v16534_v30  ;;  %v416_v20 = vrot.slane %v414_v10, 4  ;;  %v12792_v30 = vld [vmem:[#allocation2 + $0x358] sm:$0x1]  ;;  %v429_v7 = vsel %vm17212_vm5, %v12815_v57, %v428_v58  ;;  %v430_v10 = vrot.slane %v428_v58, 4  ;;  %v1429_v13 = vrot.slane %v17363_v63, 5 }
  0xae   : > { %15436 = vmatprep.subr.bf16.mxu1 %v17322_v40  ;;  %15484 = vmatprep.subr.bf16.mxu0 %v17335_v5  ;;  %v424_v36 = vrot.slane %v12792_v30, 5  ;;  %v1426_v6 = vsel %vm17212_vm5, %v1424_v54, %v1425_v50  ;;  %v1432_v14 = vrot.slane %v12971_v0, 5  ;;  %v12816_v24 = vrot.slane %v12796_v15, 9  ;;  %v12975_v45 = vld [vmem:[#allocation2 + $0x2fc] sm:$0xe] }
  0xaf   : > { %15277 = vmatmul.mubr.bf16.gmra.mxu1 %v12915_v53  ;;  %15325 = vmatmul.mubr.bf16.gmra.mxu0 %v13003_v60  ;;  %v418_v28 = vsel %vm17212_vm5, %v416_v20, %v417_v11  ;;  %v1423_v53 = vsel %vm17212_vm5, %v12990_v43, %v1422_v44  ;;  %v432_v9 = vsel %vm17212_vm5, %v430_v10, %v431_v56  ;;  %v12992_v30 = vrot.slane %v12972_v23, 9  ;;  %v12801_v44 = vld [vmem:[#allocation2 + $0x3ac] sm:$0x1]  ;;  %v17383_v52 = vld [vmem:[#allocation2 + $0x300] sm:$0xf] }
  0xb0   : > { %15280 = vmatprep.mubr.bf16.mxu1 %v12916_v16  ;;  %15328 = vmatprep.mubr.bf16.mxu0 %v13004_v21  ;;  %v12917_v38 = vcombine.low %v415_v19, %v418_v28  ;;  %v425_v60 = vsel %vm17212_vm5, %v423_v49, %v424_v36  ;;  %v13006_v11 = vcombine.low %v1423_v53, %v1426_v6  ;;  %v12797_v16 = vld [vmem:[#allocation2 + $0x38c] sm:$0xf]  ;;  %v1431_v21 = vrot.slane %v1429_v13, 4  ;;  %v12799_v36 = vld [vmem:[#allocation2 + $0x3a4] sm:$0xe] }
  0xb1   : > { %v12918_v4 = vcombine.low %v422_v47, %v425_v60  ;;  %v12919_v19 = vcombine.low %v429_v7, %v432_v9  ;;  %v1430_v20 = vsel %vm17212_vm5, %v12991_v2, %v1429_v13  ;;  %v435_v26 = vrot.slane %v12797_v16, 5  ;;  %v12977_v54 = vld [vmem:[#allocation2 + $0x304] sm:$0x1]  ;;  %v13018_v10 = vld [vmem:[#allocation2 + $0x160] sm:$0xf] }
  0xb2   : > { %v438_v28 = vrot.slane %v12798_v18, 5  ;;  %v1436_v31 = vrot.slane %v17374_v25, 5  ;;  %v1433_v32 = vsel %vm17212_vm5, %v1431_v21, %v1432_v14  ;;  %v1439_v35 = vrot.slane %v12974_v29, 5  ;;  %v13058_v13 = vld [vmem:[#allocation2 + $0x1fc] sm:$0xc] }
  0xb3   : > { %v437_v42 = vrot.slane %v435_v26, 4  ;;  %v12817_v49 = vrot.slane %v12799_v36, 9  ;;  %v442_v50 = vrot.slane %v12800_v34, 5  ;;  %v445_v51 = vrot.slane %v12801_v44, 5  ;;  %v13059_v14 = vld [vmem:[#allocation2 + $0x200] sm:$0xf] }
  0xb4   : > { %v1437_v43 = vsel %vm17212_vm5, %v12992_v30, %v1436_v31  ;;  %v1438_v47 = vrot.slane %v1436_v31, 4  ;;  %v12993_v57 = vrot.slane %v12975_v45, 9  ;;  %v1443_v58 = vrot.slane %v17383_v52, 5  ;;  %v13060_v9 = vld [vmem:[#allocation2 + $0x204] sm:$0x3] }
  0xb5   : > { %v439_v53 = vsel %vm17212_vm5, %v437_v42, %v438_v28  ;;  %v443_v56 = vsel %vm17212_vm5, %v12817_v49, %v442_v50  ;;  %v444_v0 = vrot.slane %v442_v50, 4  ;;  %v1446_v7 = vrot.slane %v12977_v54, 5  ;;  %v13063_v28 = vld [vmem:[#allocation2 + $0x220] sm:$0x3]  ;;  %v13019_v34 = vld [vmem:[#allocation2 + $0x17c] sm:$0xf] }
  0xb6   : > { %v1440_v60 = vsel %vm17212_vm5, %v1438_v47, %v1439_v35  ;;  %v1445_v6 = vrot.slane %v1443_v58, 4  ;;  %v13106_v18 = vrot.slane %v13058_v13, 10  ;;  %v2225_v23 = vrot.slane %v13060_v9, 6  ;;  %v13066_v44 = vld [vmem:[#allocation2 + $0x23c] sm:$0x3] }
  0xb7   : > { %15281 = vmatmul.mubr.bf16.gmra.mxu1 %v12917_v38  ;;  %15329 = vmatmul.mubr.bf16.gmra.mxu0 %v13005_v39  ;;  %v13007_v38 = vcombine.low %v1430_v20, %v1433_v32  ;;  %v436_v39 = vsel %vm17212_vm5, %v12816_v24, %v435_v26  ;;  %v13008_v2 = vcombine.low %v1437_v43, %v1440_v60  ;;  %v13061_v20 = vld [vmem:[#allocation2 + $0x218] sm:$0xc]  ;;  %v13062_v26 = vld [vmem:[#allocation2 + $0x21c] sm:$0xf]  ;;  %v2232_v35 = vrot.slane %v13063_v28, 6 }
  0xb8   : > { %15284 = vmatprep.mubr.bf16.mxu1 %v12918_v4  ;;  %15332 = vmatprep.mubr.bf16.mxu0 %v13006_v11  ;;  %v12920_v59 = vcombine.low %v436_v39, %v439_v53  ;;  %v1444_v4 = vsel %vm17212_vm5, %v12993_v57, %v1443_v58  ;;  %v446_v11 = vsel %vm17212_vm5, %v444_v0, %v445_v51  ;;  %v13107_v29 = vrot.slane %v13061_v20, 10  ;;  %v13064_v39 = vld [vmem:[#allocation2 + $0x234] sm:$0xc]  ;;  %v13065_v43 = vld [vmem:[#allocation2 + $0x238] sm:$0xf] }
  0xb9   : > { %v12921_v15 = vcombine.low %v443_v56, %v446_v11  ;;  %v1447_v16 = vsel %vm17212_vm5, %v1445_v6, %v1446_v7  ;;  %v13034_v24 = vcombine.low %v17216_v61, %v13018_v10  ;;  %v2229_v32 = vrot.slane %v13062_v26, 6  ;;  %v13020_v49 = vld [vmem:[#allocation2 + $0x198] sm:$0xf]  ;;  %v13067_v53 = vld [vmem:[#allocation2 + $0x250] sm:$0xc] }
  0xba   : > { %v13009_v21 = vcombine.low %v1444_v4, %v1447_v16  ;;  %v13108_v45 = vrot.slane %v13064_v39, 10  ;;  %v2236_v50 = vrot.slane %v13065_v43, 6  ;;  %v2239_v51 = vrot.slane %v13066_v44, 6  ;;  %v13068_v58 = vld [vmem:[#allocation2 + $0x254] sm:$0xf] }
  0xbb   : > { %v2231_v61 = vrot.slane %v2229_v32, 4  ;;  %v13035_v54 = vcombine.low %v17223_v17, %v13019_v34  ;;  %v13109_v60 = vrot.slane %v13067_v53, 10  ;;  %v13036_v6 = vcombine.low %v17236_v41, %v13020_v49  ;;  %v16541_v11 = vld [vmem:[#allocation4 + $0x170] sm:$0xff]   ;;  %v13070_v13 = vld [vmem:[#allocation2 + $0x26c] sm:$0xc] }
  0xbc   : > { %v2237_v56 = vsel %vm17113_vm2, %v13108_v45, %v2236_v50  ;;  %v2238_v0 = vrot.slane %v2236_v50, 4  ;;  %v16542_v17 = vld [vmem:[#allocation4 + $0x1b0] sm:$0xff]   ;;  %v13110_v16 = vrot.slane %v13070_v13, 10  ;;  %v13073_v28 = vld [vmem:[#allocation2 + $0x288] sm:$0xc]  ;;  %v16549_v50 = vld [vmem:[#allocation4 + $0x160] sm:$0xff]  }
  0xbd   : > { %v2233_v47 = vsel %vm17113_vm2, %v2231_v61, %v2232_v35  ;;  %v13071_v9 = vld [vmem:[#allocation2 + $0x270] sm:$0xf]  ;;  %v13111_v34 = vrot.slane %v13073_v28, 10  ;;  %v13077_v44 = vld [vmem:[#allocation2 + $0x2a8] sm:$0xf] }
  0xbe   : > { %v2240_v7 = vsel %vm17113_vm2, %v2238_v0, %v2239_v51  ;;  %v13022_v26 = vld [vmem:[#allocation2 + $0x1d0] sm:$0xf]  ;;  %v13078_v45 = vld [vmem:[#allocation2 + $0x2ac] sm:$0x3]  ;;  %v2264_v49 = vrot.slane %v13077_v44, 6 }
  0xbf   : > { %15285 = vmatmul.mubr.bf16.gmra.mxu1 %v12919_v19  ;;  %15333 = vmatmul.mubr.bf16.gmra.mxu0 %v13007_v38  ;;  %v2222_v19 = vrot.slane %v13059_v14, 6  ;;  %v2230_v38 = vsel %vm17113_vm2, %v13107_v29, %v2229_v32  ;;  %v13124_v14 = vcombine.low %v2237_v56, %v2240_v7  ;;  %v13074_v29 = vld [vmem:[#allocation2 + $0x28c] sm:$0xf]  ;;  %v13075_v32 = vld [vmem:[#allocation2 + $0x290] sm:$0x3]  ;;  %v13038_v61 = vcombine.low %v17258_v27, %v13022_v26  ;;  %v16553_v56 = vld [vmem:[#allocation4 + $0x158] sm:$0xff]  }
  0xc0   : > { %15288 = vmatprep.mubr.bf16.mxu1 %v12920_v59  ;;  %15336 = vmatprep.mubr.bf16.mxu0 %v13008_v2  ;;  %v13123_v57 = vcombine.low %v2230_v38, %v2233_v47  ;;  %v13069_v59 = vld [vmem:[#allocation2 + $0x258] sm:$0x3]  ;;  %v2243_v2 = vrot.slane %v13068_v58, 6  ;;  %v2257_v35 = vrot.slane %v13074_v29, 6  ;;  %v13076_v38 = vld [vmem:[#allocation2 + $0x2a4] sm:$0xc] }
  0xc1   : > { %v2223_v30 = vsel %vm17113_vm2, %v13106_v18, %v2222_v19  ;;  %v2224_v31 = vrot.slane %v2222_v19, 4  ;;  %v2246_v4 = vrot.slane %v13069_v59, 6  ;;  %v13021_v18 = vld [vmem:[#allocation2 + $0x1b4] sm:$0xf]  ;;  %v2250_v19 = vrot.slane %v13071_v9, 6  ;;  %v16554_v7 = vld [vmem:[#allocation4 + $0x198] sm:$0xff]  }
  0xc2   : > { %v2245_v10 = vrot.slane %v2243_v2, 4  ;;  %v2244_v41 = vsel %vm17113_vm2, %v13109_v60, %v2243_v2  ;;  %v2260_v43 = vrot.slane %v13075_v32, 6  ;;  %v13112_v47 = vrot.slane %v13076_v38, 10  ;;  %v13023_v51 = vld [vmem:[#allocation2 + $0x1ec] sm:$0xf]  ;;  %v16558_v28 = vld [vmem:[#allocation4 + $0x190] sm:$0xff]  }
  0xc3   : > { %v2226_v36 = vsel %vm17113_vm2, %v2224_v31, %v2225_v23  ;;  %v2252_v31 = vrot.slane %v2250_v19, 4  ;;  %v13080_v53 = vld [vmem:[#allocation2 + $0x2c4] sm:$0xf]  ;;  %v2266_v58 = vrot.slane %v2264_v49, 4  ;;  %v2258_v27 = vsel %vm17113_vm2, %v13111_v34, %v2257_v35  ;;  %v13087_v32 = vld [vmem:[#allocation2 + $0x300] sm:$0x3] }
  0xc4   : > { %v13122_v42 = vcombine.low %v2223_v30, %v2226_v36  ;;  %v2247_v23 = vsel %vm17113_vm2, %v2245_v10, %v2246_v4  ;;  %v2251_v30 = vsel %vm17113_vm2, %v13110_v16, %v2250_v19  ;;  %v2271_v59 = vrot.slane %v13080_v53, 6  ;;  %v13079_v4 = vld [vmem:[#allocation2 + $0x2c0] sm:$0xc]  ;;  %v13082_v10 = vld [vmem:[#allocation2 + $0x2dc] sm:$0xc]  ;;  %v16561_v38 = vld [vmem:[#allocation4 + $0x148] sm:$0xff]  }
  0xc5   : > { %v2265_v0 = vsel %vm17113_vm2, %v13112_v47, %v2264_v49  ;;  %v13084_v13 = vld [vmem:[#allocation2 + $0x2e4] sm:$0x3]  ;;  %v2288_v49 = vrot.slane %v13087_v32, 6 }
  0xc6   : > { %v2273_v19 = vrot.slane %v2271_v59, 4  ;;  %v2281_v26 = vrot.slane %v13084_v13, 6  ;;  %v13096_v13 = vld [vmem:[#allocation2 + $0x354] sm:$0x3] }
  0xc7   : > { %15289 = vmatmul.mubr.bf16.gmra.mxu1 %v12921_v15  ;;  %15337 = vmatmul.mubr.bf16.gmra.mxu0 %v13009_v21  ;;  %v13072_v15 = vld [vmem:[#allocation2 + $0x274] sm:$0x3]  ;;  %v16545_v21 = vld [vmem:[#allocation4 + $0x168] sm:$0xff]  }
  0xc8   : > { %15356 = vmatprep.mubr.bf16.mxu1 %v13034_v24  ;;  %15404 = vmatprep.mubr.bf16.mxu0 %v13122_v42  ;;  %v2253_v20 = vrot.slane %v13072_v15, 6  ;;  %v16546_v24 = vld [vmem:[#allocation4 + $0x1a8] sm:$0xff]   ;;  %v2259_v42 = vrot.slane %v2257_v35, 4  ;;  %v13089_v35 = vld [vmem:[#allocation2 + $0x318] sm:$0xf] }
  0xc9   : > { %v2292_v34 = vrot.slane %v13089_v35, 6  ;;  %v13099_v35 = vld [vmem:[#allocation2 + $0x370] sm:$0x3] }
  0xca   : > { %v2254_v36 = vsel %vm17113_vm2, %v2252_v31, %v2253_v20  ;;  %v2261_v60 = vsel %vm17113_vm2, %v2259_v42, %v2260_v43  ;;  %v13085_v31 = vld [vmem:[#allocation2 + $0x2f8] sm:$0xc]  ;;  %v13090_v42 = vld [vmem:[#allocation2 + $0x31c] sm:$0x3]  ;;  %v16562_v43 = vld [vmem:[#allocation4 + $0x188] sm:$0xff]  }
  0xcb   : > { %v13126_v39 = vcombine.low %v2251_v30, %v2254_v36  ;;  %v2294_v53 = vrot.slane %v2292_v34, 4 }
  0xcf   : > { %15357 = vmatmul.mubr.bf16.vlgmr.msra.gmra.mxu1 %v13035_v54  ;;  %15405 = vmatmul.mubr.bf16.vlgmr.msra.gmra.mxu0 %v13123_v57  ;;  %v16550_v54 = vld [vmem:[#allocation4 + $0x1a0] sm:$0xff]   ;;  %v13024_v57 = vld [vmem:[#allocation2 + $0x208] sm:$0xf] }
  0xd0   : > { %15437 = vmatpush3.bf16.msra.mxu1 %v17322_v40  ;;  %15485 = vmatpush3.bf16.msra.mxu0 %v17335_v5  ;;  %v13037_v40 = vcombine.low %v17247_v1, %v13021_v18  ;;  %v13125_v5 = vcombine.low %v2244_v41, %v2247_v23  ;;  %v2267_v1 = vrot.slane %v13078_v45, 6  ;;  %v13040_v9 = vcombine.low %v17280_v8, %v13024_v57  ;;  %v13092_v57 = vld [vmem:[#allocation2 + $0x334] sm:$0xf] }
  0xd1   : > { %15360 = vmatprep.mubr.bf16.mxu1 %v13036_v6  ;;  %15408 = vmatprep.mubr.bf16.mxu0 %v13124_v14  ;;  %v13081_v6 = vld [vmem:[#allocation2 + $0x2c8] sm:$0x3]  ;;  %v13039_v14 = vcombine.low %v17269_v48, %v13023_v51  ;;  %v13113_v18 = vrot.slane %v13079_v4, 10  ;;  %v13114_v41 = vrot.slane %v13082_v10, 10  ;;  %v13025_v48 = vld [vmem:[#allocation2 + $0x224] sm:$0xf] }
  0xd2   : > { %15438 = vmatprep.subr.bf16.mxu1 %v16541_v11  ;;  %15486 = vmatprep.subr.bf16.mxu0 %v16542_v17  ;;  %v2268_v2 = vsel %vm17113_vm2, %v2266_v58, %v2267_v1  ;;  %v2274_v20 = vrot.slane %v13081_v6, 6  ;;  %v13115_v45 = vrot.slane %v13085_v31, 10  ;;  %v13095_v58 = vld [vmem:[#allocation2 + $0x350] sm:$0xf]  ;;  %v2299_v4 = vrot.slane %v13092_v57, 6 }
  0xd3   : > { %v13128_v16 = vcombine.low %v2265_v0, %v2268_v2  ;;  %v2272_v8 = vsel %vm17113_vm2, %v13113_v18, %v2271_v59  ;;  %v16566_v59 = vld [vmem:[#allocation4 + $0x180] sm:$0xff]   ;;  %v13093_v2 = vld [vmem:[#allocation2 + $0x338] sm:$0x3]  ;;  %v13094_v6 = vld [vmem:[#allocation2 + $0x34c] sm:$0xc] }
  0xd4   : > { %15439 = vmatpush3.bf16.msra.mxu1 %v16541_v11  ;;  %15487 = vmatpush3.bf16.msra.mxu0 %v16542_v17  ;;  %v13083_v11 = vld [vmem:[#allocation2 + $0x2e0] sm:$0xf]  ;;  %v13127_v17 = vcombine.low %v2258_v27, %v2261_v60  ;;  %v2275_v30 = vsel %vm17113_vm2, %v2273_v19, %v2274_v20  ;;  %v13027_v27 = vld [vmem:[#allocation2 + $0x25c] sm:$0xf]  ;;  %v13028_v60 = vld [vmem:[#allocation2 + $0x278] sm:$0xf] }
  0xd5   : > { %15440 = vmatprep.subr.bf16.mxu1 %v16545_v21  ;;  %15488 = vmatprep.subr.bf16.mxu0 %v16546_v24  ;;  %v2278_v15 = vrot.slane %v13083_v11, 6  ;;  %v13129_v44 = vcombine.low %v2272_v8, %v2275_v30  ;;  %v2301_v20 = vrot.slane %v2299_v4, 4  ;;  %v13105_v57 = vld [vmem:[#allocation2 + $0x3a8] sm:$0x3] }
  0xd7   : > { %15361 = vmatmul.mubr.bf16.gmra.mxu1 %v13037_v40  ;;  %15409 = vmatmul.mubr.bf16.gmra.mxu0 %v13125_v5  ;;  %v2280_v23 = vrot.slane %v2278_v15, 4  ;;  %v13026_v40 = vld [vmem:[#allocation2 + $0x240] sm:$0xf]  ;;  %v2279_v5 = vsel %vm17113_vm2, %v13114_v41, %v2278_v15  ;;  %v13118_v41 = vrot.slane %v13094_v6, 10  ;;  %v2330_v6 = vrot.slane %v13105_v57, 6 }
  0xd8   : > { %15364 = vmatprep.mubr.bf16.mxu1 %v13038_v61  ;;  %15412 = vmatprep.mubr.bf16.mxu0 %v13126_v39  ;;  %v13041_v61 = vcombine.low %v17289_v33, %v13025_v48  ;;  %v13088_v39 = vld [vmem:[#allocation2 + $0x314] sm:$0xc]  ;;  %v13042_v1 = vcombine.low %v17304_v62, %v13026_v40  ;;  %v16565_v33 = vld [vmem:[#allocation4 + $0x140] sm:$0xff]   ;;  %v13030_v48 = vld [vmem:[#allocation2 + $0x2b0] sm:$0xf] }
  0xd9   : > { %15441 = vmatpush3.bf16.msra.mxu1 %v16545_v21  ;;  %15489 = vmatpush3.bf16.msra.mxu0 %v16546_v24  ;;  %v13086_v21 = vld [vmem:[#allocation2 + $0x2fc] sm:$0xf]  ;;  %v16557_v24 = vld [vmem:[#allocation4 + $0x150] sm:$0xff]   ;;  %v2282_v36 = vsel %vm17113_vm2, %v2280_v23, %v2281_v26  ;;  %v13116_v51 = vrot.slane %v13088_v39, 10  ;;  %v2309_v26 = vrot.slane %v13096_v13, 6 }
  0xda   : > { %15442 = vmatprep.subr.bf16.mxu1 %v16549_v50  ;;  %15490 = vmatprep.subr.bf16.mxu0 %v16550_v54  ;;  %v2285_v29 = vrot.slane %v13086_v21, 6  ;;  %v2302_v21 = vrot.slane %v13093_v2, 6  ;;  %v13100_v40 = vld [vmem:[#allocation2 + $0x384] sm:$0xc] }
  0xdb   : > { %v2293_v10 = vsel %vm17113_vm2, %v13116_v51, %v2292_v34  ;;  %v13031_v51 = vld [vmem:[#allocation2 + $0x2cc] sm:$0xf] }
  0xdc   : > { %v2287_v47 = vrot.slane %v2285_v29, 4  ;;  %v2286_v62 = vsel %vm17113_vm2, %v13115_v45, %v2285_v29  ;;  %v13101_v29 = vld [vmem:[#allocation2 + $0x388] sm:$0xf]  ;;  %v2303_v30 = vsel %vm17113_vm2, %v2301_v20, %v2302_v21  ;;  %v13120_v45 = vrot.slane %v13100_v40, 10  ;;  %v13189_v21 = vld [vmem:[#allocation2 + $0x2c0] sm:$0xc] }
  0xdd   : > { %15443 = vmatpush3.bf16.msra.mxu1 %v16549_v50  ;;  %15491 = vmatpush3.bf16.msra.mxu0 %v16550_v54  ;;  %v13130_v50 = vcombine.low %v2279_v5, %v2282_v36  ;;  %v2295_v54 = vrot.slane %v13090_v42, 6  ;;  %v2320_v5 = vrot.slane %v13101_v29, 6  ;;  %v13102_v36 = vld [vmem:[#allocation2 + $0x38c] sm:$0x3]  ;;  %v13196_v40 = vld [vmem:[#allocation2 + $0x2fc] sm:$0xf] }
  0xde   : > { %15444 = vmatprep.subr.bf16.mxu1 %v16553_v56  ;;  %15492 = vmatprep.subr.bf16.mxu0 %v16554_v7  ;;  %v2289_v0 = vsel %vm17113_vm2, %v2287_v47, %v2288_v49  ;;  %v13104_v47 = vld [vmem:[#allocation2 + $0x3a4] sm:$0xf] }
  0xdf   : > { %15365 = vmatmul.mubr.bf16.gmra.mxu1 %v13039_v14  ;;  %15413 = vmatmul.mubr.bf16.gmra.mxu0 %v13127_v17  ;;  %v2296_v11 = vsel %vm17113_vm2, %v2294_v53, %v2295_v54  ;;  %v2306_v14 = vrot.slane %v13095_v58, 6  ;;  %v17455_v17 = vld [vmem:[#allocation4 + $0x238] sm:$0xff]   ;;  %v13131_v15 = vcombine.low %v2286_v62, %v2289_v0  ;;  %v2322_v49 = vrot.slane %v2320_v5, 4  ;;  %v13103_v54 = vld [vmem:[#allocation2 + $0x3a0] sm:$0xc] }
  0xe0   : > { %15368 = vmatprep.mubr.bf16.mxu1 %v13040_v9  ;;  %15416 = vmatprep.mubr.bf16.mxu0 %v13128_v16  ;;  %v13043_v9 = vcombine.low %v17313_v22, %v13027_v27  ;;  %v13044_v16 = vcombine.low %v17326_v46, %v13028_v60  ;;  %v13132_v18 = vcombine.low %v2293_v10, %v2296_v11  ;;  %v13097_v22 = vld [vmem:[#allocation2 + $0x368] sm:$0xc]  ;;  %v2327_v53 = vrot.slane %v13104_v47, 6  ;;  %v13188_v62 = vld [vmem:[#allocation2 + $0x2ac] sm:$0x3] }
  0xe1   : > { %15445 = vmatpush3.bf16.msra.mxu1 %v16553_v56  ;;  %15493 = vmatpush3.bf16.msra.mxu0 %v16554_v7  ;;  %v13091_v56 = vld [vmem:[#allocation2 + $0x330] sm:$0xc]  ;;  %v17449_v7 = vld [vmem:[#allocation4 + $0x1f8] sm:$0xff]   ;;  %v2308_v23 = vrot.slane %v2306_v14, 4  ;;  %v2307_v31 = vsel %vm17113_vm2, %v13118_v41, %v2306_v14  ;;  %v13119_v39 = vrot.slane %v13097_v22, 10  ;;  %v13047_v60 = vcombine.low %v17363_v63, %v13031_v51 }
  0xe2   : > { %15446 = vmatprep.subr.bf16.mxu1 %v16557_v24  ;;  %15494 = vmatprep.subr.bf16.mxu0 %v16558_v28  ;;  %v13117_v19 = vrot.slane %v13091_v56, 10  ;;  %v13032_v58 = vld [vmem:[#allocation2 + $0x2e8] sm:$0xf]  ;;  %v13186_v56 = vld [vmem:[#allocation2 + $0x2a4] sm:$0xc]  ;;  %v13121_v2 = vrot.slane %v13103_v54, 10 }
  0xe3   : > { %v2310_v32 = vsel %vm17113_vm2, %v2308_v23, %v2309_v26  ;;  %v13048_v10 = vcombine.low %v17374_v25, %v13032_v58  ;;  %v13234_v13 = vrot.slane %v13186_v56, 10  ;;  %v13191_v25 = vld [vmem:[#allocation2 + $0x2c8] sm:$0x3]  ;;  %v13192_v26 = vld [vmem:[#allocation2 + $0x2dc] sm:$0xc] }
  0xe4   : > { %v2300_v8 = vsel %vm17113_vm2, %v13117_v19, %v2299_v4  ;;  %v13134_v42 = vcombine.low %v2307_v31, %v2310_v32  ;;  %v2329_v4 = vrot.slane %v2327_v53, 4  ;;  %v13146_v19 = vld [vmem:[#allocation2 + $0x208] sm:$0xf]  ;;  %v2328_v63 = vsel %vm17113_vm2, %v13121_v2, %v2327_v53  ;;  %v16791_v22 = vld [vmem:[#allocation2 + $0x204] sm:$0xf] }
  0xe5   : > { %15447 = vmatpush3.bf16.msra.mxu1 %v16557_v24  ;;  %15495 = vmatpush3.bf16.msra.mxu0 %v16558_v28  ;;  %v13098_v24 = vld [vmem:[#allocation2 + $0x36c] sm:$0xf]  ;;  %v13029_v28 = vld [vmem:[#allocation2 + $0x294] sm:$0xf]  ;;  %v13235_v31 = vrot.slane %v13189_v21, 10 }
  0xe6   : > { %15448 = vmatprep.subr.bf16.mxu1 %v16561_v38  ;;  %15496 = vmatprep.subr.bf16.mxu0 %v16562_v43  ;;  %v2313_v46 = vrot.slane %v13098_v24, 6  ;;  %v13045_v34 = vcombine.low %v17337_v12, %v13029_v28  ;;  %v2331_v20 = vsel %vm17113_vm2, %v2329_v4, %v2330_v6  ;;  %v13200_v47 = vld [vmem:[#allocation2 + $0x31c] sm:$0x3]  ;;  %v17498_v53 = vld [vmem:[#allocation2 + $0x334] sm:$0xf]  ;;  %v16578_v21 = vld [vmem:[#allocation4 + $0x228] sm:$0xff]  }
  0xe7   : > { %15369 = vmatmul.mubr.bf16.gmra.mxu1 %v13041_v61  ;;  %15417 = vmatmul.mubr.bf16.gmra.mxu0 %v13129_v44  ;;  %v13046_v61 = vcombine.low %v17354_v37, %v13030_v48  ;;  %v2316_v44 = vrot.slane %v13099_v35, 6  ;;  %v13137_v29 = vcombine.low %v2328_v63, %v2331_v20  ;;  %v3119_v35 = vrot.slane %v13191_v25, 6  ;;  %v16577_v20 = vld [vmem:[#allocation4 + $0x1e8] sm:$0xff]  }
  0xe8   : > { %15372 = vmatprep.mubr.bf16.mxu1 %v13042_v1  ;;  %15420 = vmatprep.mubr.bf16.mxu0 %v13130_v50  ;;  %v2323_v1 = vrot.slane %v13102_v36, 6  ;;  %v13187_v50 = vld [vmem:[#allocation2 + $0x2a8] sm:$0xf]  ;;  %v2314_v12 = vsel %vm17113_vm2, %v13119_v39, %v2313_v46  ;;  %v13147_v36 = vld [vmem:[#allocation2 + $0x224] sm:$0xf]  ;;  %v3140_v56 = vrot.slane %v13200_v47, 6 }
  0xe9   : > { %15449 = vmatpush3.bf16.msra.mxu1 %v16561_v38  ;;  %15497 = vmatpush3.bf16.msra.mxu0 %v16562_v43  ;;  %v13133_v38 = vcombine.low %v2300_v8, %v2303_v30  ;;  %v2315_v43 = vrot.slane %v2313_v46, 4  ;;  %v3109_v27 = vrot.slane %v13187_v50, 6  ;;  %v13162_v46 = vcombine.low %v16791_v22, %v13146_v19  ;;  %v13194_v8 = vld [vmem:[#allocation2 + $0x2e4] sm:$0x3]  ;;  %v13199_v39 = vld [vmem:[#allocation2 + $0x318] sm:$0xf] }
  0xea   : > { %15450 = vmatprep.subr.bf16.mxu1 %v16565_v33  ;;  %15498 = vmatprep.subr.bf16.mxu0 %v16566_v59  ;;  %v13150_v19 = vld [vmem:[#allocation2 + $0x278] sm:$0xf] }
  0xeb   : > { %v2317_v37 = vsel %vm17113_vm2, %v2315_v43, %v2316_v44  ;;  %v3111_v14 = vrot.slane %v3109_v27, 4  ;;  %v3110_v41 = vsel %vm17113_vm2, %v13234_v13, %v3109_v27  ;;  %v3130_v43 = vrot.slane %v13196_v40, 6  ;;  %v16574_v27 = vld [vmem:[#allocation4 + $0x230] sm:$0xff]   ;;  %v13203_v13 = vld [vmem:[#allocation2 + $0x338] sm:$0x3]  ;;  %v16581_v40 = vld [vmem:[#allocation4 + $0x1e0] sm:$0xff]  }
  0xec   : > { %v13135_v0 = vcombine.low %v2314_v12, %v2317_v37  ;;  %v16792_v12 = vld [vmem:[#allocation2 + $0x220] sm:$0xf] }
  0xed   : > { %15451 = vmatpush3.bf16.msra.mxu1 %v16565_v33  ;;  %15499 = vmatpush3.bf16.msra.mxu0 %v16566_v59  ;;  %v2321_v33 = vsel %vm17113_vm2, %v13120_v45, %v2320_v5  ;;  %v2324_v59 = vsel %vm17113_vm2, %v2322_v49, %v2323_v1  ;;  %v13236_v5 = vrot.slane %v13192_v26, 10  ;;  %v13198_v45 = vld [vmem:[#allocation2 + $0x314] sm:$0xc]  ;;  %v3137_v49 = vrot.slane %v13199_v39, 6  ;;  %v13148_v1 = vld [vmem:[#allocation2 + $0x240] sm:$0xf] }
  0xee   : > { %15532 = vmatprep.subr.bf16.mxu1 %v17449_v7  ;;  %15580 = vmatprep.subr.bf16.mxu0 %v17455_v17  ;;  %v13136_v11 = vcombine.low %v2321_v33, %v2324_v59  ;;  %v13163_v37 = vcombine.low %v16792_v12, %v13147_v36  ;;  %v3132_v58 = vrot.slane %v3130_v43, 4  ;;  %v16573_v59 = vld [vmem:[#allocation4 + $0x1f0] sm:$0xff]   ;;  %v17516_v26 = vld [vmem:[#allocation2 + $0x368] sm:$0xc]  ;;  %v17527_v39 = vld [vmem:[#allocation2 + $0x38c] sm:$0x3] }
  0xef   : > { %15373 = vmatmul.mubr.bf16.gmra.mxu1 %v13043_v9  ;;  %15421 = vmatmul.mubr.bf16.gmra.mxu0 %v13131_v15  ;;  %v3112_v9 = vrot.slane %v13188_v62, 6  ;;  %v13190_v15 = vld [vmem:[#allocation2 + $0x2c4] sm:$0xf]  ;;  %v13201_v62 = vld [vmem:[#allocation2 + $0x330] sm:$0xc]  ;;  %v3139_v6 = vrot.slane %v3137_v49, 4 }
  0xf0   : > { %15376 = vmatprep.mubr.bf16.mxu1 %v13044_v16  ;;  %15424 = vmatprep.mubr.bf16.mxu0 %v13132_v18  ;;  %v13193_v16 = vld [vmem:[#allocation2 + $0x2e0] sm:$0xf]  ;;  %v13033_v18 = vld [vmem:[#allocation2 + $0x304] sm:$0xf]  ;;  %v3116_v24 = vrot.slane %v13190_v15, 6  ;;  %v13241_v47 = vrot.slane %v17516_v26, 10 }
  0xf1   : > { %v3113_v23 = vsel %vm17113_vm2, %v3111_v14, %v3112_v9  ;;  %v3123_v28 = vrot.slane %v13193_v16, 6  ;;  %v13049_v48 = vcombine.low %v17383_v52, %v13033_v18  ;;  %v13149_v14 = vld [vmem:[#allocation2 + $0x25c] sm:$0xf]  ;;  %v13204_v16 = vld [vmem:[#allocation2 + $0x34c] sm:$0xc] }
  0xf2   : > { %v13250_v30 = vcombine.low %v3110_v41, %v3113_v23  ;;  %v3118_v32 = vrot.slane %v3116_v24, 4  ;;  %v3117_v52 = vsel %vm17113_vm2, %v13235_v31, %v3116_v24  ;;  %v17509_v18 = vld [vmem:[#allocation2 + $0x36c] sm:$0xf]  ;;  %v3147_v41 = vrot.slane %v13203_v13, 6  ;;  %v13206_v23 = vld [vmem:[#allocation2 + $0x354] sm:$0x3] }
  0xf3   : > { %v3124_v50 = vsel %vm17113_vm2, %v13236_v5, %v3123_v28  ;;  %v13240_v22 = vrot.slane %v13204_v16, 10  ;;  %v16795_v31 = vld [vmem:[#allocation2 + $0x274] sm:$0xf]  ;;  %v3154_v36 = vrot.slane %v13206_v23, 6  ;;  %v17563_v16 = vld [vmem:[#allocation2 + $0x3c4] sm:$0x3] }
  0xf4   : > { %v3120_v44 = vsel %vm17113_vm2, %v3118_v32, %v3119_v35  ;;  %v13166_v32 = vcombine.low %v16795_v31, %v13150_v19  ;;  %v16589_v19 = vld [vmem:[#allocation4 + $0x1d0] sm:$0xff]   ;;  %v13154_v31 = vld [vmem:[#allocation2 + $0x2e8] sm:$0xf] }
  0xf5   : > { %v13251_v54 = vcombine.low %v3117_v52, %v3120_v44  ;;  %v17580_v26 = vld [vmem:[#allocation2 + $0x410] sm:$0xc] }
  0xf7   : > { %15377 = vmatmul.mubr.bf16.gmra.mxu1 %v13045_v34  ;;  %15425 = vmatmul.mubr.bf16.gmra.mxu0 %v13133_v38  ;;  %v3125_v34 = vrot.slane %v3123_v28, 4  ;;  %v3126_v38 = vrot.slane %v13194_v8, 6  ;;  %v16794_v28 = vld [vmem:[#allocation2 + $0x258] sm:$0xf]  ;;  %v3158_v8 = vrot.slane %v17509_v18, 6 }
  0xf8   : > { %15380 = vmatprep.mubr.bf16.mxu1 %v13046_v61  ;;  %15428 = vmatprep.mubr.bf16.mxu0 %v13134_v42  ;;  %v13195_v61 = vld [vmem:[#allocation2 + $0x2f8] sm:$0xc]  ;;  %v13197_v42 = vld [vmem:[#allocation2 + $0x300] sm:$0x3] }
  0xf9   : > { %v3127_v51 = vsel %vm17113_vm2, %v3125_v34, %v3126_v38  ;;  %v13237_v57 = vrot.slane %v13195_v61, 10  ;;  %v3133_v33 = vrot.slane %v13197_v42, 6  ;;  %v17523_v34 = vld [vmem:[#allocation2 + $0x384] sm:$0xc]  ;;  %v17529_v42 = vld [vmem:[#allocation2 + $0x3a0] sm:$0xc] }
  0xfa   : > { %v13252_v4 = vcombine.low %v3124_v50, %v3127_v51  ;;  %v17525_v38 = vld [vmem:[#allocation2 + $0x3a4] sm:$0xf]  ;;  %v13242_v51 = vrot.slane %v17523_v34, 10 }
  0xfb   : > { %v3131_v9 = vsel %vm17113_vm2, %v13237_v57, %v3130_v43  ;;  %v3134_v15 = vsel %vm17113_vm2, %v3132_v58, %v3133_v33  ;;  %v16582_v61 = vld [vmem:[#allocation4 + $0x220] sm:$0xff]   ;;  %v13151_v43 = vld [vmem:[#allocation2 + $0x294] sm:$0xf]  ;;  %v3172_v12 = vrot.slane %v17525_v38, 6  ;;  %v3168_v33 = vrot.slane %v17527_v39, 6  ;;  %v17648_v38 = vld [vmem:[#allocation4 + $0x2b8] sm:$0xff]  }
  0xff   : > { %15381 = vmatmul.mubr.bf16.gmra.mxu1 %v13047_v60  ;;  %15429 = vmatmul.mubr.bf16.gmra.mxu0 %v13135_v0  ;;  %v13238_v60 = vrot.slane %v13198_v45, 10  ;;  %v16793_v0 = vld [vmem:[#allocation2 + $0x23c] sm:$0xf]  ;;  %v13152_v45 = vld [vmem:[#allocation2 + $0x2b0] sm:$0xf] }
 0x100   : > { %15384 = vmatprep.mubr.bf16.mxu1 %v13048_v10  ;;  %15432 = vmatprep.mubr.bf16.mxu0 %v13136_v11  ;;  %v13164_v2 = vcombine.low %v16793_v0, %v13148_v1  ;;  %v3144_v10 = vrot.slane %v17498_v53, 6  ;;  %v17501_v11 = vld [vmem:[#allocation2 + $0x350] sm:$0xf]  ;;  %v3160_v1 = vrot.slane %v3158_v8, 4  ;;  %v17539_v53 = vld [vmem:[#allocation2 + $0x3a8] sm:$0x3] }
 0x101   : > { %v3138_v63 = vsel %vm17113_vm2, %v13238_v60, %v3137_v49  ;;  %v3151_v25 = vrot.slane %v17501_v11, 6  ;;  %v17550_v60 = vld [vmem:[#allocation2 + $0x2cc] sm:$0xf] }
 0x102   : > { %v3146_v24 = vrot.slane %v3144_v10, 4  ;;  %v16797_v11 = vld [vmem:[#allocation2 + $0x2ac] sm:$0xf] }
 0x103   : > { %v3153_v5 = vrot.slane %v3151_v25, 4  ;;  %v3152_v57 = vsel %vm17113_vm2, %v13240_v22, %v3151_v25  ;;  %v13168_v13 = vcombine.low %v16797_v11, %v13152_v45  ;;  %v17574_v25 = vld [vmem:[#allocation2 + $0x3f4] sm:$0xc]  ;;  %v17585_v22 = vld [vmem:[#allocation2 + $0x418] sm:$0x3]  ;;  %v13247_v45 = vrot.slane %v17580_v26, 10 }
 0x104   : > { %v3148_v44 = vsel %vm17113_vm2, %v3146_v24, %v3147_v41  ;;  %v17577_v41 = vld [vmem:[#allocation2 + $0x3fc] sm:$0x3] }
 0x105   : > { %v3155_v58 = vsel %vm17113_vm2, %v3153_v5, %v3154_v36  ;;  %v3196_v39 = vrot.slane %v17577_v41, 6 }
 0x107   : > { %15385 = vmatmul.mubr.bf16.gmra.mxu1 %v13049_v48  ;;  %15433 = vmatmul.mubr.bf16.gmra.mxu0 %v13137_v29  ;;  %v13165_v48 = vcombine.low %v16794_v28, %v13149_v14  ;;  %v13253_v29 = vcombine.low %v3131_v9, %v3134_v15  ;;  %v13256_v14 = vcombine.low %v3152_v57, %v3155_v58  ;;  %v17559_v9 = vrot.slane %v3172_v12, 4  ;;  %v17561_v15 = vld [vmem:[#allocation2 + $0x3bc] sm:$0xc]  ;;  %v16798_v28 = vld [vmem:[#allocation2 + $0x2c8] sm:$0xf]  ;;  %v16597_v58 = vld [vmem:[#allocation4 + $0x1c0] sm:$0xff]  }
 0x108   : > { %15452 = vmatprep.mubr.bf16.mxu1 %v13162_v46  ;;  %15500 = vmatprep.mubr.bf16.mxu0 %v13250_v30  ;;  %v17518_v46 = vld [vmem:[#allocation2 + $0x370] sm:$0x3]  ;;  %v17521_v30 = vld [vmem:[#allocation2 + $0x388] sm:$0xf]  ;;  %v17614_v57 = vld [vmem:[#allocation2 + $0x434] sm:$0x3] }
 0x109   : > { %v3165_v49 = vrot.slane %v17521_v30, 6  ;;  %v3161_v50 = vrot.slane %v17518_v46, 6 }
 0x10f   : > { %15453 = vmatmul.mubr.bf16.vlgmr.msra.gmra.mxu1 %v13163_v37  ;;  %15501 = vmatmul.mubr.bf16.vlgmr.msra.gmra.mxu0 %v13251_v54  ;;  %v16585_v37 = vld [vmem:[#allocation4 + $0x1d8] sm:$0xff]  }
 0x110   : > { %15533 = vmatpush3.bf16.msra.mxu1 %v17449_v7  ;;  %15581 = vmatpush3.bf16.msra.mxu0 %v17455_v17  ;;  %v3141_v7 = vsel %vm17113_vm2, %v3139_v6, %v3140_v56  ;;  %v13239_v17 = vrot.slane %v13201_v62, 10  ;;  %v16586_v54 = vld [vmem:[#allocation4 + $0x218] sm:$0xff]   ;;  %v16796_v56 = vld [vmem:[#allocation2 + $0x290] sm:$0xf] }
 0x111   : > { %15456 = vmatprep.mubr.bf16.mxu1 %v13164_v2  ;;  %15504 = vmatprep.mubr.bf16.mxu0 %v13252_v4  ;;  %v13254_v35 = vcombine.low %v3138_v63, %v3141_v7  ;;  %v13167_v62 = vcombine.low %v16796_v56, %v13151_v43  ;;  %v3167_v2 = vrot.slane %v3165_v49, 4  ;;  %v3175_v4 = vrot.slane %v17539_v53, 6  ;;  %v17553_v6 = vld [vmem:[#allocation2 + $0x3dc] sm:$0xf]  ;;  %v16590_v63 = vld [vmem:[#allocation4 + $0x210] sm:$0xff]   ;;  %v16593_v43 = vld [vmem:[#allocation4 + $0x1c8] sm:$0xff]  }
 0x112   : > { %15534 = vmatprep.subr.bf16.mxu1 %v16573_v59  ;;  %15582 = vmatprep.subr.bf16.mxu0 %v16574_v27  ;;  %v3145_v52 = vsel %vm17113_vm2, %v13239_v17, %v3144_v10  ;;  %v17555_v10 = vld [vmem:[#allocation2 + $0x3f8] sm:$0xf]  ;;  %v3159_v7 = vsel %vm17113_vm2, %v13241_v47, %v3158_v8  ;;  %v3162_v17 = vsel %vm17113_vm2, %v3160_v1, %v3161_v50  ;;  %v3186_v24 = vrot.slane %v17553_v6, 6  ;;  %v16799_v1 = vld [vmem:[#allocation2 + $0x2e4] sm:$0xf] }
 0x113   : > { %v13255_v0 = vcombine.low %v3145_v52, %v3148_v44  ;;  %v3193_v23 = vrot.slane %v17555_v10, 6  ;;  %v13257_v46 = vcombine.low %v3159_v7, %v3162_v17  ;;  %v3166_v8 = vsel %vm17113_vm2, %v13242_v51, %v3165_v49  ;;  %v16594_v52 = vld [vmem:[#allocation4 + $0x208] sm:$0xff]   ;;  %v13155_v56 = vld [vmem:[#allocation2 + $0x304] sm:$0xf]  ;;  %v17646_v17 = vld [vmem:[#allocation4 + $0x278] sm:$0xff]  }
 0x114   : > { %15535 = vmatpush3.bf16.msra.mxu1 %v16573_v59  ;;  %15583 = vmatpush3.bf16.msra.mxu0 %v16574_v27  ;;  %v13243_v59 = vrot.slane %v17529_v42, 10  ;;  %v17548_v27 = vld [vmem:[#allocation2 + $0x3c0] sm:$0xf]  ;;  %v3169_v30 = vsel %vm17113_vm2, %v3167_v2, %v3168_v33  ;;  %v17598_v36 = vrot.slane %v3186_v24, 4  ;;  %v3203_v49 = vrot.slane %v17585_v22, 6 }
 0x115   : > { %15536 = vmatprep.subr.bf16.mxu1 %v16577_v20  ;;  %15584 = vmatprep.subr.bf16.mxu0 %v16578_v21  ;;  %v3179_v18 = vrot.slane %v17548_v27, 6  ;;  %v17605_v44 = vrot.slane %v3193_v23, 4  ;;  %v13170_v50 = vcombine.low %v16799_v1, %v13154_v31  ;;  %v13258_v51 = vcombine.low %v3166_v8, %v3169_v30  ;;  %v16598_v33 = vld [vmem:[#allocation4 + $0x200] sm:$0xff]   ;;  %v17644_v7 = vld [vmem:[#allocation2 + $0x2c8] sm:$0xf] }
 0x116   : > { %v17664_v27 = vld [vmem:[#allocation2 + $0x2cc] sm:$0x1]  ;;  %v17666_v8 = vld [vmem:[#allocation2 + $0x33c] sm:$0xf]  ;;  %v22478_v31 = vrot.slane %v17644_v7, 5 }
 0x117   : > { %15457 = vmatmul.mubr.bf16.gmra.mxu1 %v13165_v48  ;;  %15505 = vmatmul.mubr.bf16.gmra.mxu0 %v13253_v29  ;;  %v13169_v48 = vcombine.low %v16798_v28, %v17550_v60  ;;  %v17583_v29 = vld [vmem:[#allocation2 + $0x414] sm:$0xf]  ;;  %v17616_v60 = vld [vmem:[#allocation2 + $0x44c] sm:$0xf]  ;;  %v17662_v28 = vld [vmem:[#allocation2 + $0x2c4] sm:$0xe] }
 0x118   : > { %15460 = vmatprep.mubr.bf16.mxu1 %v13166_v32  ;;  %15508 = vmatprep.mubr.bf16.mxu0 %v13254_v35  ;;  %v13244_v32 = vrot.slane %v17561_v15, 10  ;;  %v3181_v35 = vrot.slane %v3179_v18, 4  ;;  %v3200_v47 = vrot.slane %v17583_v29, 6  ;;  %v3173_v15 = vsel %vm17113_vm2, %v13243_v59, %v3172_v12  ;;  %v17657_v59 = vld [vmem:[#allocation2 + $0x2a8] sm:$0xe] }
 0x119   : > { %15537 = vmatpush3.bf16.msra.mxu1 %v16577_v20  ;;  %15585 = vmatpush3.bf16.msra.mxu0 %v16578_v21  ;;  %v17570_v20 = vld [vmem:[#allocation2 + $0x3d8] sm:$0xc]  ;;  %v17572_v21 = vld [vmem:[#allocation2 + $0x3e0] sm:$0x3]  ;;  %v3214_v12 = vrot.slane %v17616_v60, 6  ;;  %v13322_v6 = vrot.slane %v17657_v59, 9 }
 0x11a   : > { %15538 = vmatprep.subr.bf16.mxu1 %v16581_v40  ;;  %15586 = vmatprep.subr.bf16.mxu0 %v16582_v61  ;;  %v13245_v5 = vrot.slane %v17570_v20, 10  ;;  %v3189_v34 = vrot.slane %v17572_v21, 6  ;;  %v17624_v2 = vrot.slane %v3200_v47, 4  ;;  %v3180_v42 = vsel %vm17113_vm2, %v13244_v32, %v3179_v18  ;;  %v16800_v18 = vld [vmem:[#allocation2 + $0x300] sm:$0xf] }
 0x11b   : > { %v16801_v32 = vld [vmem:[#allocation2 + $0x31c] sm:$0xf]  ;;  %v17698_v20 = vld [vmem:[#allocation2 + $0x300] sm:$0xf]  ;;  %v17765_v10 = vsel %vm17113_vm2, %v13247_v45, %v3200_v47  ;;  %v17792_v22 = vld [vmem:[#allocation2 + $0x2b0] sm:$0xf] }
 0x11c   : > { %22544 = vst [vmem:[#allocation22_spill] sm:$0xff] %v17698_v20  ;;  %v17794_v45 = vld [vmem:[#allocation2 + $0x31c] sm:$0xf]  ;;  %v17796_v47 = vld [vmem:[#allocation2 + $0x338] sm:$0xf]  ;;  %v22554_v59 = vrot.slane %v17644_v7, 5 }
 0x11d   : > { %15539 = vmatpush3.bf16.msra.mxu1 %v16581_v40  ;;  %15587 = vmatpush3.bf16.msra.mxu0 %v16582_v61  ;;  %v3182_v40 = vrot.slane %v17563_v16, 6  ;;  %v13246_v61 = vrot.slane %v17574_v25, 10  ;;  %v3176_v16 = vsel %vm17113_vm2, %v17559_v9, %v3175_v4  ;;  %v17659_v4 = vld [vmem:[#allocation2 + $0x2b0] sm:$0x1]  ;;  %v17737_v25 = vld [vmem:[#allocation2 + $0x2fc] sm:$0xe] }
 0x11e   : > { %15540 = vmatprep.subr.bf16.mxu1 %v16585_v37  ;;  %15588 = vmatprep.subr.bf16.mxu0 %v16586_v54  ;;  %22547 = vst [vmem:[#allocation25_spill] sm:$0xff] %v17796_v47 }
 0x11f   : > { %15461 = vmatmul.mubr.bf16.gmra.mxu1 %v13167_v62  ;;  %15509 = vmatmul.mubr.bf16.gmra.mxu0 %v13255_v0  ;;  %v17618_v62 = vld [vmem:[#allocation2 + $0x2ac] sm:$0xf]  ;;  %v17620_v0 = vld [vmem:[#allocation2 + $0x320] sm:$0xf]  ;;  %v3183_v53 = vsel %vm17113_vm2, %v3181_v35, %v3182_v40 }
 0x120   : > { %15464 = vmatprep.mubr.bf16.mxu1 %v13168_v13  ;;  %15512 = vmatprep.mubr.bf16.mxu0 %v13256_v14  ;;  %v3210_v14 = vrot.slane %v17614_v57, 6  ;;  %v3639_v9 = vrot.slane %v17618_v62, 5  ;;  %v13172_v35 = vcombine.low %v16801_v32, %v17620_v0  ;;  %v13260_v40 = vcombine.low %v3180_v42, %v3183_v53  ;;  %v17734_v42 = vld [vmem:[#allocation2 + $0x2e8] sm:$0x1] }
 0x121   : > { %15541 = vmatpush3.bf16.msra.mxu1 %v16585_v37  ;;  %15589 = vmatpush3.bf16.msra.mxu0 %v16586_v54  ;;  %v17610_v37 = vld [vmem:[#allocation2 + $0x42c] sm:$0xc]  ;;  %v17612_v54 = vld [vmem:[#allocation2 + $0x430] sm:$0xf]  ;;  %v3216_v0 = vrot.slane %v3214_v12, 4  ;;  %v22476_v53 = vrot.slane %v17698_v20, 5 }
 0x122   : > { %15542 = vmatprep.subr.bf16.mxu1 %v16589_v19  ;;  %15590 = vmatprep.subr.bf16.mxu0 %v16590_v63  ;;  %v13248_v11 = vrot.slane %v17610_v37, 10  ;;  %v3207_v13 = vrot.slane %v17612_v54, 6  ;;  %v17704_v21 = vrot.slane %v3639_v9, 4 }
 0x123   : > { %v17822_v60 = vrot.slane %v22476_v53, 4  ;;  %v17846_v53 = vld [vmem:[#allocation2 + $0x3a8] sm:$0xf] }
 0x124   : > { %v17784_v26 = vsel %vm17113_vm2, %v13248_v11, %v3207_v13 }
 0x125   : > { %15543 = vmatpush3.bf16.msra.mxu1 %v16589_v19  ;;  %15591 = vmatpush3.bf16.msra.mxu0 %v16590_v63  ;;  %v17640_v19 = vld [vmem:[#allocation2 + $0x448] sm:$0xc]  ;;  %v17642_v63 = vld [vmem:[#allocation2 + $0x450] sm:$0x3] }
 0x126   : > { %15544 = vmatprep.subr.bf16.mxu1 %v16593_v43  ;;  %15592 = vmatprep.subr.bf16.mxu0 %v16594_v52  ;;  %v13249_v30 = vrot.slane %v17640_v19, 10  ;;  %v3217_v1 = vrot.slane %v17642_v63, 6  ;;  %v17728_v19 = vsel %vm17113_vm2, %v17605_v44, %v3196_v39  ;;  %v17732_v63 = vrot.slane %v22478_v31, 4  ;;  %v17743_v44 = vld [vmem:[#allocation2 + $0x304] sm:$0x1] }
 0x127   : > { %15465 = vmatmul.mubr.bf16.gmra.mxu1 %v13169_v48  ;;  %15513 = vmatmul.mubr.bf16.gmra.mxu0 %v13257_v46  ;;  %v13171_v48 = vcombine.low %v16800_v18, %v13155_v56  ;;  %v13259_v46 = vcombine.low %v3173_v15, %v3176_v16  ;;  %v17691_v56 = vsel %vm17113_vm2, %v17598_v36, %v3189_v34  ;;  %v17696_v15 = vld [vmem:[#allocation2 + $0x2e4] sm:$0xf]  ;;  %v17746_v18 = vld [vmem:[#allocation2 + $0x318] sm:$0xe]  ;;  %v17767_v34 = vld [vmem:[#allocation2 + $0x3ac] sm:$0xf] }
 0x128   : > { %15468 = vmatprep.mubr.bf16.mxu1 %v13170_v50  ;;  %15516 = vmatprep.mubr.bf16.mxu0 %v13258_v51  ;;  %v17676_v50 = vld [vmem:[#allocation2 + $0x2e0] sm:$0xe]  ;;  %v17684_v51 = vsel %vm17113_vm2, %v13245_v5, %v3186_v24  ;;  %v17700_v24 = vld [vmem:[#allocation2 + $0x374] sm:$0xf]  ;;  %v3642_v5 = vrot.slane %v17659_v4, 5  ;;  %v17721_v16 = vsel %vm17113_vm2, %v13246_v61, %v3193_v23  ;;  %v22477_v39 = vrot.slane %v17696_v15, 5 }
 0x129   : > { %15545 = vmatpush3.bf16.msra.mxu1 %v16593_v43  ;;  %15593 = vmatpush3.bf16.msra.mxu0 %v16594_v52  ;;  %v17671_v43 = vld [vmem:[#allocation2 + $0x358] sm:$0xf]  ;;  %v3209_v52 = vrot.slane %v3207_v13, 4  ;;  %v17740_v61 = vld [vmem:[#allocation2 + $0x390] sm:$0xf]  ;;  %v13261_v32 = vcombine.low %v17684_v51, %v17691_v56  ;;  %v13262_v51 = vcombine.low %v17721_v16, %v17728_v19  ;;  %v17806_v37 = vsel %vm17113_vm2, %v13249_v30, %v3214_v12 }
 0x12a   : > { %15546 = vmatprep.subr.bf16.mxu1 %v16597_v58  ;;  %15594 = vmatprep.subr.bf16.mxu0 %v16598_v33  ;;  %v16802_v23 = vld [vmem:[#allocation2 + $0x338] sm:$0xf]  ;;  %v17810_v57 = vsel %vm17113_vm2, %v3216_v0, %v3217_v1  ;;  %v17814_v13 = vld [vmem:[#allocation2 + $0x320] sm:$0x1]  ;;  %v17826_v1 = vld [vmem:[#allocation2 + $0x334] sm:$0xe] }
 0x12b   : > { %v13173_v41 = vcombine.low %v16802_v23, %v17666_v8  ;;  %v17790_v29 = vsel %vm17113_vm2, %v3209_v52, %v3210_v14  ;;  %v17816_v14 = vld [vmem:[#allocation2 + $0x354] sm:$0xf]  ;;  %v3655_v52 = vrot.slane %v22477_v39, 4  ;;  %v17834_v19 = vld [vmem:[#allocation2 + $0x38c] sm:$0xf]  ;;  %v3670_v39 = vrot.slane %v17814_v13, 5 }
 0x12c   : > { %22549 = vst [vmem:[#allocation27_spill] sm:$0xff] %v17816_v14  ;;  %v17839_v23 = vld [vmem:[#allocation2 + $0x33c] sm:$0x1]  ;;  %v17842_v12 = vld [vmem:[#allocation2 + $0x350] sm:$0xe]  ;;  %v17868_v13 = vsel %vm17212_vm5, %v13322_v6, %v3639_v9  ;;  %v22556_v6 = vrot.slane %v17664_v27, 5 }
 0x12d   : > { %15547 = vmatpush3.bf16.msra.mxu1 %v16597_v58  ;;  %15595 = vmatpush3.bf16.msra.mxu0 %v16598_v33  ;;  %v17851_v36 = vld [vmem:[#allocation2 + $0x358] sm:$0x1]  ;;  %v17896_v4 = vld [vmem:[#allocation2 + $0x2e8] sm:$0xf]  ;;  %v13327_v27 = vrot.slane %v17826_v1, 9  ;;  %v22560_v16 = vrot.slane %v17796_v47, 5 }
 0x12e   : > { %15628 = vmatprep.subr.bf16.mxu1 %v17646_v17  ;;  %15676 = vmatprep.subr.bf16.mxu0 %v17648_v38 }
 0x12f   : > { %v17711_v58 = vpop.f32.mrf.mxu0  ;;  %v17713_v33 = vpop.f32.mrf.mxu1  ;;  %15469 = vmatmul.mubr.bf16.gmra.mxu1 %v13171_v48  ;;  %15517 = vmatmul.mubr.bf16.gmra.mxu0 %v13259_v46  ;;  %v3676_v11 = vrot.slane %v22560_v16, 4  ;;  %v22566_v16 = vrot.slane %v17676_v50, 9  ;;  %v22570_v50 = vrot.slane %v17698_v20, 5 }
 0x130   : > { %22545 = vst [vmem:[#allocation23_spill] sm:$0xff] %v17713_v33  ;;  %15472 = vmatprep.mubr.bf16.mxu1 %v13172_v35  ;;  %15520 = vmatprep.mubr.bf16.mxu0 %v13260_v40  ;;  %v16803_v35 = vld [vmem:[#allocation2 + $0x354] sm:$0xf]  ;;  %v17755_v40 = vld [vmem:[#allocation2 + $0x370] sm:$0xf] }
 0x131   : > { %v17748_v48 = vpop.f32.mrf.mxu0  ;;  %v17750_v46 = vpop.f32.mrf.mxu1  ;;  %v13174_v8 = vcombine.low %v16803_v35, %v17671_v43  ;;  %v17776_v43 = vsel %vm17113_vm2, %v17624_v2, %v3203_v49  ;;  %v3656_v2 = vrot.slane %v17734_v42, 5  ;;  %v17854_v35 = vld [vmem:[#allocation2 + $0x36c] sm:$0xe] }
 0x132   : > { %22546 = vst [vmem:[#allocation24_spill] sm:$0xff] %v17750_v46  ;;  %v17872_v42 = vld [vmem:[#allocation2 + $0x2cc] sm:$0xf] }
 0x133   : > { %v17798_v49 = vpop.f32.mrf.mxu0  ;;  %v17800_v54 = vpop.f32.mrf.mxu1 }
 0x134   : > { %22548 = vst [vmem:[#allocation26_spill] sm:$0xff] %v17800_v54 }
 0x135   : > { %v17828_v56 = vpop.f32.mrf.mxu0  ;;  %v17830_v0 = vpop.f32.mrf.mxu1 }
 0x136   : > { %22550 = vst [vmem:[#allocation28_spill] sm:$0xff] %v17828_v56  ;;  %22551 = vst [vmem:[#allocation29_spill] sm:$0xff] %v17830_v0  ;;  %v22562_v0 = vrot.slane %v17816_v14, 5  ;;  %v18051_v56 = vld [vmem:[#allocation2 + $0x3dc] sm:$0xe] }
 0x137   : > { %v17856_v31 = vpop.f32.mrf.mxu0  ;;  %v17858_v30 = vpop.f32.mrf.mxu1  ;;  %15473 = vmatmul.mubr.bf16.gmra.mxu1 %v13173_v41  ;;  %15521 = vmatmul.mubr.bf16.gmra.mxu0 %v13261_v32  ;;  %v17879_v41 = vsel %vm17212_vm5, %v17704_v21, %v3642_v5  ;;  %v22555_v32 = vrot.slane %v17662_v28, 9  ;;  %v17900_v21 = vld [vmem:[#allocation2 + $0x374] sm:$0x1] }
 0x138   : > { %22552 = vst [vmem:[#allocation30_spill] sm:$0xff] %v17856_v31  ;;  %22553 = vst [vmem:[#allocation31_spill] sm:$0xff] %v17858_v30  ;;  %15476 = vmatprep.mubr.bf16.mxu1 %v13174_v8  ;;  %15524 = vmatprep.mubr.bf16.mxu0 %v13262_v51  ;;  %v17894_v8 = vsel %vm17212_vm5, %v17732_v63, %v22556_v6  ;;  %v17898_v51 = vld [vmem:[#allocation2 + $0x370] sm:$0xf]  ;;  %v3677_v63 = vrot.slane %v17839_v23, 5  ;;  %v17919_v54 = vrot.slane %v22562_v0, 4 }
 0x139   : > { %v17887_v9 = vsel %vm17212_vm5, %v22555_v32, %v22554_v59  ;;  %v17902_v5 = vpop.f32.mrf.mxu0  ;;  %v17904_v28 = vpop.f32.mrf.mxu1  ;;  %v22559_v59 = vrot.slane %v17794_v45, 5  ;;  %v17912_v6 = vld [vmem:[#allocation2 + $0x38c] sm:$0xf]  ;;  %v22565_v23 = vrot.slane %v17696_v15, 5  ;;  %v17937_v0 = vsel %vm17212_vm5, %v3655_v52, %v3656_v2  ;;  %v17941_v30 = vld [vmem:[#allocation2 + $0x388] sm:$0xe] }
 0x13a   : > { %22557 = vst [vmem:[#allocation32_spill] sm:$0xff] %v17902_v5  ;;  %22558 = vst [vmem:[#allocation33_spill] sm:$0xff] %v17904_v28  ;;  %v17952_v2 = vld [vmem:[#allocation2 + $0x3a4] sm:$0xe]  ;;  %v22571_v31 = vrot.slane %v17737_v25, 9  ;;  %v22573_v5 = vrot.slane %v17743_v44, 5 }
 0x13b   : > { %v3669_v32 = vrot.slane %v22559_v59, 4  ;;  %v17923_v1 = vpop.f32.mrf.mxu0  ;;  %v17925_v46 = vpop.f32.mrf.mxu1  ;;  %v17933_v33 = vsel %vm17212_vm5, %v22566_v16, %v22565_v23  ;;  %v17949_v23 = vld [vmem:[#allocation2 + $0x390] sm:$0x1]  ;;  %v22574_v25 = vrot.slane %v17794_v45, 5  ;;  %v13303_v44 = vld [vmem:[#allocation2 + $0x3ac] sm:$0x1] }
 0x13c   : > { %22563 = vst [vmem:[#allocation35_spill] sm:$0xff] %v17923_v1  ;;  %22564 = vst [vmem:[#allocation36_spill] sm:$0xff] %v17925_v46  ;;  %v17943_v1 = vld [vmem:[#allocation2 + $0x3a8] sm:$0xf]  ;;  %v17969_v16 = vsel %vm17212_vm5, %v22571_v31, %v22570_v50  ;;  %v17982_v46 = vsel %vm17212_vm5, %v17822_v60, %v22573_v5  ;;  %v22575_v31 = vrot.slane %v17746_v18, 9  ;;  %v22579_v18 = vcombine.low %v17755_v40, %v17700_v24 }
 0x13d   : > { %22567 = vst [vmem:[#allocation37_spill] sm:$0xff] %v17943_v1  ;;  %v17955_v28 = vpop.f32.mrf.mxu0  ;;  %v17957_v59 = vpop.f32.mrf.mxu1  ;;  %v17994_v52 = vsel %vm17212_vm5, %v3669_v32, %v3670_v39  ;;  %v22580_v5 = vcombine.low %v17765_v10, %v17776_v43  ;;  %v22581_v39 = vrot.slane %v17796_v47, 5  ;;  %v13330_v24 = vrot.slane %v17941_v30, 9  ;;  %v18023_v40 = vld [vmem:[#allocation2 + $0x3c4] sm:$0xf] }
 0x13e   : > { %22568 = vst [vmem:[#allocation38_spill] sm:$0xff] %v17955_v28  ;;  %22569 = vst [vmem:[#allocation39_spill] sm:$0xff] %v17957_v59  ;;  %v17973_v28 = vld [vmem:[#allocation2 + $0x320] sm:$0xf]  ;;  %v17990_v50 = vsel %vm17212_vm5, %v22575_v31, %v22574_v25  ;;  %v17996_v59 = vld [vmem:[#allocation2 + $0x33c] sm:$0xf]  ;;  %v18018_v25 = vsel %vm17212_vm5, %v3676_v11, %v3677_v63  ;;  %v22586_v10 = vcombine.low %v17834_v19, %v17740_v61 }
 0x13f   : > { %22572 = vst [vmem:[#allocation40_spill] sm:$0xff] %v17973_v28  ;;  %22576 = vst [vmem:[#allocation41_spill] sm:$0xff] %v17996_v59  ;;  %v18000_v20 = vpop.f32.mrf.mxu0  ;;  %v18002_v60 = vpop.f32.mrf.mxu1  ;;  %15477 = vmatmul.mubr.bf16.gmra.mxu1 %v22579_v18  ;;  %15525 = vmatmul.mubr.bf16.gmra.mxu0 %v22580_v5  ;;  %v18014_v32 = vsel %vm17212_vm5, %v13327_v27, %v22581_v39  ;;  %v22584_v31 = vrot.slane %v17898_v51, 5  ;;  %v13306_v18 = vld [vmem:[#allocation2 + $0x3c8] sm:$0x1]  ;;  %v22587_v43 = vcombine.low %v17784_v26, %v17790_v29 }
 0x140   : > { %22577 = vst [vmem:[#allocation42_spill] sm:$0xff] %v18000_v20  ;;  %22578 = vst [vmem:[#allocation43_spill] sm:$0xff] %v18002_v60  ;;  %15480 = vmatprep.mubr.bf16.mxu1 %v22586_v10  ;;  %v18031_v27 = vld [vmem:[#allocation2 + $0x358] sm:$0xf]  ;;  %v22589_v11 = vrot.slane %v17912_v6, 5  ;;  %v3698_v5 = vrot.slane %v17949_v23, 5 }
 0x141   : > { %22582 = vst [vmem:[#allocation44_spill] sm:$0xff] %v18014_v32  ;;  %22583 = vst [vmem:[#allocation45_spill] sm:$0xff] %v18018_v25  ;;  %v3690_v60 = vrot.slane %v22584_v31, 4  ;;  %15528 = vmatprep.mubr.bf16.mxu0 %v22587_v43  ;;  %v13331_v30 = vrot.slane %v17952_v2, 9  ;;  %v3709_v39 = vrot.slane %v18023_v40, 5  ;;  %v18038_v31 = vpop.f32.mrf.mxu0  ;;  %v18040_v20 = vpop.f32.mrf.mxu1  ;;  %v22592_v61 = vrot.slane %v17943_v1, 5 }
 0x142   : > { %22585 = vst [vmem:[#allocation46_spill] sm:$0xff] %v18023_v40  ;;  %22588 = vst [vmem:[#allocation47_spill] sm:$0xff] %v18031_v27  ;;  %v3697_v63 = vrot.slane %v22589_v11, 4  ;;  %v3705_v26 = vrot.slane %v13303_v44, 5  ;;  %v13332_v29 = vrot.slane %v17998_v3, 9  ;;  %v3712_v10 = vrot.slane %v13306_v18, 5 }
 0x143   : > { %22590 = vst [vmem:[#allocation48_spill] sm:$0xff] %v18038_v31  ;;  %22591 = vst [vmem:[#allocation49_spill] sm:$0xff] %v18040_v20  ;;  %v3704_v19 = vrot.slane %v22592_v61, 4  ;;  %v18045_v43 = vld [vmem:[#allocation2 + $0x3e0] sm:$0xf]  ;;  %v3711_v11 = vrot.slane %v3709_v39, 4  ;;  %v18056_v61 = vpop.f32.mrf.mxu0  ;;  %v18058_v44 = vpop.f32.mrf.mxu1  ;;  %v22613_v25 = vcombine.low %v17806_v37, %v17810_v57 }
 0x144   : > { %22593 = vst [vmem:[#allocation50_spill] sm:$0xff] %v18045_v43  ;;  %v18053_v31 = vld [vmem:[#allocation2 + $0x3e4] sm:$0x1]  ;;  %22594 = vst [vmem:[#allocation51_spill] sm:$0xff] %v18056_v61  ;;  %v22596_v28 = vrot.slane %v17816_v14, 5  ;;  %v22597_v20 = vrot.slane %v17842_v12, 9 }
 0x145   : > { %22595 = vst [vmem:[#allocation52_spill] sm:$0xff] %v18058_v44  ;;  %v22598_v44 = vrot.slane %v17851_v36, 5  ;;  %v22599_v2 = vrot.slane %v17898_v51, 5  ;;  %v22600_v3 = vrot.slane %v17854_v35, 9  ;;  %v22601_v12 = vrot.slane %v17900_v21, 5  ;;  %v18105_v27 = vpop.f32.mrf.mxu1 }
 0x146   : > { %v18074_v61 = vsel %vm17212_vm5, %v22597_v20, %v22596_v28  ;;  %v18097_v36 = vld [vmem:[#allocation2 + $0x374] sm:$0xf]  ;;  %v18099_v28 = vld [vmem:[#allocation2 + $0x390] sm:$0xf]  ;;  %22603 = vst [vmem:[#allocation54_spill] sm:$0xff] %v18105_v27  ;;  %v22604_v35 = vrot.slane %v17912_v6, 5  ;;  %v18115_v21 = vsel %vm17212_vm5, %v3697_v63, %v3698_v5 }
 0x147   : > { %v18081_v18 = vsel %vm17212_vm5, %v17919_v54, %v22598_v44  ;;  %v18089_v23 = vsel %vm17212_vm5, %v22600_v3, %v22599_v2  ;;  %v18095_v20 = vsel %vm17212_vm5, %v3690_v60, %v22601_v12  ;;  %v18101_v54 = vld [vmem:[#allocation2 + $0x3f8] sm:$0xe]  ;;  %v18103_v44 = vpop.f32.mrf.mxu0  ;;  %v22605_v60 = vrot.slane %v17943_v1, 5  ;;  %v18127_v27 = vld [vmem:[#allocation2 + $0x3ac] sm:$0xf]  ;;  %15529 = vmatmul.mubr.bf16.gmra.mxu0 %v22613_v25 }
 0x148   : > { %22602 = vst [vmem:[#allocation53_spill] sm:$0xff] %v18103_v44  ;;  %v18111_v2 = vsel %vm17212_vm5, %v13330_v24, %v22604_v35  ;;  %v18125_v12 = vsel %vm17212_vm5, %v3704_v19, %v3705_v26  ;;  %22607 = vst [vmem:[#allocation56_spill] sm:$0xff] %v18127_v27  ;;  %v18129_v44 = vld [vmem:[#allocation2 + $0x3fc] sm:$0xf]  ;;  %v13312_v24 = vld [vmem:[#allocation2 + $0x400] sm:$0x1]  ;;  %v18140_v19 = vpop.f32.mrf.mxu1  ;;  %v22612_v26 = vcombine.low %v17846_v53, %v17767_v34 }
 0x149   : > { %v18121_v3 = vsel %vm17212_vm5, %v13331_v30, %v22605_v60  ;;  %22606 = vst [vmem:[#allocation55_spill] sm:$0xff] %v18125_v12  ;;  %v18131_v35 = vld [vmem:[#allocation2 + $0x3c8] sm:$0xf]  ;;  %v13333_v63 = vrot.slane %v18051_v56, 9  ;;  %v22609_v5 = vrot.slane %v18045_v43, 5  ;;  %v3719_v59 = vrot.slane %v18053_v31, 5  ;;  %v18138_v47 = vpop.f32.mrf.mxu0 }
 0x14a   : > { %22608 = vst [vmem:[#allocation57_spill] sm:$0xff] %v18131_v35  ;;  %v3723_v30 = vrot.slane %v18129_v44, 5  ;;  %v13313_v60 = vld [vmem:[#allocation2 + $0x414] sm:$0xe]  ;;  %22610 = vst [vmem:[#allocation58_spill] sm:$0xff] %v18138_v47  ;;  %15481 = vmatmul.mubr.bf16.gmra.mxu1 %v22612_v26  ;;  %v18150_v56 = vsel %vm17212_vm5, %v13332_v29, %v3709_v39  ;;  %v18154_v31 = vsel %vm17212_vm5, %v3711_v11, %v3712_v10  ;;  %v3726_v47 = vrot.slane %v13312_v24, 5  ;;  %v18170_v11 = vpop.f32.mrf.mxu1 }
 0x14b   : > { %v3718_v14 = vrot.slane %v22609_v5, 4  ;;  %22611 = vst [vmem:[#allocation59_spill] sm:$0xff] %v18140_v19  ;;  %22614 = vst [vmem:[#allocation60_spill] sm:$0xff] %v18150_v56  ;;  %v13334_v5 = vrot.slane %v18101_v54, 9  ;;  %v18157_v19 = vld [vmem:[#allocation2 + $0x418] sm:$0xf]  ;;  %v22617_v34 = vcombine.low %v17868_v13, %v17879_v41  ;;  %v22618_v53 = vcombine.low %v17618_v62, %v17792_v22  ;;  %v18168_v10 = vpop.f32.mrf.mxu0 }
 0x14c   : > { %22615 = vst [vmem:[#allocation61_spill] sm:$0xff] %v18154_v31  ;;  %22616 = vst [vmem:[#allocation62_spill] sm:$0xff] %v18157_v19  ;;  %v13315_v32 = vld [vmem:[#allocation2 + $0x41c] sm:$0x1]  ;;  %v18165_v37 = vld [vmem:[#allocation2 + $0x3e4] sm:$0xf]  ;;  %v18190_v13 = vpop.f32.mrf.mxu1 }
 0x14d   : > { %15548 = vmatprep.mubr.bf16.mxu1 %v22617_v34  ;;  %15596 = vmatprep.mubr.bf16.mxu0 %v22618_v53  ;;  %22619 = vst [vmem:[#allocation63_spill] sm:$0xff] %v18165_v37  ;;  %v3725_v57 = vrot.slane %v3723_v30, 4  ;;  %v13335_v25 = vrot.slane %v13313_v60, 9  ;;  %v3730_v39 = vrot.slane %v18157_v19, 5  ;;  %v3733_v29 = vrot.slane %v13315_v32, 5  ;;  %22620 = vst [vmem:[#allocation64_spill] sm:$0xff] %v18170_v11  ;;  %v18188_v53 = vpop.f32.mrf.mxu0 }
 0x14e   : > { %v18186_v60 = vld [vmem:[#allocation2 + $0x400] sm:$0xf]  ;;  %v13316_v34 = vld [vmem:[#allocation2 + $0x430] sm:$0xe]  ;;  %22621 = vst [vmem:[#allocation65_spill] sm:$0xff] %v18190_v13  ;;  %v22622_v62 = vrot.slane %v18045_v43, 5  ;;  %v18214_v41 = vsel %vm17212_vm5, %v3718_v14, %v3719_v59  ;;  %v18219_v24 = vpop.f32.mrf.mxu1  ;;  %v18223_v37 = vsel %vm17212_vm5, %v13334_v5, %v3723_v30 }
 0x14f   : > { %v3732_v26 = vrot.slane %v3730_v39, 4  ;;  %v18204_v54 = vld [vmem:[#allocation2 + $0x41c] sm:$0xf]  ;;  %v18206_v11 = vld [vmem:[#allocation2 + $0x434] sm:$0xf]  ;;  %v13336_v35 = vrot.slane %v13316_v34, 9  ;;  %v18217_v31 = vpop.f32.mrf.mxu0  ;;  %v18227_v43 = vsel %vm17212_vm5, %v3725_v57, %v3726_v47  ;;  %v18231_v14 = vsel %vm17212_vm5, %v13335_v25, %v3730_v39 }
 0x150   : > { %v18200_v32 = vsel %vm17212_vm5, %v13333_v63, %v22622_v62  ;;  %22623 = vst [vmem:[#allocation66_spill] sm:$0xff] %v18204_v54  ;;  %22624 = vst [vmem:[#allocation67_spill] sm:$0xff] %v18206_v11  ;;  %v13318_v13 = vld [vmem:[#allocation2 + $0x438] sm:$0x1]  ;;  %v18208_v27 = vld [vmem:[#allocation4 + $0x270] sm:$0xff]   ;;  %v3737_v63 = vrot.slane %v18206_v11, 5  ;;  %v15262_v57 = vpop.f32.mrf.mxu1  ;;  %v22629_v25 = vcombine.low %v17887_v9, %v17894_v8  ;;  %v22630_v39 = vcombine.low %v17644_v7, %v17872_v42 }
 0x151   : > { %v18210_v22 = vld [vmem:[#allocation4 + $0x2b0] sm:$0xff]   ;;  %v3740_v62 = vrot.slane %v13318_v13, 5  ;;  %v13319_v40 = vld [vmem:[#allocation2 + $0x44c] sm:$0xe]  ;;  %22625 = vst [vmem:[#allocation68_spill] sm:$0xff] %v18219_v24  ;;  %v18235_v59 = vsel %vm17212_vm5, %v3732_v26, %v3733_v29  ;;  %v15310_v12 = vpop.f32.mrf.mxu0  ;;  %v1122_v26 = vadd.f32 %v15262_v57, %v17711_v58 }
 0x152   : > { %v18237_v13 = vld [vmem:[#allocation2 + $0x438] sm:$0xf]  ;;  %v18239_v34 = vld [vmem:[#allocation2 + $0x450] sm:$0xf]  ;;  %v13321_v24 = vld [vmem:[#allocation2 + $0x454] sm:$0x1]  ;;  %15549 = vmatmul.mubr.bf16.vlgmr.msra.gmra.mxu1 %v22629_v25  ;;  %15597 = vmatmul.mubr.bf16.vlgmr.msra.gmra.mxu0 %v22630_v39  ;;  %v1113_v39 = vpop.f32.mrf.mxu1  ;;  %v18275_v58 = vsel %vm17212_vm5, %v13336_v35, %v3737_v63 }
 0x153   : > { %22626 = vst [vmem:[#allocation69_spill] sm:$0xff] %v18237_v13  ;;  %22627 = vst [vmem:[#allocation70_spill] sm:$0xff] %v18239_v34  ;;  %v3739_v56 = vrot.slane %v3737_v63, 4  ;;  %v13337_v30 = vrot.slane %v13319_v40, 9  ;;  %v3744_v5 = vrot.slane %v18239_v34, 5  ;;  %v3747_v1 = vrot.slane %v13321_v24, 5  ;;  %15629 = vmatpush3.bf16.msra.mxu1 %v17646_v17  ;;  %15677 = vmatpush3.bf16.msra.mxu0 %v17648_v38  ;;  %v1611_v40 = vpop.f32.mrf.mxu0 }
 0x154   : > { %v18242_v47 = vld [vmem:[#allocation2 + $0x454] sm:$0xf]  ;;  %v18259_v9 = vld [vmem:[#allocation4 + $0x268] sm:$0xff]   ;;  %v22631_v24 = vcombine.low %v17933_v33, %v17937_v0  ;;  %v22632_v17 = vcombine.low %v17696_v15, %v17896_v4  ;;  %v13404_v29 = vld [vmem:[#allocation2 + $0xb0] sm:$0x7]  ;;  %v18281_v0 = vadd.f32 %v15310_v12, %v1122_v26  ;;  %v1114_v15 = vadd.f32 %v1113_v39, %v17748_v48  ;;  %15630 = vmatprep.subr.bf16.mxu1 %v18208_v27  ;;  %v15263_v26 = vpop.f32.mrf.mxu1 }
 0x155   : > { %22628 = vst [vmem:[#allocation71_spill] sm:$0xff] %v18242_v47  ;;  %v3746_v8 = vrot.slane %v3744_v5, 4  ;;  %v13402_v25 = vld [vmem:[#allocation2 + $0xa8] sm:$0x8]  ;;  %v13403_v7 = vld [vmem:[#allocation2 + $0xac] sm:$0xf]  ;;  %15678 = vmatprep.subr.bf16.mxu0 %v18210_v22  ;;  %v18288_v4 = vsel %vm17212_vm5, %v3739_v56, %v3740_v62  ;;  %v18298_v48 = vsel %vm17212_vm5, %v13337_v30, %v3744_v5  ;;  %v1125_v57 = vadd.f32 %v15263_v26, %v17798_v49 }
 0x156   : > { %15552 = vmatprep.mubr.bf16.mxu1 %v22631_v24  ;;  %15600 = vmatprep.mubr.bf16.mxu0 %v22632_v17  ;;  %v18271_v38 = vld [vmem:[#allocation4 + $0x2a8] sm:$0xff]   ;;  %v13450_v33 = vrot.slane %v13402_v25, 11  ;;  %22633 = vst [vmem:[#allocation72_spill] sm:$0xff] %v18281_v0  ;;  %v4529_v63 = vrot.slane %v13403_v7, 7  ;;  %v13490_v24 = vld [vmem:[#allocation2 + $0xb0] sm:$0xe]  ;;  %v15311_v25 = vpop.f32.mrf.mxu0  ;;  %v18304_v42 = vadd.f32 %v1611_v40, %v1114_v15  ;;  %v1116_v5 = vpop.f32.mrf.mxu1 }
 0x157   : > { %v13491_v12 = vld [vmem:[#allocation2 + $0xb4] sm:$0xf]  ;;  %v18302_v39 = vsel %vm17212_vm5, %v3746_v8, %v3747_v1  ;;  %v4532_v56 = vrot.slane %v13404_v29, 7  ;;  %v13492_v62 = vld [vmem:[#allocation2 + $0xb8] sm:$0x1]  ;;  %15631 = vmatpush3.bf16.msra.mxu1 %v18208_v27  ;;  %15679 = vmatpush3.bf16.msra.mxu0 %v18210_v22  ;;  %v13538_v0 = vrot.slane %v13490_v24, 9  ;;  %v18317_v8 = vadd.f32 %v15311_v25, %v1125_v57 }
 0x158   : > { %v5059_v17 = vrot.slane %v13491_v12, 5  ;;  %22636 = vst [vmem:[#allocation73_spill] sm:$0xff] %v18304_v42  ;;  %v4531_v7 = vrot.slane %v4529_v63, 4  ;;  %v13405_v47 = vld [vmem:[#allocation2 + $0xc4] sm:$0x8]  ;;  %v1614_v34 = vpop.f32.mrf.mxu0  ;;  %15632 = vmatprep.subr.bf16.mxu1 %v18259_v9  ;;  %15680 = vmatprep.subr.bf16.mxu0 %v18271_v38  ;;  %v18315_v29 = vsel %vm18292_vm8, %v13450_v33, %v4529_v63  ;;  %v5062_v27 = vrot.slane %v13492_v62, 5  ;;  %v15266_v54 = vpop.f32.mrf.mxu1 }
 0x159   : > { %v13406_v30 = vld [vmem:[#allocation2 + $0xc8] sm:$0xf]  ;;  %v18311_v1 = vld [vmem:[#allocation4 + $0x260] sm:$0xff]   ;;  %v13407_v40 = vld [vmem:[#allocation2 + $0xcc] sm:$0x7]  ;;  %v13451_v22 = vrot.slane %v13405_v47, 11  ;;  %v22640_v33 = vcombine.low %v17969_v16, %v17982_v46  ;;  %v22646_v46 = vcombine.low %v17990_v50, %v17994_v52 }
 0x15a   : > { %v5061_v49 = vrot.slane %v5059_v17, 4  ;;  %22637 = vst [vmem:[#allocation74_spill] sm:$0xff] %v18317_v8  ;;  %v22638_v15 = vld [vmem:[#allocation28_spill] sm:$0xff]  ;;  %v18322_v26 = vsel %vm18292_vm8, %v4531_v7, %v4532_v56  ;;  %v4536_v42 = vrot.slane %v13406_v30, 7  ;;  %v13493_v13 = vld [vmem:[#allocation2 + $0xcc] sm:$0xe]  ;;  %v15314_v19 = vpop.f32.mrf.mxu0 }
 0x15b   : > { %v1117_v24 = vadd.f32 %v1116_v5, %v22638_v15  ;;  %v16614_v12 = vld [vmem:[#allocation4 + $0x2a0] sm:$0xff]   ;;  %22639 = vst [vmem:[#allocation28_spill] sm:$0xff] %v18322_v26  ;;  %v13494_v11 = vld [vmem:[#allocation2 + $0xd0] sm:$0xf]  ;;  %15553 = vmatmul.mubr.bf16.gmra.mxu1 %v22640_v33  ;;  %v4539_v62 = vrot.slane %v13407_v40, 7  ;;  %v13539_v30 = vrot.slane %v13493_v13, 9  ;;  %v1129_v13 = vpop.f32.mrf.mxu1  ;;  %15681 = vmatpush3.bf16.msra.mxu0 %v18271_v38 }
 0x15c   : > { %v22641_v63 = vld [vmem:[#allocation22_spill] sm:$0xff]  ;;  %15556 = vmatprep.mubr.bf16.mxu1 %v22646_v46  ;;  %v22647_v16 = vld [vmem:[#allocation40_spill] sm:$0xff]  ;;  %v4538_v40 = vrot.slane %v4536_v42, 4  ;;  %15633 = vmatpush3.bf16.msra.mxu1 %v18259_v9  ;;  %v5066_v50 = vrot.slane %v13494_v11, 5  ;;  %v18363_v38 = vsel %vm18292_vm8, %v13451_v22, %v4536_v42  ;;  %v22656_v42 = vld [vmem:[#allocation35_spill] sm:$0xff] }
 0x15d   : > { %v22642_v47 = vld [vmem:[#allocation34_spill] sm:$0xff]  ;;  %v18334_v5 = vadd.f32 %v1614_v34, %v1117_v24  ;;  %v22648_v33 = vcombine.low %v17794_v45, %v22647_v16  ;;  %v1627_v34 = vpop.f32.mrf.mxu0  ;;  %v18355_v45 = vsel %vm17212_vm5, %v5061_v49, %v5062_v27  ;;  %v13408_v24 = vld [vmem:[#allocation2 + $0xe0] sm:$0x8]  ;;  %15634 = vmatprep.subr.bf16.mxu1 %v18311_v1  ;;  %15682 = vmatprep.subr.bf16.mxu0 %v16614_v12  ;;  %v13410_v46 = vld [vmem:[#allocation2 + $0xe8] sm:$0x7]  ;;  %v15267_v49 = vpop.f32.mrf.mxu1 }
 0x15e   : > { %v22643_v57 = vcombine.low %v22641_v63, %v22642_v47  ;;  %v13495_v7 = vld [vmem:[#allocation2 + $0xd4] sm:$0x1]  ;;  %v18343_v63 = vld [vmem:[#allocation4 + $0x258] sm:$0xff]   ;;  %v18347_v47 = vsel %vm17212_vm5, %v13538_v0, %v5059_v17  ;;  %v22652_v0 = vld [vmem:[#allocation32_spill] sm:$0xff]  ;;  %v13452_v16 = vrot.slane %v13408_v24, 11  ;;  %v18367_v11 = vsel %vm18292_vm8, %v4538_v40, %v4539_v62 }
 0x15f   : > { %22644 = vst [vmem:[#allocation22_spill] sm:$0xff] %v18334_v5  ;;  %v22645_v15 = vld [vmem:[#allocation30_spill] sm:$0xff]  ;;  %22649 = vst [vmem:[#allocation34_spill] sm:$0xff] %v18347_v47  ;;  %v1130_v17 = vadd.f32 %v1129_v13, %v22652_v0  ;;  %v15315_v27 = vpop.f32.mrf.mxu0  ;;  %v13497_v13 = vld [vmem:[#allocation2 + $0xec] sm:$0xf]  ;;  %v1141_v22 = vadd.f32 %v15267_v49, %v22656_v42  ;;  %v4546_v24 = vrot.slane %v13410_v46, 7  ;;  %v1132_v62 = vpop.f32.mrf.mxu1  ;;  %15683 = vmatpush3.bf16.msra.mxu0 %v16614_v12 }
 0x160   : > { %15601 = vmatmul.mubr.bf16.gmra.mxu0 %v22643_v57  ;;  %v1138_v8 = vadd.f32 %v15266_v54, %v22645_v15  ;;  %22650 = vst [vmem:[#allocation30_spill] sm:$0xff] %v18355_v45  ;;  %v5069_v54 = vrot.slane %v13495_v7, 5  ;;  %v16618_v9 = vld [vmem:[#allocation4 + $0x298] sm:$0xff]   ;;  %22653 = vst [vmem:[#allocation32_spill] sm:$0xff] %v18363_v38  ;;  %v13409_v15 = vld [vmem:[#allocation2 + $0xe4] sm:$0xf]  ;;  %15635 = vmatpush3.bf16.msra.mxu1 %v18311_v1 }
 0x161   : > { %15604 = vmatprep.mubr.bf16.mxu0 %v22648_v33  ;;  %22654 = vst [vmem:[#allocation75_spill] sm:$0xff] %v18367_v11  ;;  %v4543_v7 = vrot.slane %v13409_v15, 7  ;;  %v13496_v33 = vld [vmem:[#allocation2 + $0xe8] sm:$0xe]  ;;  %v18373_v0 = vadd.f32 %v1627_v34, %v1130_v17  ;;  %v18376_v52 = vld [vmem:[#allocation4 + $0x250] sm:$0xff]   ;;  %v1630_v40 = vpop.f32.mrf.mxu0  ;;  %v5073_v17 = vrot.slane %v13497_v13, 5  ;;  %v18385_v46 = vadd.f32 %v15315_v27, %v1141_v22  ;;  %15636 = vmatprep.subr.bf16.mxu1 %v18343_v63 }
 0x162   : > { %v18357_v57 = vadd.f32 %v15314_v19, %v1138_v8  ;;  %v18371_v19 = vsel %vm17212_vm5, %v13539_v30, %v5066_v50  ;;  %v5068_v8 = vrot.slane %v5066_v50, 4  ;;  %v13498_v56 = vld [vmem:[#allocation2 + $0xf0] sm:$0x1]  ;;  %v13540_v25 = vrot.slane %v13496_v33, 9  ;;  %v13412_v15 = vld [vmem:[#allocation2 + $0x100] sm:$0xf]  ;;  %15684 = vmatprep.subr.bf16.mxu0 %v16618_v9 }
 0x163   : > { %22655 = vst [vmem:[#allocation76_spill] sm:$0xff] %v18373_v0  ;;  %v4545_v50 = vrot.slane %v4543_v7, 4  ;;  %v13413_v49 = vld [vmem:[#allocation2 + $0x104] sm:$0x7]  ;;  %22657 = vst [vmem:[#allocation35_spill] sm:$0xff] %v18385_v46  ;;  %v22658_v33 = vld [vmem:[#allocation38_spill] sm:$0xff]  ;;  %15685 = vmatpush3.bf16.msra.mxu0 %v16618_v9 }
 0x164   : > { %22651 = vst [vmem:[#allocation40_spill] sm:$0xff] %v18357_v57  ;;  %v13411_v57 = vld [vmem:[#allocation2 + $0xfc] sm:$0x8]  ;;  %v18383_v34 = vsel %vm17212_vm5, %v5068_v8, %v5069_v54  ;;  %v1133_v42 = vadd.f32 %v1132_v62, %v22658_v33  ;;  %v16622_v1 = vld [vmem:[#allocation4 + $0x290] sm:$0xff]   ;;  %v5076_v30 = vrot.slane %v13498_v56, 5  ;;  %v15270_v54 = vpop.f32.mrf.mxu1  ;;  %v15318_v8 = vpop.f32.mrf.mxu0  ;;  %v22659_v45 = vld [vmem:[#allocation44_spill] sm:$0xff]  ;;  %v18401_v33 = vsel %vm18292_vm8, %v13452_v16, %v4543_v7  ;;  %15637 = vmatpush3.bf16.msra.mxu1 %v18343_v63 }
 0x165   : > { %v13499_v0 = vld [vmem:[#allocation2 + $0x104] sm:$0xe]  ;;  %v13500_v5 = vld [vmem:[#allocation2 + $0x108] sm:$0xf]  ;;  %v5075_v56 = vrot.slane %v5073_v17, 4  ;;  %v13453_v12 = vrot.slane %v13411_v57, 11  ;;  %v18416_v16 = vsel %vm18292_vm8, %v4545_v50, %v4546_v24  ;;  %15638 = vmatprep.subr.bf16.mxu1 %v18376_v52  ;;  %15686 = vmatprep.subr.bf16.mxu0 %v16622_v1 }
 0x166   : > { %v22660_v13 = vld [vmem:[#allocation45_spill] sm:$0xff]  ;;  %v18405_v38 = vadd.f32 %v1630_v40, %v1133_v42  ;;  %v22666_v26 = vld [vmem:[#allocation42_spill] sm:$0xff]  ;;  %v4550_v7 = vrot.slane %v13412_v15, 7  ;;  %v1145_v57 = vpop.f32.mrf.mxu1  ;;  %v5080_v42 = vrot.slane %v13500_v5, 5  ;;  %v13414_v15 = vld [vmem:[#allocation2 + $0x118] sm:$0x8] }
 0x167   : > { %v22661_v47 = vcombine.low %v22659_v45, %v22660_v13  ;;  %v22662_v27 = vld [vmem:[#allocation25_spill] sm:$0xff]  ;;  %v1154_v45 = vadd.f32 %v15270_v54, %v22666_v26  ;;  %v22669_v13 = vld [vmem:[#allocation47_spill] sm:$0xff]  ;;  %v13541_v26 = vrot.slane %v13499_v0, 9  ;;  %v18431_v63 = vsel %vm17212_vm5, %v5075_v56, %v5076_v30  ;;  %v13503_v62 = vld [vmem:[#allocation2 + $0x124] sm:$0xf]  ;;  %15687 = vmatpush3.bf16.msra.mxu0 %v16622_v1 }
 0x168   : > { %v22663_v22 = vld [vmem:[#allocation41_spill] sm:$0xff]  ;;  %22665 = vst [vmem:[#allocation38_spill] sm:$0xff] %v18405_v38  ;;  %v4552_v9 = vrot.slane %v4550_v7, 4  ;;  %v18437_v0 = vsel %vm18292_vm8, %v13453_v12, %v4550_v7  ;;  %v22674_v30 = vld [vmem:[#allocation51_spill] sm:$0xff]  ;;  %v13504_v5 = vld [vmem:[#allocation2 + $0x128] sm:$0x1]  ;;  %15639 = vmatpush3.bf16.msra.mxu1 %v18376_v52 }
 0x169   : > { %15557 = vmatmul.mubr.bf16.gmra.mxu1 %v22661_v47  ;;  %v22664_v46 = vcombine.low %v22662_v27, %v22663_v22  ;;  %v18403_v11 = vld [vmem:[#allocation2 + $0x10c] sm:$0x1]  ;;  %v22667_v47 = vcombine.low %v18074_v61, %v18081_v18  ;;  %v1643_v22 = vpop.f32.mrf.mxu0  ;;  %v18423_v61 = vsel %vm17212_vm5, %v13540_v25, %v5073_v17  ;;  %v4553_v18 = vrot.slane %v13413_v49, 7  ;;  %v15271_v25 = vpop.f32.mrf.mxu1  ;;  %v16629_v52 = vld [vmem:[#allocation4 + $0x240] sm:$0xff]  }
 0x16a   : > { %v18419_v40 = vld [vmem:[#allocation4 + $0x248] sm:$0xff]   ;;  %v18425_v54 = vadd.f32 %v15318_v8, %v1154_v45  ;;  %v5082_v49 = vrot.slane %v5080_v42, 4  ;;  %v5083_v8 = vrot.slane %v18403_v11, 5  ;;  %v13416_v45 = vld [vmem:[#allocation2 + $0x120] sm:$0x7]  ;;  %v1157_v56 = vadd.f32 %v15271_v25, %v22674_v30 }
 0x16b   : > { %15605 = vmatmul.mubr.bf16.gmra.mxu0 %v22664_v46  ;;  %15560 = vmatprep.mubr.bf16.mxu1 %v22667_v47  ;;  %v22668_v46 = vld [vmem:[#allocation27_spill] sm:$0xff]  ;;  %v22672_v47 = vld [vmem:[#allocation48_spill] sm:$0xff]  ;;  %v15319_v17 = vpop.f32.mrf.mxu0  ;;  %v18452_v12 = vsel %vm17212_vm5, %v13541_v26, %v5080_v42 }
 0x16c   : > { %v22670_v27 = vcombine.low %v22668_v46, %v22669_v13  ;;  %22671 = vst [vmem:[#allocation44_spill] sm:$0xff] %v18425_v54  ;;  %v1146_v24 = vadd.f32 %v1145_v57, %v22672_v47  ;;  %v16626_v50 = vld [vmem:[#allocation4 + $0x288] sm:$0xff]   ;;  %v13415_v46 = vld [vmem:[#allocation2 + $0x11c] sm:$0xf]  ;;  %v13502_v13 = vld [vmem:[#allocation2 + $0x120] sm:$0xe]  ;;  %v18445_v57 = vsel %vm18292_vm8, %v4552_v9, %v4553_v18  ;;  %v1148_v54 = vpop.f32.mrf.mxu1  ;;  %v18454_v9 = vadd.f32 %v15319_v17, %v1157_v56 }
 0x16d   : > { %22675 = vst [vmem:[#allocation25_spill] sm:$0xff] %v18445_v57  ;;  %v13454_v47 = vrot.slane %v13414_v15, 11  ;;  %v1646_v38 = vpop.f32.mrf.mxu0  ;;  %v4557_v7 = vrot.slane %v13415_v46, 7  ;;  %v13418_v18 = vld [vmem:[#allocation2 + $0x138] sm:$0xf]  ;;  %v22677_v15 = vld [vmem:[#allocation53_spill] sm:$0xff]  ;;  %15640 = vmatprep.subr.bf16.mxu1 %v18419_v40  ;;  %15688 = vmatprep.subr.bf16.mxu0 %v16626_v50  ;;  %v22678_v46 = vcombine.low %v18089_v23, %v18095_v20  ;;  %v22679_v17 = vcombine.low %v17898_v51, %v18097_v36 }
 0x16e   : > { %15608 = vmatprep.mubr.bf16.mxu0 %v22670_v27  ;;  %v18440_v27 = vadd.f32 %v1643_v22, %v1146_v24  ;;  %v4560_v22 = vrot.slane %v13416_v45, 7  ;;  %v13417_v24 = vld [vmem:[#allocation2 + $0x134] sm:$0x8]  ;;  %22676 = vst [vmem:[#allocation41_spill] sm:$0xff] %v18454_v9  ;;  %v1149_v25 = vadd.f32 %v1148_v54, %v22677_v15  ;;  %v16630_v1 = vld [vmem:[#allocation4 + $0x280] sm:$0xff]   ;;  %v13542_v11 = vrot.slane %v13502_v13, 9  ;;  %v15274_v26 = vpop.f32.mrf.mxu1  ;;  %15641 = vmatpush3.bf16.msra.mxu1 %v18419_v40 }
 0x16f   : > { %v15322_v42 = vpop.f32.mrf.mxu0  ;;  %v18468_v54 = vsel %vm17212_vm5, %v5082_v49, %v5083_v8  ;;  %v4559_v45 = vrot.slane %v4557_v7, 4  ;;  %v5087_v56 = vrot.slane %v13503_v62, 5  ;;  %v5090_v15 = vrot.slane %v13504_v5, 5  ;;  %v18470_v30 = vld [vmem:[#allocation2 + $0x13c] sm:$0xe]  ;;  %v22681_v9 = vld [vmem:[#allocation58_spill] sm:$0xff]  ;;  %15689 = vmatpush3.bf16.msra.mxu0 %v16626_v50  ;;  %15642 = vmatprep.subr.bf16.mxu1 %v16629_v52 }
 0x170   : > { %22673 = vst [vmem:[#allocation45_spill] sm:$0xff] %v18440_v27  ;;  %v13419_v27 = vld [vmem:[#allocation2 + $0x13c] sm:$0x7]  ;;  %v18472_v13 = vadd.f32 %v1646_v38, %v1149_v25  ;;  %v1170_v57 = vadd.f32 %v15274_v26, %v22681_v9  ;;  %v22682_v23 = vcombine.low %v18111_v2, %v18115_v21  ;;  %v22683_v51 = vcombine.low %v17912_v6, %v18099_v28  ;;  %v13506_v62 = vld [vmem:[#allocation2 + $0x140] sm:$0xf]  ;;  %v1161_v5 = vpop.f32.mrf.mxu1 }
 0x171   : > { %15561 = vmatmul.mubr.bf16.gmra.mxu1 %v22678_v46  ;;  %v18481_v20 = vld [vmem:[#allocation4 + $0x2f8] sm:$0xff]   ;;  %v13455_v36 = vrot.slane %v13417_v24, 11  ;;  %v4564_v49 = vrot.slane %v13418_v18, 7  ;;  %v1659_v8 = vpop.f32.mrf.mxu0  ;;  %v18486_v38 = vsel %vm18292_vm8, %v13454_v47, %v4557_v7  ;;  %v18490_v2 = vsel %vm18292_vm8, %v4559_v45, %v4560_v22  ;;  %15690 = vmatprep.subr.bf16.mxu0 %v16630_v1  ;;  %v13507_v47 = vld [vmem:[#allocation2 + $0x144] sm:$0x1]  ;;  %v22690_v46 = vld [vmem:[#allocation37_spill] sm:$0xff] }
 0x172   : > { %22680 = vst [vmem:[#allocation42_spill] sm:$0xff] %v18472_v13  ;;  %15564 = vmatprep.mubr.bf16.mxu1 %v22682_v23  ;;  %v5089_v6 = vrot.slane %v5087_v56, 4  ;;  %v4567_v28 = vrot.slane %v13419_v27, 7  ;;  %v18492_v21 = vadd.f32 %v15322_v42, %v1170_v57  ;;  %v1162_v24 = vadd.f32 %v1161_v5, %v18168_v10  ;;  %v18495_v18 = vld [vmem:[#allocation4 + $0x338] sm:$0xff]   ;;  %v15275_v7 = vpop.f32.mrf.mxu1  ;;  %v13420_v25 = vld [vmem:[#allocation2 + $0x150] sm:$0x8]  ;;  %15643 = vmatpush3.bf16.msra.mxu1 %v16629_v52 }
 0x173   : > { %15609 = vmatmul.mubr.bf16.gmra.mxu0 %v22679_v17  ;;  %v18499_v40 = vsel %vm17212_vm5, %v13542_v11, %v5087_v56  ;;  %v4566_v50 = vrot.slane %v4564_v49, 4  ;;  %v15323_v9 = vpop.f32.mrf.mxu0  ;;  %v13543_v10 = vrot.slane %v18470_v30, 9  ;;  %v5094_v57 = vrot.slane %v13506_v62, 5  ;;  %v13421_v26 = vld [vmem:[#allocation2 + $0x154] sm:$0xf]  ;;  %15724 = vmatprep.subr.bf16.mxu1 %v18481_v20  ;;  %v22691_v22 = vld [vmem:[#allocation56_spill] sm:$0xff] }
 0x174   : > { %15612 = vmatprep.mubr.bf16.mxu0 %v22683_v51  ;;  %22684 = vst [vmem:[#allocation27_spill] sm:$0xff] %v18492_v21  ;;  %v18505_v27 = vsel %vm17212_vm5, %v5089_v6, %v5090_v15  ;;  %v18508_v42 = vadd.f32 %v1659_v8, %v1162_v24  ;;  %v1173_v11 = vadd.f32 %v15275_v7, %v18188_v53  ;;  %v13422_v45 = vld [vmem:[#allocation2 + $0x158] sm:$0x7]  ;;  %v13509_v15 = vld [vmem:[#allocation2 + $0x15c] sm:$0xf]  ;;  %v1164_v23 = vpop.f32.mrf.mxu1  ;;  %v5097_v5 = vrot.slane %v13507_v47, 5 }
 0x175   : > { %22685 = vst [vmem:[#allocation47_spill] sm:$0xff] %v18505_v27  ;;  %v18515_v17 = vsel %vm18292_vm8, %v13455_v36, %v4564_v49  ;;  %v13508_v56 = vld [vmem:[#allocation2 + $0x158] sm:$0xe]  ;;  %v1662_v51 = vpop.f32.mrf.mxu0  ;;  %15691 = vmatpush3.bf16.msra.mxu0 %v16630_v1  ;;  %v18521_v53 = vsel %vm18292_vm8, %v4566_v50, %v4567_v28  ;;  %v5096_v62 = vrot.slane %v5094_v57, 4  ;;  %v13510_v8 = vld [vmem:[#allocation2 + $0x160] sm:$0x1]  ;;  %v1165_v49 = vadd.f32 %v1164_v23, %v18217_v31 }
 0x176   : > { %22686 = vst [vmem:[#allocation48_spill] sm:$0xff] %v18508_v42  ;;  %v18523_v6 = vld [vmem:[#allocation2 + $0x16c] sm:$0x8]  ;;  %v18525_v36 = vadd.f32 %v15323_v9, %v1173_v11  ;;  %15772 = vmatprep.subr.bf16.mxu0 %v18495_v18  ;;  %v13456_v52 = vrot.slane %v13420_v25, 11  ;;  %v4571_v1 = vrot.slane %v13421_v26, 7  ;;  %v15278_v30 = vpop.f32.mrf.mxu1  ;;  %v22688_v50 = vld [vmem:[#allocation55_spill] sm:$0xff]  ;;  %v22692_v9 = vcombine.low %v22690_v46, %v22691_v22 }
 0x177   : > { %v13424_v24 = vld [vmem:[#allocation2 + $0x170] sm:$0xf]  ;;  %v13425_v7 = vld [vmem:[#allocation2 + $0x174] sm:$0x7]  ;;  %v15326_v28 = vpop.f32.mrf.mxu0  ;;  %v22689_v47 = vcombine.low %v18121_v3, %v22688_v50  ;;  %v18538_v31 = vsel %vm17212_vm5, %v13543_v10, %v5094_v57  ;;  %v4574_v11 = vrot.slane %v13422_v45, 7  ;;  %v13544_v23 = vrot.slane %v13508_v56, 9 }
 0x178   : > { %22687 = vst [vmem:[#allocation51_spill] sm:$0xff] %v18525_v36  ;;  %v5101_v25 = vrot.slane %v13509_v15, 5  ;;  %v13511_v26 = vld [vmem:[#allocation2 + $0x174] sm:$0xe]  ;;  %v18540_v36 = vadd.f32 %v1662_v51, %v1165_v49  ;;  %v22694_v42 = vld [vmem:[#allocation23_spill] sm:$0xff]  ;;  %v22695_v13 = vld [vmem:[#allocation60_spill] sm:$0xff]  ;;  %v18551_v10 = vsel %vm17212_vm5, %v5096_v62, %v5097_v5  ;;  %v1177_v45 = vpop.f32.mrf.mxu1 }
 0x179   : > { %15565 = vmatmul.mubr.bf16.gmra.mxu1 %v22689_v47  ;;  %v1186_v21 = vadd.f32 %v15278_v30, %v22694_v42  ;;  %v22696_v27 = vld [vmem:[#allocation61_spill] sm:$0xff]  ;;  %v22698_v50 = vld [vmem:[#allocation46_spill] sm:$0xff]  ;;  %22701 = vst [vmem:[#allocation58_spill] sm:$0xff] %v18551_v10  ;;  %v4573_v57 = vrot.slane %v4571_v1, 4  ;;  %v1675_v56 = vpop.f32.mrf.mxu0  ;;  %v18557_v42 = vsel %vm18292_vm8, %v13456_v52, %v4571_v1  ;;  %v22704_v30 = vld [vmem:[#allocation24_spill] sm:$0xff]  ;;  %v13457_v5 = vrot.slane %v18523_v6, 11 }
 0x17a   : > { %22693 = vst [vmem:[#allocation53_spill] sm:$0xff] %v18540_v36  ;;  %v22697_v3 = vcombine.low %v22695_v13, %v22696_v27  ;;  %v22699_v47 = vld [vmem:[#allocation57_spill] sm:$0xff]  ;;  %v13512_v46 = vld [vmem:[#allocation2 + $0x178] sm:$0xf]  ;;  %22702 = vst [vmem:[#allocation55_spill] sm:$0xff] %v18557_v42  ;;  %v5103_v13 = vrot.slane %v5101_v25, 4  ;;  %v1178_v49 = vadd.f32 %v1177_v45, %v22704_v30  ;;  %v18571_v52 = vsel %vm17212_vm5, %v13544_v23, %v5101_v25 }
 0x17b   : > { %15613 = vmatmul.mubr.bf16.gmra.mxu0 %v22692_v9  ;;  %v22700_v22 = vcombine.low %v22698_v50, %v22699_v47  ;;  %v5104_v27 = vrot.slane %v13510_v8, 5  ;;  %v18559_v51 = vadd.f32 %v15326_v28, %v1186_v21  ;;  %v18564_v62 = vsel %vm18292_vm8, %v4573_v57, %v4574_v11  ;;  %v13513_v9 = vld [vmem:[#allocation2 + $0x17c] sm:$0x1]  ;;  %v15327_v50 = vpop.f32.mrf.mxu0  ;;  %v13426_v1 = vld [vmem:[#allocation2 + $0x188] sm:$0x8]  ;;  %v22707_v11 = vld [vmem:[#allocation26_spill] sm:$0xff] }
 0x17c   : > { %15568 = vmatprep.mubr.bf16.mxu1 %v22697_v3  ;;  %22705 = vst [vmem:[#allocation56_spill] sm:$0xff] %v18564_v62  ;;  %v15279_v3 = vpop.f32.mrf.mxu1  ;;  %v4578_v21 = vrot.slane %v13424_v24, 7  ;;  %v4581_v8 = vrot.slane %v13425_v7, 7  ;;  %v13427_v28 = vld [vmem:[#allocation2 + $0x18c] sm:$0xf]  ;;  %v13545_v45 = vrot.slane %v13511_v26, 9  ;;  %v22710_v42 = vcombine.low %v18200_v32, %v18214_v41 }
 0x17d   : > { %15616 = vmatprep.mubr.bf16.mxu0 %v22700_v22  ;;  %22703 = vst [vmem:[#allocation37_spill] sm:$0xff] %v18559_v51  ;;  %v18573_v22 = vadd.f32 %v1675_v56, %v1178_v49  ;;  %v1189_v57 = vadd.f32 %v15279_v3, %v22707_v11  ;;  %v13428_v30 = vld [vmem:[#allocation2 + $0x190] sm:$0x7]  ;;  %v1678_v51 = vpop.f32.mrf.mxu0  ;;  %v18580_v47 = vsel %vm17212_vm5, %v5103_v13, %v5104_v27  ;;  %v5108_v24 = vrot.slane %v13512_v46, 5  ;;  %v13516_v6 = vld [vmem:[#allocation2 + $0x198] sm:$0x1] }
 0x17e   : > { %v1180_v15 = vpop.f32.mrf.mxu1  ;;  %v4580_v23 = vrot.slane %v4578_v21, 4  ;;  %v5111_v7 = vrot.slane %v13513_v9, 5  ;;  %v13514_v25 = vld [vmem:[#allocation2 + $0x190] sm:$0xe]  ;;  %v13458_v3 = vrot.slane %v13426_v1, 11  ;;  %v4585_v11 = vrot.slane %v13427_v28, 7 }
 0x17f   : > { %22706 = vst [vmem:[#allocation23_spill] sm:$0xff] %v18573_v22  ;;  %v18582_v36 = vadd.f32 %v15327_v50, %v1189_v57  ;;  %v22709_v56 = vld [vmem:[#allocation29_spill] sm:$0xff]  ;;  %v13515_v22 = vld [vmem:[#allocation2 + $0x194] sm:$0xf]  ;;  %v15330_v62 = vpop.f32.mrf.mxu0  ;;  %v22712_v27 = vld [vmem:[#allocation63_spill] sm:$0xff]  ;;  %v18593_v46 = vsel %vm18292_vm8, %v13457_v5, %v4578_v21  ;;  %v5110_v9 = vrot.slane %v5108_v24, 4  ;;  %v18610_v5 = vsel %vm17212_vm5, %v13545_v45, %v5108_v24 }
 0x180   : > { %v1181_v49 = vadd.f32 %v1180_v15, %v22709_v56  ;;  %v15282_v26 = vpop.f32.mrf.mxu1  ;;  %v22711_v13 = vld [vmem:[#allocation50_spill] sm:$0xff]  ;;  %v18597_v15 = vsel %vm18292_vm8, %v4580_v23, %v4581_v8  ;;  %v4588_v50 = vrot.slane %v13428_v30, 7  ;;  %v13429_v1 = vld [vmem:[#allocation2 + $0x1a4] sm:$0x8]  ;;  %v13430_v28 = vld [vmem:[#allocation2 + $0x1a8] sm:$0xf] }
 0x181   : > { %22708 = vst [vmem:[#allocation60_spill] sm:$0xff] %v18582_v36  ;;  %15569 = vmatmul.mubr.bf16.gmra.mxu1 %v22710_v42  ;;  %v22713_v10 = vcombine.low %v22711_v13, %v22712_v27  ;;  %v22715_v41 = vld [vmem:[#allocation31_spill] sm:$0xff]  ;;  %v22716_v42 = vcombine.low %v18223_v37, %v18227_v43  ;;  %v4587_v21 = vrot.slane %v4585_v11, 4  ;;  %v13431_v8 = vld [vmem:[#allocation2 + $0x1ac] sm:$0x7]  ;;  %v1691_v56 = vpop.f32.mrf.mxu0  ;;  %v18616_v43 = vsel %vm17212_vm5, %v5110_v9, %v5111_v7 }
 0x182   : > { %v18599_v57 = vadd.f32 %v1678_v51, %v1181_v49  ;;  %v1202_v32 = vadd.f32 %v15282_v26, %v22715_v41  ;;  %v13517_v30 = vld [vmem:[#allocation2 + $0x1ac] sm:$0xe]  ;;  %v13518_v23 = vld [vmem:[#allocation2 + $0x1b0] sm:$0xf]  ;;  %v1193_v51 = vpop.f32.mrf.mxu1  ;;  %v5115_v37 = vrot.slane %v13515_v22, 5  ;;  %v13546_v13 = vrot.slane %v13514_v25, 9 }
 0x183   : > { %15617 = vmatmul.mubr.bf16.gmra.mxu0 %v22713_v10  ;;  %15572 = vmatprep.mubr.bf16.mxu1 %v22716_v42  ;;  %v22717_v10 = vcombine.low %v18129_v44, %v18186_v60  ;;  %v18620_v44 = vsel %vm18292_vm8, %v13458_v3, %v4585_v11  ;;  %v22719_v45 = vld [vmem:[#allocation33_spill] sm:$0xff]  ;;  %v18627_v26 = vsel %vm18292_vm8, %v4587_v21, %v4588_v50  ;;  %v15331_v41 = vpop.f32.mrf.mxu0  ;;  %v5118_v11 = vrot.slane %v13516_v6, 5  ;;  %v13432_v50 = vld [vmem:[#allocation2 + $0x1c0] sm:$0x8]  ;;  %v22724_v6 = vld [vmem:[#allocation39_spill] sm:$0xff] }
 0x184   : > { %22714 = vst [vmem:[#allocation61_spill] sm:$0xff] %v18599_v57  ;;  %v18622_v60 = vadd.f32 %v15330_v62, %v1202_v32  ;;  %v1194_v24 = vadd.f32 %v1193_v51, %v22719_v45  ;;  %22720 = vst [vmem:[#allocation57_spill] sm:$0xff] %v18627_v26  ;;  %v15283_v27 = vpop.f32.mrf.mxu1  ;;  %v5117_v3 = vrot.slane %v5115_v37, 4  ;;  %v22722_v62 = vld [vmem:[#allocation36_spill] sm:$0xff]  ;;  %v13459_v42 = vrot.slane %v13429_v1, 11 }
 0x185   : > { %15620 = vmatprep.mubr.bf16.mxu0 %v22717_v10  ;;  %v1205_v32 = vadd.f32 %v15283_v27, %v22722_v62  ;;  %v4592_v10 = vrot.slane %v13430_v28, 7  ;;  %v13519_v51 = vld [vmem:[#allocation2 + $0x1b4] sm:$0x1]  ;;  %v1694_v25 = vpop.f32.mrf.mxu0  ;;  %v4595_v49 = vrot.slane %v13431_v8, 7  ;;  %v13547_v7 = vrot.slane %v13517_v30, 9 }
 0x186   : > { %22718 = vst [vmem:[#allocation46_spill] sm:$0xff] %v18622_v60  ;;  %v18633_v22 = vadd.f32 %v1691_v56, %v1194_v24  ;;  %v1196_v21 = vpop.f32.mrf.mxu1  ;;  %v5122_v60 = vrot.slane %v13518_v23, 5  ;;  %v13433_v57 = vld [vmem:[#allocation2 + $0x1c4] sm:$0xf]  ;;  %v18643_v24 = vsel %vm17212_vm5, %v13546_v13, %v5115_v37  ;;  %v18647_v1 = vsel %vm17212_vm5, %v5117_v3, %v5118_v11  ;;  %v13434_v28 = vld [vmem:[#allocation2 + $0x1c8] sm:$0x7] }
 0x187   : > { %v18638_v9 = vadd.f32 %v15331_v41, %v1205_v32  ;;  %v1197_v56 = vadd.f32 %v1196_v21, %v22724_v6  ;;  %v13520_v27 = vld [vmem:[#allocation2 + $0x1c8] sm:$0xe]  ;;  %v13521_v62 = vld [vmem:[#allocation2 + $0x1cc] sm:$0xf]  ;;  %v15334_v8 = vpop.f32.mrf.mxu0  ;;  %v22725_v30 = vcombine.low %v18231_v14, %v18235_v59  ;;  %v22726_v23 = vld [vmem:[#allocation62_spill] sm:$0xff]  ;;  %v18657_v37 = vsel %vm18292_vm8, %v13459_v42, %v4592_v10 }
 0x188   : > { %22721 = vst [vmem:[#allocation24_spill] sm:$0xff] %v18633_v22  ;;  %v15286_v45 = vpop.f32.mrf.mxu1  ;;  %v22727_v41 = vld [vmem:[#allocation66_spill] sm:$0xff]  ;;  %v4594_v13 = vrot.slane %v4592_v10, 4  ;;  %v5124_v3 = vrot.slane %v5122_v60, 4  ;;  %v5125_v11 = vrot.slane %v13519_v51, 5  ;;  %v22731_v14 = vcombine.low %v18275_v58, %v18288_v4  ;;  %v22732_v59 = vld [vmem:[#allocation67_spill] sm:$0xff] }
 0x189   : > { %22723 = vst [vmem:[#allocation26_spill] sm:$0xff] %v18638_v9  ;;  %15573 = vmatmul.mubr.bf16.gmra.mxu1 %v22725_v30  ;;  %v22728_v32 = vcombine.low %v22726_v23, %v22727_v41  ;;  %v13522_v21 = vld [vmem:[#allocation2 + $0x1d0] sm:$0x1]  ;;  %v18659_v6 = vadd.f32 %v1694_v25, %v1197_v56  ;;  %v22730_v9 = vld [vmem:[#allocation43_spill] sm:$0xff]  ;;  %v13460_v41 = vrot.slane %v13432_v50, 11  ;;  %v1707_v51 = vpop.f32.mrf.mxu0  ;;  %v18676_v58 = vsel %vm17212_vm5, %v13547_v7, %v5122_v60  ;;  %v22740_v7 = vld [vmem:[#allocation52_spill] sm:$0xff] }
 0x18a   : > { %v1218_v22 = vadd.f32 %v15286_v45, %v22730_v9  ;;  %15576 = vmatprep.mubr.bf16.mxu1 %v22731_v14  ;;  %v22733_v30 = vld [vmem:[#allocation69_spill] sm:$0xff]  ;;  %v13435_v42 = vld [vmem:[#allocation2 + $0x1dc] sm:$0x8]  ;;  %v13436_v36 = vld [vmem:[#allocation2 + $0x1e0] sm:$0xf]  ;;  %v1209_v26 = vpop.f32.mrf.mxu1  ;;  %v18672_v9 = vsel %vm18292_vm8, %v4594_v13, %v4595_v49  ;;  %22735 = vst [vmem:[#allocation50_spill] sm:$0xff] %v18676_v58  ;;  %v18683_v56 = vsel %vm17212_vm5, %v5124_v3, %v5125_v11 }
 0x18b   : > { %15621 = vmatmul.mubr.bf16.gmra.mxu0 %v22728_v32  ;;  %22729 = vst [vmem:[#allocation29_spill] sm:$0xff] %v18659_v6  ;;  %v22734_v23 = vcombine.low %v22732_v59, %v22733_v30  ;;  %v4599_v32 = vrot.slane %v13433_v57, 7  ;;  %v13437_v10 = vld [vmem:[#allocation2 + $0x1e4] sm:$0x7]  ;;  %v4602_v4 = vrot.slane %v13434_v28, 7  ;;  %v22737_v57 = vld [vmem:[#allocation49_spill] sm:$0xff]  ;;  %v15335_v30 = vpop.f32.mrf.mxu0 }
 0x18c   : > { %v18678_v45 = vadd.f32 %v15334_v8, %v1218_v22  ;;  %v1210_v50 = vadd.f32 %v1209_v26, %v22737_v57  ;;  %22738 = vst [vmem:[#allocation31_spill] sm:$0xff] %v18683_v56  ;;  %v13548_v14 = vrot.slane %v13520_v27, 9  ;;  %v15287_v59 = vpop.f32.mrf.mxu1  ;;  %v5132_v25 = vrot.slane %v13522_v21, 5  ;;  %v13523_v8 = vld [vmem:[#allocation2 + $0x1e4] sm:$0xe]  ;;  %v22752_v6 = vld [vmem:[#allocation59_spill] sm:$0xff] }
 0x18d   : > { %15624 = vmatprep.mubr.bf16.mxu0 %v22734_v23  ;;  %v4601_v13 = vrot.slane %v4599_v32, 4  ;;  %v5129_v23 = vrot.slane %v13521_v62, 5  ;;  %v1221_v22 = vadd.f32 %v15287_v59, %v22740_v7  ;;  %v18692_v26 = vsel %vm18292_vm8, %v13460_v41, %v4599_v32  ;;  %v13524_v3 = vld [vmem:[#allocation2 + $0x1e8] sm:$0xf]  ;;  %v1710_v11 = vpop.f32.mrf.mxu0  ;;  %v22744_v59 = vld [vmem:[#allocation54_spill] sm:$0xff] }
 0x18e   : > { %22736 = vst [vmem:[#allocation63_spill] sm:$0xff] %v18678_v45  ;;  %v18687_v60 = vadd.f32 %v1707_v51, %v1210_v50  ;;  %22741 = vst [vmem:[#allocation36_spill] sm:$0xff] %v18692_v26  ;;  %v4606_v28 = vrot.slane %v13436_v36, 7  ;;  %v1212_v27 = vpop.f32.mrf.mxu1  ;;  %v13461_v62 = vrot.slane %v13435_v42, 11  ;;  %v4609_v21 = vrot.slane %v13437_v10, 7  ;;  %v22747_v10 = vld [vmem:[#allocation70_spill] sm:$0xff] }
 0x18f   : > { %v18696_v57 = vsel %vm18292_vm8, %v4601_v13, %v4602_v4  ;;  %v5131_v49 = vrot.slane %v5129_v23, 4  ;;  %v13525_v51 = vld [vmem:[#allocation2 + $0x1ec] sm:$0x1]  ;;  %v18698_v50 = vadd.f32 %v15335_v30, %v1221_v22  ;;  %v1213_v7 = vadd.f32 %v1212_v27, %v22744_v59  ;;  %v13438_v32 = vld [vmem:[#allocation2 + $0x1f8] sm:$0x8]  ;;  %v15338_v13 = vpop.f32.mrf.mxu0  ;;  %v22753_v58 = vld [vmem:[#allocation28_spill] sm:$0xff] }
 0x190   : > { %22739 = vst [vmem:[#allocation33_spill] sm:$0xff] %v18687_v60  ;;  %22742 = vst [vmem:[#allocation39_spill] sm:$0xff] %v18696_v57  ;;  %v18705_v36 = vsel %vm17212_vm5, %v13548_v14, %v5129_v23  ;;  %v13439_v60 = vld [vmem:[#allocation2 + $0x1fc] sm:$0xf]  ;;  %v18707_v45 = vld [vmem:[#allocation2 + $0x200] sm:$0x7]  ;;  %v15290_v4 = vpop.f32.mrf.mxu1  ;;  %v22746_v42 = vcombine.low %v18298_v48, %v18302_v39  ;;  %v22754_v48 = vcombine.low %v18315_v29, %v22753_v58 }
 0x191   : > { %22743 = vst [vmem:[#allocation62_spill] sm:$0xff] %v18698_v50  ;;  %22745 = vst [vmem:[#allocation66_spill] sm:$0xff] %v18705_v36  ;;  %v22748_v30 = vld [vmem:[#allocation71_spill] sm:$0xff]  ;;  %v18717_v27 = vsel %vm17212_vm5, %v5131_v49, %v5132_v25  ;;  %v4608_v14 = vrot.slane %v4606_v28, 4  ;;  %v13549_v23 = vrot.slane %v13523_v8, 9  ;;  %v5136_v59 = vrot.slane %v13524_v3, 5 }
 0x192   : > { %15577 = vmatmul.mubr.bf16.gmra.mxu1 %v22746_v42  ;;  %v22749_v22 = vcombine.low %v22747_v10, %v22748_v30  ;;  %22750 = vst [vmem:[#allocation43_spill] sm:$0xff] %v18717_v27  ;;  %v13526_v41 = vld [vmem:[#allocation2 + $0x200] sm:$0xe]  ;;  %v18719_v50 = vadd.f32 %v1710_v11, %v1213_v7  ;;  %v1234_v56 = vadd.f32 %v15290_v4, %v22752_v6  ;;  %v22755_v39 = vld [vmem:[#allocation34_spill] sm:$0xff]  ;;  %v5139_v49 = vrot.slane %v13525_v51, 5  ;;  %v1225_v3 = vpop.f32.mrf.mxu1 }
 0x193   : > { %15644 = vmatprep.mubr.bf16.mxu1 %v22754_v48  ;;  %v22756_v42 = vld [vmem:[#allocation30_spill] sm:$0xff]  ;;  %v13527_v30 = vld [vmem:[#allocation2 + $0x204] sm:$0xf]  ;;  %v13528_v8 = vld [vmem:[#allocation2 + $0x208] sm:$0x1]  ;;  %v18732_v11 = vsel %vm18292_vm8, %v13461_v62, %v4606_v28  ;;  %v18736_v29 = vsel %vm18292_vm8, %v4608_v14, %v4609_v21  ;;  %v5138_v6 = vrot.slane %v5136_v59, 4  ;;  %v18745_v28 = vsel %vm17212_vm5, %v13549_v23, %v5136_v59 }
 0x194   : > { %15625 = vmatmul.mubr.bf16.gmra.mxu0 %v22749_v22  ;;  %22751 = vst [vmem:[#allocation67_spill] sm:$0xff] %v18719_v50  ;;  %v22757_v10 = vcombine.low %v22755_v39, %v22756_v42  ;;  %v1723_v22 = vpop.f32.mrf.mxu0  ;;  %22758 = vst [vmem:[#allocation69_spill] sm:$0xff] %v18732_v11  ;;  %v13462_v58 = vrot.slane %v13438_v32, 11  ;;  %v13441_v7 = vld [vmem:[#allocation2 + $0x214] sm:$0x8]  ;;  %v18738_v4 = vadd.f32 %v15338_v13, %v1234_v56  ;;  %v22761_v48 = vld [vmem:[#allocation64_spill] sm:$0xff] }
 0x195   : > { %22759 = vst [vmem:[#allocation49_spill] sm:$0xff] %v18736_v29  ;;  %v1226_v39 = vadd.f32 %v1225_v3, %v22761_v48  ;;  %v4613_v42 = vrot.slane %v13439_v60, 7  ;;  %v4616_v62 = vrot.slane %v18707_v45, 7  ;;  %v13550_v21 = vrot.slane %v13526_v41, 9  ;;  %v13442_v32 = vld [vmem:[#allocation2 + $0x218] sm:$0xf] }
 0x196   : > { %15692 = vmatprep.mubr.bf16.mxu0 %v22757_v10  ;;  %22760 = vst [vmem:[#allocation52_spill] sm:$0xff] %v18738_v4  ;;  %v15291_v10 = vpop.f32.mrf.mxu1  ;;  %v15339_v25 = vpop.f32.mrf.mxu0  ;;  %v5143_v14 = vrot.slane %v13527_v30, 5  ;;  %v22763_v56 = vld [vmem:[#allocation65_spill] sm:$0xff]  ;;  %v18755_v60 = vsel %vm17212_vm5, %v5138_v6, %v5139_v49  ;;  %v13443_v51 = vld [vmem:[#allocation2 + $0x21c] sm:$0x7]  ;;  %v13463_v6 = vrot.slane %v13441_v7, 11 }
 0x197   : > { %v18748_v50 = vadd.f32 %v1723_v22, %v1226_v39  ;;  %v1237_v13 = vadd.f32 %v15291_v10, %v22763_v56  ;;  %v16633_v3 = vld [vmem:[#allocation4 + $0x2f0] sm:$0xff]   ;;  %v18757_v23 = vld [vmem:[#allocation2 + $0x21c] sm:$0xe]  ;;  %v18761_v30 = vsel %vm18292_vm8, %v13462_v58, %v4613_v42  ;;  %v4615_v22 = vrot.slane %v4613_v42, 4  ;;  %v18763_v56 = vld [vmem:[#allocation2 + $0x220] sm:$0xf] }
 0x198   : > { %v1228_v59 = vpop.f32.mrf.mxu1  ;;  %v1726_v45 = vpop.f32.mrf.mxu0  ;;  %v16634_v41 = vld [vmem:[#allocation4 + $0x330] sm:$0xff]   ;;  %v5145_v39 = vrot.slane %v5143_v14, 4  ;;  %v5146_v10 = vrot.slane %v13528_v8, 5  ;;  %v4620_v4 = vrot.slane %v13442_v32, 7  ;;  %v18768_v29 = vld [vmem:[#allocation2 + $0x224] sm:$0x1]  ;;  %v22769_v8 = vcombine.low %v18371_v19, %v18383_v34 }
 0x199   : > { %22762 = vst [vmem:[#allocation54_spill] sm:$0xff] %v18748_v50  ;;  %v18765_v48 = vadd.f32 %v15339_v25, %v1237_v13  ;;  %v22765_v50 = vld [vmem:[#allocation68_spill] sm:$0xff]  ;;  %v18770_v11 = vld [vmem:[#allocation2 + $0x230] sm:$0x8]  ;;  %v22767_v58 = vld [vmem:[#allocation75_spill] sm:$0xff]  ;;  %v18784_v7 = vsel %vm18292_vm8, %v4615_v22, %v4616_v62  ;;  %v18788_v42 = vsel %vm17212_vm5, %v13550_v21, %v5143_v14  ;;  %v4623_v32 = vrot.slane %v13443_v51, 7 }
 0x19a   : > { %v1229_v49 = vadd.f32 %v1228_v59, %v22765_v50  ;;  %v15358_v27 = vpop.f32.mrf.mxu1  ;;  %v15406_v36 = vpop.f32.mrf.mxu0  ;;  %v22766_v57 = vld [vmem:[#allocation32_spill] sm:$0xff]  ;;  %v18803_v62 = vsel %vm17212_vm5, %v5145_v39, %v5146_v10  ;;  %v4622_v21 = vrot.slane %v4620_v4, 4  ;;  %v18805_v51 = vld [vmem:[#allocation2 + $0x238] sm:$0xe]  ;;  %v13533_v14 = vld [vmem:[#allocation2 + $0x23c] sm:$0xf] }
 0x19b   : > { %22764 = vst [vmem:[#allocation70_spill] sm:$0xff] %v18765_v48  ;;  %v22768_v26 = vcombine.low %v22766_v57, %v22767_v58  ;;  %v18778_v25 = vld [vmem:[#allocation4 + $0x2e8] sm:$0xff]   ;;  %v18790_v57 = vld [vmem:[#allocation2 + $0x234] sm:$0xf]  ;;  %v13551_v39 = vrot.slane %v18757_v23, 9  ;;  %v5150_v10 = vrot.slane %v18763_v56, 5 }
 0x19c   : > { %15693 = vmatmul.mubr.bf16.vlgmr.msra.gmra.mxu0 %v22769_v8  ;;  %v18794_v19 = vadd.f32 %v1726_v45, %v1229_v49  ;;  %v22771_v34 = vld [vmem:[#allocation72_spill] sm:$0xff]  ;;  %v1965_v22 = vpop.f32.mrf.mxu1  ;;  %v2495_v58 = vpop.f32.mrf.mxu0  ;;  %v22772_v45 = vcombine.low %v18401_v33, %v18416_v16  ;;  %v18821_v49 = vld [vmem:[#allocation2 + $0x240] sm:$0x1]  ;;  %v22775_v33 = vld [vmem:[#allocation73_spill] sm:$0xff] }
 0x19d   : > { %15645 = vmatmul.mubr.bf16.vlgmr.msra.gmra.mxu1 %v22768_v26  ;;  %v18792_v26 = vld [vmem:[#allocation2 + $0x238] sm:$0x7]  ;;  %v2094_v13 = vadd.f32 %v15358_v27, %v22771_v34  ;;  %15773 = vmatpush3.bf16.msra.mxu0 %v18495_v18  ;;  %v18799_v59 = vld [vmem:[#allocation4 + $0x328] sm:$0xff]   ;;  %v18817_v27 = vsel %vm18292_vm8, %v13463_v6, %v4620_v4  ;;  %v2092_v16 = vadd.f32 %v1965_v22, %v22775_v33  ;;  %v5152_v56 = vrot.slane %v5150_v10, 4 }
 0x19e   : > { %22770 = vst [vmem:[#allocation71_spill] sm:$0xff] %v18794_v19  ;;  %15725 = vmatpush3.bf16.msra.mxu1 %v18481_v20  ;;  %15648 = vmatprep.mubr.bf16.mxu1 %v22772_v45  ;;  %v22773_v20 = vcombine.low %v18423_v61, %v18431_v63  ;;  %v18828_v61 = vsel %vm18292_vm8, %v4622_v21, %v4623_v32  ;;  %v5153_v63 = vrot.slane %v18768_v29, 5  ;;  %v15359_v4 = vpop.f32.mrf.mxu1  ;;  %v15407_v6 = vpop.f32.mrf.mxu0  ;;  %v13464_v34 = vrot.slane %v18770_v11, 11  ;;  %v22777_v22 = vld [vmem:[#allocation74_spill] sm:$0xff]  ;;  %v18838_v32 = vld [vmem:[#allocation4 + $0x2e0] sm:$0xff]  }
 0x19f   : > { %v18823_v8 = vadd.f32 %v15406_v36, %v2094_v13  ;;  %15726 = vmatprep.subr.bf16.mxu1 %v16633_v3  ;;  %15774 = vmatprep.subr.bf16.mxu0 %v16634_v41  ;;  %v4627_v36 = vrot.slane %v18790_v57, 7  ;;  %v18835_v13 = vadd.f32 %v2495_v58, %v2092_v16  ;;  %v2095_v45 = vadd.f32 %v15359_v4, %v22777_v22  ;;  %v13448_v58 = vld [vmem:[#allocation2 + $0x250] sm:$0xf]  ;;  %v16638_v22 = vld [vmem:[#allocation4 + $0x320] sm:$0xff]   ;;  %v13535_v11 = vld [vmem:[#allocation2 + $0x254] sm:$0xe] }
 0x1a0   : > { %15696 = vmatprep.mubr.bf16.mxu0 %v22773_v20  ;;  %v4630_v29 = vrot.slane %v18792_v26, 7  ;;  %v13552_v21 = vrot.slane %v18805_v51, 9  ;;  %v13447_v20 = vld [vmem:[#allocation2 + $0x24c] sm:$0x8]  ;;  %v1968_v33 = vpop.f32.mrf.mxu1  ;;  %v2498_v23 = vpop.f32.mrf.mxu0  ;;  %v5157_v57 = vrot.slane %v13533_v14, 5  ;;  %v22779_v51 = vld [vmem:[#allocation22_spill] sm:$0xff]  ;;  %v18855_v18 = vsel %vm17212_vm5, %v5152_v56, %v5153_v63 }
 0x1a1   : > { %22774 = vst [vmem:[#allocation59_spill] sm:$0xff] %v18823_v8  ;;  %22776 = vst [vmem:[#allocation28_spill] sm:$0xff] %v18835_v13  ;;  %15775 = vmatpush3.bf16.msra.mxu0 %v16634_v41  ;;  %v4629_v41 = vrot.slane %v4627_v36, 4  ;;  %v13449_v26 = vld [vmem:[#allocation2 + $0x254] sm:$0x7]  ;;  %v18850_v16 = vadd.f32 %v15407_v6, %v2095_v45  ;;  %v2093_v4 = vadd.f32 %v1968_v33, %v22779_v51  ;;  %v5160_v50 = vrot.slane %v18821_v49, 5 }
 0x1a2   : > { %15727 = vmatpush3.bf16.msra.mxu1 %v16633_v3  ;;  %15776 = vmatprep.subr.bf16.mxu0 %v18799_v59  ;;  %v18848_v3 = vsel %vm17212_vm5, %v13551_v39, %v5150_v10  ;;  %v13536_v13 = vld [vmem:[#allocation2 + $0x258] sm:$0xf]  ;;  %v15362_v8 = vpop.f32.mrf.mxu1  ;;  %v15410_v39 = vpop.f32.mrf.mxu0  ;;  %v22780_v10 = vld [vmem:[#allocation25_spill] sm:$0xff]  ;;  %v22782_v6 = vcombine.low %v18452_v12, %v18468_v54  ;;  %v18866_v45 = vsel %vm18292_vm8, %v13464_v34, %v4627_v36  ;;  %v5159_v49 = vrot.slane %v5157_v57, 4  ;;  %v18872_v33 = vld [vmem:[#allocation2 + $0x25c] sm:$0x1] }
 0x1a3   : > { %15728 = vmatprep.subr.bf16.mxu1 %v18778_v25  ;;  %22778 = vst [vmem:[#allocation34_spill] sm:$0xff] %v18850_v16  ;;  %v22781_v14 = vcombine.low %v18437_v0, %v22780_v10  ;;  %v18870_v63 = vsel %vm18292_vm8, %v4629_v41, %v4630_v29  ;;  %v13465_v56 = vrot.slane %v13447_v20, 11  ;;  %v18874_v51 = vadd.f32 %v2498_v23, %v2093_v4  ;;  %v22784_v0 = vld [vmem:[#allocation40_spill] sm:$0xff]  ;;  %v22786_v54 = vld [vmem:[#allocation47_spill] sm:$0xff]  ;;  %v18887_v20 = vld [vmem:[#allocation2 + $0xb4] sm:$0x8] }
 0x1a4   : > { %15697 = vmatmul.mubr.bf16.gmra.mxu0 %v22782_v6  ;;  %v2098_v10 = vadd.f32 %v15362_v8, %v22784_v0  ;;  %v22785_v12 = vcombine.low %v18486_v38, %v18490_v2  ;;  %v22787_v34 = vcombine.low %v18499_v40, %v22786_v54  ;;  %v18885_v36 = vsel %vm17212_vm5, %v13552_v21, %v5157_v57  ;;  %v18889_v41 = vld [vmem:[#allocation2 + $0xb8] sm:$0xf]  ;;  %v18891_v23 = vld [vmem:[#allocation2 + $0xbc] sm:$0x7]  ;;  %v1981_v8 = vpop.f32.mrf.mxu1  ;;  %v2511_v4 = vpop.f32.mrf.mxu0  ;;  %v22789_v6 = vld [vmem:[#allocation76_spill] sm:$0xff] }
 0x1a5   : > { %15649 = vmatmul.mubr.bf16.gmra.mxu1 %v22781_v14  ;;  %22783 = vst [vmem:[#allocation30_spill] sm:$0xff] %v18874_v51  ;;  %v4634_v29 = vrot.slane %v13448_v58, 7  ;;  %15777 = vmatpush3.bf16.msra.mxu0 %v18799_v59  ;;  %v18895_v38 = vld [vmem:[#allocation4 + $0x2d8] sm:$0xff]   ;;  %v18899_v2 = vsel %vm17212_vm5, %v5159_v49, %v5160_v50  ;;  %v4637_v40 = vrot.slane %v13449_v26, 7  ;;  %v13553_v21 = vrot.slane %v13535_v11, 9  ;;  %v22798_v16 = vld [vmem:[#allocation44_spill] sm:$0xff] }
 0x1a6   : > { %15652 = vmatprep.mubr.bf16.mxu1 %v22785_v12  ;;  %15700 = vmatprep.mubr.bf16.mxu0 %v22787_v34  ;;  %v5164_v57 = vrot.slane %v13536_v13, 5  ;;  %v18901_v58 = vld [vmem:[#allocation2 + $0x1f8] sm:$0x8]  ;;  %v18903_v14 = vadd.f32 %v15410_v39, %v2098_v10  ;;  %v2096_v0 = vadd.f32 %v1981_v8, %v22789_v6  ;;  %v15363_v54 = vpop.f32.mrf.mxu1  ;;  %v15411_v50 = vpop.f32.mrf.mxu0  ;;  %v5167_v39 = vrot.slane %v18872_v33, 5  ;;  %v13667_v59 = vld [vmem:[#allocation2 + $0x1fc] sm:$0xf] }
 0x1a7   : > { %15729 = vmatpush3.bf16.msra.mxu1 %v18778_v25  ;;  %15778 = vmatprep.subr.bf16.mxu0 %v16638_v22  ;;  %v16640_v25 = vld [vmem:[#allocation4 + $0x318] sm:$0xff]   ;;  %v4636_v12 = vrot.slane %v4634_v29, 4  ;;  %v18913_v13 = vsel %vm18292_vm8, %v13465_v56, %v4634_v29  ;;  %v13668_v11 = vld [vmem:[#allocation2 + $0x200] sm:$0x7]  ;;  %v18952_v51 = vld [vmem:[#allocation2 + $0x214] sm:$0x8] }
 0x1a8   : > { %22788 = vst [vmem:[#allocation64_spill] sm:$0xff] %v18903_v14  ;;  %15730 = vmatprep.subr.bf16.mxu1 %v18838_v32  ;;  %v5166_v26 = vrot.slane %v5164_v57, 4  ;;  %v18916_v49 = vadd.f32 %v2511_v4, %v2096_v0  ;;  %v22791_v10 = vld [vmem:[#allocation35_spill] sm:$0xff]  ;;  %v18925_v14 = vld [vmem:[#allocation2 + $0xd0] sm:$0x8]  ;;  %v1984_v56 = vpop.f32.mrf.mxu1  ;;  %v2514_v29 = vpop.f32.mrf.mxu0  ;;  %v18930_v33 = vsel %vm17212_vm5, %v13553_v21, %v5164_v57  ;;  %v13626_v4 = vrot.slane %v18887_v20, 11 }
 0x1a9   : > { %v2099_v34 = vadd.f32 %v15363_v54, %v22791_v10  ;;  %v18923_v6 = vsel %vm18292_vm8, %v4636_v12, %v4637_v40  ;;  %15779 = vmatpush3.bf16.msra.mxu0 %v16638_v22  ;;  %v5589_v0 = vrot.slane %v18889_v41, 7  ;;  %v5592_v40 = vrot.slane %v18891_v23, 7  ;;  %v13582_v12 = vld [vmem:[#allocation2 + $0xd4] sm:$0xf]  ;;  %v13583_v20 = vld [vmem:[#allocation2 + $0xd8] sm:$0x7] }
 0x1aa   : > { %22790 = vst [vmem:[#allocation65_spill] sm:$0xff] %v18916_v49  ;;  %v22793_v10 = vld [vmem:[#allocation38_spill] sm:$0xff]  ;;  %15780 = vmatprep.subr.bf16.mxu0 %v16640_v25  ;;  %v13714_v57 = vrot.slane %v18901_v58, 11  ;;  %v15366_v49 = vpop.f32.mrf.mxu1  ;;  %v15414_v41 = vpop.f32.mrf.mxu0  ;;  %v22794_v23 = vcombine.low %v18515_v17, %v18521_v53  ;;  %v6122_v21 = vrot.slane %v13668_v11, 7  ;;  %v22799_v48 = vld [vmem:[#allocation55_spill] sm:$0xff]  ;;  %v22800_v17 = vld [vmem:[#allocation56_spill] sm:$0xff] }
 0x1ab   : > { %15731 = vmatpush3.bf16.msra.mxu1 %v18838_v32  ;;  %v18935_v54 = vadd.f32 %v15411_v50, %v2099_v34  ;;  %v2097_v8 = vadd.f32 %v1984_v56, %v22793_v10  ;;  %v16641_v32 = vld [vmem:[#allocation4 + $0x2d0] sm:$0xff]   ;;  %v18950_v56 = vsel %vm17212_vm5, %v5166_v26, %v5167_v39  ;;  %v5591_v10 = vrot.slane %v5589_v0, 4  ;;  %v13670_v11 = vld [vmem:[#allocation2 + $0x218] sm:$0xf]  ;;  %v18966_v39 = vld [vmem:[#allocation2 + $0x21c] sm:$0x7] }
 0x1ac   : > { %15732 = vmatprep.subr.bf16.mxu1 %v18895_v38  ;;  %v16642_v22 = vld [vmem:[#allocation4 + $0x310] sm:$0xff]   ;;  %v2102_v19 = vadd.f32 %v15366_v49, %v22798_v16  ;;  %v22801_v53 = vcombine.low %v22799_v48, %v22800_v17  ;;  %v13627_v26 = vrot.slane %v18925_v14, 11  ;;  %v18971_v48 = vsel %vm18292_vm8, %v13626_v4, %v5589_v0  ;;  %v18977_v14 = vld [vmem:[#allocation2 + $0xec] sm:$0x8] }
 0x1ad   : > { %22792 = vst [vmem:[#allocation68_spill] sm:$0xff] %v18935_v54  ;;  %15653 = vmatmul.mubr.bf16.gmra.mxu1 %v22794_v23  ;;  %v22795_v50 = vld [vmem:[#allocation58_spill] sm:$0xff]  ;;  %v6119_v54 = vrot.slane %v13667_v59, 7  ;;  %v18954_v58 = vadd.f32 %v2514_v29, %v2097_v8  ;;  %v18963_v23 = vld [vmem:[#allocation4 + $0x2c8] sm:$0xff]   ;;  %v5596_v59 = vrot.slane %v13582_v12, 7  ;;  %v1997_v8 = vpop.f32.mrf.mxu1  ;;  %v2527_v29 = vpop.f32.mrf.mxu0  ;;  %15781 = vmatpush3.bf16.msra.mxu0 %v16640_v25  ;;  %v5599_v16 = vrot.slane %v13583_v20, 7 }
 0x1ae   : > { %v22796_v34 = vcombine.low %v18538_v31, %v22795_v50  ;;  %15656 = vmatprep.mubr.bf16.mxu1 %v22801_v53  ;;  %v22802_v31 = vcombine.low %v18571_v52, %v18580_v47  ;;  %v18975_v47 = vsel %vm18292_vm8, %v5591_v10, %v5592_v40  ;;  %v18979_v49 = vld [vmem:[#allocation2 + $0xf0] sm:$0xf]  ;;  %v18981_v12 = vadd.f32 %v15414_v41, %v2102_v19  ;;  %v18988_v0 = vld [vmem:[#allocation2 + $0xf4] sm:$0x7] }
 0x1af   : > { %22797 = vst [vmem:[#allocation32_spill] sm:$0xff] %v18954_v58  ;;  %15733 = vmatpush3.bf16.msra.mxu1 %v18895_v38  ;;  %v6121_v52 = vrot.slane %v6119_v54, 4  ;;  %v22804_v50 = vld [vmem:[#allocation45_spill] sm:$0xff]  ;;  %15782 = vmatprep.subr.bf16.mxu0 %v16642_v22  ;;  %v18986_v25 = vsel %vm18292_vm8, %v13714_v57, %v6119_v54  ;;  %v5598_v4 = vrot.slane %v5596_v59, 4  ;;  %v15367_v40 = vpop.f32.mrf.mxu1  ;;  %v15415_v20 = vpop.f32.mrf.mxu0  ;;  %v13715_v41 = vrot.slane %v18952_v51, 11  ;;  %v19008_v51 = vld [vmem:[#allocation4 + $0x300] sm:$0xff]  }
 0x1b0   : > { %15701 = vmatmul.mubr.bf16.gmra.mxu0 %v22796_v34  ;;  %22803 = vst [vmem:[#allocation75_spill] sm:$0xff] %v18981_v12  ;;  %v2100_v34 = vadd.f32 %v1997_v8, %v22804_v50  ;;  %15734 = vmatprep.subr.bf16.mxu1 %v16641_v32  ;;  %v16644_v38 = vld [vmem:[#allocation4 + $0x308] sm:$0xff]   ;;  %v6126_v17 = vrot.slane %v13670_v11, 7  ;;  %v19004_v8 = vsel %vm18292_vm8, %v13627_v26, %v5596_v59  ;;  %v13672_v50 = vld [vmem:[#allocation2 + $0x230] sm:$0x8]  ;;  %v6129_v26 = vrot.slane %v18966_v39, 7 }
 0x1b1   : > { %15704 = vmatprep.mubr.bf16.mxu0 %v22802_v31  ;;  %v18994_v19 = vsel %vm18292_vm8, %v6121_v52, %v6122_v21  ;;  %v22806_v31 = vld [vmem:[#allocation41_spill] sm:$0xff]  ;;  %v13673_v10 = vld [vmem:[#allocation2 + $0x234] sm:$0xf]  ;;  %v2000_v55 = vpop.f32.mrf.mxu1  ;;  %v2530_v12 = vpop.f32.mrf.mxu0  ;;  %15783 = vmatpush3.bf16.msra.mxu0 %v16642_v22  ;;  %v19006_v21 = vld [vmem:[#allocation4 + $0x2c0] sm:$0xff]   ;;  %v13628_v22 = vrot.slane %v18977_v14, 11  ;;  %v22809_v39 = vcombine.low %v18593_v46, %v18597_v15  ;;  %v5606_v14 = vrot.slane %v18988_v0, 7 }
 0x1b2   : > { %v18997_v53 = vadd.f32 %v2527_v29, %v2100_v34  ;;  %v2103_v54 = vadd.f32 %v15367_v40, %v22806_v31  ;;  %v19014_v29 = vsel %vm18292_vm8, %v5598_v4, %v5599_v16  ;;  %v6128_v52 = vrot.slane %v6126_v17, 4  ;;  %v13674_v59 = vld [vmem:[#allocation2 + $0x238] sm:$0x7]  ;;  %15784 = vmatprep.subr.bf16.mxu0 %v16644_v38  ;;  %v19023_v11 = vld [vmem:[#allocation2 + $0x108] sm:$0x8] }
 0x1b3   : > { %15735 = vmatpush3.bf16.msra.mxu1 %v16641_v32  ;;  %v22808_v40 = vld [vmem:[#allocation42_spill] sm:$0xff]  ;;  %v5603_v31 = vrot.slane %v18979_v49, 7  ;;  %v19025_v57 = vld [vmem:[#allocation2 + $0x10c] sm:$0xf]  ;;  %v15370_v16 = vpop.f32.mrf.mxu1  ;;  %v15418_v4 = vpop.f32.mrf.mxu0  ;;  %v13716_v49 = vrot.slane %v13672_v50, 11  ;;  %v6136_v50 = vrot.slane %v13674_v59, 7 }
 0x1b4   : > { %22805 = vst [vmem:[#allocation72_spill] sm:$0xff] %v18997_v53  ;;  %v19017_v34 = vadd.f32 %v15415_v20, %v2103_v54  ;;  %v2101_v32 = vadd.f32 %v2000_v55, %v22808_v40  ;;  %15736 = vmatprep.subr.bf16.mxu1 %v18963_v23  ;;  %v22810_v55 = vcombine.low %v18610_v5, %v18616_v43  ;;  %v6133_v54 = vrot.slane %v13673_v10, 7  ;;  %v13589_v40 = vld [vmem:[#allocation2 + $0x110] sm:$0x7]  ;;  %v22812_v53 = vld [vmem:[#allocation27_spill] sm:$0xff] }
 0x1b5   : > { %15657 = vmatmul.mubr.bf16.gmra.mxu1 %v22809_v39  ;;  %v19035_v20 = vsel %vm18292_vm8, %v13715_v41, %v6126_v17  ;;  %v2106_v58 = vadd.f32 %v15370_v16, %v22812_v53  ;;  %v22813_v46 = vld [vmem:[#allocation57_spill] sm:$0xff]  ;;  %v22815_v5 = vcombine.low %v18643_v24, %v18647_v1  ;;  %v19049_v43 = vsel %vm18292_vm8, %v6128_v52, %v6129_v26  ;;  %v19051_v0 = vld [vmem:[#allocation4 + $0x378] sm:$0xff]   ;;  %v2013_v17 = vpop.f32.mrf.mxu1  ;;  %v2543_v53 = vpop.f32.mrf.mxu0  ;;  %v13677_v52 = vld [vmem:[#allocation2 + $0x254] sm:$0x7] }
 0x1b6   : > { %22807 = vst [vmem:[#allocation73_spill] sm:$0xff] %v19017_v34  ;;  %v19038_v34 = vadd.f32 %v2530_v12, %v2101_v32  ;;  %v22814_v15 = vcombine.low %v18620_v44, %v22813_v46  ;;  %v5605_v10 = vrot.slane %v5603_v31, 4  ;;  %v19053_v41 = vld [vmem:[#allocation2 + $0x24c] sm:$0x8]  ;;  %v13676_v12 = vld [vmem:[#allocation2 + $0x250] sm:$0xf]  ;;  %15785 = vmatpush3.bf16.msra.mxu0 %v16644_v38  ;;  %v19060_v24 = vsel %vm18292_vm8, %v13628_v22, %v5603_v31 }
 0x1b7   : > { %15737 = vmatpush3.bf16.msra.mxu1 %v18963_v23  ;;  %v6135_v1 = vrot.slane %v6133_v54, 4  ;;  %v13590_v26 = vld [vmem:[#allocation2 + $0x124] sm:$0x8]  ;;  %v19062_v32 = vadd.f32 %v15418_v4, %v2106_v58  ;;  %15786 = vmatprep.subr.bf16.mxu0 %v19008_v51  ;;  %v19067_v23 = vld [vmem:[#allocation4 + $0x3b8] sm:$0xff]   ;;  %v13629_v22 = vrot.slane %v19023_v11, 11  ;;  %v15371_v59 = vpop.f32.mrf.mxu1  ;;  %v19078_v4 = vsel %vm18292_vm8, %v13716_v49, %v6133_v54 }
 0x1b8   : > { %15705 = vmatmul.mubr.bf16.gmra.mxu0 %v22810_v55  ;;  %22811 = vst [vmem:[#allocation74_spill] sm:$0xff] %v19038_v34  ;;  %15660 = vmatprep.mubr.bf16.mxu1 %v22814_v15  ;;  %v22817_v16 = vld [vmem:[#allocation48_spill] sm:$0xff]  ;;  %v19071_v38 = vsel %vm18292_vm8, %v5605_v10, %v5606_v14  ;;  %v15419_v55 = vpop.f32.mrf.mxu0  ;;  %22819 = vst [vmem:[#allocation40_spill] sm:$0xff] %v19078_v4  ;;  %v5610_v46 = vrot.slane %v19025_v57, 7  ;;  %v5613_v15 = vrot.slane %v13589_v40, 7  ;;  %v13717_v10 = vrot.slane %v19053_v41, 11 }
 0x1b9   : > { %15708 = vmatprep.mubr.bf16.mxu0 %v22815_v5  ;;  %22816 = vst [vmem:[#allocation22_spill] sm:$0xff] %v19062_v32  ;;  %v2104_v39 = vadd.f32 %v2013_v17, %v22817_v16  ;;  %15738 = vmatprep.subr.bf16.mxu1 %v19006_v21  ;;  %22818 = vst [vmem:[#allocation25_spill] sm:$0xff] %v19071_v38  ;;  %v13591_v31 = vld [vmem:[#allocation2 + $0x128] sm:$0xf]  ;;  %v22821_v17 = vld [vmem:[#allocation51_spill] sm:$0xff]  ;;  %v2016_v44 = vpop.f32.mrf.mxu1  ;;  %v19091_v57 = vsel %vm18292_vm8, %v6135_v1, %v6136_v50  ;;  %v6140_v54 = vrot.slane %v13676_v12, 7 }
 0x1ba   : > { %v2107_v14 = vadd.f32 %v15371_v59, %v22821_v17  ;;  %v13592_v16 = vld [vmem:[#allocation2 + $0x12c] sm:$0x7]  ;;  %v2546_v32 = vpop.f32.mrf.mxu0  ;;  %15787 = vmatpush3.bf16.msra.mxu0 %v19008_v51  ;;  %22822 = vst [vmem:[#allocation76_spill] sm:$0xff] %v19091_v57  ;;  %v5612_v49 = vrot.slane %v5610_v46, 4  ;;  %v6143_v40 = vrot.slane %v13677_v52, 7  ;;  %v13630_v41 = vrot.slane %v13590_v26, 11 }
 0x1bb   : > { %v19081_v5 = vadd.f32 %v2543_v53, %v2104_v39  ;;  %15739 = vmatpush3.bf16.msra.mxu1 %v19006_v21  ;;  %v22824_v39 = vld [vmem:[#allocation53_spill] sm:$0xff]  ;;  %15868 = vmatprep.subr.bf16.mxu0 %v19067_v23  ;;  %v5617_v17 = vrot.slane %v13591_v31, 7  ;;  %v15374_v51 = vpop.f32.mrf.mxu1  ;;  %v22825_v1 = vcombine.low %v18657_v37, %v18672_v9  ;;  %v22826_v12 = vld [vmem:[#allocation50_spill] sm:$0xff]  ;;  %v22827_v50 = vld [vmem:[#allocation31_spill] sm:$0xff]  ;;  %v6142_v31 = vrot.slane %v6140_v54, 4 }
 0x1bc   : > { %v19093_v53 = vadd.f32 %v15419_v55, %v2107_v14  ;;  %v2105_v59 = vadd.f32 %v2016_v44, %v22824_v39  ;;  %15820 = vmatprep.subr.bf16.mxu1 %v19051_v0  ;;  %v13678_v21 = vld [vmem:[#allocation2 + $0x268] sm:$0x8]  ;;  %v13679_v11 = vld [vmem:[#allocation2 + $0x26c] sm:$0xf]  ;;  %v15422_v58 = vpop.f32.mrf.mxu0  ;;  %v22828_v52 = vcombine.low %v22826_v12, %v22827_v50  ;;  %v19106_v44 = vsel %vm18292_vm8, %v13629_v22, %v5610_v46  ;;  %v13680_v14 = vld [vmem:[#allocation2 + $0x270] sm:$0x7] }
 0x1bd   : > { %22820 = vst [vmem:[#allocation47_spill] sm:$0xff] %v19081_v5  ;;  %15661 = vmatmul.mubr.bf16.gmra.mxu1 %v22825_v1  ;;  %22829 = vst [vmem:[#allocation38_spill] sm:$0xff] %v19106_v44  ;;  %v19110_v26 = vsel %vm18292_vm8, %v5612_v49, %v5613_v15  ;;  %v5620_v55 = vrot.slane %v13592_v16, 7  ;;  %v13593_v39 = vld [vmem:[#allocation2 + $0x140] sm:$0x8]  ;;  %v22832_v37 = vld [vmem:[#allocation37_spill] sm:$0xff]  ;;  %v19123_v46 = vsel %vm18292_vm8, %v13717_v10, %v6140_v54  ;;  %v2029_v34 = vpop.f32.mrf.mxu1 }
 0x1be   : > { %22823 = vst [vmem:[#allocation35_spill] sm:$0xff] %v19093_v53  ;;  %22830 = vst [vmem:[#allocation58_spill] sm:$0xff] %v19110_v26  ;;  %v19112_v53 = vadd.f32 %v2546_v32, %v2105_v59  ;;  %v2110_v9 = vadd.f32 %v15374_v51, %v22832_v37  ;;  %v22833_v1 = vld [vmem:[#allocation36_spill] sm:$0xff]  ;;  %v22834_v5 = vld [vmem:[#allocation39_spill] sm:$0xff]  ;;  %v5619_v15 = vrot.slane %v5617_v17, 4  ;;  %v2559_v32 = vpop.f32.mrf.mxu0  ;;  %v19133_v51 = vsel %vm18292_vm8, %v13630_v41, %v5617_v17 }
 0x1bf   : > { %v22835_v12 = vcombine.low %v22833_v1, %v22834_v5  ;;  %v22836_v50 = vld [vmem:[#allocation66_spill] sm:$0xff]  ;;  %v13594_v16 = vld [vmem:[#allocation2 + $0x144] sm:$0xf]  ;;  %v13595_v49 = vld [vmem:[#allocation2 + $0x148] sm:$0x7]  ;;  %v19129_v5 = vsel %vm18292_vm8, %v6142_v31, %v6143_v40  ;;  %v6147_v37 = vrot.slane %v13679_v11, 7 }
 0x1c0   : > { %15709 = vmatmul.mubr.bf16.gmra.mxu0 %v22828_v52  ;;  %22831 = vst [vmem:[#allocation44_spill] sm:$0xff] %v19112_v53  ;;  %v22837_v52 = vld [vmem:[#allocation43_spill] sm:$0xff]  ;;  %v13681_v1 = vld [vmem:[#allocation2 + $0x284] sm:$0x8]  ;;  %v13682_v10 = vld [vmem:[#allocation2 + $0x288] sm:$0xf]  ;;  %v19135_v54 = vadd.f32 %v15422_v58, %v2110_v9  ;;  %v15375_v53 = vpop.f32.mrf.mxu1  ;;  %v15423_v40 = vpop.f32.mrf.mxu0 }
 0x1c1   : > { %15664 = vmatprep.mubr.bf16.mxu1 %v22835_v12  ;;  %v22838_v22 = vcombine.low %v22836_v50, %v22837_v52  ;;  %v22840_v12 = vld [vmem:[#allocation23_spill] sm:$0xff]  ;;  %v19140_v52 = vsel %vm18292_vm8, %v5619_v15, %v5620_v55  ;;  %v13683_v59 = vld [vmem:[#allocation2 + $0x28c] sm:$0x7]  ;;  %v6149_v41 = vrot.slane %v6147_v37, 4  ;;  %v6150_v17 = vrot.slane %v13680_v14, 7  ;;  %v22842_v9 = vld [vmem:[#allocation60_spill] sm:$0xff] }
 0x1c2   : > { %22839 = vst [vmem:[#allocation55_spill] sm:$0xff] %v19135_v54  ;;  %v2108_v50 = vadd.f32 %v2029_v34, %v22840_v12  ;;  %v2111_v34 = vadd.f32 %v15375_v53, %v22842_v9  ;;  %v13631_v12 = vrot.slane %v13593_v39, 11  ;;  %v5624_v54 = vrot.slane %v13594_v16, 7  ;;  %v13596_v55 = vld [vmem:[#allocation2 + $0x15c] sm:$0x8]  ;;  %v2032_v15 = vpop.f32.mrf.mxu1  ;;  %v22844_v11 = vld [vmem:[#allocation61_spill] sm:$0xff] }
 0x1c3   : > { %15712 = vmatprep.mubr.bf16.mxu0 %v22838_v22  ;;  %v13718_v22 = vrot.slane %v13678_v21, 11  ;;  %v2562_v21 = vpop.f32.mrf.mxu0  ;;  %v5627_v4 = vrot.slane %v13595_v49, 7  ;;  %v13719_v38 = vrot.slane %v13681_v1, 11  ;;  %v6154_v31 = vrot.slane %v13682_v10, 7  ;;  %v13597_v26 = vld [vmem:[#allocation2 + $0x160] sm:$0xf] }
 0x1c4   : > { %v19146_v58 = vadd.f32 %v2559_v32, %v2108_v50  ;;  %v19151_v44 = vadd.f32 %v15423_v40, %v2111_v34  ;;  %v2109_v14 = vadd.f32 %v2032_v15, %v22844_v11  ;;  %v19160_v53 = vsel %vm18292_vm8, %v6149_v41, %v6150_v17  ;;  %v13598_v39 = vld [vmem:[#allocation2 + $0x164] sm:$0x7]  ;;  %v13684_v16 = vld [vmem:[#allocation2 + $0x2a0] sm:$0x8]  ;;  %v15378_v50 = vpop.f32.mrf.mxu1  ;;  %v22845_v49 = vld [vmem:[#allocation69_spill] sm:$0xff] }
 0x1c5   : > { %v19156_v32 = vsel %vm18292_vm8, %v13718_v22, %v6147_v37  ;;  %v15426_v9 = vpop.f32.mrf.mxu0  ;;  %v22846_v1 = vld [vmem:[#allocation49_spill] sm:$0xff]  ;;  %v22848_v40 = vcombine.low %v18745_v28, %v18755_v60  ;;  %v19170_v37 = vsel %vm18292_vm8, %v13631_v12, %v5624_v54  ;;  %v5626_v22 = vrot.slane %v5624_v54, 4  ;;  %v13685_v17 = vld [vmem:[#allocation2 + $0x2a4] sm:$0xf]  ;;  %v22850_v15 = vld [vmem:[#allocation46_spill] sm:$0xff] }
 0x1c6   : > { %22841 = vst [vmem:[#allocation56_spill] sm:$0xff] %v19146_v58  ;;  %22843 = vst [vmem:[#allocation45_spill] sm:$0xff] %v19151_v44  ;;  %v22847_v10 = vcombine.low %v22845_v49, %v22846_v1  ;;  %v6156_v11 = vrot.slane %v6154_v31, 4  ;;  %v6157_v41 = vrot.slane %v13683_v59, 7  ;;  %v19172_v34 = vadd.f32 %v2562_v21, %v2109_v14  ;;  %v13686_v12 = vld [vmem:[#allocation2 + $0x2a8] sm:$0x7]  ;;  %v2045_v54 = vpop.f32.mrf.mxu1 }
 0x1c7   : > { %v2114_v57 = vadd.f32 %v15378_v50, %v22850_v15  ;;  %v22851_v49 = vcombine.low %v18761_v30, %v18784_v7  ;;  %v22852_v28 = vcombine.low %v18788_v42, %v18803_v62  ;;  %v13632_v60 = vrot.slane %v13596_v55, 11  ;;  %v13600_v42 = vld [vmem:[#allocation2 + $0x17c] sm:$0xf]  ;;  %v13601_v62 = vld [vmem:[#allocation2 + $0x180] sm:$0x7] }
 0x1c8   : > { %15665 = vmatmul.mubr.bf16.gmra.mxu1 %v22847_v10  ;;  %15713 = vmatmul.mubr.bf16.gmra.mxu0 %v22848_v40  ;;  %22849 = vst [vmem:[#allocation41_spill] sm:$0xff] %v19172_v34  ;;  %v5631_v1 = vrot.slane %v13597_v26, 7  ;;  %v13599_v10 = vld [vmem:[#allocation2 + $0x178] sm:$0x8]  ;;  %v2575_v40 = vpop.f32.mrf.mxu0  ;;  %v19185_v21 = vsel %vm18292_vm8, %v5626_v22, %v5627_v4  ;;  %v19189_v30 = vsel %vm18292_vm8, %v13719_v38, %v6154_v31  ;;  %v5634_v7 = vrot.slane %v13598_v39, 7  ;;  %v22854_v26 = vld [vmem:[#allocation24_spill] sm:$0xff]  ;;  %v15379_v4 = vpop.f32.mrf.mxu1 }
 0x1c9   : > { %15668 = vmatprep.mubr.bf16.mxu1 %v22851_v49  ;;  %15716 = vmatprep.mubr.bf16.mxu0 %v22852_v28  ;;  %v19191_v55 = vadd.f32 %v15426_v9, %v2114_v57  ;;  %v2112_v14 = vadd.f32 %v2045_v54, %v22854_v26  ;;  %v19196_v50 = vsel %vm18292_vm8, %v6156_v11, %v6157_v41  ;;  %v13720_v15 = vrot.slane %v13684_v16, 11  ;;  %v13687_v49 = vld [vmem:[#allocation2 + $0x2bc] sm:$0x8]  ;;  %v13688_v28 = vld [vmem:[#allocation2 + $0x2c0] sm:$0xf]  ;;  %v22856_v57 = vld [vmem:[#allocation26_spill] sm:$0xff] }
 0x1ca   : > { %v15427_v22 = vpop.f32.mrf.mxu0  ;;  %v5633_v31 = vrot.slane %v5631_v1, 4  ;;  %v6161_v39 = vrot.slane %v13685_v17, 7  ;;  %v6164_v59 = vrot.slane %v13686_v12, 7  ;;  %v2115_v9 = vadd.f32 %v15379_v4, %v22856_v57  ;;  %v2048_v16 = vpop.f32.mrf.mxu1  ;;  %v13689_v17 = vld [vmem:[#allocation2 + $0x2c4] sm:$0x7] }
 0x1cb   : > { %22853 = vst [vmem:[#allocation42_spill] sm:$0xff] %v19191_v55  ;;  %v19200_v34 = vadd.f32 %v2575_v40, %v2112_v14  ;;  %v19205_v54 = vsel %vm18292_vm8, %v13632_v60, %v5631_v1  ;;  %v5638_v11 = vrot.slane %v13600_v42, 7  ;;  %v13633_v38 = vrot.slane %v13599_v10, 11  ;;  %v22858_v40 = vld [vmem:[#allocation29_spill] sm:$0xff]  ;;  %v13602_v1 = vld [vmem:[#allocation2 + $0x194] sm:$0x8] }
 0x1cc   : > { %v2578_v41 = vpop.f32.mrf.mxu0  ;;  %v19209_v26 = vsel %vm18292_vm8, %v5633_v31, %v5634_v7  ;;  %v6163_v55 = vrot.slane %v6161_v39, 4  ;;  %v5641_v44 = vrot.slane %v13601_v62, 7  ;;  %v19211_v12 = vadd.f32 %v15427_v22, %v2115_v9  ;;  %v13603_v42 = vld [vmem:[#allocation2 + $0x198] sm:$0xf]  ;;  %v15382_v57 = vpop.f32.mrf.mxu1 }
 0x1cd   : > { %22855 = vst [vmem:[#allocation27_spill] sm:$0xff] %v19200_v34  ;;  %v2113_v14 = vadd.f32 %v2048_v16, %v22858_v40  ;;  %v19218_v60 = vsel %vm18292_vm8, %v13720_v15, %v6161_v39  ;;  %v22859_v10 = vcombine.low %v18817_v27, %v18828_v61  ;;  %v22860_v62 = vcombine.low %v18848_v3, %v18855_v18  ;;  %v13604_v39 = vld [vmem:[#allocation2 + $0x19c] sm:$0x7] }
 0x1ce   : > { %22857 = vst [vmem:[#allocation57_spill] sm:$0xff] %v19211_v12  ;;  %v15430_v7 = vpop.f32.mrf.mxu0  ;;  %v19228_v22 = vsel %vm18292_vm8, %v6163_v55, %v6164_v59  ;;  %v5640_v31 = vrot.slane %v5638_v11, 4  ;;  %v13721_v9 = vrot.slane %v13687_v49, 11  ;;  %v6168_v15 = vrot.slane %v13688_v28, 7  ;;  %v22862_v40 = vld [vmem:[#allocation63_spill] sm:$0xff]  ;;  %v2061_v49 = vpop.f32.mrf.mxu1 }
 0x1cf   : > { %v19230_v16 = vadd.f32 %v2578_v41, %v2113_v14  ;;  %v2118_v4 = vadd.f32 %v15382_v57, %v22862_v40  ;;  %v22863_v27 = vcombine.low %v18866_v45, %v18870_v63  ;;  %v22864_v18 = vcombine.low %v18885_v36, %v18899_v2  ;;  %v13690_v59 = vld [vmem:[#allocation2 + $0x2d8] sm:$0x8]  ;;  %v13691_v55 = vld [vmem:[#allocation2 + $0x2dc] sm:$0xf]  ;;  %v13692_v36 = vld [vmem:[#allocation2 + $0x2e0] sm:$0x7] }
 0x1d0   : > { %15669 = vmatmul.mubr.bf16.gmra.mxu1 %v22859_v10  ;;  %15717 = vmatmul.mubr.bf16.gmra.mxu0 %v22860_v62  ;;  %v6171_v3 = vrot.slane %v13689_v17, 7  ;;  %v2591_v28 = vpop.f32.mrf.mxu0  ;;  %v19243_v41 = vsel %vm18292_vm8, %v13633_v38, %v5638_v11  ;;  %v19247_v45 = vsel %vm18292_vm8, %v5640_v31, %v5641_v44  ;;  %v6170_v63 = vrot.slane %v6168_v15, 4  ;;  %v13605_v2 = vld [vmem:[#allocation2 + $0x1b0] sm:$0x8]  ;;  %v22866_v10 = vld [vmem:[#allocation33_spill] sm:$0xff]  ;;  %v15383_v38 = vpop.f32.mrf.mxu1 }
 0x1d1   : > { %22861 = vst [vmem:[#allocation48_spill] sm:$0xff] %v19230_v16  ;;  %15672 = vmatprep.mubr.bf16.mxu1 %v22863_v27  ;;  %15720 = vmatprep.mubr.bf16.mxu0 %v22864_v18  ;;  %v13634_v14 = vrot.slane %v13602_v1, 11  ;;  %v19249_v57 = vadd.f32 %v15430_v7, %v2118_v4  ;;  %v2116_v17 = vadd.f32 %v2061_v49, %v22866_v10  ;;  %v5645_v40 = vrot.slane %v13603_v42, 7  ;;  %v13606_v27 = vld [vmem:[#allocation2 + $0x1b4] sm:$0xf] }
 0x1d2   : > { %v13607_v18 = vld [vmem:[#allocation2 + $0x1b8] sm:$0x7]  ;;  %v15431_v11 = vpop.f32.mrf.mxu0  ;;  %v19256_v44 = vsel %vm18292_vm8, %v13721_v9, %v6168_v15  ;;  %v5648_v31 = vrot.slane %v13604_v39, 7  ;;  %v13722_v1 = vrot.slane %v13690_v59, 11  ;;  %v6175_v61 = vrot.slane %v13691_v55, 7  ;;  %v2064_v10 = vpop.f32.mrf.mxu1 }
 0x1d3   : > { %22865 = vst [vmem:[#allocation51_spill] sm:$0xff] %v19249_v57  ;;  %v19258_v16 = vadd.f32 %v2591_v28, %v2116_v17  ;;  %v22868_v4 = vld [vmem:[#allocation62_spill] sm:$0xff]  ;;  %v19265_v42 = vsel %vm18292_vm8, %v6170_v63, %v6171_v3  ;;  %v19269_v9 = vsel %vm18292_vm8, %v13634_v14, %v5645_v40  ;;  %v5647_v15 = vrot.slane %v5645_v40, 4  ;;  %v22870_v17 = vld [vmem:[#allocation67_spill] sm:$0xff] }
 0x1d4   : > { %v2119_v7 = vadd.f32 %v15383_v38, %v22868_v4  ;;  %v2594_v62 = vpop.f32.mrf.mxu0  ;;  %v6177_v39 = vrot.slane %v6175_v61, 4  ;;  %v6178_v59 = vrot.slane %v13692_v36, 7  ;;  %v13693_v55 = vld [vmem:[#allocation2 + $0x2f4] sm:$0x8]  ;;  %v2117_v38 = vadd.f32 %v2064_v10, %v22870_v17  ;;  %v13695_v57 = vld [vmem:[#allocation2 + $0x2fc] sm:$0x7]  ;;  %v15386_v3 = vpop.f32.mrf.mxu1 }
 0x1d5   : > { %22867 = vst [vmem:[#allocation53_spill] sm:$0xff] %v19258_v16  ;;  %v13635_v4 = vrot.slane %v13605_v2, 11  ;;  %v5652_v49 = vrot.slane %v13606_v27, 7  ;;  %v13694_v16 = vld [vmem:[#allocation2 + $0x2f8] sm:$0xf]  ;;  %v22871_v12 = vcombine.low %v18913_v13, %v18923_v6  ;;  %v22872_v14 = vcombine.low %v18930_v33, %v18950_v56  ;;  %v22874_v13 = vld [vmem:[#allocation52_spill] sm:$0xff] }
 0x1d6   : > { %v19271_v28 = vadd.f32 %v15431_v11, %v2119_v7  ;;  %v15434_v63 = vpop.f32.mrf.mxu0  ;;  %v19282_v36 = vsel %vm18292_vm8, %v5647_v15, %v5648_v31  ;;  %v19286_v2 = vsel %vm18292_vm8, %v13722_v1, %v6175_v61  ;;  %v19290_v40 = vsel %vm18292_vm8, %v6177_v39, %v6178_v59  ;;  %v13608_v31 = vld [vmem:[#allocation2 + $0x1cc] sm:$0x8]  ;;  %v13609_v1 = vld [vmem:[#allocation2 + $0x1d0] sm:$0xf]  ;;  %v2077_v7 = vpop.f32.mrf.mxu1 }
 0x1d7   : > { %v5655_v27 = vrot.slane %v13607_v18, 7  ;;  %v19292_v11 = vadd.f32 %v2594_v62, %v2117_v38  ;;  %v2122_v6 = vadd.f32 %v15386_v3, %v22874_v13  ;;  %v22875_v33 = vcombine.low %v18971_v48, %v18975_v47  ;;  %v13610_v48 = vld [vmem:[#allocation2 + $0x1d4] sm:$0x7]  ;;  %v13696_v47 = vld [vmem:[#allocation2 + $0x310] sm:$0x8] }
 0x1d8   : > { %22869 = vst [vmem:[#allocation50_spill] sm:$0xff] %v19271_v28  ;;  %15673 = vmatmul.mubr.bf16.gmra.mxu1 %v22871_v12  ;;  %15721 = vmatmul.mubr.bf16.gmra.mxu0 %v22872_v14  ;;  %v22876_v56 = vcombine.low %v18986_v25, %v18994_v19  ;;  %v5654_v12 = vrot.slane %v5652_v49, 4  ;;  %v13723_v61 = vrot.slane %v13693_v55, 11  ;;  %v2607_v10 = vpop.f32.mrf.mxu0  ;;  %v6182_v15 = vrot.slane %v13694_v16, 7  ;;  %v22878_v25 = vld [vmem:[#allocation54_spill] sm:$0xff]  ;;  %v15387_v16 = vpop.f32.mrf.mxu1 }
 0x1d9   : > { %22873 = vst [vmem:[#allocation31_spill] sm:$0xff] %v19292_v11  ;;  %15740 = vmatprep.mubr.bf16.mxu1 %v22875_v33  ;;  %v6185_v39 = vrot.slane %v13695_v57, 7  ;;  %v19305_v59 = vadd.f32 %v15434_v63, %v2122_v6  ;;  %v2120_v19 = vadd.f32 %v2077_v7, %v22878_v25  ;;  %v19312_v17 = vsel %vm18292_vm8, %v13635_v4, %v5652_v49  ;;  %v13697_v38 = vld [vmem:[#allocation2 + $0x314] sm:$0xf]  ;;  %v19314_v3 = vld [vmem:[#allocation2 + $0x318] sm:$0x7] }
 0x1da   : > { %15788 = vmatprep.mubr.bf16.mxu0 %v22876_v56  ;;  %v19316_v14 = vld [vmem:[#allocation2 + $0x1e8] sm:$0x8]  ;;  %v15435_v57 = vpop.f32.mrf.mxu0  ;;  %v19320_v63 = vsel %vm18292_vm8, %v5654_v12, %v5655_v27  ;;  %v6184_v13 = vrot.slane %v6182_v15, 4  ;;  %v13636_v6 = vrot.slane %v13608_v31, 11  ;;  %v5659_v33 = vrot.slane %v13609_v1, 7  ;;  %v22880_v25 = vld [vmem:[#allocation70_spill] sm:$0xff]  ;;  %v2080_v62 = vpop.f32.mrf.mxu1 }
 0x1db   : > { %22877 = vst [vmem:[#allocation37_spill] sm:$0xff] %v19305_v59  ;;  %v13612_v56 = vld [vmem:[#allocation2 + $0x1ec] sm:$0xf]  ;;  %v19322_v7 = vadd.f32 %v2607_v10, %v2120_v19  ;;  %v2123_v49 = vadd.f32 %v15387_v16, %v22880_v25  ;;  %v19327_v4 = vsel %vm18292_vm8, %v13723_v61, %v6182_v15  ;;  %v5662_v55 = vrot.slane %v13610_v48, 7  ;;  %v19329_v18 = vld [vmem:[#allocation2 + $0x1f0] sm:$0x7] }
 0x1dc   : > { %v2610_v59 = vpop.f32.mrf.mxu0  ;;  %v16649_v11 = vld [vmem:[#allocation4 + $0x370] sm:$0xff]   ;;  %v19333_v27 = vsel %vm18292_vm8, %v6184_v13, %v6185_v39  ;;  %v5661_v12 = vrot.slane %v5659_v33, 4  ;;  %v13724_v31 = vrot.slane %v13696_v47, 11  ;;  %v6189_v1 = vrot.slane %v13697_v38, 7  ;;  %v22882_v19 = vld [vmem:[#allocation71_spill] sm:$0xff]  ;;  %v15454_v28 = vpop.f32.mrf.mxu1 }
 0x1dd   : > { %22879 = vst [vmem:[#allocation36_spill] sm:$0xff] %v19322_v7  ;;  %v19335_v10 = vadd.f32 %v15435_v57, %v2123_v49  ;;  %v2121_v16 = vadd.f32 %v2080_v62, %v22882_v19  ;;  %v16650_v25 = vld [vmem:[#allocation4 + $0x3b0] sm:$0xff]   ;;  %v6192_v15 = vrot.slane %v19314_v3, 7  ;;  %v13699_v48 = vld [vmem:[#allocation2 + $0x32c] sm:$0x8]  ;;  %v22883_v39 = vcombine.low %v19004_v8, %v19014_v29  ;;  %v22886_v29 = vld [vmem:[#allocation59_spill] sm:$0xff] }
 0x1de   : > { %v13700_v7 = vld [vmem:[#allocation2 + $0x330] sm:$0xf]  ;;  %v15502_v34 = vpop.f32.mrf.mxu0  ;;  %v22884_v47 = vcombine.low %v19035_v20, %v19049_v43  ;;  %v19351_v38 = vsel %vm18292_vm8, %v13636_v6, %v5659_v33  ;;  %v6191_v3 = vrot.slane %v6189_v1, 4  ;;  %v13637_v57 = vrot.slane %v19316_v14, 11  ;;  %v19354_v13 = vld [vmem:[#allocation2 + $0x334] sm:$0x7] }
 0x1df   : > { %22881 = vst [vmem:[#allocation39_spill] sm:$0xff] %v19335_v10  ;;  %v19356_v49 = vld [vmem:[#allocation2 + $0x204] sm:$0x8]  ;;  %v19358_v8 = vadd.f32 %v2610_v59, %v2121_v16  ;;  %v2978_v19 = vadd.f32 %v15454_v28, %v22886_v29  ;;  %v19363_v20 = vld [vmem:[#allocation4 + $0x368] sm:$0xff]   ;;  %v19367_v43 = vsel %vm18292_vm8, %v5661_v12, %v5662_v55  ;;  %v5666_v6 = vrot.slane %v13612_v56, 7 }
 0x1e0   : > { %15741 = vmatmul.mubr.bf16.vlgmr.msra.gmra.mxu1 %v22883_v39  ;;  %15789 = vmatmul.mubr.bf16.vlgmr.msra.gmra.mxu0 %v22884_v47  ;;  %v19369_v14 = vld [vmem:[#allocation2 + $0x208] sm:$0xf]  ;;  %v19371_v33 = vld [vmem:[#allocation2 + $0x20c] sm:$0x7]  ;;  %v2849_v39 = vpop.f32.mrf.mxu1  ;;  %v3382_v59 = vpop.f32.mrf.mxu0  ;;  %v19381_v55 = vsel %vm18292_vm8, %v13724_v31, %v6189_v1  ;;  %v5669_v56 = vrot.slane %v19329_v18, 7  ;;  %v13725_v12 = vrot.slane %v13699_v48, 11 }
 0x1e1   : > { %22885 = vst [vmem:[#allocation66_spill] sm:$0xff] %v19358_v8  ;;  %15821 = vmatpush3.bf16.msra.mxu1 %v19051_v0  ;;  %15869 = vmatpush3.bf16.msra.mxu0 %v19067_v23  ;;  %v22887_v16 = vld [vmem:[#allocation25_spill] sm:$0xff]  ;;  %v22889_v0 = vld [vmem:[#allocation40_spill] sm:$0xff]  ;;  %v6196_v62 = vrot.slane %v13700_v7, 7  ;;  %v19386_v8 = vadd.f32 %v15502_v34, %v2978_v19  ;;  %v19401_v34 = vsel %vm18292_vm8, %v13637_v57, %v5666_v6  ;;  %v6199_v48 = vrot.slane %v19354_v13, 7 }
 0x1e2   : > { %v22888_v28 = vcombine.low %v19060_v24, %v22887_v16  ;;  %v22890_v47 = vld [vmem:[#allocation76_spill] sm:$0xff]  ;;  %v19384_v61 = vld [vmem:[#allocation2 + $0x348] sm:$0x8]  ;;  %15822 = vmatprep.subr.bf16.mxu1 %v16649_v11  ;;  %15870 = vmatprep.subr.bf16.mxu0 %v16650_v25  ;;  %v19391_v16 = vsel %vm18292_vm8, %v6191_v3, %v6192_v15  ;;  %v19395_v31 = vld [vmem:[#allocation2 + $0x350] sm:$0x7]  ;;  %v15455_v18 = vpop.f32.mrf.mxu1  ;;  %v15503_v1 = vpop.f32.mrf.mxu0  ;;  %v13638_v57 = vrot.slane %v19356_v49, 11 }
 0x1e3   : > { %v22891_v23 = vcombine.low %v22889_v0, %v22890_v47  ;;  %v16652_v29 = vld [vmem:[#allocation4 + $0x3a8] sm:$0xff]   ;;  %22892 = vst [vmem:[#allocation43_spill] sm:$0xff] %v19386_v8  ;;  %22894 = vst [vmem:[#allocation23_spill] sm:$0xff] %v19391_v16  ;;  %v19404_v19 = vld [vmem:[#allocation2 + $0x220] sm:$0x8] }
 0x1e4   : > { %15744 = vmatprep.mubr.bf16.mxu1 %v22888_v28  ;;  %v22893_v10 = vld [vmem:[#allocation28_spill] sm:$0xff]  ;;  %v5668_v28 = vrot.slane %v5666_v6, 4  ;;  %v19393_v0 = vld [vmem:[#allocation2 + $0x34c] sm:$0xf]  ;;  %v2852_v6 = vpop.f32.mrf.mxu1  ;;  %v3385_v7 = vpop.f32.mrf.mxu0 }
 0x1e5   : > { %15792 = vmatprep.mubr.bf16.mxu0 %v22891_v23  ;;  %v2976_v24 = vadd.f32 %v2849_v39, %v22893_v10  ;;  %v6198_v10 = vrot.slane %v6196_v62, 4  ;;  %v19406_v15 = vld [vmem:[#allocation2 + $0x224] sm:$0xf]  ;;  %v22896_v39 = vld [vmem:[#allocation34_spill] sm:$0xff]  ;;  %15823 = vmatpush3.bf16.msra.mxu1 %v16649_v11  ;;  %v5673_v11 = vrot.slane %v19369_v14, 7  ;;  %v22901_v14 = vcombine.low %v19123_v46, %v19129_v5 }
 0x1e6   : > { %v2979_v47 = vadd.f32 %v15455_v18, %v22896_v39  ;;  %15871 = vmatpush3.bf16.msra.mxu0 %v16650_v25  ;;  %v19413_v23 = vsel %vm18292_vm8, %v5668_v28, %v5669_v56  ;;  %15824 = vmatprep.subr.bf16.mxu1 %v19363_v20  ;;  %v5676_v25 = vrot.slane %v19371_v33, 7  ;;  %v16653_v28 = vld [vmem:[#allocation4 + $0x360] sm:$0xff]   ;;  %v13619_v13 = vld [vmem:[#allocation2 + $0x228] sm:$0x7]  ;;  %v15458_v8 = vpop.f32.mrf.mxu1  ;;  %v15506_v58 = vpop.f32.mrf.mxu0  ;;  %v22904_v46 = vcombine.low %v19156_v32, %v19160_v53 }
 0x1e7   : > { %v19408_v3 = vadd.f32 %v3382_v59, %v2976_v24  ;;  %15872 = vmatprep.subr.bf16.mxu0 %v16652_v29  ;;  %v19421_v59 = vsel %vm18292_vm8, %v13725_v12, %v6196_v62  ;;  %v22897_v24 = vld [vmem:[#allocation30_spill] sm:$0xff]  ;;  %v16654_v18 = vld [vmem:[#allocation4 + $0x3a0] sm:$0xff]   ;;  %v19439_v33 = vsel %vm18292_vm8, %v6198_v10, %v6199_v48  ;;  %v13639_v5 = vrot.slane %v19404_v19, 11 }
 0x1e8   : > { %v19425_v56 = vadd.f32 %v15503_v1, %v2979_v47  ;;  %v2977_v49 = vadd.f32 %v2852_v6, %v22897_v24  ;;  %v22898_v62 = vld [vmem:[#allocation38_spill] sm:$0xff]  ;;  %15793 = vmatmul.mubr.bf16.gmra.mxu0 %v22901_v14  ;;  %v5675_v1 = vrot.slane %v5673_v11, 4  ;;  %v6203_v47 = vrot.slane %v19393_v0, 7  ;;  %v22902_v24 = vld [vmem:[#allocation64_spill] sm:$0xff] }
 0x1e9   : > { %22895 = vst [vmem:[#allocation60_spill] sm:$0xff] %v19408_v3  ;;  %v13726_v3 = vrot.slane %v19384_v61, 11  ;;  %v22899_v12 = vld [vmem:[#allocation58_spill] sm:$0xff]  ;;  %v6206_v61 = vrot.slane %v19395_v31, 7  ;;  %v2982_v39 = vadd.f32 %v15458_v8, %v22902_v24  ;;  %15796 = vmatprep.mubr.bf16.mxu0 %v22904_v46  ;;  %v5680_v10 = vrot.slane %v19406_v15, 7  ;;  %v3398_v31 = vpop.f32.mrf.mxu0  ;;  %15825 = vmatpush3.bf16.msra.mxu1 %v19363_v20  ;;  %v22906_v15 = vld [vmem:[#allocation65_spill] sm:$0xff] }
 0x1ea   : > { %v22900_v16 = vcombine.low %v22898_v62, %v22899_v12  ;;  %v19443_v6 = vadd.f32 %v3385_v7, %v2977_v49  ;;  %v13705_v48 = vld [vmem:[#allocation2 + $0x364] sm:$0x8]  ;;  %v13706_v0 = vld [vmem:[#allocation2 + $0x368] sm:$0xf]  ;;  %v2865_v62 = vpop.f32.mrf.mxu1  ;;  %15873 = vmatpush3.bf16.msra.mxu0 %v16652_v29  ;;  %v19455_v8 = vld [vmem:[#allocation4 + $0x358] sm:$0xff]   ;;  %v6205_v32 = vrot.slane %v6203_v47, 4  ;;  %15826 = vmatprep.subr.bf16.mxu1 %v16653_v28 }
 0x1eb   : > { %v5683_v53 = vrot.slane %v13619_v13, 7  ;;  %v13707_v7 = vld [vmem:[#allocation2 + $0x36c] sm:$0x7]  ;;  %v19465_v19 = vadd.f32 %v15506_v58, %v2982_v39  ;;  %v2980_v49 = vadd.f32 %v2865_v62, %v22906_v15  ;;  %15874 = vmatprep.subr.bf16.mxu0 %v16654_v18  ;;  %v16656_v20 = vld [vmem:[#allocation4 + $0x398] sm:$0xff]   ;;  %v19470_v29 = vsel %vm18292_vm8, %v13726_v3, %v6203_v47  ;;  %v13621_v12 = vld [vmem:[#allocation2 + $0x240] sm:$0xf] }
 0x1ec   : > { %15745 = vmatmul.mubr.bf16.gmra.mxu1 %v22900_v16  ;;  %v22903_v16 = vcombine.low %v19133_v51, %v19140_v52  ;;  %v19459_v51 = vsel %vm18292_vm8, %v13638_v57, %v5673_v11  ;;  %v19463_v52 = vsel %vm18292_vm8, %v5675_v1, %v5676_v25  ;;  %v5682_v57 = vrot.slane %v5680_v10, 4  ;;  %v13620_v11 = vld [vmem:[#allocation2 + $0x23c] sm:$0x8]  ;;  %v15459_v14 = vpop.f32.mrf.mxu1  ;;  %v15507_v25 = vpop.f32.mrf.mxu0  ;;  %v13622_v24 = vld [vmem:[#allocation2 + $0x244] sm:$0x7] }
 0x1ed   : > { %22905 = vst [vmem:[#allocation61_spill] sm:$0xff] %v19465_v19  ;;  %v19476_v58 = vsel %vm18292_vm8, %v6205_v32, %v6206_v61  ;;  %v13727_v39 = vrot.slane %v13705_v48, 11  ;;  %v6210_v1 = vrot.slane %v13706_v0, 7  ;;  %v19480_v46 = vadd.f32 %v3398_v31, %v2980_v49  ;;  %v22908_v3 = vld [vmem:[#allocation68_spill] sm:$0xff]  ;;  %15827 = vmatpush3.bf16.msra.mxu1 %v16653_v28 }
 0x1ee   : > { %15748 = vmatprep.mubr.bf16.mxu1 %v22903_v16  ;;  %v19478_v16 = vld [vmem:[#allocation2 + $0x380] sm:$0x8]  ;;  %v2983_v47 = vadd.f32 %v15459_v14, %v22908_v3  ;;  %v19487_v15 = vsel %vm18292_vm8, %v13639_v5, %v5680_v10  ;;  %v13709_v13 = vld [vmem:[#allocation2 + $0x384] sm:$0xf]  ;;  %v2868_v19 = vpop.f32.mrf.mxu1  ;;  %v3401_v61 = vpop.f32.mrf.mxu0  ;;  %15875 = vmatpush3.bf16.msra.mxu0 %v16654_v18  ;;  %v19493_v0 = vsel %vm18292_vm8, %v5682_v57, %v5683_v53  ;;  %v6213_v32 = vrot.slane %v13707_v7, 7  ;;  %v16657_v5 = vld [vmem:[#allocation4 + $0x350] sm:$0xff]  }
 0x1ef   : > { %22907 = vst [vmem:[#allocation69_spill] sm:$0xff] %v19480_v46  ;;  %v6212_v31 = vrot.slane %v6210_v1, 4  ;;  %v22910_v14 = vld [vmem:[#allocation32_spill] sm:$0xff]  ;;  %15828 = vmatprep.subr.bf16.mxu1 %v19455_v8  ;;  %15876 = vmatprep.subr.bf16.mxu0 %v16656_v20  ;;  %v16658_v10 = vld [vmem:[#allocation4 + $0x390] sm:$0xff]   ;;  %v13640_v28 = vrot.slane %v13620_v11, 11  ;;  %v5687_v18 = vrot.slane %v13621_v12, 7  ;;  %v22911_v53 = vcombine.low %v19170_v37, %v19185_v21 }
 0x1f0   : > { %v19495_v49 = vadd.f32 %v15507_v25, %v2983_v47  ;;  %v2981_v3 = vadd.f32 %v2868_v19, %v22910_v14  ;;  %v13710_v62 = vld [vmem:[#allocation2 + $0x388] sm:$0x7]  ;;  %v15462_v46 = vpop.f32.mrf.mxu1  ;;  %v15510_v48 = vpop.f32.mrf.mxu0  ;;  %v22912_v7 = vcombine.low %v19189_v30, %v19196_v50  ;;  %v19507_v19 = vsel %vm18292_vm8, %v13727_v39, %v6210_v1  ;;  %v13623_v12 = vld [vmem:[#allocation2 + $0x258] sm:$0x8]  ;;  %v13624_v39 = vld [vmem:[#allocation2 + $0x25c] sm:$0xf] }
 0x1f1   : > { %v5690_v57 = vrot.slane %v13622_v24, 7  ;;  %v13728_v25 = vrot.slane %v19478_v16, 11  ;;  %v6217_v11 = vrot.slane %v13709_v13, 7  ;;  %v22914_v14 = vld [vmem:[#allocation75_spill] sm:$0xff]  ;;  %v22915_v37 = vcombine.low %v19205_v54, %v19209_v26  ;;  %v19523_v50 = vld [vmem:[#allocation4 + $0x348] sm:$0xff]   ;;  %15829 = vmatpush3.bf16.msra.mxu1 %v19455_v8 }
 0x1f2   : > { %22909 = vst [vmem:[#allocation49_spill] sm:$0xff] %v19495_v49  ;;  %15797 = vmatmul.mubr.bf16.gmra.mxu0 %v22912_v7  ;;  %v19510_v47 = vadd.f32 %v3401_v61, %v2981_v3  ;;  %v2986_v49 = vadd.f32 %v15462_v46, %v22914_v14  ;;  %v22916_v21 = vcombine.low %v19218_v60, %v19228_v22  ;;  %v5689_v13 = vrot.slane %v5687_v18, 4  ;;  %v13625_v1 = vld [vmem:[#allocation2 + $0x260] sm:$0x7]  ;;  %v2881_v24 = vpop.f32.mrf.mxu1  ;;  %v3414_v16 = vpop.f32.mrf.mxu0  ;;  %v19532_v46 = vld [vmem:[#allocation2 + $0x39c] sm:$0x8] }
 0x1f3   : > { %v19521_v30 = vsel %vm18292_vm8, %v6212_v31, %v6213_v32  ;;  %15877 = vmatpush3.bf16.msra.mxu0 %v16656_v20  ;;  %v19530_v26 = vsel %vm18292_vm8, %v13640_v28, %v5687_v18  ;;  %v6219_v60 = vrot.slane %v6217_v11, 4  ;;  %v6220_v22 = vrot.slane %v13710_v62, 7  ;;  %v13712_v61 = vld [vmem:[#allocation2 + $0x3a0] sm:$0xf]  ;;  %15830 = vmatprep.subr.bf16.mxu1 %v16657_v5  ;;  %v16660_v8 = vld [vmem:[#allocation4 + $0x388] sm:$0xff]  }
 0x1f4   : > { %15749 = vmatmul.mubr.bf16.gmra.mxu1 %v22911_v53  ;;  %22913 = vst [vmem:[#allocation46_spill] sm:$0xff] %v19510_v47  ;;  %15800 = vmatprep.mubr.bf16.mxu0 %v22916_v21  ;;  %v19534_v31 = vadd.f32 %v15510_v48, %v2986_v49  ;;  %v22918_v32 = vld [vmem:[#allocation72_spill] sm:$0xff]  ;;  %v19539_v20 = vsel %vm18292_vm8, %v5689_v13, %v5690_v57  ;;  %v13641_v53 = vrot.slane %v13623_v12, 11  ;;  %v15463_v18 = vpop.f32.mrf.mxu1  ;;  %v15511_v62 = vpop.f32.mrf.mxu0  ;;  %v5694_v49 = vrot.slane %v13624_v39, 7  ;;  %v22920_v12 = vld [vmem:[#allocation73_spill] sm:$0xff] }
 0x1f5   : > { %15752 = vmatprep.mubr.bf16.mxu1 %v22915_v37  ;;  %v2984_v3 = vadd.f32 %v2881_v24, %v22918_v32  ;;  %15878 = vmatprep.subr.bf16.mxu0 %v16658_v10  ;;  %v13713_v7 = vld [vmem:[#allocation2 + $0x3a4] sm:$0x7]  ;;  %v19541_v28 = vld [vmem:[#allocation2 + $0x204] sm:$0x8]  ;;  %v19547_v48 = vsel %vm18292_vm8, %v13728_v25, %v6217_v11  ;;  %v5697_v37 = vrot.slane %v13625_v1, 7  ;;  %v2987_v13 = vadd.f32 %v15463_v18, %v22920_v12 }
 0x1f6   : > { %22917 = vst [vmem:[#allocation24_spill] sm:$0xff] %v19534_v31  ;;  %v19549_v21 = vld [vmem:[#allocation2 + $0x208] sm:$0xf]  ;;  %v19551_v24 = vld [vmem:[#allocation2 + $0x20c] sm:$0x7]  ;;  %v19560_v14 = vsel %vm18292_vm8, %v6219_v60, %v6220_v22  ;;  %v19562_v54 = vld [vmem:[#allocation4 + $0x340] sm:$0xff]   ;;  %v2884_v39 = vpop.f32.mrf.mxu1  ;;  %v3417_v1 = vpop.f32.mrf.mxu0  ;;  %15831 = vmatpush3.bf16.msra.mxu1 %v16657_v5  ;;  %v19575_v22 = vsel %vm18292_vm8, %v13641_v53, %v5694_v49 }
 0x1f7   : > { %v19553_v57 = vadd.f32 %v3414_v16, %v2984_v3  ;;  %v19564_v25 = vld [vmem:[#allocation2 + $0x348] sm:$0x8]  ;;  %v19566_v11 = vld [vmem:[#allocation2 + $0x34c] sm:$0xf]  ;;  %15879 = vmatpush3.bf16.msra.mxu0 %v16658_v10  ;;  %v5696_v16 = vrot.slane %v5694_v49, 4  ;;  %v13729_v3 = vrot.slane %v19532_v46, 11  ;;  %v19569_v32 = vadd.f32 %v15511_v62, %v2987_v13  ;;  %15832 = vmatprep.subr.bf16.mxu1 %v19523_v50 }
 0x1f8   : > { %v6224_v18 = vrot.slane %v13712_v61, 7  ;;  %v6227_v12 = vrot.slane %v13713_v7, 7  ;;  %15880 = vmatprep.subr.bf16.mxu0 %v16660_v8  ;;  %v16662_v31 = vld [vmem:[#allocation4 + $0x380] sm:$0xff]   ;;  %v6649_v5 = vrot.slane %v19549_v21, 7  ;;  %v15466_v10 = vpop.f32.mrf.mxu1  ;;  %v15514_v47 = vpop.f32.mrf.mxu0  ;;  %v22922_v46 = vcombine.low %v19243_v41, %v19247_v45  ;;  %v13844_v21 = vld [vmem:[#allocation2 + $0x350] sm:$0x7] }
 0x1f9   : > { %22919 = vst [vmem:[#allocation26_spill] sm:$0xff] %v19553_v57  ;;  %v22921_v57 = vld [vmem:[#allocation74_spill] sm:$0xff]  ;;  %v22923_v61 = vcombine.low %v19256_v44, %v19265_v42  ;;  %v19586_v7 = vsel %vm18292_vm8, %v5696_v16, %v5697_v37  ;;  %v13802_v53 = vrot.slane %v19541_v28, 11  ;;  %v6652_v49 = vrot.slane %v19551_v24, 7  ;;  %v13757_v28 = vld [vmem:[#allocation2 + $0x220] sm:$0x8] }
 0x1fa   : > { %v2985_v60 = vadd.f32 %v2884_v39, %v22921_v57  ;;  %v6226_v62 = vrot.slane %v6224_v18, 4  ;;  %v22924_v13 = vld [vmem:[#allocation22_spill] sm:$0xff]  ;;  %v22925_v41 = vcombine.low %v19269_v9, %v19282_v36  ;;  %v22926_v45 = vcombine.low %v19286_v2, %v19290_v40  ;;  %v2897_v37 = vpop.f32.mrf.mxu1  ;;  %v3430_v24 = vpop.f32.mrf.mxu0  ;;  %15833 = vmatpush3.bf16.msra.mxu1 %v19523_v50  ;;  %v13758_v40 = vld [vmem:[#allocation2 + $0x224] sm:$0xf]  ;;  %v13759_v16 = vld [vmem:[#allocation2 + $0x228] sm:$0x7] }
 0x1fb   : > { %15801 = vmatmul.mubr.bf16.gmra.mxu0 %v22923_v61  ;;  %v2990_v39 = vadd.f32 %v15466_v10, %v22924_v13  ;;  %v6651_v42 = vrot.slane %v6649_v5, 4  ;;  %v13890_v36 = vrot.slane %v19564_v25, 11  ;;  %v7182_v2 = vrot.slane %v19566_v11, 7  ;;  %v22928_v10 = vld [vmem:[#allocation47_spill] sm:$0xff]  ;;  %15834 = vmatprep.subr.bf16.mxu1 %v19562_v54 }
 0x1fc   : > { %15753 = vmatmul.mubr.bf16.gmra.mxu1 %v22922_v46  ;;  %v19590_v57 = vadd.f32 %v3417_v1, %v2985_v60  ;;  %15804 = vmatprep.mubr.bf16.mxu0 %v22926_v45  ;;  %v19604_v1 = vsel %vm18292_vm8, %v13729_v3, %v6224_v18  ;;  %v19608_v9 = vsel %vm18292_vm8, %v6226_v62, %v6227_v12  ;;  %v13845_v3 = vld [vmem:[#allocation2 + $0x364] sm:$0x8]  ;;  %v13846_v18 = vld [vmem:[#allocation2 + $0x368] sm:$0xf]  ;;  %v19618_v12 = vld [vmem:[#allocation4 + $0x3f8] sm:$0xff]   ;;  %v15467_v25 = vpop.f32.mrf.mxu1  ;;  %v15515_v61 = vpop.f32.mrf.mxu0  ;;  %v13803_v13 = vrot.slane %v13757_v28, 11 }
 0x1fd   : > { %15756 = vmatprep.mubr.bf16.mxu1 %v22925_v41  ;;  %15881 = vmatpush3.bf16.msra.mxu0 %v16660_v8  ;;  %v19612_v60 = vadd.f32 %v15514_v47, %v2990_v39  ;;  %v2988_v46 = vadd.f32 %v2897_v37, %v22928_v10  ;;  %v7185_v8 = vrot.slane %v13844_v21, 7  ;;  %v19622_v11 = vsel %vm18292_vm8, %v13802_v53, %v6649_v5  ;;  %v13847_v39 = vld [vmem:[#allocation2 + $0x36c] sm:$0x7]  ;;  %v19628_v41 = vld [vmem:[#allocation2 + $0x23c] sm:$0x8] }
 0x1fe   : > { %15882 = vmatprep.subr.bf16.mxu0 %v16662_v31  ;;  %v19626_v47 = vsel %vm18292_vm8, %v6651_v42, %v6652_v49  ;;  %v7184_v62 = vrot.slane %v7182_v2, 4  ;;  %v22930_v45 = vld [vmem:[#allocation35_spill] sm:$0xff]  ;;  %v6656_v50 = vrot.slane %v13758_v40, 7  ;;  %v19635_v5 = vld [vmem:[#allocation2 + $0x244] sm:$0x7]  ;;  %v2900_v53 = vpop.f32.mrf.mxu1  ;;  %15835 = vmatpush3.bf16.msra.mxu1 %v19562_v54  ;;  %v19640_v49 = vsel %vm18292_vm8, %v13890_v36, %v7182_v2 }
 0x1ff   : > { %22927 = vst [vmem:[#allocation29_spill] sm:$0xff] %v19612_v60  ;;  %v19630_v21 = vadd.f32 %v3430_v24, %v2988_v46  ;;  %v2991_v37 = vadd.f32 %v15467_v25, %v22930_v45  ;;  %v13761_v44 = vld [vmem:[#allocation2 + $0x240] sm:$0xf]  ;;  %v3433_v60 = vpop.f32.mrf.mxu0  ;;  %v6659_v42 = vrot.slane %v13759_v16, 7  ;;  %v13891_v28 = vrot.slane %v13845_v3, 11  ;;  %v19642_v46 = vld [vmem:[#allocation4 + $0x438] sm:$0xff]   ;;  %15916 = vmatprep.subr.bf16.mxu1 %v19618_v12 }
 0x200   : > { %v7189_v24 = vrot.slane %v13846_v18, 7  ;;  %v22932_v40 = vld [vmem:[#allocation44_spill] sm:$0xff]  ;;  %v19651_v54 = vsel %vm18292_vm8, %v7184_v62, %v7185_v8  ;;  %v22933_v2 = vcombine.low %v19312_v17, %v19320_v63  ;;  %v22934_v16 = vcombine.low %v19327_v4, %v19333_v27  ;;  %v22938_v63 = vld [vmem:[#allocation23_spill] sm:$0xff] }
 0x201   : > { %22929 = vst [vmem:[#allocation63_spill] sm:$0xff] %v19630_v21  ;;  %15883 = vmatpush3.bf16.msra.mxu0 %v16662_v31  ;;  %v19644_v25 = vadd.f32 %v15515_v61, %v2991_v37  ;;  %v2989_v45 = vadd.f32 %v2900_v53, %v22932_v40  ;;  %v15470_v31 = vpop.f32.mrf.mxu1  ;;  %v15518_v36 = vpop.f32.mrf.mxu0  ;;  %v19662_v3 = vsel %vm18292_vm8, %v13803_v13, %v6656_v50  ;;  %v6658_v18 = vrot.slane %v6656_v50, 4  ;;  %v13848_v62 = vld [vmem:[#allocation2 + $0x380] sm:$0x8]  ;;  %v22936_v53 = vld [vmem:[#allocation55_spill] sm:$0xff] }
 0x202   : > { %v7191_v61 = vrot.slane %v7189_v24, 4  ;;  %v7192_v8 = vrot.slane %v13847_v39, 7  ;;  %v2994_v40 = vadd.f32 %v15470_v31, %v22936_v53  ;;  %v22937_v17 = vcombine.low %v19351_v38, %v19367_v43  ;;  %v13850_v50 = vld [vmem:[#allocation2 + $0x388] sm:$0x7]  ;;  %15964 = vmatprep.subr.bf16.mxu0 %v19642_v46 }
 0x203   : > { %22931 = vst [vmem:[#allocation33_spill] sm:$0xff] %v19644_v25  ;;  %15805 = vmatmul.mubr.bf16.gmra.mxu0 %v22934_v16  ;;  %v19664_v37 = vadd.f32 %v3433_v60, %v2989_v45  ;;  %v22939_v4 = vcombine.low %v19381_v55, %v22938_v63  ;;  %v13804_v27 = vrot.slane %v19628_v41, 11  ;;  %v6663_v13 = vrot.slane %v13761_v44, 7  ;;  %v2913_v16 = vpop.f32.mrf.mxu1  ;;  %v3446_v39 = vpop.f32.mrf.mxu0  ;;  %v13763_v55 = vld [vmem:[#allocation2 + $0x258] sm:$0x8]  ;;  %v22941_v31 = vld [vmem:[#allocation56_spill] sm:$0xff] }
 0x204   : > { %15757 = vmatmul.mubr.bf16.gmra.mxu1 %v22933_v2  ;;  %v13849_v2 = vld [vmem:[#allocation2 + $0x384] sm:$0xf]  ;;  %v19678_v45 = vsel %vm18292_vm8, %v6658_v18, %v6659_v42  ;;  %v19682_v38 = vsel %vm18292_vm8, %v13891_v28, %v7189_v24  ;;  %v6666_v43 = vrot.slane %v19635_v5, 7  ;;  %v13764_v44 = vld [vmem:[#allocation2 + $0x25c] sm:$0xf]  ;;  %v19686_v41 = vadd.f32 %v15518_v36, %v2994_v40  ;;  %v22943_v40 = vld [vmem:[#allocation45_spill] sm:$0xff] }
 0x205   : > { %22935 = vst [vmem:[#allocation62_spill] sm:$0xff] %v19664_v37  ;;  %15760 = vmatprep.mubr.bf16.mxu1 %v22937_v17  ;;  %15808 = vmatprep.mubr.bf16.mxu0 %v22939_v4  ;;  %v2992_v53 = vadd.f32 %v2913_v16, %v22941_v31  ;;  %v19691_v17 = vsel %vm18292_vm8, %v7191_v61, %v7192_v8  ;;  %v13892_v42 = vrot.slane %v13848_v62, 11  ;;  %v13765_v18 = vld [vmem:[#allocation2 + $0x260] sm:$0x7]  ;;  %v13851_v63 = vld [vmem:[#allocation2 + $0x39c] sm:$0x8]  ;;  %v15471_v4 = vpop.f32.mrf.mxu1  ;;  %v15519_v28 = vpop.f32.mrf.mxu0 }
 0x206   : > { %22940 = vst [vmem:[#allocation67_spill] sm:$0xff] %v19686_v41  ;;  %v6665_v60 = vrot.slane %v6663_v13, 4  ;;  %v7196_v5 = vrot.slane %v13849_v2, 7  ;;  %v7199_v10 = vrot.slane %v13850_v50, 7  ;;  %v13852_v37 = vld [vmem:[#allocation2 + $0x3a0] sm:$0xf]  ;;  %v2995_v16 = vadd.f32 %v15471_v4, %v22943_v40 }
 0x207   : > { %v19695_v36 = vadd.f32 %v3446_v39, %v2992_v53  ;;  %v19700_v61 = vsel %vm18292_vm8, %v13804_v27, %v6663_v13  ;;  %v6670_v8 = vrot.slane %v13764_v44, 7  ;;  %v13853_v62 = vld [vmem:[#allocation2 + $0x3a4] sm:$0x7]  ;;  %v13766_v31 = vld [vmem:[#allocation2 + $0x274] sm:$0x8]  ;;  %v2916_v41 = vpop.f32.mrf.mxu1  ;;  %v3449_v25 = vpop.f32.mrf.mxu0  ;;  %v13805_v50 = vrot.slane %v13763_v55, 11 }
 0x208   : > { %v19704_v24 = vsel %vm18292_vm8, %v6665_v60, %v6666_v43  ;;  %v7198_v2 = vrot.slane %v7196_v5, 4  ;;  %v6673_v21 = vrot.slane %v13765_v18, 7  ;;  %v13767_v39 = vld [vmem:[#allocation2 + $0x278] sm:$0xf]  ;;  %v19706_v53 = vadd.f32 %v15519_v28, %v2995_v16  ;;  %v22945_v4 = vld [vmem:[#allocation41_spill] sm:$0xff] }
 0x209   : > { %22942 = vst [vmem:[#allocation52_spill] sm:$0xff] %v19695_v36  ;;  %v2993_v40 = vadd.f32 %v2916_v41, %v22945_v4  ;;  %v19713_v13 = vsel %vm18292_vm8, %v13892_v42, %v7196_v5  ;;  %v15474_v44 = vpop.f32.mrf.mxu1  ;;  %v15522_v36 = vpop.f32.mrf.mxu0  ;;  %v22946_v60 = vcombine.low %v19401_v34, %v19413_v23  ;;  %v22947_v43 = vcombine.low %v19421_v59, %v19439_v33  ;;  %v13768_v16 = vld [vmem:[#allocation2 + $0x27c] sm:$0x7]  ;;  %v22949_v5 = vld [vmem:[#allocation42_spill] sm:$0xff] }
 0x20a   : > { %22944 = vst [vmem:[#allocation54_spill] sm:$0xff] %v19706_v53  ;;  %v19723_v55 = vsel %vm18292_vm8, %v7198_v2, %v7199_v10  ;;  %v6672_v41 = vrot.slane %v6670_v8, 4  ;;  %v13893_v18 = vrot.slane %v13851_v63, 11  ;;  %v7203_v28 = vrot.slane %v13852_v37, 7  ;;  %v13854_v10 = vld [vmem:[#allocation2 + $0x3b8] sm:$0x8] }
 0x20b   : > { %15809 = vmatmul.mubr.bf16.gmra.mxu0 %v22947_v43  ;;  %v19725_v42 = vadd.f32 %v3449_v25, %v2993_v40  ;;  %v2998_v4 = vadd.f32 %v15474_v44, %v22949_v5  ;;  %v22950_v34 = vcombine.low %v19459_v51, %v19463_v52  ;;  %v22951_v23 = vcombine.low %v19470_v29, %v19476_v58  ;;  %v13855_v63 = vld [vmem:[#allocation2 + $0x3bc] sm:$0xf]  ;;  %v2929_v37 = vpop.f32.mrf.mxu1  ;;  %v3462_v2 = vpop.f32.mrf.mxu0  ;;  %v13856_v29 = vld [vmem:[#allocation2 + $0x3c0] sm:$0x7]  ;;  %v13769_v5 = vld [vmem:[#allocation2 + $0x290] sm:$0x8] }
 0x20c   : > { %15761 = vmatmul.mubr.bf16.gmra.mxu1 %v22946_v60  ;;  %v7206_v33 = vrot.slane %v13853_v62, 7  ;;  %v19738_v25 = vsel %vm18292_vm8, %v13805_v50, %v6670_v8  ;;  %v19742_v51 = vsel %vm18292_vm8, %v6672_v41, %v6673_v21  ;;  %v7205_v52 = vrot.slane %v7203_v28, 4  ;;  %v22953_v44 = vld [vmem:[#allocation27_spill] sm:$0xff]  ;;  %v13857_v62 = vld [vmem:[#allocation2 + $0x3d4] sm:$0x8] }
 0x20d   : > { %22948 = vst [vmem:[#allocation70_spill] sm:$0xff] %v19725_v42  ;;  %15764 = vmatprep.mubr.bf16.mxu1 %v22950_v34  ;;  %15812 = vmatprep.mubr.bf16.mxu0 %v22951_v23  ;;  %v13806_v40 = vrot.slane %v13766_v31, 11  ;;  %v19744_v58 = vadd.f32 %v15522_v36, %v2998_v4  ;;  %v2996_v60 = vadd.f32 %v2929_v37, %v22953_v44  ;;  %v6677_v43 = vrot.slane %v13767_v39, 7  ;;  %v13770_v34 = vld [vmem:[#allocation2 + $0x294] sm:$0xf]  ;;  %v15475_v23 = vpop.f32.mrf.mxu1  ;;  %v15523_v8 = vpop.f32.mrf.mxu0  ;;  %v22955_v4 = vld [vmem:[#allocation57_spill] sm:$0xff] }
 0x20e   : > { %v19751_v50 = vsel %vm18292_vm8, %v13893_v18, %v7203_v28  ;;  %v6680_v21 = vrot.slane %v13768_v16, 7  ;;  %v13894_v41 = vrot.slane %v13854_v10, 11  ;;  %v7210_v31 = vrot.slane %v13855_v63, 7  ;;  %v13771_v59 = vld [vmem:[#allocation2 + $0x298] sm:$0x7] }
 0x20f   : > { %22952 = vst [vmem:[#allocation71_spill] sm:$0xff] %v19744_v58  ;;  %v19753_v36 = vadd.f32 %v3462_v2, %v2996_v60  ;;  %v2999_v37 = vadd.f32 %v15475_v23, %v22955_v4  ;;  %v19760_v39 = vsel %vm18292_vm8, %v7205_v52, %v7206_v33  ;;  %v13858_v27 = vld [vmem:[#allocation2 + $0x3d8] sm:$0xf]  ;;  %v13859_v58 = vld [vmem:[#allocation2 + $0x3dc] sm:$0x7]  ;;  %v2932_v18 = vpop.f32.mrf.mxu1  ;;  %v3465_v28 = vpop.f32.mrf.mxu0  ;;  %v19764_v16 = vsel %vm18292_vm8, %v13806_v40, %v6677_v43  ;;  %v22956_v4 = vld [vmem:[#allocation48_spill] sm:$0xff] }
 0x210   : > { %v6679_v10 = vrot.slane %v6677_v43, 4  ;;  %v7212_v63 = vrot.slane %v7210_v31, 4  ;;  %v7213_v2 = vrot.slane %v13856_v29, 7  ;;  %v13772_v60 = vld [vmem:[#allocation2 + $0x2ac] sm:$0x8]  ;;  %v2997_v44 = vadd.f32 %v2932_v18, %v22956_v4 }
 0x211   : > { %22954 = vst [vmem:[#allocation59_spill] sm:$0xff] %v19753_v36  ;;  %v19766_v23 = vadd.f32 %v15523_v8, %v2999_v37  ;;  %v19771_v33 = vsel %vm18292_vm8, %v13894_v41, %v7210_v31  ;;  %v6684_v52 = vrot.slane %v13770_v34, 7  ;;  %v15478_v36 = vpop.f32.mrf.mxu1  ;;  %v15526_v42 = vpop.f32.mrf.mxu0  ;;  %v22957_v53 = vcombine.low %v19487_v15, %v19493_v0  ;;  %v22959_v31 = vld [vmem:[#allocation51_spill] sm:$0xff] }
 0x212   : > { %v22958_v40 = vcombine.low %v19507_v19, %v19521_v30  ;;  %v19781_v29 = vsel %vm18292_vm8, %v6679_v10, %v6680_v21  ;;  %v19785_v43 = vsel %vm18292_vm8, %v7212_v63, %v7213_v2  ;;  %v13807_v8 = vrot.slane %v13769_v5, 11  ;;  %v13861_v63 = vld [vmem:[#allocation2 + $0x3f4] sm:$0xf] }
 0x213   : > { %v6687_v34 = vrot.slane %v13771_v59, 7  ;;  %v19787_v41 = vadd.f32 %v3465_v28, %v2997_v44  ;;  %v3002_v37 = vadd.f32 %v15478_v36, %v22959_v31  ;;  %v22960_v15 = vcombine.low %v19530_v26, %v19539_v20  ;;  %v2945_v21 = vpop.f32.mrf.mxu1  ;;  %v3478_v18 = vpop.f32.mrf.mxu0  ;;  %v13774_v28 = vld [vmem:[#allocation2 + $0x2b4] sm:$0x7]  ;;  %v22963_v20 = vld [vmem:[#allocation53_spill] sm:$0xff]  ;;  %v13862_v31 = vld [vmem:[#allocation2 + $0x3f8] sm:$0x7] }
 0x214   : > { %15765 = vmatmul.mubr.bf16.gmra.mxu1 %v22957_v53  ;;  %15813 = vmatmul.mubr.bf16.gmra.mxu0 %v22958_v40  ;;  %v22961_v0 = vcombine.low %v19547_v48, %v19560_v14  ;;  %v6686_v19 = vrot.slane %v6684_v52, 4  ;;  %v13895_v30 = vrot.slane %v13857_v62, 11  ;;  %v13773_v53 = vld [vmem:[#allocation2 + $0x2b0] sm:$0xf]  ;;  %v7217_v36 = vrot.slane %v13858_v27, 7 }
 0x215   : > { %15768 = vmatprep.mubr.bf16.mxu1 %v22960_v15  ;;  %v7220_v44 = vrot.slane %v13859_v58, 7  ;;  %v19800_v26 = vadd.f32 %v15526_v42, %v3002_v37  ;;  %v3000_v10 = vadd.f32 %v2945_v21, %v22963_v20  ;;  %v13808_v48 = vrot.slane %v13772_v60, 11  ;;  %v13860_v62 = vld [vmem:[#allocation2 + $0x3f0] sm:$0x8]  ;;  %v15479_v2 = vpop.f32.mrf.mxu1  ;;  %v15527_v4 = vpop.f32.mrf.mxu0  ;;  %v13775_v37 = vld [vmem:[#allocation2 + $0x2c8] sm:$0x8] }
 0x216   : > { %15816 = vmatprep.mubr.bf16.mxu0 %v22961_v0  ;;  %v19807_v40 = vsel %vm18292_vm8, %v13807_v8, %v6684_v52  ;;  %v19811_v27 = vsel %vm18292_vm8, %v6686_v19, %v6687_v34  ;;  %v7219_v42 = vrot.slane %v7217_v36, 4  ;;  %v6691_v58 = vrot.slane %v13773_v53, 7  ;;  %v22965_v0 = vld [vmem:[#allocation50_spill] sm:$0xff]  ;;  %v13776_v14 = vld [vmem:[#allocation2 + $0x2cc] sm:$0xf] }
 0x217   : > { %22962 = vst [vmem:[#allocation25_spill] sm:$0xff] %v19800_v26  ;;  %v19813_v15 = vadd.f32 %v3478_v18, %v3000_v10  ;;  %v3003_v60 = vadd.f32 %v15479_v2, %v22965_v0  ;;  %v19818_v21 = vsel %vm18292_vm8, %v13895_v30, %v7217_v36  ;;  %v6694_v20 = vrot.slane %v13774_v28, 7  ;;  %v13777_v52 = vld [vmem:[#allocation2 + $0x2d0] sm:$0x7]  ;;  %v2948_v8 = vpop.f32.mrf.mxu1  ;;  %v3481_v5 = vpop.f32.mrf.mxu0  ;;  %v13863_v18 = vld [vmem:[#allocation2 + $0x40c] sm:$0x8] }
 0x218   : > { %v19822_v34 = vsel %vm18292_vm8, %v7219_v42, %v7220_v44  ;;  %v6693_v19 = vrot.slane %v6691_v58, 4  ;;  %v13896_v53 = vrot.slane %v13860_v62, 11  ;;  %v7224_v59 = vrot.slane %v13861_v63, 7  ;;  %v13864_v10 = vld [vmem:[#allocation2 + $0x410] sm:$0xf]  ;;  %v22966_v2 = vld [vmem:[#allocation31_spill] sm:$0xff] }
 0x219   : > { %22964 = vst [vmem:[#allocation40_spill] sm:$0xff] %v19813_v15  ;;  %v19824_v15 = vadd.f32 %v15527_v4, %v3003_v60  ;;  %v3001_v0 = vadd.f32 %v2948_v8, %v22966_v2  ;;  %v19829_v30 = vsel %vm18292_vm8, %v13808_v48, %v6691_v58  ;;  %v7227_v36 = vrot.slane %v13862_v31, 7  ;;  %v15482_v28 = vpop.f32.mrf.mxu1  ;;  %v15530_v26 = vpop.f32.mrf.mxu0  ;;  %v22970_v31 = vld [vmem:[#allocation37_spill] sm:$0xff]  ;;  %v13778_v2 = vld [vmem:[#allocation2 + $0x2e4] sm:$0x8] }
 0x21a   : > { %v22967_v44 = vcombine.low %v19575_v22, %v19586_v7  ;;  %v22968_v62 = vcombine.low %v19604_v1, %v19608_v9  ;;  %v19841_v4 = vsel %vm18292_vm8, %v6693_v19, %v6694_v20  ;;  %v7226_v48 = vrot.slane %v7224_v59, 4  ;;  %v13865_v20 = vld [vmem:[#allocation2 + $0x414] sm:$0x7]  ;;  %v13868_v1 = vld [vmem:[#allocation2 + $0x430] sm:$0x7] }
 0x21b   : > { %v13809_v42 = vrot.slane %v13775_v37, 11  ;;  %v19843_v58 = vadd.f32 %v3481_v5, %v3001_v0  ;;  %v3006_v60 = vadd.f32 %v15482_v28, %v22970_v31  ;;  %v22971_v22 = vcombine.low %v19622_v11, %v19626_v47  ;;  %v2961_v8 = vpop.f32.mrf.mxu1  ;;  %v3494_v19 = vpop.f32.mrf.mxu0  ;;  %v13779_v0 = vld [vmem:[#allocation2 + $0x2e8] sm:$0xf]  ;;  %v16665_v5 = vld [vmem:[#allocation4 + $0x3f0] sm:$0xff]   ;;  %v19874_v63 = vld [vmem:[#allocation2 + $0x300] sm:$0x8] }
 0x21c   : > { %15769 = vmatmul.mubr.bf16.gmra.mxu1 %v22967_v44  ;;  %15817 = vmatmul.mubr.bf16.gmra.mxu0 %v22968_v62  ;;  %v22972_v7 = vcombine.low %v19640_v49, %v19651_v54  ;;  %v6698_v9 = vrot.slane %v13776_v14, 7  ;;  %v19858_v37 = vsel %vm18292_vm8, %v13896_v53, %v7224_v59  ;;  %v6701_v11 = vrot.slane %v13777_v52, 7  ;;  %v22974_v54 = vld [vmem:[#allocation36_spill] sm:$0xff]  ;;  %v13780_v62 = vld [vmem:[#allocation2 + $0x2ec] sm:$0x7] }
 0x21d   : > { %22969 = vst [vmem:[#allocation76_spill] sm:$0xff] %v19843_v58  ;;  %15836 = vmatprep.mubr.bf16.mxu1 %v22971_v22  ;;  %v7231_v47 = vrot.slane %v13864_v10, 7  ;;  %v19860_v49 = vadd.f32 %v15530_v26, %v3006_v60  ;;  %v3004_v28 = vadd.f32 %v2961_v8, %v22974_v54  ;;  %v19865_v14 = vsel %vm18292_vm8, %v7226_v48, %v7227_v36  ;;  %v13866_v31 = vld [vmem:[#allocation2 + $0x428] sm:$0x8]  ;;  %v15483_v22 = vpop.f32.mrf.mxu1  ;;  %v13867_v26 = vld [vmem:[#allocation2 + $0x42c] sm:$0xf] }
 0x21e   : > { %15884 = vmatprep.mubr.bf16.mxu0 %v22972_v7  ;;  %v13897_v44 = vrot.slane %v13863_v18, 11  ;;  %v15531_v7 = vpop.f32.mrf.mxu0  ;;  %v19869_v59 = vsel %vm18292_vm8, %v13809_v42, %v6698_v9  ;;  %v6700_v52 = vrot.slane %v6698_v9, 4  ;;  %v7234_v10 = vrot.slane %v13865_v20, 7  ;;  %v22976_v8 = vld [vmem:[#allocation39_spill] sm:$0xff]  ;;  %v16666_v36 = vld [vmem:[#allocation4 + $0x430] sm:$0xff]  }
 0x21f   : > { %22973 = vst [vmem:[#allocation28_spill] sm:$0xff] %v19860_v49  ;;  %v7233_v53 = vrot.slane %v7231_v47, 4  ;;  %v19871_v60 = vadd.f32 %v3494_v19, %v3004_v28  ;;  %v3007_v54 = vadd.f32 %v15483_v22, %v22976_v8  ;;  %v13810_v48 = vrot.slane %v13778_v2, 11  ;;  %v2964_v49 = vpop.f32.mrf.mxu1  ;;  %v19882_v28 = vld [vmem:[#allocation2 + $0x304] sm:$0xf] }
 0x220   : > { %v6705_v18 = vrot.slane %v13779_v0, 7  ;;  %v3497_v58 = vpop.f32.mrf.mxu0  ;;  %v19880_v9 = vsel %vm18292_vm8, %v6700_v52, %v6701_v11  ;;  %v6708_v20 = vrot.slane %v13780_v62, 7  ;;  %v13898_v19 = vrot.slane %v13866_v31, 11  ;;  %v19884_v22 = vld [vmem:[#allocation2 + $0x308] sm:$0x7]  ;;  %v22977_v0 = vld [vmem:[#allocation66_spill] sm:$0xff] }
 0x221   : > { %22975 = vst [vmem:[#allocation34_spill] sm:$0xff] %v19871_v60  ;;  %v19886_v2 = vadd.f32 %v15531_v7, %v3007_v54  ;;  %v3005_v8 = vadd.f32 %v2964_v49, %v22977_v0  ;;  %v19891_v60 = vsel %vm18292_vm8, %v13897_v44, %v7231_v47  ;;  %v19895_v42 = vsel %vm18292_vm8, %v7233_v53, %v7234_v10  ;;  %v19897_v11 = vld [vmem:[#allocation2 + $0x444] sm:$0x8]  ;;  %v15550_v62 = vpop.f32.mrf.mxu1  ;;  %v22981_v10 = vld [vmem:[#allocation43_spill] sm:$0xff] }
 0x222   : > { %v15598_v31 = vpop.f32.mrf.mxu0  ;;  %v22978_v52 = vcombine.low %v19662_v3, %v19678_v45  ;;  %v22979_v7 = vcombine.low %v19682_v38, %v19691_v17  ;;  %v6707_v49 = vrot.slane %v6705_v18, 4  ;;  %v7238_v44 = vrot.slane %v13867_v26, 7  ;;  %v13870_v38 = vld [vmem:[#allocation2 + $0x448] sm:$0xf] }
 0x223   : > { %v7241_v54 = vrot.slane %v13868_v1, 7  ;;  %v19907_v53 = vadd.f32 %v3497_v58, %v3005_v8  ;;  %v4041_v0 = vadd.f32 %v15550_v62, %v22981_v10  ;;  %v19914_v3 = vsel %vm18292_vm8, %v13810_v48, %v6705_v18  ;;  %v3912_v17 = vpop.f32.mrf.mxu1  ;;  %v13785_v10 = vld [vmem:[#allocation2 + $0x320] sm:$0xf] }
 0x224   : > { %15837 = vmatmul.mubr.bf16.vlgmr.msra.gmra.mxu1 %v22978_v52  ;;  %15885 = vmatmul.mubr.bf16.vlgmr.msra.gmra.mxu0 %v22979_v7  ;;  %v6712_v45 = vrot.slane %v19882_v28, 7  ;;  %v4266_v52 = vpop.f32.mrf.mxu0  ;;  %v22982_v1 = vcombine.low %v19700_v61, %v19704_v24  ;;  %v22983_v58 = vcombine.low %v19713_v13, %v19723_v55  ;;  %v19929_v26 = vsel %vm18292_vm8, %v6707_v49, %v6708_v20  ;;  %v13871_v61 = vld [vmem:[#allocation2 + $0x44c] sm:$0x7]  ;;  %v22985_v13 = vld [vmem:[#allocation60_spill] sm:$0xff]  ;;  %v13784_v7 = vld [vmem:[#allocation2 + $0x31c] sm:$0x8] }
 0x225   : > { %22980 = vst [vmem:[#allocation30_spill] sm:$0xff] %v19907_v53  ;;  %15917 = vmatpush3.bf16.msra.mxu1 %v19618_v12  ;;  %15965 = vmatpush3.bf16.msra.mxu0 %v19642_v46  ;;  %v19923_v12 = vld [vmem:[#allocation4 + $0x3e8] sm:$0xff]   ;;  %v19933_v48 = vsel %vm18292_vm8, %v13898_v19, %v7238_v44  ;;  %v7240_v18 = vrot.slane %v7238_v44, 4  ;;  %v13811_v24 = vrot.slane %v19874_v63, 11  ;;  %v19936_v28 = vadd.f32 %v15598_v31, %v4041_v0  ;;  %v15551_v20 = vpop.f32.mrf.mxu1  ;;  %v13786_v0 = vld [vmem:[#allocation2 + $0x324] sm:$0x7] }
 0x226   : > { %15840 = vmatprep.mubr.bf16.mxu1 %v22982_v1  ;;  %15888 = vmatprep.mubr.bf16.mxu0 %v22983_v58  ;;  %v19925_v46 = vld [vmem:[#allocation4 + $0x428] sm:$0xff]   ;;  %v4039_v55 = vadd.f32 %v3912_v17, %v22985_v13  ;;  %v6714_v8 = vrot.slane %v6712_v45, 4  ;;  %v6715_v62 = vrot.slane %v19884_v22, 7  ;;  %v15599_v49 = vpop.f32.mrf.mxu0  ;;  %v13899_v63 = vrot.slane %v19897_v11, 11  ;;  %v19950_v22 = vld [vmem:[#allocation4 + $0x3e0] sm:$0xff]  }
 0x227   : > { %22984 = vst [vmem:[#allocation38_spill] sm:$0xff] %v19936_v28  ;;  %15918 = vmatprep.subr.bf16.mxu1 %v16665_v5  ;;  %15966 = vmatprep.subr.bf16.mxu0 %v16666_v36  ;;  %v19944_v44 = vsel %vm18292_vm8, %v7240_v18, %v7241_v54  ;;  %v7245_v31 = vrot.slane %v13870_v38, 7  ;;  %v4042_v1 = vadd.f32 %v15551_v20, %v19425_v56  ;;  %v7248_v13 = vrot.slane %v13871_v61, 7  ;;  %v13872_v19 = vld [vmem:[#allocation2 + $0x460] sm:$0x8]  ;;  %v3915_v18 = vpop.f32.mrf.mxu1 }
 0x228   : > { %v19947_v17 = vadd.f32 %v4266_v52, %v4039_v55  ;;  %v13873_v54 = vld [vmem:[#allocation2 + $0x464] sm:$0xf]  ;;  %v4269_v47 = vpop.f32.mrf.mxu0  ;;  %v19960_v56 = vsel %vm18292_vm8, %v13811_v24, %v6712_v45  ;;  %v13874_v38 = vld [vmem:[#allocation2 + $0x468] sm:$0x7]  ;;  %v19962_v52 = vld [vmem:[#allocation2 + $0x338] sm:$0x8]  ;;  %v4040_v55 = vadd.f32 %v3915_v18, %v19443_v6  ;;  %v19969_v58 = vsel %vm18292_vm8, %v6714_v8, %v6715_v62 }
 0x229   : > { %15919 = vmatpush3.bf16.msra.mxu1 %v16665_v5  ;;  %15967 = vmatpush3.bf16.msra.mxu0 %v16666_v36  ;;  %v7247_v5 = vrot.slane %v7245_v31, 4  ;;  %v13812_v36 = vrot.slane %v13784_v7, 11  ;;  %v19964_v61 = vadd.f32 %v15599_v49, %v4042_v1  ;;  %v16670_v20 = vld [vmem:[#allocation4 + $0x420] sm:$0xff]   ;;  %v19971_v11 = vld [vmem:[#allocation2 + $0x33c] sm:$0xf]  ;;  %v15554_v45 = vpop.f32.mrf.mxu1  ;;  %v22988_v7 = vcombine.low %v19738_v25, %v19742_v51  ;;  %v22990_v18 = vld [vmem:[#allocation61_spill] sm:$0xff] }
 0x22a   : > { %22986 = vst [vmem:[#allocation58_spill] sm:$0xff] %v19947_v17  ;;  %15920 = vmatprep.subr.bf16.mxu1 %v19923_v12  ;;  %15968 = vmatprep.subr.bf16.mxu0 %v19925_v46  ;;  %v6719_v17 = vrot.slane %v13785_v10, 7  ;;  %v19973_v28 = vld [vmem:[#allocation2 + $0x340] sm:$0x7]  ;;  %v15602_v24 = vpop.f32.mrf.mxu0  ;;  %v22989_v49 = vcombine.low %v19751_v50, %v19760_v39  ;;  %v19983_v6 = vsel %vm18292_vm8, %v13899_v63, %v7245_v31  ;;  %v6722_v8 = vrot.slane %v13786_v0, 7  ;;  %v22993_v31 = vld [vmem:[#allocation69_spill] sm:$0xff] }
 0x22b   : > { %22987 = vst [vmem:[#allocation64_spill] sm:$0xff] %v19964_v61  ;;  %v13900_v62 = vrot.slane %v13872_v19, 11  ;;  %v7252_v10 = vrot.slane %v13873_v54, 7  ;;  %v19985_v1 = vadd.f32 %v4269_v47, %v4040_v55  ;;  %v4045_v61 = vadd.f32 %v15554_v45, %v22990_v18  ;;  %v3928_v39 = vpop.f32.mrf.mxu1  ;;  %v13877_v54 = vld [vmem:[#allocation2 + $0x484] sm:$0x7] }
 0x22c   : > { %15841 = vmatmul.mubr.bf16.gmra.mxu1 %v22988_v7  ;;  %15889 = vmatmul.mubr.bf16.gmra.mxu0 %v22989_v49  ;;  %v22991_v53 = vcombine.low %v19764_v16, %v19781_v29  ;;  %v22992_v25 = vcombine.low %v19771_v33, %v19785_v43  ;;  %v19996_v51 = vsel %vm18292_vm8, %v7247_v5, %v7248_v13  ;;  %v6721_v50 = vrot.slane %v6719_v17, 4  ;;  %v4282_v19 = vpop.f32.mrf.mxu0  ;;  %v20002_v16 = vld [vmem:[#allocation4 + $0x3d8] sm:$0xff]  }
 0x22d   : > { %15921 = vmatpush3.bf16.msra.mxu1 %v19923_v12  ;;  %15969 = vmatpush3.bf16.msra.mxu0 %v19925_v46  ;;  %v20006_v33 = vsel %vm18292_vm8, %v13812_v36, %v6719_v17  ;;  %v7254_v29 = vrot.slane %v7252_v10, 4  ;;  %v7255_v43 = vrot.slane %v13874_v38, 7  ;;  %v20010_v63 = vadd.f32 %v15602_v24, %v4045_v61  ;;  %v16672_v12 = vld [vmem:[#allocation4 + $0x418] sm:$0xff]   ;;  %v13876_v17 = vld [vmem:[#allocation2 + $0x480] sm:$0xf]  ;;  %v15555_v5 = vpop.f32.mrf.mxu1 }
 0x22e   : > { %15844 = vmatprep.mubr.bf16.mxu1 %v22991_v53  ;;  %15892 = vmatprep.mubr.bf16.mxu0 %v22992_v25  ;;  %v20008_v53 = vld [vmem:[#allocation2 + $0x47c] sm:$0x8]  ;;  %v4043_v0 = vadd.f32 %v3928_v39, %v22993_v31  ;;  %v20016_v46 = vsel %vm18292_vm8, %v6721_v50, %v6722_v8  ;;  %v13813_v13 = vrot.slane %v19962_v52, 11  ;;  %v15603_v36 = vpop.f32.mrf.mxu0  ;;  %v20023_v61 = vsel %vm18292_vm8, %v13900_v62, %v7252_v10  ;;  %v20027_v24 = vld [vmem:[#allocation2 + $0x358] sm:$0xf]  ;;  %v22995_v52 = vld [vmem:[#allocation49_spill] sm:$0xff] }
 0x22f   : > { %15922 = vmatprep.subr.bf16.mxu1 %v19950_v22  ;;  %15970 = vmatprep.subr.bf16.mxu0 %v16670_v20  ;;  %v6726_v55 = vrot.slane %v19971_v11, 7  ;;  %v6729_v45 = vrot.slane %v19973_v28, 7  ;;  %v4046_v49 = vadd.f32 %v15555_v5, %v22995_v52  ;;  %v20036_v18 = vsel %vm18292_vm8, %v7254_v29, %v7255_v43  ;;  %v20038_v25 = vld [vmem:[#allocation4 + $0x3d0] sm:$0xff]   ;;  %v13792_v10 = vld [vmem:[#allocation2 + $0x35c] sm:$0x7]  ;;  %v3931_v28 = vpop.f32.mrf.mxu1 }
 0x230   : > { %v20029_v7 = vadd.f32 %v4282_v19, %v4043_v0  ;;  %v13790_v62 = vld [vmem:[#allocation2 + $0x354] sm:$0x8]  ;;  %v20040_v11 = vld [vmem:[#allocation2 + $0x498] sm:$0x8]  ;;  %v4285_v50 = vpop.f32.mrf.mxu0  ;;  %v13901_v19 = vrot.slane %v20008_v53, 11  ;;  %v7259_v31 = vrot.slane %v13876_v17, 7 }
 0x231   : > { %15923 = vmatpush3.bf16.msra.mxu1 %v19950_v22  ;;  %15971 = vmatpush3.bf16.msra.mxu0 %v16670_v20  ;;  %v6728_v39 = vrot.slane %v6726_v55, 4  ;;  %v7262_v0 = vrot.slane %v13877_v54, 7  ;;  %v20044_v5 = vld [vmem:[#allocation2 + $0x49c] sm:$0xf]  ;;  %v20046_v29 = vadd.f32 %v15603_v36, %v4046_v49  ;;  %v22997_v43 = vld [vmem:[#allocation46_spill] sm:$0xff]  ;;  %v20052_v8 = vsel %vm18292_vm8, %v13813_v13, %v6726_v55  ;;  %v15558_v17 = vpop.f32.mrf.mxu1 }
 0x232   : > { %22994 = vst [vmem:[#allocation65_spill] sm:$0xff] %v20029_v7  ;;  %v4044_v52 = vadd.f32 %v3931_v28, %v22997_v43  ;;  %15924 = vmatprep.subr.bf16.mxu1 %v20002_v16  ;;  %15972 = vmatprep.subr.bf16.mxu0 %v16672_v12  ;;  %v16674_v22 = vld [vmem:[#allocation4 + $0x410] sm:$0xff]   ;;  %v6733_v20 = vrot.slane %v20027_v24, 7  ;;  %v20055_v38 = vld [vmem:[#allocation2 + $0x4a0] sm:$0x7]  ;;  %v15606_v54 = vpop.f32.mrf.mxu0  ;;  %v22998_v36 = vcombine.low %v19807_v40, %v19811_v27  ;;  %v7261_v55 = vrot.slane %v7259_v31, 4 }
 0x233   : > { %22996 = vst [vmem:[#allocation68_spill] sm:$0xff] %v20046_v29  ;;  %v20057_v53 = vld [vmem:[#allocation2 + $0x370] sm:$0x8]  ;;  %v22999_v49 = vcombine.low %v19818_v21, %v19822_v34  ;;  %v20067_v13 = vsel %vm18292_vm8, %v6728_v39, %v6729_v45  ;;  %v13814_v24 = vrot.slane %v13790_v62, 11  ;;  %v6736_v28 = vrot.slane %v13792_v10, 7  ;;  %v23000_v29 = vld [vmem:[#allocation24_spill] sm:$0xff]  ;;  %v3944_v45 = vpop.f32.mrf.mxu1 }
 0x234   : > { %15845 = vmatmul.mubr.bf16.gmra.mxu1 %v22998_v36  ;;  %v20069_v43 = vld [vmem:[#allocation2 + $0x374] sm:$0xf]  ;;  %v20071_v47 = vadd.f32 %v4285_v50, %v4044_v52  ;;  %v4049_v7 = vadd.f32 %v15558_v17, %v23000_v29  ;;  %v23001_v40 = vcombine.low %v19829_v30, %v19841_v4  ;;  %v23002_v27 = vcombine.low %v19858_v37, %v19865_v14  ;;  %v4298_v62 = vpop.f32.mrf.mxu0  ;;  %v20093_v14 = vld [vmem:[#allocation2 + $0x378] sm:$0x7]  ;;  %v13883_v36 = vld [vmem:[#allocation2 + $0x4bc] sm:$0x7] }
 0x235   : > { %15893 = vmatmul.mubr.bf16.gmra.mxu0 %v22999_v49  ;;  %v6735_v34 = vrot.slane %v6733_v20, 4  ;;  %15925 = vmatpush3.bf16.msra.mxu1 %v20002_v16  ;;  %v20085_v10 = vsel %vm18292_vm8, %v13901_v19, %v7259_v31  ;;  %v20089_v30 = vsel %vm18292_vm8, %v7261_v55, %v7262_v0  ;;  %v13902_v4 = vrot.slane %v20040_v11, 11  ;;  %v23003_v39 = vld [vmem:[#allocation26_spill] sm:$0xff]  ;;  %v16675_v0 = vld [vmem:[#allocation4 + $0x3c8] sm:$0xff]   ;;  %v15559_v11 = vpop.f32.mrf.mxu1  ;;  %v16678_v55 = vld [vmem:[#allocation4 + $0x400] sm:$0xff]  }
 0x236   : > { %15848 = vmatprep.mubr.bf16.mxu1 %v23001_v40  ;;  %15896 = vmatprep.mubr.bf16.mxu0 %v23002_v27  ;;  %v7266_v37 = vrot.slane %v20044_v5, 7  ;;  %v20095_v50 = vadd.f32 %v15606_v54, %v4049_v7  ;;  %v4047_v29 = vadd.f32 %v3944_v45, %v23003_v39  ;;  %v13881_v19 = vld [vmem:[#allocation2 + $0x4b4] sm:$0x8]  ;;  %v13882_v31 = vld [vmem:[#allocation2 + $0x4b8] sm:$0xf]  ;;  %v15607_v52 = vpop.f32.mrf.mxu0  ;;  %v20104_v5 = vsel %vm18292_vm8, %v13814_v24, %v6733_v20  ;;  %v16676_v27 = vld [vmem:[#allocation4 + $0x408] sm:$0xff]  }
 0x237   : > { %15973 = vmatpush3.bf16.msra.mxu0 %v16672_v12  ;;  %15926 = vmatprep.subr.bf16.mxu1 %v20038_v25  ;;  %v7269_v12 = vrot.slane %v20055_v38, 7  ;;  %v20108_v7 = vsel %vm18292_vm8, %v6735_v34, %v6736_v28  ;;  %v13815_v54 = vrot.slane %v20057_v53, 11  ;;  %v4050_v38 = vadd.f32 %v15559_v11, %v19569_v32  ;;  %v20117_v20 = vld [vmem:[#allocation2 + $0x38c] sm:$0x8]  ;;  %v20119_v24 = vld [vmem:[#allocation2 + $0x390] sm:$0xf]  ;;  %v3947_v28 = vpop.f32.mrf.mxu1 }
 0x238   : > { %15974 = vmatprep.subr.bf16.mxu0 %v16674_v22  ;;  %v7268_v17 = vrot.slane %v7266_v37, 4  ;;  %v20111_v49 = vadd.f32 %v4298_v62, %v4047_v29  ;;  %v6740_v40 = vrot.slane %v20069_v43, 7  ;;  %v4301_v34 = vpop.f32.mrf.mxu0  ;;  %v20124_v53 = vsel %vm18292_vm8, %v13902_v4, %v7266_v37  ;;  %v13798_v39 = vld [vmem:[#allocation2 + $0x394] sm:$0x7]  ;;  %v16677_v43 = vld [vmem:[#allocation4 + $0x3c0] sm:$0xff]   ;;  %v23007_v21 = vld [vmem:[#allocation29_spill] sm:$0xff] }
 0x239   : > { %15927 = vmatpush3.bf16.msra.mxu1 %v20038_v25  ;;  %v6743_v32 = vrot.slane %v20093_v14, 7  ;;  %v13903_v45 = vrot.slane %v13881_v19, 11  ;;  %v7273_v62 = vrot.slane %v13882_v31, 7  ;;  %v20127_v29 = vadd.f32 %v15607_v52, %v4050_v38  ;;  %v20138_v4 = vld [vmem:[#allocation2 + $0x4d4] sm:$0xf]  ;;  %v15562_v14 = vpop.f32.mrf.mxu1 }
 0x23a   : > { %v4048_v11 = vadd.f32 %v3947_v28, %v19590_v57  ;;  %v20134_v25 = vsel %vm18292_vm8, %v7268_v17, %v7269_v12  ;;  %15928 = vmatprep.subr.bf16.mxu1 %v16675_v0  ;;  %v20140_v37 = vld [vmem:[#allocation2 + $0x4d8] sm:$0x7]  ;;  %v15610_v19 = vpop.f32.mrf.mxu0  ;;  %v23005_v31 = vcombine.low %v19869_v59, %v19880_v9  ;;  %v23006_v57 = vcombine.low %v19891_v60, %v19895_v42  ;;  %v20152_v28 = vld [vmem:[#allocation2 + $0x3ac] sm:$0xf] }
 0x23b   : > { %15975 = vmatpush3.bf16.msra.mxu0 %v16674_v22  ;;  %23004 = vst [vmem:[#allocation32_spill] sm:$0xff] %v20127_v29  ;;  %v20136_v22 = vld [vmem:[#allocation2 + $0x4d0] sm:$0x8]  ;;  %v20150_v12 = vsel %vm18292_vm8, %v13815_v54, %v6740_v40  ;;  %v6742_v52 = vrot.slane %v6740_v40, 4  ;;  %v7275_v17 = vrot.slane %v7273_v62, 4  ;;  %v7276_v38 = vrot.slane %v13883_v36, 7  ;;  %v3960_v54 = vpop.f32.mrf.mxu1 }
 0x23c   : > { %15849 = vmatmul.mubr.bf16.gmra.mxu1 %v23005_v31  ;;  %v20154_v16 = vadd.f32 %v4301_v34, %v4048_v11  ;;  %v4053_v29 = vadd.f32 %v15562_v14, %v23007_v21  ;;  %v23008_v59 = vcombine.low %v19914_v3, %v19929_v26  ;;  %v23009_v60 = vcombine.low %v19933_v48, %v19944_v44  ;;  %v4314_v36 = vpop.f32.mrf.mxu0  ;;  %v23010_v44 = vld [vmem:[#allocation63_spill] sm:$0xff]  ;;  %v13801_v11 = vld [vmem:[#allocation2 + $0x3b0] sm:$0x7] }
 0x23d   : > { %15897 = vmatmul.mubr.bf16.gmra.mxu0 %v23006_v57  ;;  %v13816_v42 = vrot.slane %v20117_v20, 11  ;;  %v6747_v9 = vrot.slane %v20119_v24, 7  ;;  %v20169_v21 = vsel %vm18292_vm8, %v6742_v52, %v6743_v32  ;;  %v20173_v3 = vsel %vm18292_vm8, %v13903_v45, %v7273_v62  ;;  %15929 = vmatpush3.bf16.msra.mxu1 %v16675_v0  ;;  %v13799_v32 = vld [vmem:[#allocation2 + $0x3a8] sm:$0x8]  ;;  %v15563_v14 = vpop.f32.mrf.mxu1 }
 0x23e   : > { %15852 = vmatprep.mubr.bf16.mxu1 %v23008_v59  ;;  %15900 = vmatprep.mubr.bf16.mxu0 %v23009_v60  ;;  %v6750_v26 = vrot.slane %v13798_v39, 7  ;;  %v20175_v48 = vadd.f32 %v15610_v19, %v4053_v29  ;;  %v4051_v20 = vadd.f32 %v3960_v54, %v23010_v44  ;;  %v20180_v24 = vsel %vm18292_vm8, %v7275_v17, %v7276_v38  ;;  %v15611_v31 = vpop.f32.mrf.mxu0  ;;  %v13887_v29 = vld [vmem:[#allocation2 + $0x4ec] sm:$0x8]  ;;  %v13888_v17 = vld [vmem:[#allocation2 + $0x4f0] sm:$0xf]  ;;  %v20195_v59 = vld [vmem:[#allocation4 + $0x478] sm:$0xff]  }
 0x23f   : > { %15976 = vmatprep.subr.bf16.mxu0 %v16676_v27  ;;  %v13904_v34 = vrot.slane %v20136_v22, 11  ;;  %v6749_v45 = vrot.slane %v6747_v9, 4  ;;  %v7280_v62 = vrot.slane %v20138_v4, 7  ;;  %v7283_v39 = vrot.slane %v20140_v37, 7  ;;  %15930 = vmatprep.subr.bf16.mxu1 %v16677_v43  ;;  %v13889_v38 = vld [vmem:[#allocation2 + $0x4f4] sm:$0x7]  ;;  %v3963_v4 = vpop.f32.mrf.mxu1 }
 0x240   : > { %15977 = vmatpush3.bf16.msra.mxu0 %v16676_v27  ;;  %v20187_v19 = vadd.f32 %v4314_v36, %v4051_v20  ;;  %v23011_v27 = vld [vmem:[#allocation33_spill] sm:$0xff]  ;;  %v20192_v22 = vsel %vm18292_vm8, %v13816_v42, %v6747_v9  ;;  %v6754_v52 = vrot.slane %v20152_v28, 7  ;;  %v4317_v60 = vpop.f32.mrf.mxu0  ;;  %v13817_v36 = vrot.slane %v13799_v32, 11  ;;  %v23013_v28 = vld [vmem:[#allocation62_spill] sm:$0xff] }
 0x241   : > { %15978 = vmatprep.subr.bf16.mxu0 %v16678_v55  ;;  %v4054_v57 = vadd.f32 %v15563_v14, %v23011_v27  ;;  %v20199_v37 = vsel %vm18292_vm8, %v6749_v45, %v6750_v26  ;;  %v7282_v54 = vrot.slane %v7280_v62, 4  ;;  %v6757_v44 = vrot.slane %v13801_v11, 7  ;;  %15931 = vmatpush3.bf16.msra.mxu1 %v16677_v43  ;;  %v13930_v20 = vld [vmem:[#allocation2 + $0x350] sm:$0xe]  ;;  %v20201_v14 = vld [vmem:[#allocation4 + $0x4b8] sm:$0xff]   ;;  %v15566_v11 = vpop.f32.mrf.mxu1 }
 0x242   : > { %v4052_v9 = vadd.f32 %v3963_v4, %v23013_v28  ;;  %v20210_v0 = vsel %vm18292_vm8, %v13904_v34, %v7280_v62  ;;  %v13931_v26 = vld [vmem:[#allocation2 + $0x354] sm:$0xf]  ;;  %v13932_v45 = vld [vmem:[#allocation2 + $0x358] sm:$0x1]  ;;  %v15614_v43 = vpop.f32.mrf.mxu0  ;;  %v23014_v40 = vcombine.low %v19960_v56, %v19969_v58  ;;  %v6756_v34 = vrot.slane %v6754_v52, 4  ;;  %v23017_v27 = vld [vmem:[#allocation67_spill] sm:$0xff]  ;;  %16012 = vmatprep.subr.bf16.mxu1 %v20195_v59 }
 0x243   : > { %v20203_v42 = vadd.f32 %v15611_v31, %v4054_v57  ;;  %v14018_v32 = vld [vmem:[#allocation2 + $0x354] sm:$0x8]  ;;  %v23015_v31 = vcombine.low %v19983_v6, %v19996_v51  ;;  %v20220_v57 = vsel %vm18292_vm8, %v7282_v54, %v7283_v39  ;;  %v13905_v62 = vrot.slane %v13887_v29, 11  ;;  %v14019_v4 = vld [vmem:[#allocation2 + $0x358] sm:$0xf] }
 0x244   : > { %15979 = vmatpush3.bf16.msra.mxu0 %v16678_v55  ;;  %15853 = vmatmul.mubr.bf16.gmra.mxu1 %v23014_v40  ;;  %v7287_v55 = vrot.slane %v13888_v17, 7  ;;  %v20222_v28 = vadd.f32 %v4317_v60, %v4052_v9  ;;  %v23018_v58 = vcombine.low %v20006_v33, %v20016_v46  ;;  %v23019_v56 = vcombine.low %v20023_v61, %v20036_v18  ;;  %v3976_v40 = vpop.f32.mrf.mxu1  ;;  %v4330_v39 = vpop.f32.mrf.mxu0  ;;  %v23021_v18 = vld [vmem:[#allocation52_spill] sm:$0xff] }
 0x245   : > { %23012 = vst [vmem:[#allocation75_spill] sm:$0xff] %v20203_v42  ;;  %15901 = vmatmul.mubr.bf16.gmra.mxu0 %v23015_v31  ;;  %v4057_v42 = vadd.f32 %v15566_v11, %v23017_v27  ;;  %v7290_v51 = vrot.slane %v13889_v38, 7  ;;  %v20235_v29 = vsel %vm18292_vm8, %v13817_v36, %v6754_v52  ;;  %v20239_v17 = vsel %vm18292_vm8, %v6756_v34, %v6757_v44  ;;  %v14020_v52 = vld [vmem:[#allocation2 + $0x35c] sm:$0x7]  ;;  %v13933_v36 = vld [vmem:[#allocation2 + $0x36c] sm:$0xe] }
 0x246   : > { %23016 = vst [vmem:[#allocation72_spill] sm:$0xff] %v20222_v28  ;;  %15856 = vmatprep.mubr.bf16.mxu1 %v23018_v58  ;;  %15904 = vmatprep.mubr.bf16.mxu0 %v23019_v56  ;;  %v7289_v33 = vrot.slane %v7287_v55, 4  ;;  %v13978_v46 = vrot.slane %v13930_v20, 9  ;;  %v4055_v38 = vadd.f32 %v3976_v40, %v23021_v18  ;;  %v7712_v54 = vrot.slane %v13931_v26, 5  ;;  %v15567_v9 = vpop.f32.mrf.mxu1  ;;  %v15615_v27 = vpop.f32.mrf.mxu0  ;;  %v13934_v34 = vld [vmem:[#allocation2 + $0x370] sm:$0xf] }
 0x247   : > { %16060 = vmatprep.subr.bf16.mxu0 %v20201_v14  ;;  %v20243_v61 = vadd.f32 %v15614_v43, %v4057_v42  ;;  %v20250_v44 = vsel %vm18292_vm8, %v13905_v62, %v7287_v55  ;;  %v7715_v20 = vrot.slane %v13932_v45, 5  ;;  %v14066_v11 = vrot.slane %v14018_v32, 11  ;;  %v23023_v43 = vld [vmem:[#allocation54_spill] sm:$0xff] }
 0x248   : > { %v8242_v31 = vrot.slane %v14019_v4, 7  ;;  %v20252_v42 = vadd.f32 %v4330_v39, %v4055_v38  ;;  %v4058_v58 = vadd.f32 %v15567_v9, %v23023_v43  ;;  %v20259_v26 = vsel %vm18292_vm8, %v7289_v33, %v7290_v51  ;;  %v13935_v40 = vld [vmem:[#allocation2 + $0x374] sm:$0x1]  ;;  %v3979_v18 = vpop.f32.mrf.mxu1  ;;  %v4333_v60 = vpop.f32.mrf.mxu0  ;;  %v14021_v39 = vld [vmem:[#allocation2 + $0x370] sm:$0x8] }
 0x249   : > { %23020 = vst [vmem:[#allocation73_spill] sm:$0xff] %v20243_v61  ;;  %v20263_v45 = vsel %vm17212_vm5, %v13978_v46, %v7712_v54  ;;  %v7714_v32 = vrot.slane %v7712_v54, 4  ;;  %v8245_v4 = vrot.slane %v14020_v52, 7  ;;  %v23025_v9 = vld [vmem:[#allocation70_spill] sm:$0xff]  ;;  %v13979_v56 = vrot.slane %v13933_v36, 9 }
 0x24a   : > { %23022 = vst [vmem:[#allocation74_spill] sm:$0xff] %v20252_v42  ;;  %v8244_v55 = vrot.slane %v8242_v31, 4  ;;  %v20265_v38 = vadd.f32 %v15615_v27, %v4058_v58  ;;  %v4056_v43 = vadd.f32 %v3979_v18, %v23025_v9  ;;  %v7719_v6 = vrot.slane %v13934_v34, 5  ;;  %v14022_v42 = vld [vmem:[#allocation2 + $0x374] sm:$0xf]  ;;  %v15570_v33 = vpop.f32.mrf.mxu1  ;;  %v15618_v61 = vpop.f32.mrf.mxu0 }
 0x24b   : > { %v14023_v51 = vld [vmem:[#allocation2 + $0x378] sm:$0x7]  ;;  %v23026_v28 = vcombine.low %v20052_v8, %v20067_v13  ;;  %v23027_v46 = vcombine.low %v20085_v10, %v20089_v30  ;;  %v20276_v54 = vsel %vm17212_vm5, %v7714_v32, %v7715_v20  ;;  %v20280_v52 = vsel %vm18292_vm8, %v14066_v11, %v8242_v31  ;;  %v13936_v34 = vld [vmem:[#allocation2 + $0x388] sm:$0xe]  ;;  %v13937_v8 = vld [vmem:[#allocation2 + $0x38c] sm:$0xf] }
 0x24c   : > { %v20284_v36 = vsel %vm18292_vm8, %v8244_v55, %v8245_v4  ;;  %v7722_v27 = vrot.slane %v13935_v40, 5  ;;  %v20286_v13 = vadd.f32 %v4333_v60, %v4056_v43  ;;  %v23029_v30 = vcombine.low %v20104_v5, %v20108_v7  ;;  %v13938_v58 = vld [vmem:[#allocation2 + $0x390] sm:$0x1]  ;;  %v3992_v18 = vpop.f32.mrf.mxu1  ;;  %v4346_v32 = vpop.f32.mrf.mxu0  ;;  %v23031_v5 = vld [vmem:[#allocation59_spill] sm:$0xff] }
 0x24d   : > { %15857 = vmatmul.mubr.bf16.gmra.mxu1 %v23026_v28  ;;  %15905 = vmatmul.mubr.bf16.gmra.mxu0 %v23027_v46  ;;  %v23028_v28 = vld [vmem:[#allocation71_spill] sm:$0xff]  ;;  %v23030_v20 = vcombine.low %v20124_v53, %v20134_v25  ;;  %v7721_v11 = vrot.slane %v7719_v6, 4  ;;  %v14067_v31 = vrot.slane %v14021_v39, 11  ;;  %v8249_v55 = vrot.slane %v14022_v42, 7  ;;  %v14024_v39 = vld [vmem:[#allocation2 + $0x38c] sm:$0x8] }
 0x24e   : > { %v4061_v10 = vadd.f32 %v15570_v33, %v23028_v28  ;;  %15860 = vmatprep.mubr.bf16.mxu1 %v23029_v30  ;;  %v8252_v4 = vrot.slane %v14023_v51, 7  ;;  %v4059_v7 = vadd.f32 %v3992_v18, %v23031_v5  ;;  %v20306_v25 = vsel %vm17212_vm5, %v13979_v56, %v7719_v6  ;;  %v14025_v43 = vld [vmem:[#allocation2 + $0x390] sm:$0xf]  ;;  %v15571_v33 = vpop.f32.mrf.mxu1  ;;  %v15619_v46 = vpop.f32.mrf.mxu0  ;;  %v13939_v18 = vld [vmem:[#allocation2 + $0x3a4] sm:$0xe] }
 0x24f   : > { %15908 = vmatprep.mubr.bf16.mxu0 %v23030_v20  ;;  %v20310_v28 = vsel %vm17212_vm5, %v7721_v11, %v7722_v27  ;;  %v8251_v42 = vrot.slane %v8249_v55, 4  ;;  %v7726_v51 = vrot.slane %v13937_v8, 5  ;;  %v4062_v20 = vadd.f32 %v15571_v33, %v19766_v23  ;;  %v13940_v5 = vld [vmem:[#allocation2 + $0x3a8] sm:$0xf]  ;;  %v14028_v33 = vld [vmem:[#allocation2 + $0x3ac] sm:$0xf] }
 0x250   : > { %v20299_v9 = vadd.f32 %v15618_v61, %v4061_v10  ;;  %v13980_v61 = vrot.slane %v13936_v34, 9  ;;  %v14026_v10 = vld [vmem:[#allocation2 + $0x394] sm:$0x7]  ;;  %v20312_v30 = vadd.f32 %v4346_v32, %v4059_v7  ;;  %v20317_v6 = vsel %vm18292_vm8, %v14067_v31, %v8249_v55  ;;  %v3995_v53 = vpop.f32.mrf.mxu1  ;;  %v4349_v60 = vpop.f32.mrf.mxu0  ;;  %v13941_v32 = vld [vmem:[#allocation2 + $0x3ac] sm:$0x1] }
 0x251   : > { %v7729_v56 = vrot.slane %v13938_v58, 5  ;;  %v20321_v27 = vsel %vm18292_vm8, %v8251_v42, %v8252_v4  ;;  %v7728_v34 = vrot.slane %v7726_v51, 4  ;;  %v14068_v8 = vrot.slane %v14024_v39, 11  ;;  %v14027_v55 = vld [vmem:[#allocation2 + $0x3a8] sm:$0x8] }
 0x252   : > { %23032 = vst [vmem:[#allocation22_spill] sm:$0xff] %v20312_v30  ;;  %v8256_v11 = vrot.slane %v14025_v43, 7  ;;  %v20323_v7 = vadd.f32 %v15619_v46, %v4062_v20  ;;  %v4060_v23 = vadd.f32 %v3995_v53, %v19787_v41  ;;  %v8259_v58 = vrot.slane %v14026_v10, 7  ;;  %v15574_v40 = vpop.f32.mrf.mxu1  ;;  %v15622_v30 = vpop.f32.mrf.mxu0  ;;  %v14029_v42 = vld [vmem:[#allocation2 + $0x3b0] sm:$0x7] }
 0x253   : > { %v23033_v4 = vcombine.low %v20150_v12, %v20169_v21  ;;  %v23034_v39 = vcombine.low %v20173_v3, %v20180_v24  ;;  %v20336_v43 = vsel %vm17212_vm5, %v13980_v61, %v7726_v51  ;;  %v20340_v41 = vsel %vm17212_vm5, %v7728_v34, %v7729_v56  ;;  %v23035_v20 = vld [vmem:[#allocation25_spill] sm:$0xff]  ;;  %v13942_v51 = vld [vmem:[#allocation2 + $0x3c0] sm:$0xe]  ;;  %v13943_v56 = vld [vmem:[#allocation2 + $0x3c4] sm:$0xf] }
 0x254   : > { %v8258_v53 = vrot.slane %v8256_v11, 4  ;;  %v13981_v46 = vrot.slane %v13939_v18, 9  ;;  %v20342_v10 = vadd.f32 %v4349_v60, %v4060_v23  ;;  %v4065_v12 = vadd.f32 %v15574_v40, %v23035_v20  ;;  %v4008_v18 = vpop.f32.mrf.mxu1  ;;  %v4362_v34 = vpop.f32.mrf.mxu0  ;;  %v13947_v31 = vld [vmem:[#allocation2 + $0x3e4] sm:$0x1] }
 0x255   : > { %15861 = vmatmul.mubr.bf16.gmra.mxu1 %v23033_v4  ;;  %15909 = vmatmul.mubr.bf16.gmra.mxu0 %v23034_v39  ;;  %v23036_v21 = vcombine.low %v20192_v22, %v20199_v37  ;;  %v23037_v3 = vcombine.low %v20210_v0, %v20220_v57  ;;  %v7733_v61 = vrot.slane %v13940_v5, 5  ;;  %v20355_v60 = vsel %vm18292_vm8, %v14068_v8, %v8256_v11  ;;  %v23039_v4 = vld [vmem:[#allocation40_spill] sm:$0xff] }
 0x256   : > { %v7736_v40 = vrot.slane %v13941_v32, 5  ;;  %v14069_v23 = vrot.slane %v14027_v55, 11  ;;  %v8263_v22 = vrot.slane %v14028_v33, 7  ;;  %v20357_v37 = vadd.f32 %v15622_v30, %v4065_v12  ;;  %v13944_v39 = vld [vmem:[#allocation2 + $0x3c8] sm:$0x1]  ;;  %v15575_v20 = vpop.f32.mrf.mxu1 }
 0x257   : > { %15864 = vmatprep.mubr.bf16.mxu1 %v23036_v21  ;;  %15912 = vmatprep.mubr.bf16.mxu0 %v23037_v3  ;;  %v4063_v0 = vadd.f32 %v4008_v18, %v23039_v4  ;;  %v20364_v5 = vsel %vm18292_vm8, %v8258_v53, %v8259_v58  ;;  %v15623_v21 = vpop.f32.mrf.mxu0  ;;  %v20368_v8 = vsel %vm17212_vm5, %v13981_v46, %v7733_v61  ;;  %v7735_v11 = vrot.slane %v7733_v61, 4  ;;  %v14030_v55 = vld [vmem:[#allocation2 + $0x3c4] sm:$0x8]  ;;  %v14031_v53 = vld [vmem:[#allocation2 + $0x3c8] sm:$0xf] }
 0x258   : > { %23038 = vst [vmem:[#allocation47_spill] sm:$0xff] %v20357_v37  ;;  %v8265_v32 = vrot.slane %v8263_v22, 4  ;;  %v8266_v30 = vrot.slane %v14029_v42, 7  ;;  %v4066_v12 = vadd.f32 %v15575_v20, %v19824_v15  ;;  %v20375_v3 = vsel %vm18292_vm8, %v14069_v23, %v8263_v22  ;;  %v14032_v18 = vld [vmem:[#allocation2 + $0x3cc] sm:$0x7]  ;;  %v4011_v4 = vpop.f32.mrf.mxu1  ;;  %v23042_v23 = vld [vmem:[#allocation76_spill] sm:$0xff] }
 0x259   : > { %v20370_v33 = vadd.f32 %v4362_v34, %v4063_v0  ;;  %v7740_v58 = vrot.slane %v13943_v56, 5  ;;  %v4365_v57 = vpop.f32.mrf.mxu0  ;;  %v20379_v46 = vsel %vm17212_vm5, %v7735_v11, %v7736_v40  ;;  %v13982_v61 = vrot.slane %v13942_v51, 9  ;;  %v13945_v15 = vld [vmem:[#allocation2 + $0x3dc] sm:$0xe]  ;;  %v13946_v0 = vld [vmem:[#allocation2 + $0x3e0] sm:$0xf] }
 0x25a   : > { %v20383_v42 = vsel %vm18292_vm8, %v8265_v32, %v8266_v30  ;;  %v7743_v34 = vrot.slane %v13944_v39, 5  ;;  %v20385_v20 = vadd.f32 %v15623_v21, %v4066_v12  ;;  %v4064_v56 = vadd.f32 %v4011_v4, %v23042_v23  ;;  %v15578_v40 = vpop.f32.mrf.mxu1  ;;  %v23046_v23 = vld [vmem:[#allocation28_spill] sm:$0xff]  ;;  %v16681_v39 = vld [vmem:[#allocation4 + $0x470] sm:$0xff]  }
 0x25b   : > { %23040 = vst [vmem:[#allocation35_spill] sm:$0xff] %v20370_v33  ;;  %v14070_v24 = vrot.slane %v14030_v55, 11  ;;  %v20390_v33 = vld [vmem:[#allocation2 + $0x3e0] sm:$0x8]  ;;  %v15626_v11 = vpop.f32.mrf.mxu0  ;;  %v23043_v32 = vcombine.low %v20235_v29, %v20239_v17  ;;  %v23044_v51 = vcombine.low %v20250_v44, %v20259_v26  ;;  %v7742_v21 = vrot.slane %v7740_v58, 4 }
 0x25c   : > { %23041 = vst [vmem:[#allocation44_spill] sm:$0xff] %v20385_v20  ;;  %v8270_v30 = vrot.slane %v14031_v53, 7  ;;  %v8273_v12 = vrot.slane %v14032_v18, 7  ;;  %v14034_v55 = vld [vmem:[#allocation2 + $0x3e4] sm:$0xf]  ;;  %v20400_v4 = vadd.f32 %v4365_v57, %v4064_v56  ;;  %v4069_v22 = vadd.f32 %v15578_v40, %v23046_v23  ;;  %v4024_v18 = vpop.f32.mrf.mxu1  ;;  %v23050_v40 = vld [vmem:[#allocation34_spill] sm:$0xff] }
 0x25d   : > { %15865 = vmatmul.mubr.bf16.gmra.mxu1 %v23043_v32  ;;  %15913 = vmatmul.mubr.bf16.gmra.mxu0 %v23044_v51  ;;  %v23047_v20 = vcombine.low %v20263_v45, %v20276_v54  ;;  %v23048_v29 = vcombine.low %v20280_v52, %v20284_v36  ;;  %v7747_v44 = vrot.slane %v13946_v0, 5  ;;  %v14035_v26 = vld [vmem:[#allocation2 + $0x3e8] sm:$0x7]  ;;  %v20411_v53 = vld [vmem:[#allocation2 + $0x3f8] sm:$0xe]  ;;  %v4378_v57 = vpop.f32.mrf.mxu0  ;;  %v20415_v56 = vsel %vm17212_vm5, %v13982_v61, %v7740_v58 }
 0x25e   : > { %23045 = vst [vmem:[#allocation55_spill] sm:$0xff] %v20400_v4  ;;  %v20419_v45 = vsel %vm17212_vm5, %v7742_v21, %v7743_v34  ;;  %v8272_v54 = vrot.slane %v8270_v30, 4  ;;  %v13983_v52 = vrot.slane %v13945_v15, 9  ;;  %v13949_v36 = vld [vmem:[#allocation2 + $0x3fc] sm:$0xf]  ;;  %v4067_v0 = vadd.f32 %v4024_v18, %v23050_v40  ;;  %v15579_v23 = vpop.f32.mrf.mxu1  ;;  %v23056_v4 = vld [vmem:[#allocation38_spill] sm:$0xff] }
 0x25f   : > { %15932 = vmatprep.mubr.bf16.mxu1 %v23047_v20  ;;  %15980 = vmatprep.mubr.bf16.mxu0 %v23048_v29  ;;  %v20421_v20 = vadd.f32 %v15626_v11, %v4069_v22  ;;  %v20426_v32 = vsel %vm18292_vm8, %v14070_v24, %v8270_v30  ;;  %v7750_v51 = vrot.slane %v13947_v31, 5  ;;  %v15627_v29 = vpop.f32.mrf.mxu0  ;;  %v7749_v61 = vrot.slane %v7747_v44, 4  ;;  %v13950_v21 = vld [vmem:[#allocation2 + $0x400] sm:$0x1]  ;;  %v14036_v31 = vld [vmem:[#allocation2 + $0x3fc] sm:$0x8] }
 0x260   : > { %v20430_v58 = vsel %vm18292_vm8, %v8272_v54, %v8273_v12  ;;  %v14071_v34 = vrot.slane %v20390_v33, 11  ;;  %v8277_v15 = vrot.slane %v14034_v55, 7  ;;  %v20433_v22 = vadd.f32 %v4378_v57, %v4067_v0  ;;  %v14037_v18 = vld [vmem:[#allocation2 + $0x400] sm:$0xf]  ;;  %v4027_v40 = vpop.f32.mrf.mxu1  ;;  %v23053_v0 = vld [vmem:[#allocation30_spill] sm:$0xff] }
 0x261   : > { %23049 = vst [vmem:[#allocation23_spill] sm:$0xff] %v20421_v20  ;;  %v4070_v11 = vadd.f32 %v15579_v23, %v19886_v2  ;;  %v8280_v30 = vrot.slane %v14035_v26, 7  ;;  %v4381_v17 = vpop.f32.mrf.mxu0  ;;  %v20442_v33 = vsel %vm17212_vm5, %v13983_v52, %v7747_v44  ;;  %v13984_v57 = vrot.slane %v20411_v53, 9  ;;  %v14038_v2 = vld [vmem:[#allocation2 + $0x404] sm:$0x7]  ;;  %v16682_v23 = vld [vmem:[#allocation4 + $0x4b0] sm:$0xff]  }
 0x262   : > { %23051 = vst [vmem:[#allocation56_spill] sm:$0xff] %v20433_v22  ;;  %v8279_v55 = vrot.slane %v8277_v15, 4  ;;  %v4068_v26 = vadd.f32 %v4027_v40, %v23053_v0  ;;  %v20450_v24 = vsel %vm17212_vm5, %v7749_v61, %v7750_v51  ;;  %v7754_v22 = vrot.slane %v13949_v36, 5  ;;  %v20452_v20 = vld [vmem:[#allocation2 + $0x414] sm:$0xe]  ;;  %v15646_v44 = vpop.f32.mrf.mxu1  ;;  %v20466_v51 = vld [vmem:[#allocation4 + $0x468] sm:$0xff]  }
 0x263   : > { %v20445_v54 = vadd.f32 %v15627_v29, %v4070_v11  ;;  %v20454_v12 = vld [vmem:[#allocation2 + $0x418] sm:$0xf]  ;;  %v15694_v52 = vpop.f32.mrf.mxu0  ;;  %v23054_v53 = vcombine.low %v20306_v25, %v20310_v28  ;;  %v23055_v29 = vcombine.low %v20317_v6, %v20321_v27  ;;  %v20464_v11 = vsel %vm18292_vm8, %v14071_v34, %v8277_v15  ;;  %v13953_v0 = vld [vmem:[#allocation2 + $0x41c] sm:$0x1]  ;;  %v20477_v28 = vld [vmem:[#allocation4 + $0x4a8] sm:$0xff]  }
 0x264   : > { %v7757_v36 = vrot.slane %v13950_v21, 5  ;;  %v14072_v61 = vrot.slane %v14036_v31, 11  ;;  %v8284_v40 = vrot.slane %v14037_v18, 7  ;;  %v4931_v37 = vadd.f32 %v15646_v44, %v23056_v4  ;;  %v14039_v27 = vld [vmem:[#allocation2 + $0x418] sm:$0x8]  ;;  %v4802_v15 = vpop.f32.mrf.mxu1 }
 0x265   : > { %23052 = vst [vmem:[#allocation45_spill] sm:$0xff] %v20445_v54  ;;  %15933 = vmatmul.mubr.bf16.vlgmr.msra.gmra.mxu1 %v23054_v53  ;;  %15981 = vmatmul.mubr.bf16.vlgmr.msra.gmra.mxu0 %v23055_v29  ;;  %v20468_v54 = vadd.f32 %v4381_v17, %v4068_v26  ;;  %v20475_v25 = vsel %vm18292_vm8, %v8279_v55, %v8280_v30  ;;  %v7756_v6 = vrot.slane %v7754_v22, 4  ;;  %v14040_v34 = vld [vmem:[#allocation2 + $0x41c] sm:$0xf]  ;;  %v5332_v21 = vpop.f32.mrf.mxu0  ;;  %v8287_v31 = vrot.slane %v14038_v2, 7  ;;  %v23059_v26 = vld [vmem:[#allocation58_spill] sm:$0xff] }
 0x266   : > { %16013 = vmatpush3.bf16.msra.mxu1 %v20195_v59  ;;  %16061 = vmatpush3.bf16.msra.mxu0 %v20201_v14  ;;  %v23057_v17 = vcombine.low %v20336_v43, %v20340_v41  ;;  %v23058_v59 = vcombine.low %v20355_v60, %v20364_v5  ;;  %v13999_v14 = vcombine.low %v20442_v33, %v20450_v24  ;;  %v8286_v30 = vrot.slane %v8284_v40, 4  ;;  %v20491_v18 = vld [vmem:[#allocation2 + $0x420] sm:$0x7]  ;;  %v15647_v5 = vpop.f32.mrf.mxu1 }
 0x267   : > { %v20489_v4 = vsel %vm17212_vm5, %v13984_v57, %v7754_v22  ;;  %v20493_v55 = vadd.f32 %v15694_v52, %v4931_v37  ;;  %v4929_v43 = vadd.f32 %v4802_v15, %v23059_v26  ;;  %16014 = vmatprep.subr.bf16.mxu1 %v16681_v39  ;;  %16062 = vmatprep.subr.bf16.mxu0 %v16682_v23  ;;  %v13985_v60 = vrot.slane %v20452_v20, 9  ;;  %v15695_v44 = vpop.f32.mrf.mxu0  ;;  %v20508_v52 = vld [vmem:[#allocation2 + $0x434] sm:$0xf]  ;;  %v23060_v29 = vld [vmem:[#allocation64_spill] sm:$0xff]  ;;  %v13954_v15 = vld [vmem:[#allocation2 + $0x430] sm:$0xe] }
 0x268   : > { %15936 = vmatprep.mubr.bf16.mxu1 %v23057_v17  ;;  %15984 = vmatprep.mubr.bf16.mxu0 %v23058_v59  ;;  %v20498_v41 = vsel %vm17212_vm5, %v7756_v6, %v7757_v36  ;;  %v20505_v57 = vsel %vm18292_vm8, %v14072_v61, %v8284_v40  ;;  %v7761_v37 = vrot.slane %v20454_v12, 5  ;;  %v7764_v2 = vrot.slane %v13953_v0, 5  ;;  %v4805_v17 = vpop.f32.mrf.mxu1  ;;  %v13956_v0 = vld [vmem:[#allocation2 + $0x438] sm:$0x1] }
 0x269   : > { %v20510_v53 = vadd.f32 %v5332_v21, %v4929_v43  ;;  %v4932_v36 = vadd.f32 %v15647_v5, %v23060_v29  ;;  %v14073_v6 = vrot.slane %v14039_v27, 11  ;;  %v5335_v59 = vpop.f32.mrf.mxu0  ;;  %v20519_v12 = vsel %vm18292_vm8, %v8286_v30, %v8287_v31  ;;  %v16686_v43 = vld [vmem:[#allocation4 + $0x4a0] sm:$0xff]   ;;  %v14042_v29 = vld [vmem:[#allocation2 + $0x434] sm:$0x8]  ;;  %v14043_v30 = vld [vmem:[#allocation2 + $0x438] sm:$0xf] }
 0x26a   : > { %16015 = vmatpush3.bf16.msra.mxu1 %v16681_v39  ;;  %16063 = vmatpush3.bf16.msra.mxu0 %v16682_v23  ;;  %v7763_v61 = vrot.slane %v7761_v37, 4  ;;  %v8291_v40 = vrot.slane %v14040_v34, 7  ;;  %v8294_v39 = vrot.slane %v20491_v18, 7  ;;  %v16685_v23 = vld [vmem:[#allocation4 + $0x460] sm:$0xff]   ;;  %v4930_v27 = vadd.f32 %v4805_v17, %v19985_v1  ;;  %v15650_v31 = vpop.f32.mrf.mxu1 }
 0x26b   : > { %16016 = vmatprep.subr.bf16.mxu1 %v20466_v51  ;;  %16064 = vmatprep.subr.bf16.mxu0 %v20477_v28  ;;  %v20522_v21 = vadd.f32 %v15695_v44, %v4932_v36  ;;  %v20527_v26 = vsel %vm17212_vm5, %v13985_v60, %v7761_v37  ;;  %v7768_v5 = vrot.slane %v20508_v52, 5  ;;  %v15698_v20 = vpop.f32.mrf.mxu0  ;;  %v23061_v34 = vcombine.low %v20368_v8, %v20379_v46  ;;  %v14044_v52 = vld [vmem:[#allocation2 + $0x43c] sm:$0x7]  ;;  %v13957_v36 = vld [vmem:[#allocation2 + $0x44c] sm:$0xe] }
 0x26c   : > { %v23062_v18 = vcombine.low %v20375_v3, %v20383_v42  ;;  %v20538_v1 = vsel %vm17212_vm5, %v7763_v61, %v7764_v2  ;;  %v20542_v60 = vsel %vm18292_vm8, %v14073_v6, %v8291_v40  ;;  %v8293_v44 = vrot.slane %v8291_v40, 4  ;;  %v13958_v6 = vld [vmem:[#allocation2 + $0x450] sm:$0xf]  ;;  %v20553_v61 = vld [vmem:[#allocation2 + $0x454] sm:$0x1] }
 0x26d   : > { %15937 = vmatmul.mubr.bf16.gmra.mxu1 %v23061_v34  ;;  %v13986_v37 = vrot.slane %v13954_v15, 9  ;;  %v20544_v17 = vadd.f32 %v5335_v59, %v4930_v27  ;;  %v4935_v8 = vadd.f32 %v15650_v31, %v20010_v63  ;;  %v23063_v3 = vcombine.low %v20415_v56, %v20419_v45  ;;  %v4818_v15 = vpop.f32.mrf.mxu1  ;;  %v5348_v40 = vpop.f32.mrf.mxu0  ;;  %v14046_v59 = vld [vmem:[#allocation2 + $0x454] sm:$0xf]  ;;  %v23065_v27 = vld [vmem:[#allocation65_spill] sm:$0xff]  ;;  %v14047_v34 = vld [vmem:[#allocation2 + $0x458] sm:$0x7] }
 0x26e   : > { %15985 = vmatmul.mubr.bf16.gmra.mxu0 %v23062_v18  ;;  %v23064_v46 = vcombine.low %v20426_v32, %v20430_v58  ;;  %v7770_v42 = vrot.slane %v7768_v5, 4  ;;  %v7771_v2 = vrot.slane %v13956_v0, 5  ;;  %16017 = vmatpush3.bf16.msra.mxu1 %v20466_v51  ;;  %v14088_v63 = vcombine.low %v20505_v57, %v20519_v12  ;;  %v14045_v58 = vld [vmem:[#allocation2 + $0x450] sm:$0x8]  ;;  %v16687_v57 = vld [vmem:[#allocation4 + $0x458] sm:$0xff]  }
 0x26f   : > { %15940 = vmatprep.mubr.bf16.mxu1 %v23063_v3  ;;  %16065 = vmatpush3.bf16.msra.mxu0 %v20477_v28  ;;  %v20561_v56 = vsel %vm18292_vm8, %v8293_v44, %v8294_v39  ;;  %v14074_v45 = vrot.slane %v14042_v29, 11  ;;  %v8298_v32 = vrot.slane %v14043_v30, 7  ;;  %v20563_v0 = vadd.f32 %v15698_v20, %v4935_v8  ;;  %v15651_v12 = vpop.f32.mrf.mxu1  ;;  %v15699_v18 = vpop.f32.mrf.mxu0  ;;  %v20574_v44 = vld [vmem:[#allocation2 + $0x468] sm:$0xe]  ;;  %v20576_v8 = vld [vmem:[#allocation2 + $0x46c] sm:$0xf] }
 0x270   : > { %15988 = vmatprep.mubr.bf16.mxu0 %v23064_v46  ;;  %v4933_v31 = vadd.f32 %v4818_v15, %v23065_v27  ;;  %16018 = vmatprep.subr.bf16.mxu1 %v16685_v23  ;;  %v8301_v28 = vrot.slane %v14044_v52, 7  ;;  %v20572_v29 = vsel %vm17212_vm5, %v13986_v37, %v7768_v5  ;;  %v13987_v30 = vrot.slane %v13957_v36, 9  ;;  %v23066_v52 = vld [vmem:[#allocation68_spill] sm:$0xff]  ;;  %v16688_v39 = vld [vmem:[#allocation4 + $0x498] sm:$0xff]   ;;  %v20585_v51 = vld [vmem:[#allocation2 + $0x470] sm:$0x1] }
 0x271   : > { %16066 = vmatprep.subr.bf16.mxu0 %v16686_v43  ;;  %v8300_v20 = vrot.slane %v8298_v32, 4  ;;  %v4936_v46 = vadd.f32 %v15651_v12, %v23066_v52  ;;  %v20583_v15 = vsel %vm17212_vm5, %v7770_v42, %v7771_v2  ;;  %v7775_v27 = vrot.slane %v13958_v6, 5  ;;  %v4821_v5 = vpop.f32.mrf.mxu1  ;;  %v5351_v37 = vpop.f32.mrf.mxu0  ;;  %v20592_v52 = vld [vmem:[#allocation2 + $0x46c] sm:$0x8]  ;;  %v16689_v42 = vld [vmem:[#allocation4 + $0x450] sm:$0xff]  }
 0x272   : > { %v20578_v3 = vadd.f32 %v5348_v40, %v4933_v31  ;;  %16019 = vmatpush3.bf16.msra.mxu1 %v16685_v23  ;;  %v20589_v36 = vsel %vm18292_vm8, %v14074_v45, %v8298_v32  ;;  %v7778_v40 = vrot.slane %v20553_v61, 5  ;;  %v14075_v31 = vrot.slane %v14045_v58, 11  ;;  %v20607_v61 = vld [vmem:[#allocation2 + $0x474] sm:$0x7] }
 0x273   : > { %16067 = vmatpush3.bf16.msra.mxu0 %v16686_v43  ;;  %v8305_v12 = vrot.slane %v14046_v59, 7  ;;  %v20594_v2 = vadd.f32 %v15699_v18, %v4936_v46  ;;  %v4934_v6 = vadd.f32 %v4821_v5, %v20071_v47  ;;  %v20599_v22 = vsel %vm18292_vm8, %v8300_v20, %v8301_v28  ;;  %16020 = vmatprep.subr.bf16.mxu1 %v16687_v57  ;;  %v20605_v43 = vld [vmem:[#allocation2 + $0x470] sm:$0xf]  ;;  %v15654_v45 = vpop.f32.mrf.mxu1  ;;  %v15702_v32 = vpop.f32.mrf.mxu0 }
 0x274   : > { %v20603_v23 = vsel %vm17212_vm5, %v13987_v30, %v7775_v27  ;;  %v23067_v47 = vcombine.low %v20464_v11, %v20475_v25  ;;  %v7777_v58 = vrot.slane %v7775_v27, 4  ;;  %v8308_v18 = vrot.slane %v14047_v34, 7  ;;  %v16690_v20 = vld [vmem:[#allocation4 + $0x490] sm:$0xff]   ;;  %v20627_v25 = vld [vmem:[#allocation2 + $0x484] sm:$0xe]  ;;  %16068 = vmatprep.subr.bf16.mxu0 %v16688_v39 }
 0x275   : > { %15941 = vmatmul.mubr.bf16.gmra.mxu1 %v13999_v14  ;;  %v20617_v59 = vsel %vm18292_vm8, %v14075_v31, %v8305_v12  ;;  %v8307_v28 = vrot.slane %v8305_v12, 4  ;;  %v20619_v30 = vadd.f32 %v5351_v37, %v4934_v6  ;;  %v4939_v46 = vadd.f32 %v15654_v45, %v20095_v50  ;;  %v20629_v14 = vld [vmem:[#allocation2 + $0x488] sm:$0xf]  ;;  %v4834_v27 = vpop.f32.mrf.mxu1  ;;  %v5364_v34 = vpop.f32.mrf.mxu0 }
 0x276   : > { %15989 = vmatmul.mubr.bf16.gmra.mxu0 %v23067_v47  ;;  %v23068_v24 = vcombine.low %v20489_v4, %v20498_v41  ;;  %v13988_v33 = vrot.slane %v20574_v44, 9  ;;  %v7782_v11 = vrot.slane %v20576_v8, 5  ;;  %v20633_v5 = vsel %vm17212_vm5, %v7777_v58, %v7778_v40  ;;  %16021 = vmatpush3.bf16.msra.mxu1 %v16687_v57  ;;  %v20650_v31 = vld [vmem:[#allocation2 + $0x488] sm:$0x8]  ;;  %v20652_v57 = vld [vmem:[#allocation2 + $0x48c] sm:$0xf] }
 0x277   : > { %15992 = vmatprep.mubr.bf16.mxu0 %v14088_v63  ;;  %v20637_v50 = vsel %vm18292_vm8, %v8307_v28, %v8308_v18  ;;  %v7785_v4 = vrot.slane %v20585_v51, 5  ;;  %v14076_v41 = vrot.slane %v20592_v52, 11  ;;  %v20641_v63 = vld [vmem:[#allocation2 + $0x48c] sm:$0x1]  ;;  %v20643_v44 = vadd.f32 %v15702_v32, %v4939_v46  ;;  %16069 = vmatpush3.bf16.msra.mxu0 %v16688_v39  ;;  %v15655_v51 = vpop.f32.mrf.mxu1  ;;  %v15703_v12 = vpop.f32.mrf.mxu0  ;;  %v20664_v47 = vld [vmem:[#allocation2 + $0x490] sm:$0x7] }
 0x278   : > { %15944 = vmatprep.mubr.bf16.mxu1 %v23068_v24  ;;  %v4937_v8 = vadd.f32 %v4834_v27, %v20111_v49  ;;  %v14002_v37 = vcombine.low %v20572_v29, %v20583_v15  ;;  %v14090_v40 = vcombine.low %v20589_v36, %v20599_v22  ;;  %v14003_v52 = vcombine.low %v20603_v23, %v20633_v5  ;;  %v16691_v29 = vld [vmem:[#allocation4 + $0x448] sm:$0xff]   ;;  %v13966_v27 = vld [vmem:[#allocation2 + $0x4a0] sm:$0xe]  ;;  %v20756_v36 = vld [vmem:[#allocation2 + $0x4d8] sm:$0xe] }
 0x279   : > { %v7784_v6 = vrot.slane %v7782_v11, 4  ;;  %v8312_v45 = vrot.slane %v20605_v43, 7  ;;  %v8315_v49 = vrot.slane %v20607_v61, 7  ;;  %16022 = vmatprep.subr.bf16.mxu1 %v16689_v42  ;;  %16070 = vmatprep.subr.bf16.mxu0 %v16690_v20  ;;  %v23069_v22 = vld [vmem:[#allocation32_spill] sm:$0xff]  ;;  %v7789_v32 = vrot.slane %v20629_v14, 5  ;;  %v4837_v28 = vpop.f32.mrf.mxu1  ;;  %v5367_v18 = vpop.f32.mrf.mxu0  ;;  %v23075_v23 = vld [vmem:[#allocation73_spill] sm:$0xff] }
 0x27a   : > { %v20658_v15 = vadd.f32 %v5364_v34, %v4937_v8  ;;  %v4940_v39 = vadd.f32 %v15655_v51, %v23069_v22  ;;  %v16692_v58 = vld [vmem:[#allocation4 + $0x488] sm:$0xff]   ;;  %v20668_v43 = vsel %vm17212_vm5, %v13988_v33, %v7782_v11  ;;  %v13989_v24 = vrot.slane %v20627_v25, 9  ;;  %16023 = vmatpush3.bf16.msra.mxu1 %v16689_v42  ;;  %v13967_v34 = vld [vmem:[#allocation2 + $0x4a4] sm:$0xf] }
 0x27b   : > { %v20672_v61 = vsel %vm17212_vm5, %v7784_v6, %v7785_v4  ;;  %v8314_v46 = vrot.slane %v8312_v45, 4  ;;  %v4938_v8 = vadd.f32 %v4837_v28, %v20154_v16  ;;  %v20680_v51 = vsel %vm18292_vm8, %v14076_v41, %v8312_v45  ;;  %16071 = vmatpush3.bf16.msra.mxu0 %v16690_v20  ;;  %v20683_v11 = vld [vmem:[#allocation2 + $0x4a8] sm:$0x1]  ;;  %v14054_v4 = vld [vmem:[#allocation2 + $0x4a4] sm:$0x8]  ;;  %v15658_v25 = vpop.f32.mrf.mxu1  ;;  %v15706_v42 = vpop.f32.mrf.mxu0  ;;  %16024 = vmatprep.subr.bf16.mxu1 %v16691_v29 }
 0x27c   : > { %v20675_v14 = vadd.f32 %v15703_v12, %v4940_v39  ;;  %v7792_v33 = vrot.slane %v20641_v63, 5  ;;  %v20685_v6 = vld [vmem:[#allocation4 + $0x440] sm:$0xff]   ;;  %v23070_v12 = vcombine.low %v20527_v26, %v20538_v1  ;;  %v23071_v16 = vcombine.low %v20542_v60, %v20561_v56  ;;  %v14055_v22 = vld [vmem:[#allocation2 + $0x4a8] sm:$0xf]  ;;  %v14056_v56 = vld [vmem:[#allocation2 + $0x4ac] sm:$0x7]  ;;  %16072 = vmatprep.subr.bf16.mxu0 %v16692_v58 }
 0x27d   : > { %v20695_v41 = vsel %vm18292_vm8, %v8314_v46, %v8315_v49  ;;  %v7791_v20 = vrot.slane %v7789_v32, 4  ;;  %v14077_v63 = vrot.slane %v20650_v31, 11  ;;  %v8319_v45 = vrot.slane %v20652_v57, 7  ;;  %v16694_v39 = vld [vmem:[#allocation4 + $0x480] sm:$0xff]   ;;  %v4850_v49 = vpop.f32.mrf.mxu1  ;;  %v5380_v46 = vpop.f32.mrf.mxu0 }
 0x27e   : > { %15945 = vmatmul.mubr.bf16.gmra.mxu1 %v23070_v12  ;;  %15993 = vmatmul.mubr.bf16.gmra.mxu0 %v23071_v16  ;;  %v20699_v28 = vadd.f32 %v5367_v18, %v4938_v8  ;;  %v4943_v26 = vadd.f32 %v15658_v25, %v20175_v48  ;;  %v8322_v60 = vrot.slane %v20664_v47, 7  ;;  %v14092_v31 = vcombine.low %v20680_v51, %v20695_v41  ;;  %v20711_v48 = vld [vmem:[#allocation2 + $0x4bc] sm:$0xe] }
 0x27f   : > { %15948 = vmatprep.mubr.bf16.mxu1 %v14002_v37  ;;  %15996 = vmatprep.mubr.bf16.mxu0 %v14090_v40  ;;  %v20709_v57 = vsel %vm17212_vm5, %v13989_v24, %v7789_v32  ;;  %v8321_v18 = vrot.slane %v8319_v45, 4  ;;  %v13990_v8 = vrot.slane %v13966_v27, 9  ;;  %v20713_v37 = vld [vmem:[#allocation2 + $0x4c0] sm:$0xf]  ;;  %v4941_v47 = vadd.f32 %v4850_v49, %v20187_v19  ;;  %v15659_v32 = vpop.f32.mrf.mxu1  ;;  %v15707_v24 = vpop.f32.mrf.mxu0  ;;  %v20728_v19 = vld [vmem:[#allocation4 + $0x4f8] sm:$0xff]  }
 0x280   : > { %v20715_v40 = vadd.f32 %v15706_v42, %v4943_v26  ;;  %v20720_v25 = vsel %vm17212_vm5, %v7791_v20, %v7792_v33  ;;  %v7796_v51 = vrot.slane %v13967_v34, 5  ;;  %16025 = vmatpush3.bf16.msra.mxu1 %v16691_v29  ;;  %16073 = vmatpush3.bf16.msra.mxu0 %v16692_v58  ;;  %v20724_v27 = vsel %vm18292_vm8, %v14077_v63, %v8319_v45  ;;  %v23072_v34 = vld [vmem:[#allocation75_spill] sm:$0xff]  ;;  %v20743_v20 = vld [vmem:[#allocation2 + $0x4c4] sm:$0xf] }
 0x281   : > { %v7799_v12 = vrot.slane %v20683_v11, 5  ;;  %v14078_v16 = vrot.slane %v14054_v4, 11  ;;  %v8326_v42 = vrot.slane %v14055_v22, 7  ;;  %16026 = vmatprep.subr.bf16.mxu1 %v20685_v6  ;;  %16074 = vmatprep.subr.bf16.mxu0 %v16694_v39  ;;  %v20730_v33 = vadd.f32 %v5380_v46, %v4941_v47  ;;  %v13971_v11 = vld [vmem:[#allocation2 + $0x4c4] sm:$0x1]  ;;  %v4853_v63 = vpop.f32.mrf.mxu1  ;;  %v5383_v45 = vpop.f32.mrf.mxu0 }
 0x282   : > { %v4944_v29 = vadd.f32 %v15659_v32, %v23072_v34  ;;  %v20735_v58 = vsel %vm18292_vm8, %v8321_v18, %v8322_v60  ;;  %v20739_v41 = vsel %vm17212_vm5, %v13990_v8, %v7796_v51  ;;  %v20741_v4 = vld [vmem:[#allocation2 + $0x4c0] sm:$0x8]  ;;  %v7798_v22 = vrot.slane %v7796_v51, 4  ;;  %v14059_v60 = vld [vmem:[#allocation2 + $0x4c8] sm:$0x7]  ;;  %v20749_v18 = vld [vmem:[#allocation4 + $0x538] sm:$0xff]  }
 0x283   : > { %v20747_v26 = vsel %vm18292_vm8, %v14078_v16, %v8326_v42  ;;  %v8328_v49 = vrot.slane %v8326_v42, 4  ;;  %v8329_v46 = vrot.slane %v14056_v56, 7  ;;  %v23073_v8 = vld [vmem:[#allocation72_spill] sm:$0xff]  ;;  %v13991_v34 = vrot.slane %v20711_v48, 9  ;;  %v20758_v51 = vld [vmem:[#allocation2 + $0x4dc] sm:$0xf]  ;;  %v15662_v16 = vpop.f32.mrf.mxu1  ;;  %v15710_v56 = vpop.f32.mrf.mxu0 }
 0x284   : > { %v20751_v47 = vadd.f32 %v15707_v24, %v4944_v29  ;;  %v4942_v32 = vadd.f32 %v4853_v63, %v23073_v8  ;;  %v7803_v1 = vrot.slane %v20713_v37, 5  ;;  %16027 = vmatpush3.bf16.msra.mxu1 %v20685_v6  ;;  %16075 = vmatpush3.bf16.msra.mxu0 %v16694_v39  ;;  %v23074_v24 = vcombine.low %v20617_v59, %v20637_v50  ;;  %v13974_v42 = vld [vmem:[#allocation2 + $0x4e0] sm:$0x1]  ;;  %v14060_v29 = vld [vmem:[#allocation2 + $0x4dc] sm:$0x8] }
 0x285   : > { %v14005_v48 = vcombine.low %v20709_v57, %v20720_v25  ;;  %v7800_v37 = vsel %vm17212_vm5, %v7798_v22, %v7799_v12  ;;  %v8330_v6 = vsel %vm18292_vm8, %v8328_v49, %v8329_v46  ;;  %v7806_v39 = vrot.slane %v13971_v11, 5  ;;  %v14061_v57 = vld [vmem:[#allocation2 + $0x4e0] sm:$0xf]  ;;  %v4866_v25 = vpop.f32.mrf.mxu1  ;;  %v5396_v12 = vpop.f32.mrf.mxu0  ;;  %16108 = vmatprep.subr.bf16.mxu1 %v20728_v19  ;;  %16156 = vmatprep.subr.bf16.mxu0 %v20749_v18 }
 0x286   : > { %15949 = vmatmul.mubr.bf16.gmra.mxu1 %v14003_v52  ;;  %15997 = vmatmul.mubr.bf16.gmra.mxu0 %v23074_v24  ;;  %v20773_v63 = vadd.f32 %v5383_v45, %v4942_v32  ;;  %v4947_v5 = vadd.f32 %v15662_v16, %v23075_v23  ;;  %v23076_v59 = vcombine.low %v20668_v43, %v20672_v61  ;;  %v7805_v52 = vrot.slane %v7803_v1, 4  ;;  %v23077_v61 = vld [vmem:[#allocation74_spill] sm:$0xff]  ;;  %v14062_v32 = vld [vmem:[#allocation2 + $0x4e4] sm:$0x7] }
 0x287   : > { %16000 = vmatprep.mubr.bf16.mxu0 %v14092_v31  ;;  %v14093_v50 = vcombine.low %v20724_v27, %v20735_v58  ;;  %v14006_v11 = vcombine.low %v20739_v41, %v7800_v37  ;;  %v14094_v22 = vcombine.low %v20747_v26, %v8330_v6  ;;  %v14079_v45 = vrot.slane %v20741_v4, 11  ;;  %v15663_v41 = vpop.f32.mrf.mxu1  ;;  %v15711_v46 = vpop.f32.mrf.mxu0 }
 0x288   : > { %15952 = vmatprep.mubr.bf16.mxu1 %v23076_v59  ;;  %v8333_v49 = vrot.slane %v20743_v20, 7  ;;  %v20787_v43 = vadd.f32 %v15710_v56, %v4947_v5  ;;  %v4945_v31 = vadd.f32 %v4866_v25, %v23077_v61  ;;  %v20792_v27 = vsel %vm17212_vm5, %v13991_v34, %v7803_v1  ;;  %v20803_v34 = vld [vmem:[#allocation2 + $0x4f4] sm:$0xe]  ;;  %v13977_v5 = vld [vmem:[#allocation2 + $0x4fc] sm:$0x1] }
 0x289   : > { %v8336_v58 = vrot.slane %v14059_v60, 7  ;;  %v20796_v4 = vsel %vm17212_vm5, %v7805_v52, %v7806_v39  ;;  %v13992_v26 = vrot.slane %v20756_v36, 9  ;;  %v7810_v8 = vrot.slane %v20758_v51, 5  ;;  %v20805_v60 = vld [vmem:[#allocation2 + $0x4f8] sm:$0xf]  ;;  %v4869_v37 = vpop.f32.mrf.mxu1  ;;  %v5399_v6 = vpop.f32.mrf.mxu0 }
 0x28a   : > { %v8335_v20 = vrot.slane %v8333_v49, 4  ;;  %v20800_v16 = vadd.f32 %v5396_v12, %v4945_v31  ;;  %v4948_v56 = vadd.f32 %v15663_v41, %v20265_v38  ;;  %v7813_v24 = vrot.slane %v13974_v42, 5  ;;  %v14064_v52 = vld [vmem:[#allocation2 + $0x4fc] sm:$0xf]  ;;  %v14065_v61 = vld [vmem:[#allocation2 + $0x500] sm:$0x7] }
 0x28b   : > { %v14080_v1 = vrot.slane %v14060_v29, 11  ;;  %v8334_v39 = vsel %vm18292_vm8, %v14079_v45, %v8333_v49  ;;  %v7812_v23 = vrot.slane %v7810_v8, 4  ;;  %v8340_v36 = vrot.slane %v14061_v57, 7  ;;  %v14063_v29 = vld [vmem:[#allocation2 + $0x4f8] sm:$0x8]  ;;  %v15666_v25 = vpop.f32.mrf.mxu1  ;;  %v15714_v12 = vpop.f32.mrf.mxu0 }
 0x28c   : > { %v20809_v51 = vadd.f32 %v15711_v46, %v4948_v56  ;;  %v4946_v59 = vadd.f32 %v4869_v37, %v20286_v13  ;;  %v8337_v38 = vsel %vm18292_vm8, %v8335_v20, %v8336_v58  ;;  %v8343_v42 = vrot.slane %v14062_v32, 7  ;;  %v9063_v32 = vld [vmem:[#allocation2 + $0xc] sm:$0xf] }
 0x28d   : > { %v14007_v45 = vcombine.low %v20792_v27, %v20796_v4  ;;  %v7811_v57 = vsel %vm17212_vm5, %v13992_v26, %v7810_v8  ;;  %v7814_v49 = vsel %vm17212_vm5, %v7812_v23, %v7813_v24  ;;  %v8342_v13 = vrot.slane %v8340_v36, 4  ;;  %v9062_v27 = vld [vmem:[#allocation2 + $0x8] sm:$0xe]  ;;  %v4882_v41 = vpop.f32.mrf.mxu1  ;;  %v5412_v46 = vpop.f32.mrf.mxu0 }
 0x28e   : > { %15953 = vmatmul.mubr.bf16.gmra.mxu1 %v14005_v48  ;;  %16001 = vmatmul.mubr.bf16.gmra.mxu0 %v14093_v50  ;;  %v20820_v31 = vadd.f32 %v5399_v6, %v4946_v59  ;;  %v4951_v58 = vadd.f32 %v15666_v25, %v20299_v9  ;;  %v8341_v48 = vsel %vm18292_vm8, %v14080_v1, %v8340_v36  ;;  %v7817_v50 = vrot.slane %v20805_v60, 5  ;;  %v23078_v9 = vld [vmem:[#allocation22_spill] sm:$0xff]  ;;  %v9064_v1 = vld [vmem:[#allocation2 + $0x10] sm:$0x1] }
 0x28f   : > { %15956 = vmatprep.mubr.bf16.mxu1 %v14006_v11  ;;  %16004 = vmatprep.mubr.bf16.mxu0 %v14094_v22  ;;  %v14095_v4 = vcombine.low %v8334_v39, %v8337_v38  ;;  %v8344_v20 = vsel %vm18292_vm8, %v8342_v13, %v8343_v42  ;;  %v13993_v26 = vrot.slane %v20803_v34, 9  ;;  %v8347_v8 = vrot.slane %v14064_v52, 7  ;;  %v15667_v37 = vpop.f32.mrf.mxu1  ;;  %v15715_v60 = vpop.f32.mrf.mxu0 }
 0x290   : > { %v20829_v56 = vadd.f32 %v15714_v12, %v4951_v58  ;;  %v4949_v11 = vadd.f32 %v4882_v41, %v23078_v9  ;;  %v14008_v22 = vcombine.low %v7811_v57, %v7814_v49  ;;  %v7820_v24 = vrot.slane %v13977_v5, 5  ;;  %v9066_v58 = vld [vmem:[#allocation2 + $0x28] sm:$0xf]  ;;  %v9065_v49 = vld [vmem:[#allocation2 + $0x24] sm:$0xe] }
 0x291   : > { %v14096_v6 = vcombine.low %v8341_v48, %v8344_v20  ;;  %v7819_v23 = vrot.slane %v7817_v50, 4  ;;  %v14081_v36 = vrot.slane %v14063_v29, 11  ;;  %v8349_v39 = vrot.slane %v8347_v8, 4  ;;  %v4885_v52 = vpop.f32.mrf.mxu1  ;;  %v5415_v25 = vpop.f32.mrf.mxu0  ;;  %v9067_v48 = vld [vmem:[#allocation2 + $0x2c] sm:$0x1] }
 0x292   : > { %v20832_v59 = vadd.f32 %v5412_v46, %v4949_v11  ;;  %v4952_v38 = vadd.f32 %v15667_v37, %v20323_v7  ;;  %v8350_v34 = vrot.slane %v14065_v61, 7  ;;  %v9160_v42 = vrot.slane %v9063_v32, 5  ;;  %v9069_v20 = vld [vmem:[#allocation2 + $0x44] sm:$0xf] }
 0x293   : > { %v14130_v12 = vrot.slane %v9062_v27, 9  ;;  %v9163_v13 = vrot.slane %v9064_v1, 5  ;;  %v4950_v5 = vadd.f32 %v4885_v52, %v20342_v10  ;;  %v15670_v41 = vpop.f32.mrf.mxu1  ;;  %v15718_v29 = vpop.f32.mrf.mxu0  ;;  %v7818_v7 = vsel %vm17212_vm5, %v13993_v26, %v7817_v50  ;;  %v23079_v10 = vld [vmem:[#allocation47_spill] sm:$0xff] }
 0x294   : > { %v20835_v57 = vadd.f32 %v15715_v60, %v4952_v38  ;;  %v7821_v61 = vsel %vm17212_vm5, %v7819_v23, %v7820_v24  ;;  %v8348_v27 = vsel %vm18292_vm8, %v14081_v36, %v8347_v8  ;;  %v9162_v46 = vrot.slane %v9160_v42, 4  ;;  %v23080_v1 = vld [vmem:[#allocation35_spill] sm:$0xff] }
 0x295   : > { %v20844_v32 = vadd.f32 %v5415_v25, %v4950_v5  ;;  %v4955_v9 = vadd.f32 %v15670_v41, %v23079_v10  ;;  %v4898_v11 = vpop.f32.mrf.mxu1  ;;  %v5428_v50 = vpop.f32.mrf.mxu0  ;;  %v9161_v26 = vsel %vm17212_vm5, %v14130_v12, %v9160_v42  ;;  %v9068_v60 = vld [vmem:[#allocation2 + $0x40] sm:$0xe]  ;;  %v9174_v23 = vrot.slane %v9069_v20, 5  ;;  %v20859_v10 = vld [vmem:[#allocation2 + $0x7c] sm:$0xf] }
 0x296   : > { %15957 = vmatmul.mubr.bf16.gmra.mxu1 %v14007_v45  ;;  %16005 = vmatmul.mubr.bf16.gmra.mxu0 %v14095_v4  ;;  %v8351_v45 = vsel %vm18292_vm8, %v8349_v39, %v8350_v34  ;;  %v9167_v4 = vrot.slane %v9066_v58, 5  ;;  %v9164_v8 = vsel %vm17212_vm5, %v9162_v46, %v9163_v13  ;;  %v4953_v37 = vadd.f32 %v4898_v11, %v23080_v1  ;;  %v9070_v34 = vld [vmem:[#allocation2 + $0x48] sm:$0x1]  ;;  %v16695_v12 = vld [vmem:[#allocation2] sm:$0xff]   ;;  %v9071_v11 = vld [vmem:[#allocation2 + $0x5c] sm:$0xe] }
 0x297   : > { %15960 = vmatprep.mubr.bf16.mxu1 %v14008_v22  ;;  %16008 = vmatprep.mubr.bf16.mxu0 %v14096_v6  ;;  %v20853_v24 = vadd.f32 %v15718_v29, %v4955_v9  ;;  %v15671_v22 = vpop.f32.mrf.mxu1  ;;  %v15719_v6 = vpop.f32.mrf.mxu0  ;;  %v14009_v36 = vcombine.low %v7818_v7, %v7821_v61  ;;  %v14097_v35 = vcombine.low %v8348_v27, %v8351_v45  ;;  %v14131_v39 = vrot.slane %v9065_v49, 9  ;;  %v23081_v25 = vld [vmem:[#allocation44_spill] sm:$0xff]  ;;  %v23082_v7 = vld [vmem:[#allocation55_spill] sm:$0xff] }
 0x298   : > { %v9170_v38 = vrot.slane %v9067_v48, 5  ;;  %v20856_v52 = vadd.f32 %v5428_v50, %v4953_v37  ;;  %v4956_v42 = vadd.f32 %v15671_v22, %v23081_v25  ;;  %v14146_v58 = vcombine.low %v9161_v26, %v9164_v8  ;;  %v9072_v5 = vld [vmem:[#allocation2 + $0x60] sm:$0xf] }
 0x299   : > { %v9169_v13 = vrot.slane %v9167_v4, 4  ;;  %v4901_v41 = vpop.f32.mrf.mxu1  ;;  %v5431_v29 = vpop.f32.mrf.mxu0  ;;  %v14132_v46 = vrot.slane %v9068_v60, 9  ;;  %v9176_v49 = vrot.slane %v9174_v23, 4  ;;  %v9177_v48 = vrot.slane %v9070_v34, 5  ;;  %v23084_v26 = vld [vmem:[#allocation23_spill] sm:$0xff]  ;;  %v23086_v34 = vld [vmem:[#allocation56_spill] sm:$0xff] }
 0x29a   : > { %v20861_v20 = vadd.f32 %v15719_v6, %v4956_v42  ;;  %v4954_v61 = vadd.f32 %v4901_v41, %v23082_v7  ;;  %v9168_v45 = vsel %vm17212_vm5, %v14131_v39, %v9167_v4  ;;  %v9181_v37 = vrot.slane %v9072_v5, 5  ;;  %v9073_v6 = vld [vmem:[#allocation2 + $0x64] sm:$0x1]  ;;  %v9074_v42 = vld [vmem:[#allocation2 + $0x78] sm:$0xe] }
 0x29b   : > { %v15674_v27 = vpop.f32.mrf.mxu1  ;;  %v15722_v9 = vpop.f32.mrf.mxu0  ;;  %v9171_v1 = vsel %vm17212_vm5, %v9169_v13, %v9170_v38  ;;  %v9175_v39 = vsel %vm17212_vm5, %v14132_v46, %v9174_v23  ;;  %v9178_v25 = vsel %vm17212_vm5, %v9176_v49, %v9177_v48  ;;  %v16696_v13 = vld [vmem:[#allocation2 + $0x1c] sm:$0xff]   ;;  %v14133_v41 = vrot.slane %v9071_v11, 9  ;;  %v16702_v48 = vld [vmem:[#allocation4 + $0x530] sm:$0xff]  }
 0x29c   : > { %v20866_v50 = vadd.f32 %v5431_v29, %v4954_v61  ;;  %v4959_v8 = vadd.f32 %v15674_v27, %v23084_v26  ;;  %v14147_v5 = vcombine.low %v9168_v45, %v9171_v1  ;;  %v16699_v61 = vld [vmem:[#allocation2 + $0x38] sm:$0xff]   ;;  %v9183_v27 = vrot.slane %v9181_v37, 4  ;;  %v16701_v26 = vld [vmem:[#allocation4 + $0x4f0] sm:$0xff]  }
 0x29d   : > { %v4914_v60 = vpop.f32.mrf.mxu1  ;;  %v5444_v22 = vpop.f32.mrf.mxu0  ;;  %v14148_v49 = vcombine.low %v9175_v39, %v9178_v25  ;;  %v20887_v11 = vld [vmem:[#allocation2 + $0xb4] sm:$0xf] }
 0x29e   : > { %15961 = vmatmul.mubr.bf16.gmra.mxu1 %v14009_v36  ;;  %16009 = vmatmul.mubr.bf16.gmra.mxu0 %v14097_v35  ;;  %23083 = vst [vmem:[#allocation41_spill] sm:$0xff] %v20866_v50  ;;  %v9188_v36 = vrot.slane %v20859_v10, 5  ;;  %v20872_v35 = vadd.f32 %v15722_v9, %v4959_v8  ;;  %v4957_v4 = vadd.f32 %v4914_v60, %v23086_v34  ;;  %v23087_v10 = vld [vmem:[#allocation45_spill] sm:$0xff]  ;;  %v9184_v9 = vrot.slane %v9073_v6, 5  ;;  %v20882_v8 = vld [vmem:[#allocation2 + $0x98] sm:$0xf] }
 0x29f   : > { %16028 = vmatprep.mubr.bf16.mxu1 %v16695_v12  ;;  %16076 = vmatprep.mubr.bf16.mxu0 %v14146_v58  ;;  %v9076_v12 = vld [vmem:[#allocation2 + $0x80] sm:$0x1]  ;;  %v15675_v58 = vpop.f32.mrf.mxu1  ;;  %v15723_v38 = vpop.f32.mrf.mxu0  ;;  %v14134_v60 = vrot.slane %v9074_v42, 9  ;;  %v9182_v6 = vsel %vm17212_vm5, %v14133_v41, %v9181_v37  ;;  %v9077_v42 = vld [vmem:[#allocation2 + $0x94] sm:$0xe] }
 0x2a0   : > { %23085 = vst [vmem:[#allocation42_spill] sm:$0xff] %v20872_v35  ;;  %v20879_v29 = vadd.f32 %v5444_v22, %v4957_v4  ;;  %v4960_v7 = vadd.f32 %v15675_v58, %v23087_v10  ;;  %v9190_v34 = vrot.slane %v9188_v36, 4  ;;  %v9191_v35 = vrot.slane %v9076_v12, 5  ;;  %v16705_v12 = vld [vmem:[#allocation4 + $0x4e8] sm:$0xff]  }
 0x2a1   : > { %v4917_v23 = vpop.f32.mrf.mxu1  ;;  %v5447_v46 = vpop.f32.mrf.mxu0  ;;  %v9195_v4 = vrot.slane %v20882_v8, 5  ;;  %v9189_v37 = vsel %vm17212_vm5, %v14134_v60, %v9188_v36  ;;  %v16703_v36 = vld [vmem:[#allocation2 + $0x70] sm:$0xff]  }
 0x2a2   : > { %v20884_v50 = vadd.f32 %v15723_v38, %v4960_v7  ;;  %v4958_v45 = vadd.f32 %v4917_v23, %v20468_v54  ;;  %v9185_v54 = vsel %vm17212_vm5, %v9183_v27, %v9184_v9  ;;  %v9082_v7 = vld [vmem:[#allocation2 + $0xb8] sm:$0x1]  ;;  %v14135_v23 = vrot.slane %v9077_v42, 9 }
 0x2a3   : > { %v15742_v1 = vpop.f32.mrf.mxu1  ;;  %v15790_v22 = vpop.f32.mrf.mxu0  ;;  %v16700_v9 = vld [vmem:[#allocation2 + $0x54] sm:$0xff]   ;;  %v14149_v8 = vcombine.low %v9182_v6, %v9185_v54  ;;  %v16710_v54 = vld [vmem:[#allocation4 + $0x520] sm:$0xff]  }
 0x2a4   : > { %v20892_v39 = vadd.f32 %v5447_v46, %v4958_v45  ;;  %v5991_v25 = vadd.f32 %v15742_v1, %v20493_v55  ;;  %v9079_v55 = vld [vmem:[#allocation2 + $0x9c] sm:$0x1]  ;;  %v9197_v46 = vrot.slane %v9195_v4, 4  ;;  %v20910_v45 = vld [vmem:[#allocation2 + $0xd0] sm:$0xf] }
 0x2a5   : > { %v5862_v58 = vpop.f32.mrf.mxu1  ;;  %v6392_v38 = vpop.f32.mrf.mxu0 }
 0x2a6   : > { %16029 = vmatmul.mubr.bf16.vlgmr.msra.gmra.mxu1 %v16696_v13  ;;  %16077 = vmatmul.mubr.bf16.vlgmr.msra.gmra.mxu0 %v14147_v5  ;;  %v9192_v13 = vsel %vm17212_vm5, %v9190_v34, %v9191_v35  ;;  %v16706_v5 = vld [vmem:[#allocation4 + $0x528] sm:$0xff]   ;;  %v20904_v41 = vadd.f32 %v15790_v22, %v5991_v25  ;;  %v5989_v10 = vadd.f32 %v5862_v58, %v20510_v53  ;;  %v9198_v34 = vrot.slane %v9079_v55, 5  ;;  %v16709_v53 = vld [vmem:[#allocation4 + $0x4e0] sm:$0xff]  }
 0x2a7   : > { %16109 = vmatpush3.bf16.msra.mxu1 %v20728_v19  ;;  %16157 = vmatpush3.bf16.msra.mxu0 %v20749_v18  ;;  %v9080_v19 = vld [vmem:[#allocation2 + $0xb0] sm:$0xe]  ;;  %v9202_v18 = vrot.slane %v20887_v11, 5  ;;  %v15791_v27 = vpop.f32.mrf.mxu0  ;;  %v14150_v60 = vcombine.low %v9189_v37, %v9192_v13  ;;  %v9205_v25 = vrot.slane %v9082_v7, 5  ;;  %v9083_v37 = vld [vmem:[#allocation2 + $0xcc] sm:$0xe] }
 0x2a8   : > { %16032 = vmatprep.mubr.bf16.mxu1 %v16699_v61  ;;  %16080 = vmatprep.mubr.bf16.mxu0 %v14148_v49  ;;  %v15743_v61 = vpop.f32.mrf.mxu1  ;;  %v20907_v35 = vadd.f32 %v6392_v38, %v5989_v10  ;;  %v14136_v22 = vrot.slane %v9080_v19, 9  ;;  %v9196_v38 = vsel %vm17212_vm5, %v14135_v23, %v9195_v4  ;;  %v9085_v13 = vld [vmem:[#allocation2 + $0xd4] sm:$0x1]  ;;  %v9209_v10 = vrot.slane %v20910_v45, 5  ;;  %v9086_v7 = vld [vmem:[#allocation2 + $0xe8] sm:$0xe] }
 0x2a9   : > { %16110 = vmatprep.subr.bf16.mxu1 %v16701_v26  ;;  %16158 = vmatprep.subr.bf16.mxu0 %v16702_v48  ;;  %v5992_v49 = vadd.f32 %v15743_v61, %v20522_v21  ;;  %v6395_v1 = vpop.f32.mrf.mxu0  ;;  %v9204_v6 = vrot.slane %v9202_v18, 4  ;;  %v20915_v21 = vld [vmem:[#allocation2 + $0xec] sm:$0xf] }
 0x2aa   : > { %v5865_v11 = vpop.f32.mrf.mxu1  ;;  %v9203_v4 = vsel %vm17212_vm5, %v14136_v22, %v9202_v18 }
 0x2ab   : > { %16111 = vmatpush3.bf16.msra.mxu1 %v16701_v26  ;;  %16159 = vmatpush3.bf16.msra.mxu0 %v16702_v48  ;;  %v20912_v42 = vadd.f32 %v15791_v27, %v5992_v49  ;;  %v5990_v58 = vadd.f32 %v5865_v11, %v20544_v17  ;;  %v15794_v48 = vpop.f32.mrf.mxu0  ;;  %v9199_v17 = vsel %vm17212_vm5, %v9197_v46, %v9198_v34  ;;  %v14137_v49 = vrot.slane %v9083_v37, 9  ;;  %v20933_v34 = vld [vmem:[#allocation2 + $0x108] sm:$0xf] }
 0x2ac   : > { %16112 = vmatprep.subr.bf16.mxu1 %v16705_v12  ;;  %16160 = vmatprep.subr.bf16.mxu0 %v16706_v5  ;;  %v15746_v26 = vpop.f32.mrf.mxu1  ;;  %v14151_v18 = vcombine.low %v9196_v38, %v9199_v17  ;;  %v9212_v11 = vrot.slane %v9085_v13, 5  ;;  %v20941_v38 = vld [vmem:[#allocation2 + $0x124] sm:$0xf]  ;;  %v16717_v13 = vld [vmem:[#allocation4 + $0x4d0] sm:$0xff]  }
 0x2ad   : > { %v20919_v55 = vadd.f32 %v6395_v1, %v5990_v58  ;;  %v5995_v19 = vadd.f32 %v15746_v26, %v20563_v0  ;;  %v6408_v27 = vpop.f32.mrf.mxu0  ;;  %v9216_v0 = vrot.slane %v20915_v21, 5  ;;  %v14138_v1 = vrot.slane %v9086_v7, 9  ;;  %v16718_v17 = vld [vmem:[#allocation4 + $0x510] sm:$0xff]  }
 0x2ae   : > { %16033 = vmatmul.mubr.bf16.gmra.mxu1 %v16700_v9  ;;  %16081 = vmatmul.mubr.bf16.gmra.mxu0 %v14149_v8  ;;  %v5878_v61 = vpop.f32.mrf.mxu1  ;;  %v16704_v9 = vld [vmem:[#allocation2 + $0x8c] sm:$0xff]   ;;  %v9206_v8 = vsel %vm17212_vm5, %v9204_v6, %v9205_v25  ;;  %v9211_v21 = vrot.slane %v9209_v10, 4 }
 0x2af   : > { %16036 = vmatprep.mubr.bf16.mxu1 %v16703_v36  ;;  %16084 = vmatprep.mubr.bf16.mxu0 %v14150_v60  ;;  %v16713_v36 = vld [vmem:[#allocation4 + $0x4d8] sm:$0xff]   ;;  %v20930_v23 = vadd.f32 %v15794_v48, %v5995_v19  ;;  %v5993_v46 = vadd.f32 %v5878_v61, %v20578_v3  ;;  %v9088_v60 = vld [vmem:[#allocation2 + $0xf0] sm:$0x1]  ;;  %v15795_v45 = vpop.f32.mrf.mxu0  ;;  %v16707_v25 = vld [vmem:[#allocation2 + $0xa8] sm:$0xff]   ;;  %v14152_v58 = vcombine.low %v9203_v4, %v9206_v8  ;;  %v9218_v48 = vrot.slane %v9216_v0, 4 }
 0x2b0   : > { %16113 = vmatpush3.bf16.msra.mxu1 %v16705_v12  ;;  %16161 = vmatpush3.bf16.msra.mxu0 %v16706_v5  ;;  %v16714_v12 = vld [vmem:[#allocation4 + $0x518] sm:$0xff]   ;;  %v15747_v5 = vpop.f32.mrf.mxu1  ;;  %v9219_v37 = vrot.slane %v9088_v60, 5  ;;  %v9089_v8 = vld [vmem:[#allocation2 + $0x104] sm:$0xe]  ;;  %v16721_v60 = vld [vmem:[#allocation4 + $0x4c8] sm:$0xff]  }
 0x2b1   : > { %16114 = vmatprep.subr.bf16.mxu1 %v16709_v53  ;;  %16162 = vmatprep.subr.bf16.mxu0 %v16710_v54  ;;  %v20935_v22 = vadd.f32 %v6408_v27, %v5993_v46  ;;  %v5996_v6 = vadd.f32 %v15747_v5, %v20594_v2  ;;  %v6411_v26 = vpop.f32.mrf.mxu0  ;;  %v9091_v46 = vld [vmem:[#allocation2 + $0x10c] sm:$0x1] }
 0x2b2   : > { %v5881_v3 = vpop.f32.mrf.mxu1 }
 0x2b3   : > { %v20938_v19 = vadd.f32 %v15795_v45, %v5996_v6  ;;  %v5994_v61 = vadd.f32 %v5881_v3, %v20619_v30  ;;  %v15798_v7 = vpop.f32.mrf.mxu0  ;;  %v9213_v30 = vsel %vm17212_vm5, %v9211_v21, %v9212_v11  ;;  %v16708_v45 = vld [vmem:[#allocation2 + $0xc4] sm:$0xff]  }
 0x2b4   : > { %16115 = vmatpush3.bf16.msra.mxu1 %v16709_v53  ;;  %16163 = vmatpush3.bf16.msra.mxu0 %v16710_v54  ;;  %v15750_v2 = vpop.f32.mrf.mxu1  ;;  %v9210_v53 = vsel %vm17212_vm5, %v14137_v49, %v9209_v10  ;;  %v9223_v54 = vrot.slane %v20933_v34, 5  ;;  %v9217_v10 = vsel %vm17212_vm5, %v14138_v1, %v9216_v0  ;;  %v9220_v49 = vsel %vm17212_vm5, %v9218_v48, %v9219_v37  ;;  %v9094_v34 = vld [vmem:[#allocation2 + $0x128] sm:$0x1]  ;;  %v16711_v3 = vld [vmem:[#allocation2 + $0xe0] sm:$0xff]  }
 0x2b5   : > { %16116 = vmatprep.subr.bf16.mxu1 %v16713_v36  ;;  %16164 = vmatprep.subr.bf16.mxu0 %v16714_v12  ;;  %v20946_v27 = vadd.f32 %v6411_v26, %v5994_v61  ;;  %v5999_v4 = vadd.f32 %v15750_v2, %v20643_v44  ;;  %v9092_v44 = vld [vmem:[#allocation2 + $0x120] sm:$0xe]  ;;  %v16722_v6 = vld [vmem:[#allocation4 + $0x508] sm:$0xff]   ;;  %v14153_v1 = vcombine.low %v9210_v53, %v9213_v30  ;;  %v14139_v26 = vrot.slane %v9089_v8, 9  ;;  %v20967_v30 = vld [vmem:[#allocation2 + $0x15c] sm:$0xf] }
 0x2b6   : > { %16037 = vmatmul.mubr.bf16.gmra.mxu1 %v16704_v9  ;;  %16085 = vmatmul.mubr.bf16.gmra.mxu0 %v14151_v18  ;;  %v5894_v5 = vpop.f32.mrf.mxu1  ;;  %v6424_v9 = vpop.f32.mrf.mxu0  ;;  %v9230_v18 = vrot.slane %v20941_v38, 5  ;;  %v14154_v61 = vcombine.low %v9217_v10, %v9220_v49  ;;  %v16725_v8 = vld [vmem:[#allocation4 + $0x4c0] sm:$0xff]  }
 0x2b7   : > { %16040 = vmatprep.mubr.bf16.mxu1 %v16707_v25  ;;  %16088 = vmatprep.mubr.bf16.mxu0 %v14152_v58  ;;  %v20956_v11 = vadd.f32 %v15798_v7, %v5999_v4  ;;  %v5997_v25 = vadd.f32 %v5894_v5, %v20658_v15  ;;  %v20959_v58 = vld [vmem:[#allocation2 + $0x140] sm:$0xf]  ;;  %v14140_v7 = vrot.slane %v9092_v44, 9  ;;  %v9233_v4 = vrot.slane %v9094_v34, 5  ;;  %v9095_v44 = vld [vmem:[#allocation2 + $0x13c] sm:$0xe] }
 0x2b8   : > { %16117 = vmatpush3.bf16.msra.mxu1 %v16713_v36  ;;  %16165 = vmatpush3.bf16.msra.mxu0 %v16714_v12  ;;  %v15751_v21 = vpop.f32.mrf.mxu1  ;;  %v15799_v0 = vpop.f32.mrf.mxu0  ;;  %v9225_v36 = vrot.slane %v9223_v54, 4  ;;  %v9226_v12 = vrot.slane %v9091_v46, 5  ;;  %v9232_v15 = vrot.slane %v9230_v18, 4  ;;  %v16726_v46 = vld [vmem:[#allocation4 + $0x500] sm:$0xff]   ;;  %v9224_v10 = vsel %vm17212_vm5, %v14139_v26, %v9223_v54 }
 0x2b9   : > { %16118 = vmatprep.subr.bf16.mxu1 %v16717_v13  ;;  %16166 = vmatprep.subr.bf16.mxu0 %v16718_v17  ;;  %v20961_v48 = vadd.f32 %v6424_v9, %v5997_v25  ;;  %v6000_v37 = vadd.f32 %v15751_v21, %v20675_v14  ;;  %v9097_v34 = vld [vmem:[#allocation2 + $0x144] sm:$0x1]  ;;  %v20977_v25 = vld [vmem:[#allocation4 + $0x578] sm:$0xff]   ;;  %v9231_v54 = vsel %vm17212_vm5, %v14140_v7, %v9230_v18 }
 0x2ba   : > { %v5897_v38 = vpop.f32.mrf.mxu1  ;;  %v6427_v2 = vpop.f32.mrf.mxu0 }
 0x2bb   : > { %v20964_v5 = vadd.f32 %v15799_v0, %v6000_v37  ;;  %v5998_v53 = vadd.f32 %v5897_v38, %v20699_v28  ;;  %v9227_v28 = vsel %vm17212_vm5, %v9225_v36, %v9226_v12  ;;  %v16712_v0 = vld [vmem:[#allocation2 + $0xfc] sm:$0xff]   ;;  %v14141_v38 = vrot.slane %v9095_v44, 9 }
 0x2bc   : > { %16119 = vmatpush3.bf16.msra.mxu1 %v16717_v13  ;;  %16167 = vmatpush3.bf16.msra.mxu0 %v16718_v17  ;;  %v15754_v9 = vpop.f32.mrf.mxu1  ;;  %v15802_v14 = vpop.f32.mrf.mxu0  ;;  %v9237_v13 = vrot.slane %v20959_v58, 5  ;;  %v9234_v58 = vsel %vm17212_vm5, %v9232_v15, %v9233_v4  ;;  %v9100_v12 = vld [vmem:[#allocation2 + $0x160] sm:$0x1]  ;;  %v14155_v18 = vcombine.low %v9224_v10, %v9227_v28  ;;  %v9240_v4 = vrot.slane %v9097_v34, 5  ;;  %v20995_v28 = vld [vmem:[#allocation2 + $0x194] sm:$0xf] }
 0x2bd   : > { %16120 = vmatprep.subr.bf16.mxu1 %v16721_v60  ;;  %16168 = vmatprep.subr.bf16.mxu0 %v16722_v6  ;;  %v20972_v17 = vadd.f32 %v6427_v2, %v5998_v53  ;;  %v6003_v49 = vadd.f32 %v15754_v9, %v20715_v40  ;;  %v9244_v40 = vrot.slane %v20967_v30, 5  ;;  %v9102_v53 = vld [vmem:[#allocation2 + $0x178] sm:$0xf] }
 0x2be   : > { %16041 = vmatmul.mubr.bf16.gmra.mxu1 %v16708_v45  ;;  %16089 = vmatmul.mubr.bf16.gmra.mxu0 %v14153_v1  ;;  %v5910_v45 = vpop.f32.mrf.mxu1  ;;  %v6440_v21 = vpop.f32.mrf.mxu0  ;;  %v9098_v1 = vld [vmem:[#allocation2 + $0x158] sm:$0xe]  ;;  %v9239_v2 = vrot.slane %v9237_v13, 4  ;;  %v9238_v34 = vsel %vm17212_vm5, %v14141_v38, %v9237_v13 }
 0x2bf   : > { %16044 = vmatprep.mubr.bf16.mxu1 %v16711_v3  ;;  %16092 = vmatprep.mubr.bf16.mxu0 %v14154_v61  ;;  %v20984_v3 = vld [vmem:[#allocation4 + $0x5b8] sm:$0xff]   ;;  %v20986_v26 = vadd.f32 %v15802_v14, %v6003_v49  ;;  %v6001_v36 = vadd.f32 %v5910_v45, %v20730_v33  ;;  %v14142_v14 = vrot.slane %v9098_v1, 9  ;;  %v9246_v33 = vrot.slane %v9244_v40, 4  ;;  %v9104_v1 = vld [vmem:[#allocation2 + $0x190] sm:$0xe] }
 0x2c0   : > { %16121 = vmatpush3.bf16.msra.mxu1 %v16721_v60  ;;  %16169 = vmatpush3.bf16.msra.mxu0 %v16722_v6  ;;  %v15755_v37 = vpop.f32.mrf.mxu1  ;;  %v15803_v61 = vpop.f32.mrf.mxu0  ;;  %v16715_v60 = vld [vmem:[#allocation2 + $0x118] sm:$0xff]   ;;  %v14156_v6 = vcombine.low %v9231_v54, %v9234_v58  ;;  %v9247_v49 = vrot.slane %v9100_v12, 5 }
 0x2c1   : > { %16122 = vmatprep.subr.bf16.mxu1 %v16725_v8  ;;  %16170 = vmatprep.subr.bf16.mxu0 %v16726_v46  ;;  %v20989_v7 = vadd.f32 %v6440_v21, %v6001_v36  ;;  %v6004_v15 = vadd.f32 %v15755_v37, %v20751_v47  ;;  %v9101_v21 = vld [vmem:[#allocation2 + $0x174] sm:$0xe]  ;;  %v9103_v58 = vld [vmem:[#allocation2 + $0x17c] sm:$0x1]  ;;  %v9106_v37 = vld [vmem:[#allocation2 + $0x198] sm:$0x1] }
 0x2c2   : > { %v5913_v30 = vpop.f32.mrf.mxu1  ;;  %v6443_v9 = vpop.f32.mrf.mxu0  ;;  %v9248_v13 = vsel %vm17212_vm5, %v9246_v33, %v9247_v49  ;;  %v14144_v33 = vrot.slane %v9104_v1, 9  ;;  %v9108_v49 = vld [vmem:[#allocation2 + $0x1b0] sm:$0xf]  ;;  %v9107_v1 = vld [vmem:[#allocation2 + $0x1ac] sm:$0xe] }
 0x2c3   : > { %v20992_v45 = vadd.f32 %v15803_v61, %v6004_v15  ;;  %v6002_v10 = vadd.f32 %v5913_v30, %v20773_v63  ;;  %v9241_v63 = vsel %vm17212_vm5, %v9239_v2, %v9240_v4  ;;  %v9258_v61 = vrot.slane %v20995_v28, 5  ;;  %v16716_v2 = vld [vmem:[#allocation2 + $0x134] sm:$0xff]  }
 0x2c4   : > { %16123 = vmatpush3.bf16.msra.mxu1 %v16725_v8  ;;  %16171 = vmatpush3.bf16.msra.mxu0 %v16726_v46  ;;  %v15758_v47 = vpop.f32.mrf.mxu1  ;;  %v15806_v44 = vpop.f32.mrf.mxu0  ;;  %v9251_v8 = vrot.slane %v9102_v53, 5  ;;  %v9254_v53 = vrot.slane %v9103_v58, 5 }
 0x2c5   : > { %16204 = vmatprep.subr.bf16.mxu1 %v20977_v25  ;;  %16252 = vmatprep.subr.bf16.mxu0 %v20984_v3  ;;  %v21001_v46 = vadd.f32 %v6443_v9, %v6002_v10  ;;  %v6007_v54 = vadd.f32 %v15758_v47, %v20787_v43  ;;  %v16719_v9 = vld [vmem:[#allocation2 + $0x150] sm:$0xff]  }
 0x2c6   : > { %16045 = vmatmul.mubr.bf16.gmra.mxu1 %v16712_v0  ;;  %16093 = vmatmul.mubr.bf16.gmra.mxu0 %v14155_v18  ;;  %v5926_v36 = vpop.f32.mrf.mxu1  ;;  %v6456_v12 = vpop.f32.mrf.mxu0  ;;  %v9245_v0 = vsel %vm17212_vm5, %v14142_v14, %v9244_v40  ;;  %v9253_v4 = vrot.slane %v9251_v8, 4  ;;  %v21017_v10 = vld [vmem:[#allocation2 + $0x14] sm:$0xf] }
 0x2c7   : > { %16048 = vmatprep.mubr.bf16.mxu1 %v16715_v60  ;;  %16096 = vmatprep.mubr.bf16.mxu0 %v14156_v6  ;;  %v21011_v18 = vadd.f32 %v15806_v44, %v6007_v54  ;;  %v6005_v43 = vadd.f32 %v5926_v36, %v20800_v16  ;;  %v14157_v60 = vcombine.low %v9238_v34, %v9241_v63  ;;  %v14143_v6 = vrot.slane %v9101_v21, 9  ;;  %v9109_v36 = vld [vmem:[#allocation2 + $0x1b4] sm:$0x1] }
 0x2c8   : > { %v15759_v38 = vpop.f32.mrf.mxu1  ;;  %v15807_v15 = vpop.f32.mrf.mxu0  ;;  %v14158_v14 = vcombine.low %v9245_v0, %v9248_v13  ;;  %v9260_v16 = vrot.slane %v9258_v61, 4  ;;  %v9261_v44 = vrot.slane %v9106_v37, 5  ;;  %v9255_v58 = vsel %vm17212_vm5, %v9253_v4, %v9254_v53  ;;  %v16720_v53 = vld [vmem:[#allocation2 + $0x16c] sm:$0xff]  }
 0x2c9   : > { %v21014_v30 = vadd.f32 %v6456_v12, %v6005_v43  ;;  %v6008_v40 = vadd.f32 %v15759_v38, %v20809_v51  ;;  %v9252_v51 = vsel %vm17212_vm5, %v14143_v6, %v9251_v8  ;;  %v9265_v13 = vrot.slane %v9108_v49, 5  ;;  %v9594_v6 = vld [vmem:[#allocation2 + $0x18] sm:$0x3] }
 0x2ca   : > { %v5929_v28 = vpop.f32.mrf.mxu1  ;;  %v6459_v47 = vpop.f32.mrf.mxu0  ;;  %v9259_v38 = vsel %vm17212_vm5, %v14144_v33, %v9258_v61  ;;  %v9262_v8 = vsel %vm17212_vm5, %v9260_v16, %v9261_v44  ;;  %v16723_v61 = vld [vmem:[#allocation2 + $0x188] sm:$0xff]  }
 0x2cb   : > { %v21019_v54 = vadd.f32 %v15807_v15, %v6008_v40  ;;  %v6006_v34 = vadd.f32 %v5929_v28, %v20820_v31  ;;  %v9690_v31 = vrot.slane %v21017_v10, 6  ;;  %v14159_v40 = vcombine.low %v9252_v51, %v9255_v58  ;;  %v21043_v51 = vld [vmem:[#allocation2 + $0x4c] sm:$0xf] }
 0x2cc   : > { %v15762_v21 = vpop.f32.mrf.mxu1  ;;  %v15810_v63 = vpop.f32.mrf.mxu0  ;;  %v14160_v33 = vcombine.low %v9259_v38, %v9262_v8  ;;  %v9267_v28 = vrot.slane %v9265_v13, 4  ;;  %v9597_v8 = vld [vmem:[#allocation2 + $0x34] sm:$0x3] }
 0x2cd   : > { %v21026_v12 = vadd.f32 %v6459_v47, %v6006_v34  ;;  %v6011_v0 = vadd.f32 %v15762_v21, %v20829_v56  ;;  %v9596_v47 = vld [vmem:[#allocation2 + $0x30] sm:$0xf]  ;;  %v9693_v21 = vrot.slane %v9594_v6, 6 }
 0x2ce   : > { %16049 = vmatmul.mubr.bf16.gmra.mxu1 %v16716_v2  ;;  %16097 = vmatmul.mubr.bf16.gmra.mxu0 %v14157_v60  ;;  %v5942_v37 = vpop.f32.mrf.mxu1  ;;  %v6472_v43 = vpop.f32.mrf.mxu0  ;;  %v9592_v60 = vld [vmem:[#allocation2 + $0x10] sm:$0xc] }
 0x2cf   : > { %16052 = vmatprep.mubr.bf16.mxu1 %v16719_v9  ;;  %16100 = vmatprep.mubr.bf16.mxu0 %v14158_v14  ;;  %v21034_v15 = vadd.f32 %v15810_v63, %v6011_v0  ;;  %v6009_v2 = vadd.f32 %v5942_v37, %v20832_v59  ;;  %v14145_v9 = vrot.slane %v9107_v1, 9  ;;  %v9268_v14 = vrot.slane %v9109_v36, 5 }
 0x2d0   : > { %v15763_v56 = vpop.f32.mrf.mxu1  ;;  %v15811_v4 = vpop.f32.mrf.mxu0  ;;  %v14170_v34 = vrot.slane %v9592_v60, 10  ;;  %v9692_v59 = vrot.slane %v9690_v31, 4  ;;  %v9697_v36 = vrot.slane %v9596_v47, 6 }
 0x2d1   : > { %v21037_v49 = vadd.f32 %v6472_v43, %v6009_v2  ;;  %v6012_v10 = vadd.f32 %v15763_v56, %v20835_v57  ;;  %v9266_v57 = vsel %vm17212_vm5, %v14145_v9, %v9265_v13  ;;  %v9269_v38 = vsel %vm17212_vm5, %v9267_v28, %v9268_v14  ;;  %v9600_v9 = vld [vmem:[#allocation2 + $0x50] sm:$0x3] }
 0x2d2   : > { %v5945_v16 = vpop.f32.mrf.mxu1  ;;  %v6475_v44 = vpop.f32.mrf.mxu0  ;;  %v9691_v56 = vsel %vm17113_vm2, %v14170_v34, %v9690_v31  ;;  %v9694_v13 = vsel %vm17113_vm2, %v9692_v59, %v9693_v21  ;;  %v9699_v47 = vrot.slane %v9697_v36, 4  ;;  %v16727_v59 = vld [vmem:[#allocation2 + $0x1f8] sm:$0xff]  }
 0x2d3   : > { %v21040_v63 = vadd.f32 %v15811_v4, %v6012_v10  ;;  %v6010_v0 = vadd.f32 %v5945_v16, %v20844_v32  ;;  %v9595_v32 = vld [vmem:[#allocation2 + $0x2c] sm:$0xc]  ;;  %v9598_v4 = vld [vmem:[#allocation2 + $0x48] sm:$0xc]  ;;  %v9700_v16 = vrot.slane %v9597_v8, 6  ;;  %v14186_v34 = vcombine.low %v9691_v56, %v9694_v13  ;;  %v23090_v13 = vld [vmem:[#allocation42_spill] sm:$0xff] }
 0x2d4   : > { %v15766_v58 = vpop.f32.mrf.mxu1  ;;  %v15814_v1 = vpop.f32.mrf.mxu0  ;;  %v14171_v28 = vrot.slane %v9595_v32, 10  ;;  %v14172_v21 = vrot.slane %v9598_v4, 10 }
 0x2d5   : > { %v21047_v37 = vadd.f32 %v6475_v44, %v6010_v0  ;;  %v6015_v43 = vadd.f32 %v15766_v58, %v20853_v24  ;;  %v9602_v0 = vld [vmem:[#allocation2 + $0x68] sm:$0xf] }
 0x2d6   : > { %16053 = vmatmul.mubr.bf16.gmra.mxu1 %v16720_v53  ;;  %16101 = vmatmul.mubr.bf16.gmra.mxu0 %v14159_v40  ;;  %v5958_v2 = vpop.f32.mrf.mxu1  ;;  %v6488_v60 = vpop.f32.mrf.mxu0  ;;  %v9704_v53 = vrot.slane %v21043_v51, 6 }
 0x2d7   : > { %16056 = vmatprep.mubr.bf16.mxu1 %v16723_v61  ;;  %16104 = vmatprep.mubr.bf16.mxu0 %v14160_v33  ;;  %v21057_v40 = vadd.f32 %v15814_v1, %v6015_v43  ;;  %v6013_v24 = vadd.f32 %v5958_v2, %v20856_v52  ;;  %v16724_v61 = vld [vmem:[#allocation2 + $0x1a4] sm:$0xff]   ;;  %v14161_v33 = vcombine.low %v9266_v57, %v9269_v38  ;;  %v9707_v52 = vrot.slane %v9600_v9, 6  ;;  %v9603_v9 = vld [vmem:[#allocation2 + $0x6c] sm:$0x3] }
 0x2d8   : > { %v15767_v10 = vpop.f32.mrf.mxu1  ;;  %v15815_v14 = vpop.f32.mrf.mxu0  ;;  %v9706_v1 = vrot.slane %v9704_v53, 4  ;;  %v21063_v43 = vld [vmem:[#allocation2 + $0x84] sm:$0xf]  ;;  %v23089_v57 = vld [vmem:[#allocation41_spill] sm:$0xff] }
 0x2d9   : > { %v21060_v44 = vadd.f32 %v6488_v60, %v6013_v24  ;;  %v6016_v31 = vadd.f32 %v15767_v10, %v20861_v20  ;;  %v9698_v20 = vsel %vm17113_vm2, %v14171_v28, %v9697_v36  ;;  %v9601_v60 = vld [vmem:[#allocation2 + $0x64] sm:$0xc]  ;;  %v9701_v24 = vsel %vm17113_vm2, %v9699_v47, %v9700_v16  ;;  %v16728_v28 = vld [vmem:[#allocation2 + $0x214] sm:$0xff]  }
 0x2da   : > { %v5961_v51 = vpop.f32.mrf.mxu1  ;;  %v6491_v58 = vpop.f32.mrf.mxu0  ;;  %v9711_v10 = vrot.slane %v9602_v0, 6  ;;  %v14187_v0 = vcombine.low %v9698_v20, %v9701_v24  ;;  %v21091_v24 = vld [vmem:[#allocation2 + $0xbc] sm:$0xf] }
 0x2db   : > { %v21065_v2 = vadd.f32 %v15815_v14, %v6016_v31  ;;  %v6014_v38 = vadd.f32 %v5961_v51, %v23089_v57  ;;  %v9604_v14 = vld [vmem:[#allocation2 + $0x80] sm:$0xc]  ;;  %v16731_v57 = vld [vmem:[#allocation2 + $0x230] sm:$0xff]  }
 0x2dc   : > { %v15770_v32 = vpop.f32.mrf.mxu1  ;;  %v15818_v8 = vpop.f32.mrf.mxu0 }
 0x2dd   : > { %v21070_v56 = vadd.f32 %v6491_v58, %v6014_v38  ;;  %v6019_v4 = vadd.f32 %v15770_v32, %v23090_v13  ;;  %v9705_v58 = vsel %vm17113_vm2, %v14172_v21, %v9704_v53  ;;  %v14173_v38 = vrot.slane %v9601_v60, 10  ;;  %v21083_v13 = vld [vmem:[#allocation2 + $0xa0] sm:$0xf]  ;;  %v16734_v60 = vld [vmem:[#allocation4 + $0x5b0] sm:$0xff]  }
 0x2de   : > { %16057 = vmatmul.mubr.bf16.gmra.mxu1 %v16724_v61  ;;  %16105 = vmatmul.mubr.bf16.gmra.mxu0 %v14161_v33  ;;  %v5974_v31 = vpop.f32.mrf.mxu1  ;;  %v6504_v51 = vpop.f32.mrf.mxu0  ;;  %v9718_v61 = vrot.slane %v21063_v43, 6  ;;  %v9714_v32 = vrot.slane %v9603_v9, 6 }
 0x2df   : > { %16124 = vmatprep.mubr.bf16.mxu1 %v14186_v34  ;;  %16172 = vmatprep.mubr.bf16.mxu0 %v16727_v59  ;;  %v21076_v33 = vadd.f32 %v15818_v8, %v6019_v4  ;;  %v6017_v36 = vadd.f32 %v5974_v31, %v20879_v29  ;;  %v9708_v34 = vsel %vm17113_vm2, %v9706_v1, %v9707_v52  ;;  %v9606_v59 = vld [vmem:[#allocation2 + $0x88] sm:$0x3]  ;;  %v9713_v8 = vrot.slane %v9711_v10, 4  ;;  %v16733_v4 = vld [vmem:[#allocation4 + $0x570] sm:$0xff]  }
 0x2e0   : > { %v15771_v47 = vpop.f32.mrf.mxu1  ;;  %v15819_v16 = vpop.f32.mrf.mxu0  ;;  %v14174_v31 = vrot.slane %v9604_v14, 10  ;;  %v14188_v62 = vcombine.low %v9705_v58, %v9708_v34  ;;  %v9720_v1 = vrot.slane %v9718_v61, 4  ;;  %v9721_v52 = vrot.slane %v9606_v59, 6  ;;  %v9607_v14 = vld [vmem:[#allocation2 + $0x9c] sm:$0xc]  ;;  %v16737_v59 = vld [vmem:[#allocation4 + $0x568] sm:$0xff]  }
 0x2e1   : > { %23091 = vst [vmem:[#allocation27_spill] sm:$0xff] %v21076_v33  ;;  %v21085_v43 = vadd.f32 %v6504_v51, %v6017_v36  ;;  %v6020_v29 = vadd.f32 %v15771_v47, %v20884_v50  ;;  %v9712_v50 = vsel %vm17113_vm2, %v14173_v38, %v9711_v10  ;;  %v9609_v36 = vld [vmem:[#allocation2 + $0xa4] sm:$0x3]  ;;  %v9725_v34 = vrot.slane %v21083_v13, 6  ;;  %v16732_v10 = vld [vmem:[#allocation2 + $0x24c] sm:$0xff]  }
 0x2e2   : > { %v5977_v53 = vpop.f32.mrf.mxu1  ;;  %v6507_v21 = vpop.f32.mrf.mxu0  ;;  %v9610_v38 = vld [vmem:[#allocation2 + $0xb8] sm:$0xc] }
 0x2e3   : > { %v21088_v33 = vadd.f32 %v15819_v16, %v6020_v29  ;;  %v6018_v20 = vadd.f32 %v5977_v53, %v20892_v39  ;;  %v9715_v39 = vsel %vm17113_vm2, %v9713_v8, %v9714_v32  ;;  %v9732_v29 = vrot.slane %v21091_v24, 6  ;;  %v21114_v24 = vld [vmem:[#allocation2 + $0xd8] sm:$0xf] }
 0x2e4   : > { %v15838_v9 = vpop.f32.mrf.mxu1  ;;  %v15886_v51 = vpop.f32.mrf.mxu0 }
 0x2e5   : > { %v21095_v47 = vadd.f32 %v6507_v21, %v6018_v20  ;;  %v7051_v58 = vadd.f32 %v15838_v9, %v20904_v41  ;;  %v9722_v41 = vsel %vm17113_vm2, %v9720_v1, %v9721_v52  ;;  %v14189_v21 = vcombine.low %v9712_v50, %v9715_v39  ;;  %v16735_v52 = vld [vmem:[#allocation2 + $0x268] sm:$0xff]   ;;  %v16742_v50 = vld [vmem:[#allocation4 + $0x5a0] sm:$0xff]  }
 0x2e6   : > { %16125 = vmatmul.mubr.bf16.vlgmr.msra.gmra.mxu1 %v14187_v0  ;;  %16173 = vmatmul.mubr.bf16.vlgmr.msra.gmra.mxu0 %v16728_v28  ;;  %v6922_v28 = vpop.f32.mrf.mxu1  ;;  %v7455_v16 = vpop.f32.mrf.mxu0  ;;  %v9719_v0 = vsel %vm17113_vm2, %v14174_v31, %v9718_v61  ;;  %v9727_v20 = vrot.slane %v9725_v34, 4 }
 0x2e7   : > { %16205 = vmatpush3.bf16.msra.mxu1 %v20977_v25  ;;  %16253 = vmatpush3.bf16.msra.mxu0 %v20984_v3  ;;  %v16738_v25 = vld [vmem:[#allocation4 + $0x5a8] sm:$0xff]   ;;  %v9612_v3 = vld [vmem:[#allocation2 + $0xc0] sm:$0x3]  ;;  %v21108_v32 = vadd.f32 %v15886_v51, %v7051_v58  ;;  %v7049_v13 = vadd.f32 %v6922_v28, %v20907_v35  ;;  %v14190_v1 = vcombine.low %v9719_v0, %v9722_v41  ;;  %v14176_v51 = vrot.slane %v9610_v38, 10  ;;  %v9613_v0 = vld [vmem:[#allocation2 + $0xd4] sm:$0xc] }
 0x2e8   : > { %16128 = vmatprep.mubr.bf16.mxu1 %v14188_v62  ;;  %16176 = vmatprep.mubr.bf16.mxu0 %v16731_v57  ;;  %v14175_v62 = vrot.slane %v9607_v14, 10  ;;  %v9728_v57 = vrot.slane %v9609_v36, 6  ;;  %v15839_v8 = vpop.f32.mrf.mxu1  ;;  %v15887_v53 = vpop.f32.mrf.mxu0  ;;  %v9734_v14 = vrot.slane %v9732_v29, 4  ;;  %v9735_v36 = vrot.slane %v9612_v3, 6  ;;  %v16741_v58 = vld [vmem:[#allocation4 + $0x560] sm:$0xff]  }
 0x2e9   : > { %16206 = vmatprep.subr.bf16.mxu1 %v16733_v4  ;;  %16254 = vmatprep.subr.bf16.mxu0 %v16734_v60  ;;  %v21111_v61 = vadd.f32 %v7455_v16, %v7049_v13  ;;  %v7052_v31 = vadd.f32 %v15839_v8, %v20912_v42  ;;  %v9739_v41 = vrot.slane %v21114_v24, 6  ;;  %v9615_v13 = vld [vmem:[#allocation2 + $0xdc] sm:$0x3]  ;;  %v9616_v8 = vld [vmem:[#allocation2 + $0xf0] sm:$0xc] }
 0x2ea   : > { %v6925_v9 = vpop.f32.mrf.mxu1  ;;  %v7458_v35 = vpop.f32.mrf.mxu0  ;;  %v9726_v16 = vsel %vm17113_vm2, %v14175_v62, %v9725_v34  ;;  %v9733_v34 = vsel %vm17113_vm2, %v14176_v51, %v9732_v29  ;;  %v9736_v62 = vsel %vm17113_vm2, %v9734_v14, %v9735_v36  ;;  %v9742_v29 = vrot.slane %v9615_v13, 6  ;;  %v21145_v13 = vld [vmem:[#allocation2 + $0x10c] sm:$0xc] }
 0x2eb   : > { %16207 = vmatpush3.bf16.msra.mxu1 %v16733_v4  ;;  %16255 = vmatpush3.bf16.msra.mxu0 %v16734_v60  ;;  %v21116_v39 = vadd.f32 %v15887_v53, %v7052_v31  ;;  %v7050_v42 = vadd.f32 %v6925_v9, %v20919_v55  ;;  %v21119_v4 = vld [vmem:[#allocation2 + $0xf4] sm:$0xf]  ;;  %v9729_v55 = vsel %vm17113_vm2, %v9727_v20, %v9728_v57  ;;  %v16745_v53 = vld [vmem:[#allocation4 + $0x558] sm:$0xff]   ;;  %v14177_v9 = vrot.slane %v9613_v0, 10 }
 0x2ec   : > { %16208 = vmatprep.subr.bf16.mxu1 %v16737_v59  ;;  %16256 = vmatprep.subr.bf16.mxu0 %v16738_v25  ;;  %v15842_v60 = vpop.f32.mrf.mxu1  ;;  %v15890_v28 = vpop.f32.mrf.mxu0  ;;  %v9618_v31 = vld [vmem:[#allocation2 + $0xf8] sm:$0x3]  ;;  %v14192_v36 = vcombine.low %v9733_v34, %v9736_v62 }
 0x2ed   : > { %v21124_v38 = vadd.f32 %v7458_v35, %v7050_v42  ;;  %v7055_v3 = vadd.f32 %v15842_v60, %v20930_v23  ;;  %v9746_v23 = vrot.slane %v21119_v4, 6  ;;  %v9741_v35 = vrot.slane %v9739_v41, 4  ;;  %v16739_v42 = vld [vmem:[#allocation2 + $0x2a0] sm:$0xff]   ;;  %v21140_v60 = vld [vmem:[#allocation2 + $0x110] sm:$0xf] }
 0x2ee   : > { %16129 = vmatmul.mubr.bf16.gmra.mxu1 %v14189_v21  ;;  %16177 = vmatmul.mubr.bf16.gmra.mxu0 %v16732_v10  ;;  %v6938_v21 = vpop.f32.mrf.mxu1  ;;  %v7471_v10 = vpop.f32.mrf.mxu0  ;;  %v14178_v4 = vrot.slane %v9616_v8, 10  ;;  %v16750_v8 = vld [vmem:[#allocation4 + $0x590] sm:$0xff]   ;;  %v9753_v62 = vrot.slane %v21140_v60, 6 }
 0x2ef   : > { %16132 = vmatprep.mubr.bf16.mxu1 %v14190_v1  ;;  %16180 = vmatprep.mubr.bf16.mxu0 %v16735_v52  ;;  %v16746_v1 = vld [vmem:[#allocation4 + $0x598] sm:$0xff]   ;;  %v21134_v52 = vadd.f32 %v15890_v28, %v7055_v3  ;;  %v7053_v57 = vadd.f32 %v6938_v21, %v20935_v22  ;;  %v16749_v28 = vld [vmem:[#allocation4 + $0x550] sm:$0xff]   ;;  %v9748_v21 = vrot.slane %v9746_v23, 4 }
 0x2f0   : > { %16209 = vmatpush3.bf16.msra.mxu1 %v16737_v59  ;;  %16257 = vmatpush3.bf16.msra.mxu0 %v16738_v25  ;;  %v15843_v20 = vpop.f32.mrf.mxu1  ;;  %v15891_v24 = vpop.f32.mrf.mxu0  ;;  %v14191_v59 = vcombine.low %v9726_v16, %v9729_v55  ;;  %v16736_v25 = vld [vmem:[#allocation2 + $0x284] sm:$0xff]   ;;  %v9749_v16 = vrot.slane %v9618_v31, 6 }
 0x2f1   : > { %16210 = vmatprep.subr.bf16.mxu1 %v16741_v58  ;;  %16258 = vmatprep.subr.bf16.mxu0 %v16742_v50  ;;  %v21137_v51 = vadd.f32 %v7471_v10, %v7053_v57  ;;  %v7056_v14 = vadd.f32 %v15843_v20, %v20938_v19  ;;  %v21147_v19 = vld [vmem:[#allocation2 + $0x12c] sm:$0xf]  ;;  %v9743_v57 = vsel %vm17113_vm2, %v9741_v35, %v9742_v29  ;;  %v9622_v20 = vld [vmem:[#allocation2 + $0x128] sm:$0xc]  ;;  %v9624_v35 = vld [vmem:[#allocation2 + $0x130] sm:$0x3] }
 0x2f2   : > { %v6941_v22 = vpop.f32.mrf.mxu1  ;;  %v7474_v3 = vpop.f32.mrf.mxu0  ;;  %v21165_v29 = vld [vmem:[#allocation2 + $0x148] sm:$0xf] }
 0x2f3   : > { %v21142_v55 = vadd.f32 %v15891_v24, %v7056_v14  ;;  %v7054_v0 = vadd.f32 %v6941_v22, %v20946_v27  ;;  %v16753_v24 = vld [vmem:[#allocation4 + $0x548] sm:$0xff]  }
 0x2f4   : > { %16211 = vmatpush3.bf16.msra.mxu1 %v16741_v58  ;;  %16259 = vmatpush3.bf16.msra.mxu0 %v16742_v50  ;;  %v15846_v10 = vpop.f32.mrf.mxu1  ;;  %v9740_v58 = vsel %vm17113_vm2, %v14177_v9, %v9739_v41  ;;  %v9621_v50 = vld [vmem:[#allocation2 + $0x114] sm:$0x3]  ;;  %v9750_v41 = vsel %vm17113_vm2, %v9748_v21, %v9749_v16  ;;  %v9760_v9 = vrot.slane %v21147_v19, 6  ;;  %v9755_v19 = vrot.slane %v9753_v62, 4 }
 0x2f5   : > { %16212 = vmatprep.subr.bf16.mxu1 %v16745_v53  ;;  %16260 = vmatprep.subr.bf16.mxu0 %v16746_v1  ;;  %v15894_v34 = vpop.f32.mrf.mxu0  ;;  %v21152_v31 = vadd.f32 %v7474_v3, %v7054_v0  ;;  %v7059_v27 = vadd.f32 %v15846_v10, %v20956_v11  ;;  %v16754_v11 = vld [vmem:[#allocation4 + $0x588] sm:$0xff]   ;;  %v14179_v3 = vrot.slane %v21145_v13, 10  ;;  %v16743_v0 = vld [vmem:[#allocation2 + $0x2d8] sm:$0xff]  }
 0x2f6   : > { %16133 = vmatmul.mubr.bf16.gmra.mxu1 %v14191_v59  ;;  %16181 = vmatmul.mubr.bf16.gmra.mxu0 %v16736_v25  ;;  %v6954_v14 = vpop.f32.mrf.mxu1  ;;  %v9747_v25 = vsel %vm17113_vm2, %v14178_v4, %v9746_v23  ;;  %v14193_v23 = vcombine.low %v9740_v58, %v9743_v57  ;;  %v16740_v4 = vld [vmem:[#allocation2 + $0x2bc] sm:$0xff]  }
 0x2f7   : > { %16136 = vmatprep.mubr.bf16.mxu1 %v14192_v36  ;;  %16184 = vmatprep.mubr.bf16.mxu0 %v16739_v42  ;;  %v7487_v59 = vpop.f32.mrf.mxu0  ;;  %v21162_v36 = vadd.f32 %v15894_v34, %v7059_v27  ;;  %v7057_v42 = vadd.f32 %v6954_v14, %v20961_v48  ;;  %v14194_v16 = vcombine.low %v9747_v25, %v9750_v41  ;;  %v14180_v34 = vrot.slane %v9622_v20, 10  ;;  %v16757_v58 = vld [vmem:[#allocation4 + $0x540] sm:$0xff]  }
 0x2f8   : > { %16213 = vmatpush3.bf16.msra.mxu1 %v16745_v53  ;;  %16261 = vmatpush3.bf16.msra.mxu0 %v16746_v1  ;;  %v15847_v60 = vpop.f32.mrf.mxu1  ;;  %v9756_v53 = vrot.slane %v9621_v50, 6  ;;  %v9762_v27 = vrot.slane %v9760_v9, 4  ;;  %v9763_v14 = vrot.slane %v9624_v35, 6  ;;  %v16758_v57 = vld [vmem:[#allocation4 + $0x580] sm:$0xff]   ;;  %v9754_v20 = vsel %vm17113_vm2, %v14179_v3, %v9753_v62  ;;  %v21191_v3 = vld [vmem:[#allocation4 + $0x638] sm:$0xff]  }
 0x2f9   : > { %23092 = vst [vmem:[#allocation57_spill] sm:$0xff] %v21162_v36  ;;  %16214 = vmatprep.subr.bf16.mxu1 %v16749_v28  ;;  %16262 = vmatprep.subr.bf16.mxu0 %v16750_v8  ;;  %v15895_v22 = vpop.f32.mrf.mxu0  ;;  %v21168_v1 = vadd.f32 %v7487_v59, %v7057_v42  ;;  %v7060_v21 = vadd.f32 %v15847_v60, %v20964_v5  ;;  %v9767_v36 = vrot.slane %v21165_v29, 6  ;;  %v21175_v59 = vld [vmem:[#allocation2 + $0x164] sm:$0xf]  ;;  %v9627_v42 = vld [vmem:[#allocation2 + $0x14c] sm:$0x3] }
 0x2fa   : > { %v6957_v48 = vpop.f32.mrf.mxu1  ;;  %v9628_v62 = vld [vmem:[#allocation2 + $0x160] sm:$0xc] }
 0x2fb   : > { %v7490_v10 = vpop.f32.mrf.mxu0  ;;  %v21172_v13 = vadd.f32 %v15895_v22, %v7060_v21  ;;  %v7058_v50 = vadd.f32 %v6957_v48, %v20972_v17  ;;  %v9757_v17 = vsel %vm17113_vm2, %v9755_v19, %v9756_v53  ;;  %v9761_v22 = vsel %vm17113_vm2, %v14180_v34, %v9760_v9  ;;  %v16744_v48 = vld [vmem:[#allocation2 + $0x2f4] sm:$0xff]  }
 0x2fc   : > { %16215 = vmatpush3.bf16.msra.mxu1 %v16749_v28  ;;  %16263 = vmatpush3.bf16.msra.mxu0 %v16750_v8  ;;  %v15850_v5 = vpop.f32.mrf.mxu1  ;;  %v9625_v8 = vld [vmem:[#allocation2 + $0x144] sm:$0xc]  ;;  %v14195_v19 = vcombine.low %v9754_v20, %v9757_v17 }
 0x2fd   : > { %16216 = vmatprep.subr.bf16.mxu1 %v16753_v24  ;;  %16264 = vmatprep.subr.bf16.mxu0 %v16754_v11  ;;  %v15898_v25 = vpop.f32.mrf.mxu0  ;;  %v21179_v41 = vadd.f32 %v7490_v10, %v7058_v50  ;;  %v7063_v28 = vadd.f32 %v15850_v5, %v20986_v26  ;;  %v21189_v26 = vld [vmem:[#allocation4 + $0x5f8] sm:$0xff]   ;;  %v14181_v10 = vrot.slane %v9625_v8, 10  ;;  %v16747_v50 = vld [vmem:[#allocation2 + $0x310] sm:$0xff]  }
 0x2fe   : > { %16137 = vmatmul.mubr.bf16.gmra.mxu1 %v14193_v23  ;;  %16185 = vmatmul.mubr.bf16.gmra.mxu0 %v16740_v4  ;;  %v6970_v35 = vpop.f32.mrf.mxu1  ;;  %v9764_v23 = vsel %vm17113_vm2, %v9762_v27, %v9763_v14  ;;  %v9774_v4 = vrot.slane %v21175_v59, 6  ;;  %v14182_v59 = vrot.slane %v9628_v62, 10  ;;  %v9634_v62 = vld [vmem:[#allocation2 + $0x198] sm:$0xc] }
 0x2ff   : > { %16140 = vmatprep.mubr.bf16.mxu1 %v14194_v16  ;;  %16188 = vmatprep.mubr.bf16.mxu0 %v16743_v0  ;;  %v7503_v60 = vpop.f32.mrf.mxu0  ;;  %v21193_v53 = vadd.f32 %v15898_v25, %v7063_v28  ;;  %v7061_v21 = vadd.f32 %v6970_v35, %v20989_v7  ;;  %v9630_v16 = vld [vmem:[#allocation2 + $0x168] sm:$0x3]  ;;  %v14196_v14 = vcombine.low %v9761_v22, %v9764_v23  ;;  %v9632_v7 = vld [vmem:[#allocation2 + $0x180] sm:$0xf]  ;;  %v9631_v22 = vld [vmem:[#allocation2 + $0x17c] sm:$0xc] }
 0x300   : > { %16217 = vmatpush3.bf16.msra.mxu1 %v16753_v24  ;;  %16265 = vmatpush3.bf16.msra.mxu0 %v16754_v11  ;;  %v15851_v9 = vpop.f32.mrf.mxu1  ;;  %v9769_v24 = vrot.slane %v9767_v36, 4  ;;  %v9770_v11 = vrot.slane %v9627_v42, 6  ;;  %v9776_v28 = vrot.slane %v9774_v4, 4  ;;  %v9777_v35 = vrot.slane %v9630_v16, 6  ;;  %v9633_v23 = vld [vmem:[#allocation2 + $0x184] sm:$0x3] }
 0x301   : > { %23093 = vst [vmem:[#allocation48_spill] sm:$0xff] %v21193_v53  ;;  %16218 = vmatprep.subr.bf16.mxu1 %v16757_v58  ;;  %16266 = vmatprep.subr.bf16.mxu0 %v16758_v57  ;;  %v15899_v0 = vpop.f32.mrf.mxu0  ;;  %v21198_v34 = vadd.f32 %v7503_v60, %v7061_v21  ;;  %v7064_v27 = vadd.f32 %v15851_v9, %v20992_v45  ;;  %v21201_v53 = vld [vmem:[#allocation2 + $0x19c] sm:$0xf] }
 0x302   : > { %v6973_v5 = vpop.f32.mrf.mxu1  ;;  %v9768_v42 = vsel %vm17113_vm2, %v14181_v10, %v9767_v36  ;;  %v9775_v29 = vsel %vm17113_vm2, %v14182_v59, %v9774_v4  ;;  %v9778_v36 = vsel %vm17113_vm2, %v9776_v28, %v9777_v35  ;;  %v9788_v9 = vrot.slane %v21201_v53, 6  ;;  %v16751_v10 = vld [vmem:[#allocation2 + $0x348] sm:$0xff]   ;;  %v9637_v53 = vld [vmem:[#allocation2 + $0x1b4] sm:$0xc]  ;;  %v9638_v28 = vld [vmem:[#allocation2 + $0x1b8] sm:$0xf] }
 0x303   : > { %v7506_v25 = vpop.f32.mrf.mxu0  ;;  %v21203_v20 = vadd.f32 %v15899_v0, %v7064_v27  ;;  %v7062_v17 = vadd.f32 %v6973_v5, %v21001_v46  ;;  %v14184_v5 = vrot.slane %v9634_v62, 10 }
 0x304   : > { %16219 = vmatpush3.bf16.msra.mxu1 %v16757_v58  ;;  %16267 = vmatpush3.bf16.msra.mxu0 %v16758_v57  ;;  %v15854_v45 = vpop.f32.mrf.mxu1  ;;  %v9771_v58 = vsel %vm17113_vm2, %v9769_v24, %v9770_v11  ;;  %v9781_v57 = vrot.slane %v9632_v7, 6  ;;  %v9636_v24 = vld [vmem:[#allocation2 + $0x1a0] sm:$0x3]  ;;  %v9784_v7 = vrot.slane %v9633_v23, 6 }
 0x305   : > { %16300 = vmatprep.subr.bf16.mxu1 %v21189_v26  ;;  %16348 = vmatprep.subr.bf16.mxu0 %v21191_v3  ;;  %v15902_v8 = vpop.f32.mrf.mxu0  ;;  %v21214_v60 = vadd.f32 %v7506_v25, %v7062_v17  ;;  %v7067_v46 = vadd.f32 %v15854_v45, %v21011_v18  ;;  %v14197_v18 = vcombine.low %v9768_v42, %v9771_v58  ;;  %v9791_v45 = vrot.slane %v9636_v24, 6  ;;  %v9639_v58 = vld [vmem:[#allocation2 + $0x1bc] sm:$0x3] }
 0x306   : > { %16141 = vmatmul.mubr.bf16.gmra.mxu1 %v14195_v19  ;;  %16189 = vmatmul.mubr.bf16.gmra.mxu0 %v16744_v48  ;;  %v6986_v21 = vpop.f32.mrf.mxu1  ;;  %v16748_v48 = vld [vmem:[#allocation2 + $0x32c] sm:$0xff]   ;;  %v14198_v25 = vcombine.low %v9775_v29, %v9778_v36  ;;  %v9795_v29 = vrot.slane %v9638_v28, 6  ;;  %v9798_v24 = vrot.slane %v9639_v58, 6  ;;  %v16755_v28 = vld [vmem:[#allocation2 + $0x380] sm:$0xff]   ;;  %v14270_v58 = vld [vmem:[#allocation2 + $0x228] sm:$0xf] }
 0x307   : > { %16144 = vmatprep.mubr.bf16.mxu1 %v14196_v14  ;;  %16192 = vmatprep.mubr.bf16.mxu0 %v16747_v50  ;;  %v7519_v16 = vpop.f32.mrf.mxu0  ;;  %v21222_v0 = vadd.f32 %v15902_v8, %v7067_v46  ;;  %v7065_v19 = vadd.f32 %v6986_v21, %v21014_v30  ;;  %v14183_v14 = vrot.slane %v9631_v22, 10  ;;  %v9783_v50 = vrot.slane %v9781_v57, 4  ;;  %v14267_v46 = vld [vmem:[#allocation2 + $0x20c] sm:$0xf] }
 0x308   : > { %v15855_v11 = vpop.f32.mrf.mxu1  ;;  %v9790_v30 = vrot.slane %v9788_v9, 4 }
 0x309   : > { %v15903_v27 = vpop.f32.mrf.mxu0  ;;  %v21225_v4 = vadd.f32 %v7519_v16, %v7065_v19  ;;  %v7068_v59 = vadd.f32 %v15855_v11, %v21019_v54  ;;  %v9782_v54 = vsel %vm17113_vm2, %v14183_v14, %v9781_v57  ;;  %v9785_v62 = vsel %vm17113_vm2, %v9783_v50, %v9784_v7  ;;  %v14266_v11 = vld [vmem:[#allocation2 + $0x208] sm:$0xc]  ;;  %v14268_v50 = vld [vmem:[#allocation2 + $0x210] sm:$0x3] }
 0x30a   : > { %v6989_v35 = vpop.f32.mrf.mxu1  ;;  %v14185_v57 = vrot.slane %v9637_v53, 10 }
 0x30b   : > { %v7522_v17 = vpop.f32.mrf.mxu0  ;;  %v21228_v8 = vadd.f32 %v15903_v27, %v7068_v59  ;;  %v7066_v42 = vadd.f32 %v6989_v35, %v21026_v12  ;;  %v9789_v12 = vsel %vm17113_vm2, %v14184_v5, %v9788_v9  ;;  %v10606_v27 = vrot.slane %v14267_v46, 6 }
 0x30c   : > { %v14199_v59 = vcombine.low %v9782_v54, %v9785_v62  ;;  %v9797_v35 = vrot.slane %v9795_v29, 4  ;;  %v14269_v62 = vld [vmem:[#allocation2 + $0x224] sm:$0xc] }
 0x30d   : > { %v15858_v22 = vpop.f32.mrf.mxu1  ;;  %v15906_v23 = vpop.f32.mrf.mxu0  ;;  %v21235_v21 = vadd.f32 %v7522_v17, %v7066_v42  ;;  %v10609_v42 = vrot.slane %v14268_v50, 6 }
 0x30e   : > { %16145 = vmatmul.mubr.bf16.gmra.mxu1 %v14197_v18  ;;  %16193 = vmatmul.mubr.bf16.gmra.mxu0 %v16748_v48  ;;  %v7071_v16 = vadd.f32 %v15858_v22, %v21034_v15  ;;  %v16752_v18 = vld [vmem:[#allocation2 + $0x364] sm:$0xff]   ;;  %v9792_v48 = vsel %vm17113_vm2, %v9790_v30, %v9791_v45  ;;  %v14314_v30 = vrot.slane %v14266_v11, 10  ;;  %v10608_v45 = vrot.slane %v10606_v27, 4 }
 0x30f   : > { %16148 = vmatprep.mubr.bf16.mxu1 %v14198_v25  ;;  %16196 = vmatprep.mubr.bf16.mxu0 %v16751_v10  ;;  %v7002_v36 = vpop.f32.mrf.mxu1  ;;  %v7535_v19 = vpop.f32.mrf.mxu0  ;;  %v14200_v25 = vcombine.low %v9789_v12, %v9792_v48  ;;  %v21251_v22 = vld [vmem:[#allocation2 + $0x244] sm:$0xf]  ;;  %v14272_v48 = vld [vmem:[#allocation2 + $0x240] sm:$0xc] }
 0x310   : > { %v21242_v14 = vadd.f32 %v15906_v23, %v7071_v16  ;;  %v7069_v15 = vadd.f32 %v7002_v36, %v21037_v49  ;;  %v14271_v16 = vld [vmem:[#allocation2 + $0x22c] sm:$0x3] }
 0x311   : > { %v15859_v10 = vpop.f32.mrf.mxu1  ;;  %v15907_v7 = vpop.f32.mrf.mxu0 }
 0x312   : > { %v21245_v9 = vadd.f32 %v7535_v19, %v7069_v15  ;;  %v7072_v5 = vadd.f32 %v15859_v10, %v21040_v63  ;;  %v9796_v63 = vsel %vm17113_vm2, %v14185_v57, %v9795_v29  ;;  %v10613_v19 = vrot.slane %v14270_v58, 6 }
 0x313   : > { %v7005_v17 = vpop.f32.mrf.mxu1  ;;  %v7538_v53 = vpop.f32.mrf.mxu0  ;;  %v10610_v29 = vsel %vm17113_vm2, %v10608_v45, %v10609_v42  ;;  %v10620_v57 = vrot.slane %v21251_v22, 6  ;;  %v14316_v58 = vrot.slane %v14272_v48, 10 }
 0x314   : > { %v21248_v46 = vadd.f32 %v15907_v7, %v7072_v5  ;;  %v7070_v49 = vadd.f32 %v7005_v17, %v21047_v37  ;;  %v9799_v37 = vsel %vm17113_vm2, %v9797_v35, %v9798_v24  ;;  %v16756_v24 = vld [vmem:[#allocation2 + $0x39c] sm:$0xff]   ;;  %v14315_v5 = vrot.slane %v14269_v62, 10 }
 0x315   : > { %v15862_v23 = vpop.f32.mrf.mxu1  ;;  %v15910_v54 = vpop.f32.mrf.mxu0 }
 0x316   : > { %16149 = vmatmul.mubr.bf16.gmra.mxu1 %v14199_v59  ;;  %16197 = vmatmul.mubr.bf16.gmra.mxu0 %v16752_v18  ;;  %v21255_v12 = vadd.f32 %v7538_v53, %v7070_v49  ;;  %v7075_v36 = vadd.f32 %v15862_v23, %v21057_v40  ;;  %v10607_v18 = vsel %vm17113_vm2, %v14314_v30, %v10606_v27  ;;  %v16759_v53 = vld [vmem:[#allocation2 + $0x3f0] sm:$0xff]   ;;  %v10615_v30 = vrot.slane %v10613_v19, 4  ;;  %v14276_v49 = vld [vmem:[#allocation2 + $0x260] sm:$0xf] }
 0x317   : > { %16152 = vmatprep.mubr.bf16.mxu1 %v14200_v25  ;;  %16200 = vmatprep.mubr.bf16.mxu0 %v16755_v28  ;;  %v7018_v11 = vpop.f32.mrf.mxu1  ;;  %v7551_v15 = vpop.f32.mrf.mxu0  ;;  %v14201_v59 = vcombine.low %v9796_v63, %v9799_v37  ;;  %v10616_v25 = vrot.slane %v14271_v16, 6  ;;  %v14274_v28 = vld [vmem:[#allocation2 + $0x248] sm:$0x3]  ;;  %v14330_v17 = vcombine.low %v10607_v18, %v10610_v29  ;;  %v10622_v23 = vrot.slane %v10620_v57, 4  ;;  %v21274_v63 = vld [vmem:[#allocation2 + $0x27c] sm:$0xf] }
 0x318   : > { %v21265_v50 = vadd.f32 %v15910_v54, %v7075_v36  ;;  %v7073_v40 = vadd.f32 %v7018_v11, %v21060_v44  ;;  %v10623_v54 = vrot.slane %v14274_v28, 6  ;;  %v23094_v37 = vld [vmem:[#allocation27_spill] sm:$0xff] }
 0x319   : > { %v15863_v10 = vpop.f32.mrf.mxu1  ;;  %v15911_v7 = vpop.f32.mrf.mxu0  ;;  %v14275_v11 = vld [vmem:[#allocation2 + $0x25c] sm:$0xc]  ;;  %v14280_v28 = vld [vmem:[#allocation2 + $0x280] sm:$0x3] }
 0x31a   : > { %v21268_v35 = vadd.f32 %v7551_v15, %v7073_v40  ;;  %v7076_v27 = vadd.f32 %v15863_v10, %v21065_v2  ;;  %v10614_v2 = vsel %vm17113_vm2, %v14315_v5, %v10613_v19  ;;  %v10627_v15 = vrot.slane %v14276_v49, 6  ;;  %v14277_v40 = vld [vmem:[#allocation2 + $0x264] sm:$0x3]  ;;  %v14278_v5 = vld [vmem:[#allocation2 + $0x278] sm:$0xc] }
 0x31b   : > { %v7021_v45 = vpop.f32.mrf.mxu1  ;;  %v7554_v42 = vpop.f32.mrf.mxu0  ;;  %v10634_v10 = vrot.slane %v21274_v63, 6 }
 0x31c   : > { %v21271_v22 = vadd.f32 %v15911_v7, %v7076_v27  ;;  %v7074_v44 = vadd.f32 %v7021_v45, %v21070_v56  ;;  %v10617_v56 = vsel %vm17113_vm2, %v10615_v30, %v10616_v25  ;;  %v14317_v30 = vrot.slane %v14275_v11, 10  ;;  %v21299_v11 = vld [vmem:[#allocation2 + $0x2b4] sm:$0xf] }
 0x31d   : > { %v15866_v62 = vpop.f32.mrf.mxu1  ;;  %v15914_v16 = vpop.f32.mrf.mxu0  ;;  %v10629_v49 = vrot.slane %v10627_v15, 4 }
 0x31e   : > { %16153 = vmatmul.mubr.bf16.gmra.mxu1 %v14201_v59  ;;  %16201 = vmatmul.mubr.bf16.gmra.mxu0 %v16756_v24  ;;  %v21278_v36 = vadd.f32 %v7554_v42, %v7074_v44  ;;  %v7079_v48 = vadd.f32 %v15866_v62, %v23094_v37  ;;  %v10621_v59 = vsel %vm17113_vm2, %v14316_v58, %v10620_v57  ;;  %v10630_v44 = vrot.slane %v14277_v40, 6  ;;  %v16763_v62 = vld [vmem:[#allocation2 + $0x428] sm:$0xff]  }
 0x31f   : > { %16220 = vmatprep.mubr.bf16.mxu1 %v14330_v17  ;;  %16268 = vmatprep.mubr.bf16.mxu0 %v16759_v53  ;;  %v7034_v18 = vpop.f32.mrf.mxu1  ;;  %v7567_v29 = vpop.f32.mrf.mxu0  ;;  %v10624_v24 = vsel %vm17113_vm2, %v10622_v23, %v10623_v54  ;;  %v14331_v17 = vcombine.low %v10614_v2, %v10617_v56  ;;  %v16760_v53 = vld [vmem:[#allocation2 + $0x40c] sm:$0xff]   ;;  %v14318_v23 = vrot.slane %v14278_v5, 10  ;;  %v10636_v54 = vrot.slane %v10634_v10, 4  ;;  %v14283_v5 = vld [vmem:[#allocation2 + $0x29c] sm:$0x3] }
 0x320   : > { %v21284_v7 = vadd.f32 %v15914_v16, %v7079_v48  ;;  %v7077_v19 = vadd.f32 %v7034_v18, %v21085_v43  ;;  %v21294_v43 = vld [vmem:[#allocation2 + $0x298] sm:$0xf]  ;;  %v14332_v58 = vcombine.low %v10621_v59, %v10624_v24  ;;  %v10637_v16 = vrot.slane %v14280_v28, 6  ;;  %v16765_v48 = vld [vmem:[#allocation4 + $0x5f0] sm:$0xff]  }
 0x321   : > { %v15867_v25 = vpop.f32.mrf.mxu1  ;;  %v15915_v27 = vpop.f32.mrf.mxu0  ;;  %v16766_v56 = vld [vmem:[#allocation4 + $0x630] sm:$0xff]   ;;  %v10641_v40 = vrot.slane %v21294_v43, 6 }
 0x322   : > { %v21291_v45 = vadd.f32 %v7567_v29, %v7077_v19  ;;  %v7080_v42 = vadd.f32 %v15867_v25, %v21088_v33  ;;  %v10628_v29 = vsel %vm17113_vm2, %v14317_v30, %v10627_v15  ;;  %v14281_v24 = vld [vmem:[#allocation2 + $0x294] sm:$0xc]  ;;  %v10635_v15 = vsel %vm17113_vm2, %v14318_v23, %v10634_v10  ;;  %v14284_v30 = vld [vmem:[#allocation2 + $0x2b0] sm:$0xc] }
 0x323   : > { %v7037_v63 = vpop.f32.mrf.mxu1  ;;  %v7570_v57 = vpop.f32.mrf.mxu0  ;;  %v14319_v10 = vrot.slane %v14281_v24, 10  ;;  %v16773_v24 = vld [vmem:[#allocation4 + $0x5e0] sm:$0xff]  }
 0x324   : > { %v21296_v37 = vadd.f32 %v15915_v27, %v7080_v42  ;;  %v7078_v2 = vadd.f32 %v7037_v63, %v21095_v47  ;;  %v10631_v47 = vsel %vm17113_vm2, %v10629_v49, %v10630_v44  ;;  %v10638_v27 = vsel %vm17113_vm2, %v10636_v54, %v10637_v16  ;;  %v14286_v42 = vld [vmem:[#allocation2 + $0x2b8] sm:$0x3]  ;;  %v16764_v63 = vld [vmem:[#allocation2 + $0x444] sm:$0xff]  }
 0x325   : > { %v15934_v33 = vpop.f32.mrf.mxu1  ;;  %v15982_v18 = vpop.f32.mrf.mxu0  ;;  %v14333_v43 = vcombine.low %v10628_v29, %v10631_v47  ;;  %v14334_v54 = vcombine.low %v10635_v15, %v10638_v27  ;;  %v16767_v16 = vld [vmem:[#allocation2 + $0x460] sm:$0xff]   ;;  %v10651_v29 = vrot.slane %v14286_v42, 6  ;;  %v14290_v42 = vld [vmem:[#allocation2 + $0x2e8] sm:$0xc] }
 0x326   : > { %16221 = vmatmul.mubr.bf16.vlgmr.msra.gmra.mxu1 %v14331_v17  ;;  %16269 = vmatmul.mubr.bf16.vlgmr.msra.gmra.mxu0 %v16760_v53  ;;  %v21304_v19 = vadd.f32 %v7570_v57, %v7078_v2  ;;  %v8114_v59 = vadd.f32 %v15934_v33, %v21108_v32  ;;  %v16769_v32 = vld [vmem:[#allocation4 + $0x5e8] sm:$0xff]   ;;  %v10643_v57 = vrot.slane %v10641_v40, 4  ;;  %v14320_v33 = vrot.slane %v14284_v30, 10  ;;  %v14289_v30 = vld [vmem:[#allocation2 + $0x2d4] sm:$0x3] }
 0x327   : > { %16301 = vmatpush3.bf16.msra.mxu1 %v21189_v26  ;;  %16349 = vmatpush3.bf16.msra.mxu0 %v21191_v3  ;;  %v7985_v28 = vpop.f32.mrf.mxu1  ;;  %v8515_v25 = vpop.f32.mrf.mxu0  ;;  %v16770_v17 = vld [vmem:[#allocation4 + $0x628] sm:$0xff]   ;;  %v10648_v26 = vrot.slane %v21299_v11, 6 }
 0x328   : > { %16224 = vmatprep.mubr.bf16.mxu1 %v14332_v58  ;;  %16272 = vmatprep.mubr.bf16.mxu0 %v16763_v62  ;;  %v21316_v3 = vadd.f32 %v15982_v18, %v8114_v59  ;;  %v8112_v53 = vadd.f32 %v7985_v28, %v21111_v61  ;;  %v10644_v58 = vrot.slane %v14283_v5, 6  ;;  %v21322_v61 = vld [vmem:[#allocation2 + $0x2d0] sm:$0xf]  ;;  %v16774_v5 = vld [vmem:[#allocation4 + $0x620] sm:$0xff]   ;;  %v10642_v28 = vsel %vm17113_vm2, %v14319_v10, %v10641_v40 }
 0x329   : > { %16302 = vmatprep.subr.bf16.mxu1 %v16765_v48  ;;  %16350 = vmatprep.subr.bf16.mxu0 %v16766_v56  ;;  %v15935_v49 = vpop.f32.mrf.mxu1  ;;  %v15983_v44 = vpop.f32.mrf.mxu0  ;;  %v10650_v18 = vrot.slane %v10648_v26, 4  ;;  %v10655_v15 = vrot.slane %v21322_v61, 6  ;;  %v10649_v40 = vsel %vm17113_vm2, %v14320_v33, %v10648_v26  ;;  %v14292_v10 = vld [vmem:[#allocation2 + $0x2f0] sm:$0x3]  ;;  %v14322_v33 = vrot.slane %v14290_v42, 10 }
 0x32a   : > { %v21319_v62 = vadd.f32 %v8515_v25, %v8112_v53  ;;  %v8115_v23 = vadd.f32 %v15935_v49, %v21116_v39  ;;  %v21327_v39 = vld [vmem:[#allocation2 + $0x2ec] sm:$0xf]  ;;  %v10645_v25 = vsel %vm17113_vm2, %v10643_v57, %v10644_v58 }
 0x32b   : > { %16303 = vmatpush3.bf16.msra.mxu1 %v16765_v48  ;;  %16351 = vmatpush3.bf16.msra.mxu0 %v16766_v56  ;;  %v7988_v2 = vpop.f32.mrf.mxu1  ;;  %v8518_v11 = vpop.f32.mrf.mxu0  ;;  %v14287_v53 = vld [vmem:[#allocation2 + $0x2cc] sm:$0xc]  ;;  %v10662_v57 = vrot.slane %v21327_v39, 6  ;;  %v16771_v39 = vld [vmem:[#allocation2 + $0x498] sm:$0xff]  }
 0x32c   : > { %16304 = vmatprep.subr.bf16.mxu1 %v16769_v32  ;;  %16352 = vmatprep.subr.bf16.mxu0 %v16770_v17  ;;  %v21324_v59 = vadd.f32 %v15983_v44, %v8115_v23  ;;  %v8113_v47 = vadd.f32 %v7988_v2, %v21124_v38  ;;  %v14335_v23 = vcombine.low %v10642_v28, %v10645_v25  ;;  %v14321_v26 = vrot.slane %v14287_v53, 10  ;;  %v14293_v53 = vld [vmem:[#allocation2 + $0x304] sm:$0xc] }
 0x32d   : > { %v15938_v48 = vpop.f32.mrf.mxu1  ;;  %v10657_v2 = vrot.slane %v10655_v15, 4 }
 0x32e   : > { %v15986_v56 = vpop.f32.mrf.mxu0  ;;  %16225 = vmatmul.mubr.bf16.gmra.mxu1 %v14333_v43  ;;  %16273 = vmatmul.mubr.bf16.gmra.mxu0 %v16764_v63  ;;  %v21334_v27 = vadd.f32 %v8518_v11, %v8113_v47  ;;  %v8118_v38 = vadd.f32 %v15938_v48, %v21134_v52  ;;  %v16768_v43 = vld [vmem:[#allocation2 + $0x47c] sm:$0xff]   ;;  %v10652_v63 = vsel %vm17113_vm2, %v10650_v18, %v10651_v29  ;;  %v10658_v11 = vrot.slane %v14289_v30, 6  ;;  %v21347_v18 = vld [vmem:[#allocation2 + $0x324] sm:$0xf] }
 0x32f   : > { %16228 = vmatprep.mubr.bf16.mxu1 %v14334_v54  ;;  %16276 = vmatprep.mubr.bf16.mxu0 %v16767_v16  ;;  %v8001_v49 = vpop.f32.mrf.mxu1  ;;  %v21345_v54 = vld [vmem:[#allocation2 + $0x308] sm:$0xf]  ;;  %v10665_v48 = vrot.slane %v14292_v10, 6  ;;  %v16782_v10 = vld [vmem:[#allocation4 + $0x610] sm:$0xff]  }
 0x330   : > { %v8531_v44 = vpop.f32.mrf.mxu0  ;;  %16305 = vmatpush3.bf16.msra.mxu1 %v16769_v32  ;;  %16353 = vmatpush3.bf16.msra.mxu0 %v16770_v17  ;;  %v21342_v52 = vadd.f32 %v15986_v56, %v8118_v38  ;;  %v8116_v58 = vadd.f32 %v8001_v49, %v21137_v51  ;;  %v16777_v32 = vld [vmem:[#allocation4 + $0x5d8] sm:$0xff]   ;;  %v14336_v51 = vcombine.low %v10649_v40, %v10652_v63  ;;  %v21352_v56 = vld [vmem:[#allocation4 + $0x5d0] sm:$0xff]   ;;  %v10664_v38 = vrot.slane %v10662_v57, 4  ;;  %v14295_v49 = vld [vmem:[#allocation2 + $0x30c] sm:$0x3] }
 0x331   : > { %16306 = vmatprep.subr.bf16.mxu1 %v16773_v24  ;;  %16354 = vmatprep.subr.bf16.mxu0 %v16774_v5  ;;  %v16778_v17 = vld [vmem:[#allocation4 + $0x618] sm:$0xff]   ;;  %v15939_v16 = vpop.f32.mrf.mxu1  ;;  %v10669_v30 = vrot.slane %v21345_v54, 6  ;;  %v14298_v40 = vld [vmem:[#allocation2 + $0x328] sm:$0x3]  ;;  %v10676_v63 = vrot.slane %v21347_v18, 6  ;;  %v23097_v18 = vld [vmem:[#allocation57_spill] sm:$0xff] }
 0x332   : > { %v15987_v61 = vpop.f32.mrf.mxu0  ;;  %v21349_v29 = vadd.f32 %v8531_v44, %v8116_v58  ;;  %v8119_v47 = vadd.f32 %v15939_v16, %v21142_v55  ;;  %v14296_v55 = vld [vmem:[#allocation2 + $0x320] sm:$0xc] }
 0x333   : > { %v8004_v28 = vpop.f32.mrf.mxu1  ;;  %v21367_v54 = vld [vmem:[#allocation2 + $0x340] sm:$0xf] }
 0x334   : > { %v8534_v25 = vpop.f32.mrf.mxu0  ;;  %16307 = vmatpush3.bf16.msra.mxu1 %v16773_v24  ;;  %16355 = vmatpush3.bf16.msra.mxu0 %v16774_v5  ;;  %v21355_v42 = vadd.f32 %v15987_v61, %v8119_v47  ;;  %v8117_v44 = vadd.f32 %v8004_v28, %v21152_v31  ;;  %v10656_v24 = vsel %vm17113_vm2, %v14321_v26, %v10655_v15  ;;  %v10671_v26 = vrot.slane %v10669_v30, 4 }
 0x335   : > { %16308 = vmatprep.subr.bf16.mxu1 %v16777_v32  ;;  %16356 = vmatprep.subr.bf16.mxu0 %v16778_v17  ;;  %v15942_v58 = vpop.f32.mrf.mxu1  ;;  %v10659_v5 = vsel %vm17113_vm2, %v10657_v2, %v10658_v11  ;;  %v21365_v31 = vsel %vm17113_vm2, %v14322_v33, %v10662_v57  ;;  %v10666_v15 = vsel %vm17113_vm2, %v10664_v38, %v10665_v48  ;;  %v14324_v57 = vrot.slane %v14296_v55, 10  ;;  %v16785_v11 = vld [vmem:[#allocation4 + $0x5c8] sm:$0xff]  }
 0x336   : > { %23095 = vst [vmem:[#allocation51_spill] sm:$0xff] %v21355_v42  ;;  %v15990_v16 = vpop.f32.mrf.mxu0  ;;  %16229 = vmatmul.mubr.bf16.gmra.mxu1 %v14335_v23  ;;  %16277 = vmatmul.mubr.bf16.gmra.mxu0 %v16768_v43  ;;  %v21369_v61 = vadd.f32 %v8534_v25, %v8117_v44  ;;  %v8122_v47 = vadd.f32 %v15942_v58, %v23097_v18  ;;  %v14323_v23 = vrot.slane %v14293_v53, 10  ;;  %v10672_v43 = vrot.slane %v14295_v49, 6  ;;  %v16786_v33 = vld [vmem:[#allocation4 + $0x608] sm:$0xff]   ;;  %v14301_v53 = vld [vmem:[#allocation2 + $0x344] sm:$0x3] }
 0x337   : > { %16232 = vmatprep.mubr.bf16.mxu1 %v14336_v51  ;;  %16280 = vmatprep.mubr.bf16.mxu0 %v16771_v39  ;;  %v8017_v28 = vpop.f32.mrf.mxu1  ;;  %v10679_v2 = vrot.slane %v14298_v40, 6  ;;  %v10678_v51 = vrot.slane %v10676_v63, 4  ;;  %v14299_v39 = vld [vmem:[#allocation2 + $0x33c] sm:$0xc]  ;;  %v10683_v49 = vrot.slane %v21367_v54, 6  ;;  %v14338_v58 = vcombine.low %v21365_v31, %v10666_v15  ;;  %v16789_v15 = vld [vmem:[#allocation4 + $0x5c0] sm:$0xff]  }
 0x338   : > { %23096 = vst [vmem:[#allocation53_spill] sm:$0xff] %v21369_v61  ;;  %v8547_v42 = vpop.f32.mrf.mxu0  ;;  %16309 = vmatpush3.bf16.msra.mxu1 %v16777_v32  ;;  %16357 = vmatpush3.bf16.msra.mxu0 %v16778_v17  ;;  %v21374_v25 = vadd.f32 %v15990_v16, %v8122_v47  ;;  %v8120_v44 = vadd.f32 %v8017_v28, %v21168_v1  ;;  %v16772_v17 = vld [vmem:[#allocation2 + $0x4b4] sm:$0xff]   ;;  %v21387_v18 = vld [vmem:[#allocation2 + $0x35c] sm:$0xf] }
 0x339   : > { %16310 = vmatprep.subr.bf16.mxu1 %v21352_v56  ;;  %16358 = vmatprep.subr.bf16.mxu0 %v16782_v10  ;;  %v15943_v48 = vpop.f32.mrf.mxu1  ;;  %v14337_v32 = vcombine.low %v10656_v24, %v10659_v5  ;;  %v16775_v16 = vld [vmem:[#allocation2 + $0x4d0] sm:$0xff]   ;;  %v21385_v1 = vsel %vm17113_vm2, %v14323_v23, %v10669_v30  ;;  %v21391_v28 = vsel %vm17113_vm2, %v10671_v26, %v10672_v43  ;;  %v10686_v24 = vrot.slane %v14301_v53, 6  ;;  %v21398_v5 = vld [vmem:[#allocation2 + $0x378] sm:$0xf]  ;;  %v16790_v26 = vld [vmem:[#allocation4 + $0x600] sm:$0xff]  }
 0x33a   : > { %23098 = vst [vmem:[#allocation50_spill] sm:$0xff] %v21374_v25  ;;  %v15991_v38 = vpop.f32.mrf.mxu0  ;;  %v21379_v55 = vadd.f32 %v8547_v42, %v8120_v44  ;;  %v8123_v40 = vadd.f32 %v15943_v48, %v21172_v13  ;;  %v21395_v42 = vsel %vm17113_vm2, %v14324_v57, %v10676_v63  ;;  %v14325_v13 = vrot.slane %v14299_v39, 10  ;;  %v21407_v63 = vld [vmem:[#allocation2 + $0x394] sm:$0xf]  ;;  %v21410_v39 = vld [vmem:[#allocation2 + $0x3b0] sm:$0xf] }
 0x33b   : > { %v8020_v54 = vpop.f32.mrf.mxu1  ;;  %v21405_v23 = vsel %vm17113_vm2, %v10678_v51, %v10679_v2  ;;  %v10685_v43 = vrot.slane %v10683_v49, 4  ;;  %v10690_v44 = vrot.slane %v21387_v18, 6  ;;  %v23102_v2 = vld [vmem:[#allocation48_spill] sm:$0xff]  ;;  %v14304_v53 = vld [vmem:[#allocation2 + $0x360] sm:$0x3] }
 0x33c   : > { %23099 = vst [vmem:[#allocation31_spill] sm:$0xff] %v21379_v55  ;;  %v8550_v47 = vpop.f32.mrf.mxu0  ;;  %16311 = vmatpush3.bf16.msra.mxu1 %v21352_v56  ;;  %16359 = vmatpush3.bf16.msra.mxu0 %v16782_v10  ;;  %v21400_v30 = vadd.f32 %v15991_v38, %v8123_v40  ;;  %v8121_v31 = vadd.f32 %v8020_v54, %v21179_v41  ;;  %v14302_v10 = vld [vmem:[#allocation2 + $0x358] sm:$0xc]  ;;  %v14305_v48 = vld [vmem:[#allocation2 + $0x374] sm:$0xc]  ;;  %v10697_v38 = vrot.slane %v21398_v5, 6 }
 0x33d   : > { %16312 = vmatprep.subr.bf16.mxu1 %v16785_v11  ;;  %16360 = vmatprep.subr.bf16.mxu0 %v16786_v33  ;;  %v21422_v18 = vsel %vm17113_vm2, %v14325_v13, %v10683_v49  ;;  %v10711_v49 = vrot.slane %v21410_v39, 6  ;;  %v14326_v13 = vrot.slane %v14302_v10, 10 }
 0x33e   : > { %23100 = vst [vmem:[#allocation37_spill] sm:$0xff] %v21400_v30  ;;  %v15946_v57 = vpop.f32.mrf.mxu1  ;;  %v15994_v56 = vpop.f32.mrf.mxu0  ;;  %16233 = vmatmul.mubr.bf16.gmra.mxu1 %v14337_v32  ;;  %16281 = vmatmul.mubr.bf16.gmra.mxu0 %v16772_v17  ;;  %v21412_v41 = vadd.f32 %v8550_v47, %v8121_v31  ;;  %v14339_v32 = vcombine.low %v21385_v1, %v21391_v28  ;;  %v14307_v47 = vld [vmem:[#allocation2 + $0x37c] sm:$0x3]  ;;  %v14310_v28 = vld [vmem:[#allocation2 + $0x398] sm:$0x3] }
 0x33f   : > { %v8126_v51 = vadd.f32 %v15946_v57, %v23102_v2  ;;  %16236 = vmatprep.mubr.bf16.mxu1 %v14338_v58  ;;  %16284 = vmatprep.mubr.bf16.mxu0 %v16775_v16  ;;  %v14340_v17 = vcombine.low %v21395_v42, %v21405_v23  ;;  %v14308_v58 = vld [vmem:[#allocation2 + $0x390] sm:$0xc]  ;;  %v10704_v16 = vrot.slane %v21407_v63, 6  ;;  %v21430_v1 = vsel %vm17113_vm2, %v10685_v43, %v10686_v24  ;;  %v14311_v42 = vld [vmem:[#allocation2 + $0x3ac] sm:$0xc] }
 0x340   : > { %23101 = vst [vmem:[#allocation36_spill] sm:$0xff] %v21412_v41  ;;  %v8033_v40 = vpop.f32.mrf.mxu1  ;;  %v8563_v54 = vpop.f32.mrf.mxu0  ;;  %16313 = vmatpush3.bf16.msra.mxu1 %v16785_v11  ;;  %16361 = vmatpush3.bf16.msra.mxu0 %v16786_v33  ;;  %v16776_v57 = vld [vmem:[#allocation2 + $0x4ec] sm:$0xff]   ;;  %v10692_v23 = vrot.slane %v10690_v44, 4  ;;  %v10693_v63 = vrot.slane %v14304_v53, 6  ;;  %v14313_v2 = vld [vmem:[#allocation2 + $0x3b4] sm:$0x3] }
 0x341   : > { %v21425_v31 = vadd.f32 %v15994_v56, %v8126_v51  ;;  %v8124_v5 = vadd.f32 %v8033_v40, %v21198_v34  ;;  %16314 = vmatprep.subr.bf16.mxu1 %v16789_v15  ;;  %16362 = vmatprep.subr.bf16.mxu0 %v16790_v26  ;;  %v14327_v56 = vrot.slane %v14305_v48, 10  ;;  %v16779_v40 = vld [vmem:[#allocation2 + $0x508] sm:$0xff]   ;;  %v10699_v24 = vrot.slane %v10697_v38, 4 }
 0x342   : > { %v15947_v11 = vpop.f32.mrf.mxu1  ;;  %v15995_v33 = vpop.f32.mrf.mxu0  ;;  %v10700_v43 = vrot.slane %v14307_v47, 6  ;;  %v14328_v30 = vrot.slane %v14308_v58, 10  ;;  %v10706_v55 = vrot.slane %v10704_v16, 4  ;;  %v10707_v25 = vrot.slane %v14310_v28, 6  ;;  %v21450_v28 = vld [vmem:[#allocation2 + $0x404] sm:$0xf] }
 0x343   : > { %23103 = vst [vmem:[#allocation39_spill] sm:$0xff] %v21425_v31  ;;  %v21433_v51 = vadd.f32 %v8563_v54, %v8124_v5  ;;  %v8127_v34 = vadd.f32 %v15947_v11, %v21203_v20  ;;  %v21436_v31 = vld [vmem:[#allocation2 + $0x3fc] sm:$0xf]  ;;  %v14329_v61 = vrot.slane %v14311_v42, 10  ;;  %v10713_v48 = vrot.slane %v10711_v49, 4 }
 0x344   : > { %v8036_v41 = vpop.f32.mrf.mxu1  ;;  %v8566_v39 = vpop.f32.mrf.mxu0  ;;  %16315 = vmatpush3.bf16.msra.mxu1 %v16789_v15  ;;  %16363 = vmatpush3.bf16.msra.mxu0 %v16790_v26  ;;  %v10714_v54 = vrot.slane %v14313_v2, 6  ;;  %v14341_v47 = vcombine.low %v21422_v18, %v21430_v1  ;;  %v21445_v58 = vsel %vm17113_vm2, %v14326_v13, %v10690_v44  ;;  %v10694_v15 = vsel %vm17113_vm2, %v10692_v23, %v10693_v63  ;;  %v14410_v18 = vld [vmem:[#allocation2 + $0x3f8] sm:$0xe]  ;;  %v14412_v44 = vld [vmem:[#allocation2 + $0x400] sm:$0x1]  ;;  %v16780_v63 = vld [vmem:[#allocation2 + $0x524] sm:$0xff]  }
 0x345   : > { %v21438_v10 = vadd.f32 %v15995_v33, %v8127_v34  ;;  %v8125_v53 = vadd.f32 %v8036_v41, %v21214_v60  ;;  %v11525_v26 = vrot.slane %v21436_v31, 5  ;;  %v21461_v42 = vsel %vm17113_vm2, %v10699_v24, %v10700_v43  ;;  %v21485_v23 = vld [vmem:[#allocation2 + $0x420] sm:$0xf]  ;;  %v14500_v34 = vld [vmem:[#allocation2 + $0x408] sm:$0x3] }
 0x346   : > { %v15950_v20 = vpop.f32.mrf.mxu1  ;;  %v15998_v5 = vpop.f32.mrf.mxu0  ;;  %16237 = vmatmul.mubr.bf16.gmra.mxu1 %v14339_v32  ;;  %16285 = vmatmul.mubr.bf16.gmra.mxu0 %v16776_v57  ;;  %v21457_v32 = vsel %vm17113_vm2, %v14327_v56, %v10697_v38  ;;  %v21465_v31 = vsel %vm17113_vm2, %v14328_v30, %v10704_v16  ;;  %v21473_v38 = vsel %vm17113_vm2, %v14329_v61, %v10711_v49  ;;  %v12055_v30 = vrot.slane %v21450_v28, 6  ;;  %v21483_v16 = vld [vmem:[#allocation2 + $0x418] sm:$0xf]  ;;  %v16783_v24 = vld [vmem:[#allocation2 + $0x540] sm:$0xff]  }
 0x347   : > { %v21452_v60 = vadd.f32 %v8566_v39, %v8125_v53  ;;  %v8130_v41 = vadd.f32 %v15950_v20, %v21222_v0  ;;  %16240 = vmatprep.mubr.bf16.mxu1 %v14340_v17  ;;  %16288 = vmatprep.mubr.bf16.mxu0 %v16779_v40  ;;  %v21469_v0 = vsel %vm17113_vm2, %v10706_v55, %v10707_v25  ;;  %v14498_v17 = vld [vmem:[#allocation2 + $0x400] sm:$0xc]  ;;  %v14458_v49 = vrot.slane %v14410_v18, 9  ;;  %v14413_v53 = vld [vmem:[#allocation2 + $0x414] sm:$0xe] }
 0x348   : > { %v8049_v57 = vpop.f32.mrf.mxu1  ;;  %v8579_v1 = vpop.f32.mrf.mxu0  ;;  %v21480_v13 = vsel %vm17113_vm2, %v10713_v48, %v10714_v54  ;;  %v14342_v61 = vcombine.low %v21445_v58, %v10694_v15  ;;  %v11527_v56 = vrot.slane %v11525_v26, 4  ;;  %v11528_v2 = vrot.slane %v14412_v44, 5  ;;  %v21493_v48 = vld [vmem:[#allocation2 + $0x434] sm:$0xf]  ;;  %v14415_v15 = vld [vmem:[#allocation2 + $0x41c] sm:$0x1] }
 0x349   : > { %v21475_v11 = vadd.f32 %v15998_v5, %v8130_v41  ;;  %v8128_v33 = vadd.f32 %v8049_v57, %v21225_v4  ;;  %v14546_v39 = vrot.slane %v14498_v17, 10  ;;  %v11532_v28 = vrot.slane %v21483_v16, 5  ;;  %v14503_v17 = vld [vmem:[#allocation2 + $0x424] sm:$0x3] }
 0x34a   : > { %v15951_v25 = vpop.f32.mrf.mxu1  ;;  %v15999_v55 = vpop.f32.mrf.mxu0  ;;  %v12057_v44 = vrot.slane %v12055_v30, 4  ;;  %v12058_v57 = vrot.slane %v14500_v34, 6  ;;  %v21506_v58 = vsel %vm17212_vm5, %v14458_v49, %v11525_v26  ;;  %v21510_v16 = vsel %vm17212_vm5, %v11527_v56, %v11528_v2  ;;  %v21520_v49 = vld [vmem:[#allocation2 + $0x43c] sm:$0xf] }
 0x34b   : > { %v21488_v4 = vadd.f32 %v8579_v1, %v8128_v33  ;;  %v8131_v40 = vadd.f32 %v15951_v25, %v21228_v8  ;;  %v12062_v8 = vrot.slane %v21485_v23, 6  ;;  %v14501_v1 = vld [vmem:[#allocation2 + $0x41c] sm:$0xc]  ;;  %v14459_v23 = vrot.slane %v14413_v53, 9 }
 0x34c   : > { %v8052_v54 = vpop.f32.mrf.mxu1  ;;  %v8582_v20 = vpop.f32.mrf.mxu0  ;;  %v11535_v26 = vrot.slane %v14415_v15, 5  ;;  %v11534_v53 = vrot.slane %v11532_v28, 4  ;;  %v16784_v15 = vld [vmem:[#allocation2 + $0x55c] sm:$0xff]  }
 0x34d   : > { %v21501_v41 = vadd.f32 %v15999_v55, %v8131_v40  ;;  %v8129_v18 = vadd.f32 %v8052_v54, %v21235_v21  ;;  %v14416_v55 = vld [vmem:[#allocation2 + $0x430] sm:$0xe]  ;;  %v11539_v21 = vrot.slane %v21493_v48, 5  ;;  %v14547_v54 = vrot.slane %v14501_v1, 10 }
 0x34e   : > { %v15954_v33 = vpop.f32.mrf.mxu1  ;;  %v16002_v25 = vpop.f32.mrf.mxu0  ;;  %16241 = vmatmul.mubr.bf16.gmra.mxu1 %v14341_v47  ;;  %16289 = vmatmul.mubr.bf16.gmra.mxu0 %v16780_v63  ;;  %v21518_v47 = vsel %vm17113_vm2, %v14546_v39, %v12055_v30  ;;  %v14418_v63 = vld [vmem:[#allocation2 + $0x438] sm:$0x1]  ;;  %v12064_v43 = vrot.slane %v12062_v8, 4  ;;  %v12065_v48 = vrot.slane %v14503_v17, 6  ;;  %v21529_v30 = vsel %vm17113_vm2, %v12057_v44, %v12058_v57  ;;  %v14504_v17 = vld [vmem:[#allocation2 + $0x438] sm:$0xc] }
 0x34f   : > { %23104 = vst [vmem:[#allocation66_spill] sm:$0xff] %v21501_v41  ;;  %v21513_v40 = vadd.f32 %v8582_v20, %v8129_v18  ;;  %v8134_v34 = vadd.f32 %v15954_v33, %v21242_v14  ;;  %16244 = vmatprep.mubr.bf16.mxu1 %v14342_v61  ;;  %16292 = vmatprep.mubr.bf16.mxu0 %v16783_v24  ;;  %v21522_v20 = vld [vmem:[#allocation2 + $0x450] sm:$0xf]  ;;  %v14460_v61 = vrot.slane %v14416_v55, 9  ;;  %v11541_v1 = vrot.slane %v11539_v21, 4 }
 0x350   : > { %v8065_v56 = vpop.f32.mrf.mxu1  ;;  %v8595_v2 = vpop.f32.mrf.mxu0  ;;  %v12069_v41 = vrot.slane %v21520_v49, 6  ;;  %v21539_v44 = vsel %vm17212_vm5, %v14459_v23, %v11532_v28  ;;  %v14506_v57 = vld [vmem:[#allocation2 + $0x440] sm:$0x3]  ;;  %v14419_v55 = vld [vmem:[#allocation2 + $0x44c] sm:$0xe]  ;;  %v21546_v49 = vsel %vm17212_vm5, %v11534_v53, %v11535_v26  ;;  %v21554_v28 = vsel %vm17113_vm2, %v12064_v43, %v12065_v48 }
 0x351   : > { %23106 = vst [vmem:[#allocation43_spill] sm:$0xff] %v21513_v40  ;;  %v21524_v18 = vadd.f32 %v16002_v25, %v8134_v34  ;;  %v8132_v14 = vadd.f32 %v8065_v56, %v21245_v9  ;;  %v11542_v40 = vrot.slane %v14418_v63, 5  ;;  %v16787_v34 = vld [vmem:[#allocation2 + $0x578] sm:$0xff]   ;;  %v11546_v56 = vrot.slane %v21522_v20, 5  ;;  %v14421_v23 = vld [vmem:[#allocation2 + $0x454] sm:$0x1] }
 0x352   : > { %v15955_v24 = vpop.f32.mrf.mxu1  ;;  %v16003_v39 = vpop.f32.mrf.mxu0  ;;  %v21563_v26 = vld [vmem:[#allocation2 + $0x458] sm:$0xf]  ;;  %v21565_v53 = vld [vmem:[#allocation2 + $0x46c] sm:$0xf]  ;;  %v23109_v43 = vcombine.low %v21457_v32, %v21461_v42  ;;  %v11549_v32 = vrot.slane %v14421_v23, 5 }
 0x353   : > { %23107 = vst [vmem:[#allocation60_spill] sm:$0xff] %v21524_v18  ;;  %v21534_v25 = vadd.f32 %v8595_v2, %v8132_v14  ;;  %v8135_v9 = vadd.f32 %v15955_v24, %v21248_v46  ;;  %v21550_v46 = vsel %vm17113_vm2, %v14547_v54, %v12062_v8  ;;  %v21561_v14 = vsel %vm17212_vm5, %v14460_v61, %v11539_v21  ;;  %v14507_v42 = vld [vmem:[#allocation2 + $0x454] sm:$0xc] }
 0x354   : > { %v8068_v18 = vpop.f32.mrf.mxu1  ;;  %v8598_v33 = vpop.f32.mrf.mxu0  ;;  %v14548_v24 = vrot.slane %v14504_v17, 10  ;;  %v21572_v48 = vsel %vm17212_vm5, %v11541_v1, %v11542_v40  ;;  %v14461_v21 = vrot.slane %v14419_v55, 9  ;;  %v23111_v17 = vcombine.low %v21465_v31, %v21469_v0  ;;  %v16788_v1 = vld [vmem:[#allocation2 + $0x594] sm:$0xff]  }
 0x355   : > { %v21556_v2 = vadd.f32 %v16003_v39, %v8135_v9  ;;  %v8133_v20 = vadd.f32 %v8068_v18, %v21255_v12  ;;  %v12071_v12 = vrot.slane %v12069_v41, 4  ;;  %v12072_v18 = vrot.slane %v14506_v57, 6  ;;  %v14509_v57 = vld [vmem:[#allocation2 + $0x45c] sm:$0x3] }
 0x356   : > { %v15958_v8 = vpop.f32.mrf.mxu1  ;;  %v16006_v54 = vpop.f32.mrf.mxu0  ;;  %16245 = vmatmul.mubr.bf16.gmra.mxu1 %v23109_v43  ;;  %16293 = vmatmul.mubr.bf16.gmra.mxu0 %v16784_v15  ;;  %v11548_v9 = vrot.slane %v11546_v56, 4  ;;  %v21580_v15 = vld [vmem:[#allocation2 + $0x474] sm:$0xf]  ;;  %v11553_v31 = vrot.slane %v21565_v53, 5  ;;  %v21595_v23 = vsel %vm17113_vm2, %v14548_v24, %v12069_v41  ;;  %v21603_v53 = vsel %vm17212_vm5, %v14461_v21, %v11546_v56 }
 0x357   : > { %23108 = vst [vmem:[#allocation61_spill] sm:$0xff] %v21556_v2  ;;  %v21574_v61 = vadd.f32 %v8598_v33, %v8133_v20  ;;  %v8138_v39 = vadd.f32 %v15958_v8, %v21265_v50  ;;  %16248 = vmatprep.mubr.bf16.mxu1 %v23111_v17  ;;  %16296 = vmatprep.mubr.bf16.mxu0 %v16787_v34  ;;  %v12076_v50 = vrot.slane %v21563_v26, 6  ;;  %v14422_v20 = vld [vmem:[#allocation2 + $0x468] sm:$0xe]  ;;  %v14424_v8 = vld [vmem:[#allocation2 + $0x470] sm:$0x1] }
 0x358   : > { %v8081_v43 = vpop.f32.mrf.mxu1  ;;  %v8611_v40 = vpop.f32.mrf.mxu0  ;;  %v21599_v26 = vsel %vm17113_vm2, %v12071_v12, %v12072_v18  ;;  %v12079_v55 = vrot.slane %v14509_v57, 6  ;;  %v14510_v12 = vld [vmem:[#allocation2 + $0x470] sm:$0xc]  ;;  %v14512_v18 = vld [vmem:[#allocation2 + $0x478] sm:$0x3]  ;;  %v14462_v21 = vrot.slane %v14422_v20, 9 }
 0x359   : > { %23110 = vst [vmem:[#allocation69_spill] sm:$0xff] %v21574_v61  ;;  %v21588_v0 = vadd.f32 %v16006_v54, %v8138_v39  ;;  %v8136_v34 = vadd.f32 %v8081_v43, %v21268_v35  ;;  %v14549_v35 = vrot.slane %v14507_v42, 10  ;;  %v12083_v54 = vrot.slane %v21580_v15, 6  ;;  %v21606_v39 = vld [vmem:[#allocation2 + $0x488] sm:$0xf] }
 0x35a   : > { %v15959_v17 = vpop.f32.mrf.mxu1  ;;  %v16007_v33 = vpop.f32.mrf.mxu0  ;;  %v21613_v43 = vsel %vm17212_vm5, %v11548_v9, %v11549_v32  ;;  %v12078_v56 = vrot.slane %v12076_v50, 4  ;;  %v11555_v42 = vrot.slane %v11553_v31, 4  ;;  %v11556_v61 = vrot.slane %v14424_v8, 5  ;;  %v21615_v15 = vld [vmem:[#allocation2 + $0x490] sm:$0xf] }
 0x35b   : > { %23112 = vst [vmem:[#allocation49_spill] sm:$0xff] %v21588_v0  ;;  %v21608_v41 = vadd.f32 %v8611_v40, %v8136_v34  ;;  %v8139_v24 = vadd.f32 %v15959_v17, %v21271_v22  ;;  %v14425_v9 = vld [vmem:[#allocation2 + $0x484] sm:$0xe]  ;;  %v11560_v32 = vrot.slane %v21606_v39, 5  ;;  %v23113_v17 = vcombine.low %v21473_v38, %v21480_v13 }
 0x35c   : > { %v8084_v63 = vpop.f32.mrf.mxu1  ;;  %v8614_v0 = vpop.f32.mrf.mxu0  ;;  %v14477_v20 = vcombine.low %v21603_v53, %v21613_v43  ;;  %v12085_v8 = vrot.slane %v12083_v54, 4  ;;  %v23114_v39 = vcombine.low %v21506_v58, %v21510_v16  ;;  %v23115_v38 = vcombine.low %v21518_v47, %v21529_v30  ;;  %v14515_v30 = vld [vmem:[#allocation2 + $0x494] sm:$0x3] }
 0x35d   : > { %v21617_v2 = vadd.f32 %v16007_v33, %v8139_v24  ;;  %v8137_v40 = vadd.f32 %v8084_v63, %v21278_v36  ;;  %v14550_v33 = vrot.slane %v14510_v12, 10  ;;  %v12086_v24 = vrot.slane %v14512_v18, 6  ;;  %v14427_v36 = vld [vmem:[#allocation2 + $0x48c] sm:$0x1]  ;;  %v14429_v18 = vld [vmem:[#allocation2 + $0x4a4] sm:$0xf] }
 0x35e   : > { %v15962_v57 = vpop.f32.mrf.mxu1  ;;  %v16010_v34 = vpop.f32.mrf.mxu0  ;;  %16249 = vmatmul.mubr.bf16.gmra.mxu1 %v23113_v17  ;;  %16297 = vmatmul.mubr.bf16.gmra.mxu0 %v16788_v1  ;;  %v21639_v13 = vsel %vm17113_vm2, %v14549_v35, %v12076_v50  ;;  %v14513_v1 = vld [vmem:[#allocation2 + $0x48c] sm:$0xc]  ;;  %v12090_v12 = vrot.slane %v21615_v15, 6  ;;  %v21648_v58 = vsel %vm17212_vm5, %v14462_v21, %v11553_v31  ;;  %v21652_v16 = vsel %vm17212_vm5, %v11555_v42, %v11556_v61  ;;  %v14428_v17 = vld [vmem:[#allocation2 + $0x4a0] sm:$0xe] }
 0x35f   : > { %v21628_v63 = vadd.f32 %v8614_v0, %v8137_v40  ;;  %v8142_v22 = vadd.f32 %v15962_v57, %v21284_v7  ;;  %16316 = vmatprep.mubr.bf16.mxu1 %v23114_v39  ;;  %16364 = vmatprep.mubr.bf16.mxu0 %v23115_v38  ;;  %v21644_v7 = vsel %vm17113_vm2, %v12078_v56, %v12079_v55  ;;  %v14463_v47 = vrot.slane %v14425_v9, 9  ;;  %v14517_v42 = vld [vmem:[#allocation2 + $0x4ac] sm:$0xf] }
 0x360   : > { %v8097_v0 = vpop.f32.mrf.mxu1  ;;  %v8627_v40 = vpop.f32.mrf.mxu0  ;;  %v11562_v15 = vrot.slane %v11560_v32, 4  ;;  %v11563_v57 = vrot.slane %v14427_v36, 5  ;;  %v21659_v56 = vsel %vm17113_vm2, %v14550_v33, %v12083_v54  ;;  %v21663_v31 = vsel %vm17113_vm2, %v12085_v8, %v12086_v24  ;;  %v14430_v36 = vld [vmem:[#allocation2 + $0x4a8] sm:$0x1] }
 0x361   : > { %v21654_v50 = vadd.f32 %v16010_v34, %v8142_v22  ;;  %v8140_v35 = vadd.f32 %v8097_v0, %v21291_v45  ;;  %v14551_v61 = vrot.slane %v14513_v1, 10  ;;  %v11567_v21 = vrot.slane %v14429_v18, 5  ;;  %v14516_v1 = vld [vmem:[#allocation2 + $0x4a8] sm:$0xc] }
 0x362   : > { %v15963_v39 = vpop.f32.mrf.mxu1  ;;  %v16011_v55 = vpop.f32.mrf.mxu0  ;;  %v12092_v9 = vrot.slane %v12090_v12, 4  ;;  %v12093_v34 = vrot.slane %v14515_v30, 6  ;;  %v21674_v8 = vsel %vm17212_vm5, %v14463_v47, %v11560_v32  ;;  %v14464_v24 = vrot.slane %v14428_v17, 9 }
 0x363   : > { %v21665_v22 = vadd.f32 %v8627_v40, %v8140_v35  ;;  %v8143_v45 = vadd.f32 %v15963_v39, %v21296_v37  ;;  %v21681_v40 = vsel %vm17212_vm5, %v11562_v15, %v11563_v57  ;;  %v12097_v30 = vrot.slane %v14517_v42, 6  ;;  %v21683_v35 = vld [vmem:[#allocation2 + $0x4c0] sm:$0xf]  ;;  %v21685_v39 = vld [vmem:[#allocation2 + $0x4c8] sm:$0xf] }
 0x364   : > { %v8100_v38 = vpop.f32.mrf.mxu1  ;;  %v8630_v0 = vpop.f32.mrf.mxu0  ;;  %v23116_v32 = vcombine.low %v21539_v44, %v21546_v49  ;;  %v23117_v47 = vcombine.low %v21550_v46, %v21554_v28  ;;  %v21697_v15 = vsel %vm17113_vm2, %v14551_v61, %v12090_v12  ;;  %v11569_v57 = vrot.slane %v11567_v21, 4  ;;  %v14431_v12 = vld [vmem:[#allocation2 + $0x4bc] sm:$0xe] }
 0x365   : > { %v21676_v18 = vadd.f32 %v16011_v55, %v8143_v45  ;;  %v8141_v37 = vadd.f32 %v8100_v38, %v21304_v19  ;;  %v14566_v19 = vcombine.low %v21659_v56, %v21663_v31  ;;  %v11570_v17 = vrot.slane %v14430_v36, 5  ;;  %v14518_v55 = vld [vmem:[#allocation2 + $0x4b0] sm:$0x3]  ;;  %v21712_v56 = vld [vmem:[#allocation2 + $0x4dc] sm:$0xf] }
 0x366   : > { %v16030_v33 = vpop.f32.mrf.mxu1  ;;  %v16078_v54 = vpop.f32.mrf.mxu0  ;;  %16317 = vmatmul.mubr.bf16.vlgmr.msra.gmra.mxu1 %v23116_v32  ;;  %16365 = vmatmul.mubr.bf16.vlgmr.msra.gmra.mxu0 %v23117_v47  ;;  %v23118_v44 = vcombine.low %v21561_v14, %v21572_v48  ;;  %v23119_v49 = vcombine.low %v21595_v23, %v21599_v26  ;;  %v21710_v46 = vsel %vm17113_vm2, %v12092_v9, %v12093_v34  ;;  %v14552_v28 = vrot.slane %v14516_v1, 10  ;;  %v14433_v48 = vld [vmem:[#allocation2 + $0x4c4] sm:$0x1] }
 0x367   : > { %v21699_v42 = vadd.f32 %v8630_v0, %v8141_v37  ;;  %v9032_v45 = vadd.f32 %v16030_v33, %v21316_v3  ;;  %v21718_v14 = vsel %vm17212_vm5, %v14464_v24, %v11567_v21  ;;  %v11574_v23 = vrot.slane %v21683_v35, 5  ;;  %v14519_v0 = vld [vmem:[#allocation2 + $0x4c4] sm:$0xc]  ;;  %v14521_v33 = vld [vmem:[#allocation2 + $0x4cc] sm:$0x3] }
 0x368   : > { %16320 = vmatprep.mubr.bf16.mxu1 %v23118_v44  ;;  %16368 = vmatprep.mubr.bf16.mxu0 %v23119_v49  ;;  %v8903_v31 = vpop.f32.mrf.mxu1  ;;  %v9433_v61 = vpop.f32.mrf.mxu0  ;;  %v12104_v26 = vrot.slane %v21685_v39, 6  ;;  %v12099_v36 = vrot.slane %v12097_v30, 4  ;;  %v12100_v38 = vrot.slane %v14518_v55, 6  ;;  %v21729_v21 = vsel %vm17212_vm5, %v11569_v57, %v11570_v17  ;;  %v14434_v35 = vld [vmem:[#allocation2 + $0x4d8] sm:$0xe] }
 0x369   : > { %v21722_v9 = vadd.f32 %v16078_v54, %v9032_v45  ;;  %v9030_v34 = vadd.f32 %v8903_v31, %v21319_v62  ;;  %v14465_v24 = vrot.slane %v14431_v12, 9  ;;  %v11581_v54 = vrot.slane %v21712_v56, 5  ;;  %v14436_v45 = vld [vmem:[#allocation2 + $0x4e0] sm:$0x1]  ;;  %v21739_v44 = vld [vmem:[#allocation2 + $0x4e4] sm:$0xf] }
 0x36a   : > { %v16031_v1 = vpop.f32.mrf.mxu1  ;;  %v16079_v37 = vpop.f32.mrf.mxu0  ;;  %v21737_v47 = vsel %vm17113_vm2, %v14552_v28, %v12097_v30  ;;  %v11577_v55 = vrot.slane %v14433_v48, 5  ;;  %v11576_v57 = vrot.slane %v11574_v23, 4  ;;  %v14553_v17 = vrot.slane %v14519_v0, 10  ;;  %v21741_v3 = vld [vmem:[#allocation2 + $0x4f8] sm:$0xf] }
 0x36b   : > { %v21732_v39 = vadd.f32 %v9433_v61, %v9030_v34  ;;  %v9033_v62 = vadd.f32 %v16031_v1, %v21324_v59  ;;  %v12106_v12 = vrot.slane %v12104_v26, 4  ;;  %v12107_v32 = vrot.slane %v14521_v33, 6  ;;  %v14522_v1 = vld [vmem:[#allocation2 + $0x4e0] sm:$0xc] }
 0x36c   : > { %v8906_v49 = vpop.f32.mrf.mxu1  ;;  %v9436_v31 = vpop.f32.mrf.mxu0  ;;  %v21748_v30 = vsel %vm17113_vm2, %v12099_v36, %v12100_v38  ;;  %v14466_v28 = vrot.slane %v14434_v35, 9  ;;  %v23120_v34 = vcombine.low %v21639_v13, %v21644_v7  ;;  %v14480_v0 = vcombine.low %v21718_v14, %v21729_v21  ;;  %v14437_v13 = vld [vmem:[#allocation2 + $0x4f4] sm:$0xe] }
 0x36d   : > { %v21743_v56 = vadd.f32 %v16079_v37, %v9033_v62  ;;  %v9031_v59 = vadd.f32 %v8906_v49, %v21334_v27  ;;  %v11583_v33 = vrot.slane %v11581_v54, 4  ;;  %v11584_v27 = vrot.slane %v14436_v45, 5 }
 0x36e   : > { %v16034_v61 = vpop.f32.mrf.mxu1  ;;  %v16082_v48 = vpop.f32.mrf.mxu0  ;;  %16321 = vmatmul.mubr.bf16.gmra.mxu1 %v14477_v20  ;;  %16369 = vmatmul.mubr.bf16.gmra.mxu0 %v23120_v34  ;;  %v12111_v36 = vrot.slane %v21739_v44, 6  ;;  %v23121_v53 = vcombine.low %v21648_v58, %v21652_v16  ;;  %v21767_v43 = vsel %vm17212_vm5, %v14465_v24, %v11574_v23  ;;  %v14524_v20 = vld [vmem:[#allocation2 + $0x4e8] sm:$0x3]  ;;  %v11588_v7 = vrot.slane %v21741_v3, 5 }
 0x36f   : > { %v21759_v38 = vadd.f32 %v9436_v31, %v9031_v59  ;;  %v9036_v37 = vadd.f32 %v16034_v61, %v21342_v52  ;;  %16372 = vmatprep.mubr.bf16.mxu0 %v14566_v19  ;;  %v14568_v35 = vcombine.low %v21737_v47, %v21748_v30  ;;  %v21774_v52 = vsel %vm17212_vm5, %v11576_v57, %v11577_v55  ;;  %v14439_v19 = vld [vmem:[#allocation2 + $0x4fc] sm:$0x1]  ;;  %v21791_v47 = vld [vmem:[#allocation2 + $0x500] sm:$0xf]  ;;  %v21793_v55 = vld [vmem:[#allocation2 + $0x514] sm:$0xf] }
 0x370   : > { %16324 = vmatprep.mubr.bf16.mxu1 %v23121_v53  ;;  %v8919_v14 = vpop.f32.mrf.mxu1  ;;  %v9449_v21 = vpop.f32.mrf.mxu0  ;;  %v21778_v58 = vsel %vm17113_vm2, %v14553_v17, %v12104_v26  ;;  %v21782_v16 = vsel %vm17113_vm2, %v12106_v12, %v12107_v32  ;;  %v21789_v24 = vsel %vm17212_vm5, %v14466_v28, %v11581_v54  ;;  %v14554_v62 = vrot.slane %v14522_v1, 10  ;;  %v14525_v59 = vld [vmem:[#allocation2 + $0x4fc] sm:$0xc]  ;;  %v23123_v53 = vld [vmem:[#allocation53_spill] sm:$0xff] }
 0x371   : > { %v21784_v23 = vadd.f32 %v16082_v48, %v9036_v37  ;;  %v9034_v3 = vadd.f32 %v8919_v14, %v21349_v29  ;;  %v21797_v32 = vsel %vm17212_vm5, %v11583_v33, %v11584_v27  ;;  %v12113_v44 = vrot.slane %v12111_v36, 4  ;;  %v23122_v29 = vld [vmem:[#allocation51_spill] sm:$0xff]  ;;  %v14527_v33 = vld [vmem:[#allocation2 + $0x504] sm:$0x3] }
 0x372   : > { %v16035_v26 = vpop.f32.mrf.mxu1  ;;  %v16083_v45 = vpop.f32.mrf.mxu0  ;;  %v12114_v49 = vrot.slane %v14524_v20, 6  ;;  %v14467_v31 = vrot.slane %v14437_v13, 9  ;;  %v11590_v54 = vrot.slane %v11588_v7, 4  ;;  %v11591_v12 = vrot.slane %v14439_v19, 5  ;;  %v21802_v30 = vld [vmem:[#allocation2 + $0x51c] sm:$0xf] }
 0x373   : > { %v21799_v57 = vadd.f32 %v9449_v21, %v9034_v3  ;;  %v9037_v17 = vadd.f32 %v16035_v26, %v23122_v29  ;;  %v12118_v27 = vrot.slane %v21791_v47, 6  ;;  %v11595_v1 = vrot.slane %v21793_v55, 5  ;;  %v14440_v21 = vld [vmem:[#allocation2 + $0x510] sm:$0xe]  ;;  %v14442_v19 = vld [vmem:[#allocation2 + $0x518] sm:$0x1] }
 0x374   : > { %v8922_v28 = vpop.f32.mrf.mxu1  ;;  %v9452_v61 = vpop.f32.mrf.mxu0  ;;  %v21817_v14 = vsel %vm17113_vm2, %v14554_v62, %v12111_v36  ;;  %v23124_v47 = vcombine.low %v21674_v8, %v21681_v40  ;;  %v23125_v55 = vcombine.low %v21697_v15, %v21710_v46  ;;  %v21829_v29 = vsel %vm17212_vm5, %v14467_v31, %v11588_v7  ;;  %v23126_v8 = vld [vmem:[#allocation50_spill] sm:$0xff] }
 0x375   : > { %v21810_v37 = vadd.f32 %v16083_v45, %v9037_v17  ;;  %v9035_v20 = vadd.f32 %v8922_v28, %v23123_v53  ;;  %v12115_v45 = vsel %vm17113_vm2, %v12113_v44, %v12114_v49  ;;  %v14555_v36 = vrot.slane %v14525_v59, 10  ;;  %v21832_v17 = vld [vmem:[#allocation2 + $0x530] sm:$0xf]  ;;  %v14528_v44 = vld [vmem:[#allocation2 + $0x518] sm:$0xc] }
 0x376   : > { %v16038_v3 = vpop.f32.mrf.mxu1  ;;  %v16086_v26 = vpop.f32.mrf.mxu0  ;;  %16325 = vmatmul.mubr.bf16.gmra.mxu1 %v23124_v47  ;;  %16373 = vmatmul.mubr.bf16.gmra.mxu0 %v23125_v55  ;;  %v12125_v62 = vrot.slane %v21802_v30, 6  ;;  %v21839_v15 = vsel %vm17212_vm5, %v11590_v54, %v11591_v12  ;;  %v12121_v46 = vrot.slane %v14527_v33, 6  ;;  %v14530_v49 = vld [vmem:[#allocation2 + $0x520] sm:$0x3]  ;;  %v12120_v59 = vrot.slane %v12118_v27, 4 }
 0x377   : > { %v21834_v28 = vadd.f32 %v9452_v61, %v9035_v20  ;;  %v9040_v40 = vadd.f32 %v16038_v3, %v23126_v8  ;;  %16328 = vmatprep.mubr.bf16.mxu1 %v14480_v0  ;;  %16376 = vmatprep.mubr.bf16.mxu0 %v14568_v35  ;;  %v14468_v53 = vrot.slane %v14440_v21, 9  ;;  %v11597_v30 = vrot.slane %v11595_v1, 4  ;;  %v21841_v55 = vld [vmem:[#allocation2 + $0x538] sm:$0xf]  ;;  %v14443_v3 = vld [vmem:[#allocation2 + $0x52c] sm:$0xe] }
 0x378   : > { %v8935_v7 = vpop.f32.mrf.mxu1  ;;  %v9465_v31 = vpop.f32.mrf.mxu0  ;;  %v11598_v47 = vrot.slane %v14442_v19, 5  ;;  %v23128_v20 = vld [vmem:[#allocation31_spill] sm:$0xff]  ;;  %v14570_v35 = vcombine.low %v21817_v14, %v12115_v45  ;;  %v11602_v54 = vrot.slane %v21832_v17, 5  ;;  %v14556_v13 = vrot.slane %v14528_v44, 10  ;;  %v14445_v19 = vld [vmem:[#allocation2 + $0x534] sm:$0x1] }
 0x379   : > { %v21843_v61 = vadd.f32 %v16086_v26, %v9040_v40  ;;  %v9038_v0 = vadd.f32 %v8935_v7, %v23128_v20  ;;  %v12127_v21 = vrot.slane %v12125_v62, 4  ;;  %v12128_v34 = vrot.slane %v14530_v49, 6  ;;  %v23130_v26 = vld [vmem:[#allocation37_spill] sm:$0xff]  ;;  %v14531_v14 = vld [vmem:[#allocation2 + $0x534] sm:$0xc] }
 0x37a   : > { %v16039_v12 = vpop.f32.mrf.mxu1  ;;  %v16087_v33 = vpop.f32.mrf.mxu0  ;;  %v21855_v7 = vsel %vm17113_vm2, %v14555_v36, %v12118_v27  ;;  %v12132_v45 = vrot.slane %v21841_v55, 6  ;;  %v21858_v17 = vld [vmem:[#allocation2 + $0x54c] sm:$0xf]  ;;  %v21862_v44 = vsel %vm17113_vm2, %v12120_v59, %v12121_v46  ;;  %v21866_v49 = vsel %vm17212_vm5, %v14468_v53, %v11595_v1  ;;  %v14533_v36 = vld [vmem:[#allocation2 + $0x53c] sm:$0x3]  ;;  %v23131_v55 = vld [vmem:[#allocation36_spill] sm:$0xff] }
 0x37b   : > { %23127 = vst [vmem:[#allocation46_spill] sm:$0xff] %v21843_v61  ;;  %v21850_v48 = vadd.f32 %v9465_v31, %v9038_v0  ;;  %v9041_v40 = vadd.f32 %v16039_v12, %v23130_v26  ;;  %v21870_v31 = vsel %vm17212_vm5, %v11597_v30, %v11598_v47  ;;  %v14469_v27 = vrot.slane %v14443_v3, 9 }
 0x37c   : > { %v8938_v20 = vpop.f32.mrf.mxu1  ;;  %v9468_v61 = vpop.f32.mrf.mxu0  ;;  %v11604_v26 = vrot.slane %v11602_v54, 4  ;;  %v11605_v8 = vrot.slane %v14445_v19, 5  ;;  %v23132_v1 = vcombine.low %v21767_v43, %v21774_v52  ;;  %v23133_v53 = vcombine.low %v21778_v58, %v21782_v16 }
 0x37d   : > { %23129 = vst [vmem:[#allocation24_spill] sm:$0xff] %v21850_v48  ;;  %v21872_v0 = vadd.f32 %v16087_v33, %v9041_v40  ;;  %v9039_v12 = vadd.f32 %v8938_v20, %v23131_v55  ;;  %v21875_v48 = vld [vmem:[#allocation2 + $0x554] sm:$0xf]  ;;  %v21885_v30 = vsel %vm17113_vm2, %v14556_v13, %v12125_v62  ;;  %v12129_v47 = vsel %vm17113_vm2, %v12127_v21, %v12128_v34  ;;  %v14446_v33 = vld [vmem:[#allocation2 + $0x548] sm:$0xe]  ;;  %v23134_v20 = vld [vmem:[#allocation39_spill] sm:$0xff] }
 0x37e   : > { %v16042_v46 = vpop.f32.mrf.mxu1  ;;  %v16090_v59 = vpop.f32.mrf.mxu0  ;;  %16329 = vmatmul.mubr.bf16.gmra.mxu1 %v23132_v1  ;;  %16377 = vmatmul.mubr.bf16.gmra.mxu0 %v23133_v53  ;;  %v14557_v3 = vrot.slane %v14531_v14, 10  ;;  %v11609_v19 = vrot.slane %v21858_v17, 5  ;;  %v23135_v52 = vcombine.low %v21789_v24, %v21797_v32  ;;  %v12134_v58 = vrot.slane %v12132_v45, 4  ;;  %v14448_v13 = vld [vmem:[#allocation2 + $0x550] sm:$0x1] }
 0x37f   : > { %v21890_v40 = vadd.f32 %v9468_v61, %v9039_v12  ;;  %v9044_v43 = vadd.f32 %v16042_v46, %v23134_v20  ;;  %16380 = vmatprep.mubr.bf16.mxu0 %v14570_v35  ;;  %v12135_v16 = vrot.slane %v14533_v36, 6  ;;  %v14571_v34 = vcombine.low %v21855_v7, %v21862_v44  ;;  %v14534_v14 = vld [vmem:[#allocation2 + $0x550] sm:$0xc]  ;;  %v14536_v7 = vld [vmem:[#allocation2 + $0x558] sm:$0x3] }
 0x380   : > { %16332 = vmatprep.mubr.bf16.mxu1 %v23135_v52  ;;  %v8951_v62 = vpop.f32.mrf.mxu1  ;;  %v9481_v55 = vpop.f32.mrf.mxu0  ;;  %v14484_v21 = vcombine.low %v21866_v49, %v21870_v31  ;;  %v21902_v61 = vsel %vm17212_vm5, %v14469_v27, %v11602_v54  ;;  %v12139_v24 = vrot.slane %v21875_v48, 6  ;;  %v21910_v17 = vsel %vm17212_vm5, %v11604_v26, %v11605_v8  ;;  %v21912_v44 = vld [vmem:[#allocation2 + $0x568] sm:$0xf]  ;;  %v21919_v46 = vld [vmem:[#allocation2 + $0x570] sm:$0xf] }
 0x381   : > { %v21905_v32 = vadd.f32 %v16090_v59, %v9044_v43  ;;  %v9042_v35 = vadd.f32 %v8951_v62, %v21433_v51  ;;  %v14470_v36 = vrot.slane %v14446_v33, 9  ;;  %v14572_v54 = vcombine.low %v21885_v30, %v12129_v47  ;;  %v14449_v1 = vld [vmem:[#allocation2 + $0x564] sm:$0xe]  ;;  %v14451_v20 = vld [vmem:[#allocation2 + $0x56c] sm:$0x1] }
 0x382   : > { %v16043_v49 = vpop.f32.mrf.mxu1  ;;  %v16091_v31 = vpop.f32.mrf.mxu0  ;;  %v21917_v27 = vsel %vm17113_vm2, %v14557_v3, %v12132_v45  ;;  %v11611_v48 = vrot.slane %v11609_v19, 4  ;;  %v11612_v12 = vrot.slane %v14448_v13, 5  ;;  %v21926_v26 = vsel %vm17113_vm2, %v12134_v58, %v12135_v16  ;;  %v21928_v53 = vld [vmem:[#allocation2 + $0x584] sm:$0xf]  ;;  %v14537_v16 = vld [vmem:[#allocation2 + $0x56c] sm:$0xc] }
 0x383   : > { %v21921_v51 = vadd.f32 %v9481_v55, %v9042_v35  ;;  %v9045_v8 = vadd.f32 %v16043_v49, %v21438_v10  ;;  %v14558_v59 = vrot.slane %v14534_v14, 10  ;;  %v12141_v3 = vrot.slane %v12139_v24, 4  ;;  %v21941_v62 = vld [vmem:[#allocation2 + $0x58c] sm:$0xf] }
 0x384   : > { %v8954_v30 = vpop.f32.mrf.mxu1  ;;  %v9484_v47 = vpop.f32.mrf.mxu0  ;;  %v12142_v33 = vrot.slane %v14536_v7, 6  ;;  %v11616_v43 = vrot.slane %v21912_v44, 5  ;;  %v21938_v58 = vsel %vm17212_vm5, %v14470_v36, %v11609_v19  ;;  %v12146_v13 = vrot.slane %v21919_v46, 6  ;;  %v14539_v36 = vld [vmem:[#allocation2 + $0x574] sm:$0x3] }
 0x385   : > { %v21933_v52 = vadd.f32 %v16091_v31, %v9045_v8  ;;  %v9043_v10 = vadd.f32 %v8954_v30, %v21452_v60  ;;  %v23136_v35 = vcombine.low %v21829_v29, %v21839_v15  ;;  %v14573_v7 = vcombine.low %v21917_v27, %v21926_v26  ;;  %v14454_v46 = vld [vmem:[#allocation2 + $0x588] sm:$0x1]  ;;  %v14540_v30 = vld [vmem:[#allocation2 + $0x588] sm:$0xc] }
 0x386   : > { %v16046_v55 = vpop.f32.mrf.mxu1  ;;  %v16094_v14 = vpop.f32.mrf.mxu0  ;;  %16381 = vmatmul.mubr.bf16.gmra.mxu0 %v14571_v34  ;;  %v11613_v60 = vsel %vm17212_vm5, %v11611_v48, %v11612_v12  ;;  %v14471_v19 = vrot.slane %v14449_v1, 9  ;;  %v11623_v44 = vrot.slane %v21928_v53, 5  ;;  %v12140_v29 = vsel %vm17113_vm2, %v14558_v59, %v12139_v24  ;;  %v14452_v34 = vld [vmem:[#allocation2 + $0x580] sm:$0xe]  ;;  %v14542_v24 = vld [vmem:[#allocation2 + $0x590] sm:$0x3] }
 0x387   : > { %16333 = vmatmul.mubr.bf16.gmra.mxu1 %v23136_v35  ;;  %v21951_v49 = vadd.f32 %v9484_v47, %v9043_v10  ;;  %v9048_v31 = vadd.f32 %v16046_v55, %v21475_v11  ;;  %16384 = vmatprep.mubr.bf16.mxu0 %v14572_v54  ;;  %v11619_v15 = vrot.slane %v14451_v20, 5  ;;  %v12143_v48 = vsel %vm17113_vm2, %v12141_v3, %v12142_v33  ;;  %v23138_v33 = vld [vmem:[#allocation66_spill] sm:$0xff] }
 0x388   : > { %16336 = vmatprep.mubr.bf16.mxu1 %v14484_v21  ;;  %v8967_v27 = vpop.f32.mrf.mxu1  ;;  %v9497_v8 = vpop.f32.mrf.mxu0  ;;  %v11618_v12 = vrot.slane %v11616_v43, 4  ;;  %v14559_v26 = vrot.slane %v14537_v16, 10  ;;  %v12153_v1 = vrot.slane %v21941_v62, 6  ;;  %v12148_v21 = vrot.slane %v12146_v13, 4 }
 0x389   : > { %v21959_v53 = vadd.f32 %v16094_v14, %v9048_v31  ;;  %v9046_v11 = vadd.f32 %v8967_v27, %v21488_v4  ;;  %v12149_v54 = vrot.slane %v14539_v36, 6  ;;  %v14486_v20 = vcombine.low %v21938_v58, %v11613_v60  ;;  %v14456_v4 = vld [vmem:[#allocation2 + $0x5a0] sm:$0xf]  ;;  %v14544_v60 = vld [vmem:[#allocation2 + $0x5a8] sm:$0xf] }
 0x38a   : > { %v16047_v59 = vpop.f32.mrf.mxu1  ;;  %v16095_v47 = vpop.f32.mrf.mxu0  ;;  %v14472_v10 = vrot.slane %v14452_v34, 9  ;;  %v11625_v55 = vrot.slane %v11623_v44, 4  ;;  %v11626_v35 = vrot.slane %v14454_v46, 5  ;;  %v14574_v62 = vcombine.low %v12140_v29, %v12143_v48  ;;  %v23139_v46 = vld [vmem:[#allocation43_spill] sm:$0xff] }
 0x38b   : > { %23137 = vst [vmem:[#allocation26_spill] sm:$0xff] %v21959_v53  ;;  %v21963_v3 = vadd.f32 %v9497_v8, %v9046_v11  ;;  %v9049_v16 = vadd.f32 %v16047_v59, %v23138_v33  ;;  %v11617_v14 = vsel %vm17212_vm5, %v14471_v19, %v11616_v43  ;;  %v11620_v27 = vsel %vm17212_vm5, %v11618_v12, %v11619_v15 }
 0x38c   : > { %v8970_v31 = vpop.f32.mrf.mxu1  ;;  %v9500_v36 = vpop.f32.mrf.mxu0  ;;  %v14560_v45 = vrot.slane %v14540_v30, 10  ;;  %v12155_v53 = vrot.slane %v12153_v1, 4  ;;  %v12156_v58 = vrot.slane %v14542_v24, 6  ;;  %v12147_v29 = vsel %vm17113_vm2, %v14559_v26, %v12146_v13  ;;  %v14455_v30 = vld [vmem:[#allocation2 + $0x59c] sm:$0xe]  ;;  %v23141_v26 = vld [vmem:[#allocation60_spill] sm:$0xff] }
 0x38d   : > { %v21970_v34 = vadd.f32 %v16095_v47, %v9049_v16  ;;  %v9047_v8 = vadd.f32 %v8970_v31, %v23139_v46  ;;  %v12150_v43 = vsel %vm17113_vm2, %v12148_v21, %v12149_v54  ;;  %v23140_v11 = vcombine.low %v21902_v61, %v21910_v17  ;;  %v14457_v24 = vld [vmem:[#allocation2 + $0x5a4] sm:$0x1]  ;;  %v14543_v54 = vld [vmem:[#allocation2 + $0x5a4] sm:$0xc]  ;;  %v14545_v47 = vld [vmem:[#allocation2 + $0x5ac] sm:$0x3] }
 0x38e   : > { %v16050_v19 = vpop.f32.mrf.mxu1  ;;  %v16098_v48 = vpop.f32.mrf.mxu0  ;;  %16385 = vmatmul.mubr.bf16.gmra.mxu0 %v14573_v7  ;;  %v11624_v15 = vsel %vm17212_vm5, %v14472_v10, %v11623_v44  ;;  %v11627_v12 = vsel %vm17212_vm5, %v11625_v55, %v11626_v35  ;;  %v11630_v59 = vrot.slane %v14456_v4, 5  ;;  %v12160_v61 = vrot.slane %v14544_v60, 6 }
 0x38f   : > { %16337 = vmatmul.mubr.bf16.gmra.mxu1 %v23140_v11  ;;  %v21984_v13 = vadd.f32 %v9500_v36, %v9047_v8  ;;  %v9052_v21 = vadd.f32 %v16050_v19, %v23141_v26  ;;  %16388 = vmatprep.mubr.bf16.mxu0 %v14574_v62  ;;  %v14487_v33 = vcombine.low %v11617_v14, %v11620_v27  ;;  %v11633_v60 = vrot.slane %v14457_v24, 5  ;;  %v23142_v27 = vld [vmem:[#allocation61_spill] sm:$0xff] }
 0x390   : > { %16340 = vmatprep.mubr.bf16.mxu1 %v14486_v20  ;;  %v8983_v17 = vpop.f32.mrf.mxu1  ;;  %v9513_v7 = vpop.f32.mrf.mxu0  ;;  %v14575_v16 = vcombine.low %v12147_v29, %v12150_v43  ;;  %v12154_v44 = vsel %vm17113_vm2, %v14560_v45, %v12153_v1  ;;  %v12157_v10 = vsel %vm17113_vm2, %v12155_v53, %v12156_v58  ;;  %v14488_v4 = vcombine.low %v11624_v15, %v11627_v12  ;;  %v23143_v19 = vld [vmem:[#allocation69_spill] sm:$0xff] }
 0x391   : > { %v21991_v55 = vadd.f32 %v16098_v48, %v9052_v21  ;;  %v9050_v35 = vadd.f32 %v8983_v17, %v21534_v25  ;;  %v14473_v20 = vrot.slane %v14455_v30, 9  ;;  %v11632_v36 = vrot.slane %v11630_v59, 4  ;;  %v23144_v26 = vld [vmem:[#allocation49_spill] sm:$0xff] }
 0x392   : > { %v16051_v62 = vpop.f32.mrf.mxu1  ;;  %v16099_v31 = vpop.f32.mrf.mxu0  ;;  %v14561_v46 = vrot.slane %v14543_v54, 10  ;;  %v12163_v8 = vrot.slane %v14545_v47, 6  ;;  %v14576_v45 = vcombine.low %v12154_v44, %v12157_v10  ;;  %v12162_v1 = vrot.slane %v12160_v61, 4 }
 0x393   : > { %v21994_v14 = vadd.f32 %v9513_v7, %v9050_v35  ;;  %v9053_v29 = vadd.f32 %v16051_v62, %v23142_v27  ;;  %v11631_v15 = vsel %vm17212_vm5, %v14473_v20, %v11630_v59  ;;  %v11634_v12 = vsel %vm17212_vm5, %v11632_v36, %v11633_v60 }
 0x394   : > { %v8986_v43 = vpop.f32.mrf.mxu1  ;;  %v9516_v53 = vpop.f32.mrf.mxu0  ;;  %v12161_v30 = vsel %vm17113_vm2, %v14561_v46, %v12160_v61  ;;  %v12164_v54 = vsel %vm17113_vm2, %v12162_v1, %v12163_v8 }
 0x395   : > { %v21997_v58 = vadd.f32 %v16099_v31, %v9053_v29  ;;  %v9051_v25 = vadd.f32 %v8986_v43, %v23143_v19  ;;  %v14577_v44 = vcombine.low %v12161_v30, %v12164_v54 }
 0x396   : > { %v16054_v48 = vpop.f32.mrf.mxu1  ;;  %v16102_v11 = vpop.f32.mrf.mxu0  ;;  %16389 = vmatmul.mubr.bf16.gmra.mxu0 %v14575_v16  ;;  %v14489_v16 = vcombine.low %v11631_v15, %v11634_v12 }
 0x397   : > { %16341 = vmatmul.mubr.bf16.gmra.mxu1 %v14487_v33  ;;  %v22006_v24 = vadd.f32 %v9516_v53, %v9051_v25  ;;  %v9056_v21 = vadd.f32 %v16054_v48, %v23144_v26  ;;  %16392 = vmatprep.mubr.bf16.mxu0 %v14576_v45 }
 0x398   : > { %16344 = vmatprep.mubr.bf16.mxu1 %v14488_v4  ;;  %v8999_v47 = vpop.f32.mrf.mxu1  ;;  %v9529_v17 = vpop.f32.mrf.mxu0 }
 0x399   : > { %v22011_v7 = vadd.f32 %v16102_v11, %v9056_v21  ;;  %v9054_v59 = vadd.f32 %v8999_v47, %v21608_v41 }
 0x39a   : > { %v16055_v5 = vpop.f32.mrf.mxu1  ;;  %v16103_v33 = vpop.f32.mrf.mxu0 }
 0x39b   : > { %v22014_v61 = vadd.f32 %v9529_v17, %v9054_v59  ;;  %v9057_v10 = vadd.f32 %v16055_v5, %v21617_v2 }
 0x39c   : > { %v9002_v35 = vpop.f32.mrf.mxu1  ;;  %v9532_v4 = vpop.f32.mrf.mxu0 }
 0x39d   : > { %v22017_v20 = vadd.f32 %v16103_v33, %v9057_v10  ;;  %v9055_v6 = vadd.f32 %v9002_v35, %v21628_v63 }
 0x39e   : > { %v16058_v62 = vpop.f32.mrf.mxu1  ;;  %v16106_v31 = vpop.f32.mrf.mxu0  ;;  %16393 = vmatmul.mubr.bf16.gmra.mxu0 %v14577_v44 }
 0x39f   : > { %16345 = vmatmul.mubr.bf16.gmra.mxu1 %v14489_v16  ;;  %v22020_v36 = vadd.f32 %v9532_v4, %v9055_v6  ;;  %v9060_v41 = vadd.f32 %v16058_v62, %v21654_v50 }
 0x3a0   : > { %v9015_v60 = vpop.f32.mrf.mxu1  ;;  %v9545_v46 = vpop.f32.mrf.mxu0 }
 0x3a1   : > { %v22023_v8 = vadd.f32 %v16106_v31, %v9060_v41  ;;  %v9058_v2 = vadd.f32 %v9015_v60, %v21665_v22 }
 0x3a2   : > { %v16059_v27 = vpop.f32.mrf.mxu1  ;;  %v16107_v29 = vpop.f32.mrf.mxu0 }
 0x3a3   : > { %v22026_v45 = vadd.f32 %v9545_v46, %v9058_v2  ;;  %v9061_v63 = vadd.f32 %v16059_v27, %v21676_v18  ;;  %v23145_v27 = vld [vmem:[#allocation46_spill] sm:$0xff] }
 0x3a4   : > { %v9018_v1 = vpop.f32.mrf.mxu1  ;;  %v9548_v43 = vpop.f32.mrf.mxu0 }
 0x3a5   : > { %v22029_v53 = vadd.f32 %v16107_v29, %v9061_v63  ;;  %v9059_v19 = vadd.f32 %v9018_v1, %v21699_v42 }
 0x3a6   : > { %v16126_v25 = vpop.f32.mrf.mxu1  ;;  %v16174_v50 = vpop.f32.mrf.mxu0 }
 0x3a7   : > { %v22032_v48 = vadd.f32 %v9548_v43, %v9059_v19  ;;  %v10092_v11 = vadd.f32 %v16126_v25, %v21722_v9  ;;  %v23146_v43 = vld [vmem:[#allocation24_spill] sm:$0xff] }
 0x3a8   : > { %v9963_v15 = vpop.f32.mrf.mxu1  ;;  %v10349_v22 = vpop.f32.mrf.mxu0 }
 0x3a9   : > { %v22035_v12 = vadd.f32 %v16174_v50, %v10092_v11  ;;  %v10090_v30 = vadd.f32 %v9963_v15, %v21732_v39 }
 0x3aa   : > { %v16127_v26 = vpop.f32.mrf.mxu1  ;;  %v16175_v18 = vpop.f32.mrf.mxu0 }
 0x3ab   : > { %v22038_v21 = vadd.f32 %v10349_v22, %v10090_v30  ;;  %v10093_v54 = vadd.f32 %v16127_v26, %v21743_v56 }
 0x3ac   : > { %v9966_v47 = vpop.f32.mrf.mxu1  ;;  %v10352_v42 = vpop.f32.mrf.mxu0 }
 0x3ad   : > { %v22041_v17 = vadd.f32 %v16175_v18, %v10093_v54  ;;  %v10091_v59 = vadd.f32 %v9966_v47, %v21759_v38 }
 0x3ae   : > { %v16130_v5 = vpop.f32.mrf.mxu1  ;;  %v16178_v9 = vpop.f32.mrf.mxu0 }
 0x3af   : > { %v22044_v33 = vadd.f32 %v10352_v42, %v10091_v59  ;;  %v10096_v16 = vadd.f32 %v16130_v5, %v21784_v23 }
 0x3b0   : > { %v9979_v44 = vpop.f32.mrf.mxu1  ;;  %v10365_v39 = vpop.f32.mrf.mxu0 }
 0x3b1   : > { %v22047_v10 = vadd.f32 %v16178_v9, %v10096_v16  ;;  %v10094_v35 = vadd.f32 %v9979_v44, %v21799_v57 }
 0x3b2   : > { %v16131_v4 = vpop.f32.mrf.mxu1  ;;  %v16179_v56 = vpop.f32.mrf.mxu0 }
 0x3b3   : > { %v22050_v6 = vadd.f32 %v10365_v39, %v10094_v35  ;;  %v10097_v62 = vadd.f32 %v16131_v4, %v21810_v37 }
 0x3b4   : > { %v9982_v31 = vpop.f32.mrf.mxu1  ;;  %v10368_v38 = vpop.f32.mrf.mxu0 }
 0x3b5   : > { %v22053_v41 = vadd.f32 %v16179_v56, %v10097_v62  ;;  %v10095_v60 = vadd.f32 %v9982_v31, %v21834_v28 }
 0x3b6   : > { %v16134_v46 = vpop.f32.mrf.mxu1  ;;  %v16182_v23 = vpop.f32.mrf.mxu0 }
 0x3b7   : > { %v22056_v2 = vadd.f32 %v10368_v38, %v10095_v60  ;;  %v10100_v29 = vadd.f32 %v16134_v46, %v23145_v27  ;;  %v23147_v38 = vld [vmem:[#allocation26_spill] sm:$0xff] }
 0x3b8   : > { %v9995_v63 = vpop.f32.mrf.mxu1  ;;  %v10381_v57 = vpop.f32.mrf.mxu0 }
 0x3b9   : > { %v22059_v1 = vadd.f32 %v16182_v23, %v10100_v29  ;;  %v10098_v19 = vadd.f32 %v9995_v63, %v23146_v43 }
 0x3ba   : > { %v16135_v25 = vpop.f32.mrf.mxu1  ;;  %v16183_v37 = vpop.f32.mrf.mxu0 }
 0x3bb   : > { %v22062_v50 = vadd.f32 %v10381_v57, %v10098_v19  ;;  %v10101_v11 = vadd.f32 %v16135_v25, %v21872_v0 }
 0x3bc   : > { %v9998_v15 = vpop.f32.mrf.mxu1  ;;  %v10384_v28 = vpop.f32.mrf.mxu0 }
 0x3bd   : > { %v22065_v22 = vadd.f32 %v16183_v37, %v10101_v11  ;;  %v10099_v30 = vadd.f32 %v9998_v15, %v21890_v40 }
 0x3be   : > { %v16138_v26 = vpop.f32.mrf.mxu1  ;;  %v16186_v18 = vpop.f32.mrf.mxu0 }
 0x3bf   : > { %v22068_v54 = vadd.f32 %v10384_v28, %v10099_v30  ;;  %v10104_v47 = vadd.f32 %v16138_v26, %v21905_v32 }
 0x3c0   : > { %v10011_v42 = vpop.f32.mrf.mxu1  ;;  %v10397_v59 = vpop.f32.mrf.mxu0 }
 0x3c1   : > { %v22071_v5 = vadd.f32 %v16186_v18, %v10104_v47  ;;  %v10102_v9 = vadd.f32 %v10011_v42, %v21921_v51 }
 0x3c2   : > { %v16139_v16 = vpop.f32.mrf.mxu1  ;;  %v16187_v0 = vpop.f32.mrf.mxu0 }
 0x3c3   : > { %v22074_v44 = vadd.f32 %v10397_v59, %v10102_v9  ;;  %v10105_v39 = vadd.f32 %v16139_v16, %v21933_v52 }
 0x3c4   : > { %v10014_v35 = vpop.f32.mrf.mxu1  ;;  %v10400_v40 = vpop.f32.mrf.mxu0 }
 0x3c5   : > { %v22077_v4 = vadd.f32 %v16187_v0, %v10105_v39  ;;  %v10103_v56 = vadd.f32 %v10014_v35, %v21951_v49 }
 0x3c6   : > { %v16142_v62 = vpop.f32.mrf.mxu1  ;;  %v16190_v32 = vpop.f32.mrf.mxu0 }
 0x3c7   : > { %v22080_v31 = vadd.f32 %v10400_v40, %v10103_v56  ;;  %v10108_v60 = vadd.f32 %v16142_v62, %v23147_v38 }
 0x3c8   : > { %v10027_v46 = vpop.f32.mrf.mxu1  ;;  %v10413_v51 = vpop.f32.mrf.mxu0 }
 0x3c9   : > { %v22083_v23 = vadd.f32 %v16190_v32, %v10108_v60  ;;  %v10106_v27 = vadd.f32 %v10027_v46, %v21963_v3 }
 0x3ca   : > { %v16143_v29 = vpop.f32.mrf.mxu1  ;;  %v16191_v52 = vpop.f32.mrf.mxu0 }
 0x3cb   : > { %v22086_v63 = vadd.f32 %v10413_v51, %v10106_v27  ;;  %v10109_v57 = vadd.f32 %v16143_v29, %v21970_v34 }
 0x3cc   : > { %v10030_v43 = vpop.f32.mrf.mxu1  ;;  %v10416_v49 = vpop.f32.mrf.mxu0 }
 0x3cd   : > { %v22089_v19 = vadd.f32 %v16191_v52, %v10109_v57  ;;  %v10107_v25 = vadd.f32 %v10030_v43, %v21984_v13 }
 0x3ce   : > { %v16146_v37 = vpop.f32.mrf.mxu1  ;;  %v16194_v11 = vpop.f32.mrf.mxu0 }
 0x3cf   : > { %23148 = vst [vmem:[#allocation29_spill] sm:$0xff] %v22089_v19  ;;  %v22092_v15 = vadd.f32 %v10416_v49, %v10107_v25  ;;  %v10112_v28 = vadd.f32 %v16146_v37, %v21991_v55 }
 0x3d0   : > { %v10043_v30 = vpop.f32.mrf.mxu1  ;;  %v10429_v3 = vpop.f32.mrf.mxu0 }
 0x3d1   : > { %23149 = vst [vmem:[#allocation63_spill] sm:$0xff] %v22092_v15  ;;  %v22095_v26 = vadd.f32 %v16194_v11, %v10112_v28  ;;  %v10110_v18 = vadd.f32 %v10043_v30, %v21994_v14 }
 0x3d2   : > { %v16147_v47 = vpop.f32.mrf.mxu1  ;;  %v16195_v34 = vpop.f32.mrf.mxu0 }
 0x3d3   : > { %23150 = vst [vmem:[#allocation33_spill] sm:$0xff] %v22095_v26  ;;  %v22098_v42 = vadd.f32 %v10429_v3, %v10110_v18  ;;  %v10113_v59 = vadd.f32 %v16147_v47, %v21997_v58 }
 0x3d4   : > { %v10046_v9 = vpop.f32.mrf.mxu1  ;;  %v10432_v13 = vpop.f32.mrf.mxu0 }
 0x3d5   : > { %23151 = vst [vmem:[#allocation62_spill] sm:$0xff] %v22098_v42  ;;  %v22101_v16 = vadd.f32 %v16195_v34, %v10113_v59  ;;  %v10111_v0 = vadd.f32 %v10046_v9, %v22006_v24 }
 0x3d6   : > { %v16150_v39 = vpop.f32.mrf.mxu1  ;;  %v16198_v55 = vpop.f32.mrf.mxu0 }
 0x3d7   : > { %23152 = vst [vmem:[#allocation67_spill] sm:$0xff] %v22101_v16  ;;  %v22104_v35 = vadd.f32 %v10432_v13, %v10111_v0  ;;  %v10116_v40 = vadd.f32 %v16150_v39, %v22011_v7 }
 0x3d8   : > { %v10059_v56 = vpop.f32.mrf.mxu1  ;;  %v10445_v14 = vpop.f32.mrf.mxu0 }
 0x3d9   : > { %23153 = vst [vmem:[#allocation52_spill] sm:$0xff] %v22104_v35  ;;  %v22107_v62 = vadd.f32 %v16198_v55, %v10116_v40  ;;  %v10114_v32 = vadd.f32 %v10059_v56, %v22014_v61 }
 0x3da   : > { %v16151_v38 = vpop.f32.mrf.mxu1  ;;  %v16199_v58 = vpop.f32.mrf.mxu0 }
 0x3db   : > { %23154 = vst [vmem:[#allocation54_spill] sm:$0xff] %v22107_v62  ;;  %v22110_v60 = vadd.f32 %v10445_v14, %v10114_v32  ;;  %v10117_v46 = vadd.f32 %v16151_v38, %v22017_v20 }
 0x3dc   : > { %v10062_v51 = vpop.f32.mrf.mxu1  ;;  %v10448_v24 = vpop.f32.mrf.mxu0 }
 0x3dd   : > { %23155 = vst [vmem:[#allocation70_spill] sm:$0xff] %v22110_v60  ;;  %v22113_v27 = vadd.f32 %v16199_v58, %v10117_v46  ;;  %v10115_v29 = vadd.f32 %v10062_v51, %v22020_v36 }
 0x3de   : > { %v16154_v52 = vpop.f32.mrf.mxu1  ;;  %v16202_v7 = vpop.f32.mrf.mxu0 }
 0x3df   : > { %23156 = vst [vmem:[#allocation71_spill] sm:$0xff] %v22113_v27  ;;  %v22116_v57 = vadd.f32 %v10448_v24, %v10115_v29  ;;  %v10120_v43 = vadd.f32 %v16154_v52, %v22023_v8 }
 0x3e0   : > { %v10075_v49 = vpop.f32.mrf.mxu1  ;;  %v10461_v61 = vpop.f32.mrf.mxu0 }
 0x3e1   : > { %23157 = vst [vmem:[#allocation59_spill] sm:$0xff] %v22116_v57  ;;  %v22119_v25 = vadd.f32 %v16202_v7, %v10120_v43  ;;  %v10118_v37 = vadd.f32 %v10075_v49, %v22026_v45 }
 0x3e2   : > { %v16155_v11 = vpop.f32.mrf.mxu1  ;;  %v16203_v20 = vpop.f32.mrf.mxu0 }
 0x3e3   : > { %23158 = vst [vmem:[#allocation25_spill] sm:$0xff] %v22119_v25  ;;  %v22122_v28 = vadd.f32 %v10461_v61, %v10118_v37  ;;  %v10121_v30 = vadd.f32 %v16155_v11, %v22029_v53 }
 0x3e4   : > { %v10078_v3 = vpop.f32.mrf.mxu1  ;;  %v10464_v36 = vpop.f32.mrf.mxu0 }
 0x3e5   : > { %23159 = vst [vmem:[#allocation40_spill] sm:$0xff] %v22122_v28  ;;  %v22125_v18 = vadd.f32 %v16203_v20, %v10121_v30  ;;  %v10119_v47 = vadd.f32 %v10078_v3, %v22032_v48 }
 0x3e6   : > { %v16222_v34 = vpop.f32.mrf.mxu1  ;;  %v22128_v8 = vpop.f32.mrf.mxu0 }
 0x3e7   : > { %23160 = vst [vmem:[#allocation76_spill] sm:$0xff] %v22125_v18  ;;  %v22130_v59 = vadd.f32 %v10464_v36, %v10119_v47 }
 0x3e8   : > { %v10879_v9 = vpop.f32.mrf.mxu1  ;;  %v22132_v13 = vpop.f32.mrf.mxu0 }
 0x3e9   : > { %23161 = vst [vmem:[#allocation28_spill] sm:$0xff] %v22130_v59 }
 0x3ea   : > { %v22134_v45 = vpop.f32.mrf.mxu1  ;;  %v22136_v0 = vpop.f32.mrf.mxu0 }
 0x3ec   : > { %v22138_v39 = vpop.f32.mrf.mxu1  ;;  %v22140_v53 = vpop.f32.mrf.mxu0 }
 0x3ee   : > { %v22142_v55 = vpop.f32.mrf.mxu1  ;;  %v22144_v40 = vpop.f32.mrf.mxu0 }
 0x3f0   : > { %v22146_v48 = vpop.f32.mrf.mxu1  ;;  %v22148_v56 = vpop.f32.mrf.mxu0 }
 0x3f2   : > { %v22150_v14 = vpop.f32.mrf.mxu1  ;;  %v22152_v32 = vpop.f32.mrf.mxu0 }
 0x3f4   : > { %v22154_v38 = vpop.f32.mrf.mxu1  ;;  %v22156_v58 = vpop.f32.mrf.mxu0 }
 0x3f6   : > { %v22158_v46 = vpop.f32.mrf.mxu1  ;;  %v22160_v51 = vpop.f32.mrf.mxu0 }
 0x3f8   : > { %v22162_v24 = vpop.f32.mrf.mxu1  ;;  %v22164_v29 = vpop.f32.mrf.mxu0 }
 0x3fa   : > { %v22166_v52 = vpop.f32.mrf.mxu1  ;;  %v22168_v7 = vpop.f32.mrf.mxu0 }
 0x3fc   : > { %v22170_v43 = vpop.f32.mrf.mxu1  ;;  %v22172_v49 = vpop.f32.mrf.mxu0 }
 0x3fe   : > { %v22174_v61 = vpop.f32.mrf.mxu1  ;;  %v22176_v37 = vpop.f32.mrf.mxu0 }
 0x400   : > { %v22178_v11 = vpop.f32.mrf.mxu1  ;;  %v22180_v20 = vpop.f32.mrf.mxu0 }
 0x402   : > { %v22182_v30 = vpop.f32.mrf.mxu1  ;;  %v22184_v3 = vpop.f32.mrf.mxu0 }
 0x404   : > { %v22186_v36 = vpop.f32.mrf.mxu1  ;;  %v22188_v47 = vpop.f32.mrf.mxu0 }
 0x406   : > { %v22190_v59 = vpop.f32.mrf.mxu1  ;;  %v22192_v18 = vpop.f32.mrf.mxu0 }
 0x408   : > { %v22194_v28 = vpop.f32.mrf.mxu1  ;;  %v22196_v25 = vpop.f32.mrf.mxu0 }
 0x409   : > { %23162 = vst [vmem:[#allocation34_spill] sm:$0xff] %v22196_v25 }
 0x40a   : > { %v22198_v57 = vpop.f32.mrf.mxu1  ;;  %v22200_v27 = vpop.f32.mrf.mxu0 }
 0x40b   : > { %23163 = vst [vmem:[#allocation30_spill] sm:$0xff] %v22198_v57  ;;  %23164 = vst [vmem:[#allocation38_spill] sm:$0xff] %v22200_v27 }
 0x40c   : > { %v22202_v60 = vpop.f32.mrf.mxu1  ;;  %v22204_v62 = vpop.f32.mrf.mxu0 }
 0x40d   : > { %23165 = vst [vmem:[#allocation58_spill] sm:$0xff] %v22202_v60  ;;  %23166 = vst [vmem:[#allocation64_spill] sm:$0xff] %v22204_v62 }
 0x40e   : > { %v22206_v35 = vpop.f32.mrf.mxu1  ;;  %v22208_v16 = vpop.f32.mrf.mxu0 }
 0x40f   : > { %23167 = vst [vmem:[#allocation65_spill] sm:$0xff] %v22206_v35  ;;  %23168 = vst [vmem:[#allocation68_spill] sm:$0xff] %v22208_v16 }
 0x410   : > { %v22210_v42 = vpop.f32.mrf.mxu1  ;;  %v22212_v26 = vpop.f32.mrf.mxu0 }
 0x411   : > { %23169 = vst [vmem:[#allocation32_spill] sm:$0xff] %v22210_v42  ;;  %23170 = vst [vmem:[#allocation75_spill] sm:$0xff] %v22212_v26 }
 0x412   : > { %v22214_v15 = vpop.f32.mrf.mxu1  ;;  %v22216_v19 = vpop.f32.mrf.mxu0 }
 0x413   : > { %23171 = vst [vmem:[#allocation72_spill] sm:$0xff] %v22214_v15  ;;  %23172 = vst [vmem:[#allocation73_spill] sm:$0xff] %v22216_v19 }
 0x414   : > { %v22218_v25 = vpop.f32.mrf.mxu1  ;;  %v22220_v57 = vpop.f32.mrf.mxu0 }
 0x415   : > { %23173 = vst [vmem:[#allocation74_spill] sm:$0xff] %v22218_v25  ;;  %23174 = vst [vmem:[#allocation22_spill] sm:$0xff] %v22220_v57 }
 0x416   : > { %v22222_v27 = vpop.f32.mrf.mxu1  ;;  %v22224_v60 = vpop.f32.mrf.mxu0 }
 0x417   : > { %23175 = vst [vmem:[#allocation47_spill] sm:$0xff] %v22222_v27  ;;  %23176 = vst [vmem:[#allocation35_spill] sm:$0xff] %v22224_v60 }
 0x418   : > { %v22226_v62 = vpop.f32.mrf.mxu1  ;;  %v22228_v35 = vpop.f32.mrf.mxu0 }
 0x419   : > { %23177 = vst [vmem:[#allocation44_spill] sm:$0xff] %v22226_v62  ;;  %23178 = vst [vmem:[#allocation55_spill] sm:$0xff] %v22228_v35  ;;  %v11008_v62 = vadd.f32 %v16222_v34, %v22035_v12  ;;  %v11007_v12 = vadd.f32 %v22138_v39, %v22044_v33 }
 0x41a   : > { %v22230_v16 = vpop.f32.mrf.mxu1  ;;  %v22232_v42 = vpop.f32.mrf.mxu0 }
 0x41b   : > { %23179 = vst [vmem:[#allocation23_spill] sm:$0xff] %v22230_v16  ;;  %23180 = vst [vmem:[#allocation56_spill] sm:$0xff] %v22232_v42  ;;  %v11006_v42 = vadd.f32 %v10879_v9, %v22038_v21  ;;  %v11012_v21 = vadd.f32 %v22142_v55, %v22047_v10  ;;  %v22265_v9 = vld [vmem:[%s12487_s29] ss:$0 sm:$0xff]  ;;  %v11396_v33 = vadd.f32 %v22140_v53, %v11007_v12 }
 0x41c   : > { %v22234_v26 = vpop.f32.mrf.mxu1  ;;  %v22236_v15 = vpop.f32.mrf.mxu0  ;;  %v11013_v55 = vadd.f32 %v22150_v14, %v22053_v41 }
 0x41d   : > { %23181 = vst [vmem:[#allocation45_spill] sm:$0xff] %v22234_v26  ;;  %23182 = vst [vmem:[#allocation20_spill] sm:$0xff] %v22236_v15  ;;  %v11401_v39 = vadd.f32 %v22144_v40, %v11012_v21 }
 0x41e   : > { %v22238_v19 = vpop.f32.mrf.mxu1  ;;  %v22240_v25 = vpop.f32.mrf.mxu0  ;;  %v11402_v21 = vadd.f32 %v22152_v32, %v11013_v55 }
 0x41f   : > { %23183 = vst [vmem:[#allocation41_spill] sm:$0xff] %v22238_v19  ;;  %23184 = vst [vmem:[#allocation42_spill] sm:$0xff] %v22240_v25  ;;  %v11397_v19 = vadd.f32 %v22128_v8, %v11008_v62  ;;  %v11009_v25 = vadd.f32 %v22134_v45, %v22041_v17  ;;  %v11010_v45 = vadd.f32 %v22146_v48, %v22050_v6 }
 0x420   : > { %v22242_v57 = vpop.f32.mrf.mxu1  ;;  %v22244_v60 = vpop.f32.mrf.mxu0  ;;  %v11011_v48 = vadd.f32 %v22154_v38, %v22056_v2 }
 0x421   : > { %23185 = vst [vmem:[#allocation27_spill] sm:$0xff] %v22242_v57  ;;  %23186 = vst [vmem:[#allocation57_spill] sm:$0xff] %v22244_v60  ;;  %v11395_v60 = vadd.f32 %v22132_v13, %v11006_v42  ;;  %v11398_v62 = vadd.f32 %v22136_v0, %v11009_v25  ;;  %v11399_v53 = vadd.f32 %v22148_v56, %v11010_v45 }
 0x422   : > { %v22247_v35 = vpop.f32.mrf.mxu1  ;;  %v22249_v16 = vpop.f32.mrf.mxu0 }
 0x423   : > { %23187 = vst [vmem:[#allocation48_spill] sm:$0xff] %v22249_v16 }
 0x424   : > { %v22252_v26 = vpop.f32.mrf.mxu1  ;;  %v22254_v15 = vpop.f32.mrf.mxu0 }
 0x425   : > { %23188 = vst [vmem:[#allocation21_spill] sm:$0xff] %v22254_v15 }
 0x426   : > { %v16318_v57 = vpop.f32.mrf.mxu1  ;;  %v16366_v27 = vpop.f32.mrf.mxu0 }
 0x427   : > { %v11927_v34 = vadd.f32 %v16318_v57, %v11397_v19 }
 0x428   : > { %v11798_v15 = vpop.f32.mrf.mxu1  ;;  %v12328_v16 = vpop.f32.mrf.mxu0 }
 0x429   : > { %v12457_v8 = vadd.f32 %v16366_v27, %v11927_v34  ;;  %v11925_v17 = vadd.f32 %v11798_v15, %v11395_v60 }
 0x42a   : > { %v16319_v42 = vpop.f32.mrf.mxu1  ;;  %v16367_v13 = vpop.f32.mrf.mxu0 }
 0x42b   : > { %v12497_v19 = vadd.f32 %v22265_v9, %v12457_v8  ;;  %v12455_v10 = vadd.f32 %v12328_v16, %v11925_v17  ;;  %v11928_v57 = vadd.f32 %v16319_v42, %v11398_v62  ;;  %v11016_v62 = vadd.f32 %v22158_v46, %v22059_v1 }
 0x42c   : > { %v11801_v25 = vpop.f32.mrf.mxu1  ;;  %v12331_v27 = vpop.f32.mrf.mxu0  ;;  %v11400_v42 = vadd.f32 %v22156_v58, %v11011_v48 }
 0x42d   : > { %v12529_v15 = vmax.f32 %v12497_v19, 0.0  ;;  %v12495_v60 = vadd.f32 %v22265_v9, %v12455_v10  ;;  %v12458_v6 = vadd.f32 %v16367_v13, %v11928_v57  ;;  %v11926_v0 = vadd.f32 %v11801_v25, %v11396_v33 }
 0x42e   : > { %v16322_v16 = vpop.f32.mrf.mxu1  ;;  %v16370_v12 = vpop.f32.mrf.mxu0  ;;  %v11014_v13 = vadd.f32 %v22162_v24, %v22062_v50  ;;  %v11405_v57 = vadd.f32 %v22160_v51, %v11016_v62 }
 0x42f   : > { %12561 = vst [vmem:[%s17111_s23 + $0x10] sm:$0xff] %v12529_v15  ;;  %v12527_v40 = vmax.f32 %v12495_v60, 0.0  ;;  %v12498_v34 = vadd.f32 %v22265_v9, %v12458_v6  ;;  %v12456_v41 = vadd.f32 %v12331_v27, %v11926_v0  ;;  %v11931_v14 = vadd.f32 %v16322_v16, %v11401_v39 }
 0x430   : > { %v11814_v8 = vpop.f32.mrf.mxu1  ;;  %v12344_v17 = vpop.f32.mrf.mxu0  ;;  %v11017_v39 = vadd.f32 %v22166_v52, %v22065_v22  ;;  %v11403_v15 = vadd.f32 %v22164_v29, %v11014_v13  ;;  %v11015_v60 = vadd.f32 %v22170_v43, %v22068_v54  ;;  %v11020_v16 = vadd.f32 %v22174_v61, %v22071_v5 }
 0x431   : > { %12559 = vst [vmem:[%s17111_s23] sm:$0xff] %v12527_v40  ;;  %v12530_v56 = vmax.f32 %v12498_v34, 0.0  ;;  %v12496_v2 = vadd.f32 %v22265_v9, %v12456_v41  ;;  %v12461_v38 = vadd.f32 %v16370_v12, %v11931_v14  ;;  %v11929_v45 = vadd.f32 %v11814_v8, %v11399_v53 }
 0x432   : > { %v16323_v33 = vpop.f32.mrf.mxu1  ;;  %v16371_v19 = vpop.f32.mrf.mxu0  ;;  %v11406_v48 = vadd.f32 %v22168_v7, %v11017_v39  ;;  %v11404_v41 = vadd.f32 %v22172_v49, %v11015_v60  ;;  %v11018_v14 = vadd.f32 %v22178_v11, %v22074_v44  ;;  %v11019_v13 = vadd.f32 %v22186_v36, %v22080_v31  ;;  %v23190_v60 = vld [vmem:[#allocation30_spill] sm:$0xff] }
 0x433   : > { %12562 = vst [vmem:[%s17111_s23 + $0x18] sm:$0xff] %v12530_v56  ;;  %v12528_v32 = vmax.f32 %v12496_v2, 0.0  ;;  %v12501_v1 = vadd.f32 %v22265_v9, %v12461_v38  ;;  %v12459_v46 = vadd.f32 %v12344_v17, %v11929_v45  ;;  %v11932_v10 = vadd.f32 %v16323_v33, %v11402_v21 }
 0x434   : > { %v11817_v55 = vpop.f32.mrf.mxu1  ;;  %v12347_v25 = vpop.f32.mrf.mxu0  ;;  %v11409_v17 = vadd.f32 %v22176_v37, %v11020_v16  ;;  %v11021_v56 = vadd.f32 %v22182_v30, %v22077_v4  ;;  %v23193_v16 = vld [vmem:[#allocation58_spill] sm:$0xff] }
 0x435   : > { %12560 = vst [vmem:[%s17111_s23 + $0x8] sm:$0xff] %v12528_v32  ;;  %v12533_v58 = vmax.f32 %v12501_v1, 0.0  ;;  %v12499_v50 = vadd.f32 %v22265_v9, %v12459_v46  ;;  %v12462_v24 = vadd.f32 %v16371_v19, %v11932_v10  ;;  %v11930_v27 = vadd.f32 %v11817_v55, %v11400_v42 }
 0x436   : > { %v16326_v6 = vpop.f32.mrf.mxu1  ;;  %v16374_v0 = vpop.f32.mrf.mxu0  ;;  %v11407_v42 = vadd.f32 %v22180_v20, %v11018_v14  ;;  %v11410_v1 = vadd.f32 %v22184_v3, %v11021_v56  ;;  %v11024_v46 = vadd.f32 %v22190_v59, %v22083_v23  ;;  %v11408_v55 = vadd.f32 %v22188_v47, %v11019_v13 }
 0x437   : > { %12565 = vst [vmem:[%s17111_s23 + $0x30] sm:$0xff] %v12533_v58  ;;  %v12531_v51 = vmax.f32 %v12499_v50, 0.0  ;;  %v12502_v22 = vadd.f32 %v22265_v9, %v12462_v24  ;;  %v12460_v52 = vadd.f32 %v12347_v25, %v11930_v27  ;;  %v11935_v53 = vadd.f32 %v16326_v6, %v11405_v57 }
 0x438   : > { %v11830_v12 = vpop.f32.mrf.mxu1  ;;  %v12360_v40 = vpop.f32.mrf.mxu0  ;;  %v11022_v25 = vadd.f32 %v22194_v28, %v22086_v63  ;;  %v11413_v27 = vadd.f32 %v22192_v18, %v11024_v46  ;;  %v23202_v46 = vld [vmem:[#allocation72_spill] sm:$0xff] }
 0x439   : > { %12563 = vst [vmem:[%s17111_s23 + $0x20] sm:$0xff] %v12531_v51  ;;  %v12534_v29 = vmax.f32 %v12502_v22, 0.0  ;;  %v12500_v54 = vadd.f32 %v22265_v9, %v12460_v52  ;;  %v12465_v43 = vadd.f32 %v16374_v0, %v11935_v53  ;;  %v11933_v34 = vadd.f32 %v11830_v12, %v11403_v15  ;;  %v23189_v15 = vld [vmem:[#allocation29_spill] sm:$0xff]  ;;  %v23191_v52 = vld [vmem:[#allocation34_spill] sm:$0xff] }
 0x43a   : > { %v16327_v21 = vpop.f32.mrf.mxu1  ;;  %v16375_v62 = vpop.f32.mrf.mxu0  ;;  %v11025_v6 = vadd.f32 %v23190_v60, %v23189_v15  ;;  %v11411_v53 = vadd.f32 %v23191_v52, %v11022_v25  ;;  %v23203_v25 = vld [vmem:[#allocation75_spill] sm:$0xff] }
 0x43b   : > { %12566 = vst [vmem:[%s17111_s23 + $0x38] sm:$0xff] %v12534_v29  ;;  %v12532_v7 = vmax.f32 %v12500_v54, 0.0  ;;  %v12505_v5 = vadd.f32 %v22265_v9, %v12465_v43  ;;  %v12463_v61 = vadd.f32 %v12360_v40, %v11933_v34  ;;  %v11936_v8 = vadd.f32 %v16327_v21, %v11406_v48  ;;  %v23192_v48 = vld [vmem:[#allocation63_spill] sm:$0xff]  ;;  %v23195_v21 = vld [vmem:[#allocation33_spill] sm:$0xff] }
 0x43c   : > { %v11833_v2 = vpop.f32.mrf.mxu1  ;;  %v12363_v38 = vpop.f32.mrf.mxu0  ;;  %v11023_v12 = vadd.f32 %v23193_v16, %v23192_v48 }
 0x43d   : > { %12564 = vst [vmem:[%s17111_s23 + $0x28] sm:$0xff] %v12532_v7  ;;  %v12537_v49 = vmax.f32 %v12505_v5, 0.0  ;;  %v12503_v44 = vadd.f32 %v22265_v9, %v12463_v61  ;;  %v12466_v11 = vadd.f32 %v16375_v62, %v11936_v8  ;;  %v11934_v45 = vadd.f32 %v11833_v2, %v11404_v41  ;;  %v23194_v41 = vld [vmem:[#allocation38_spill] sm:$0xff]  ;;  %v23196_v62 = vld [vmem:[#allocation65_spill] sm:$0xff] }
 0x43e   : > { %v16330_v33 = vpop.f32.mrf.mxu1  ;;  %v16378_v19 = vpop.f32.mrf.mxu0  ;;  %v11414_v14 = vadd.f32 %v23194_v41, %v11025_v6  ;;  %v11028_v7 = vadd.f32 %v23196_v62, %v23195_v21 }
 0x43f   : > { %12569 = vst [vmem:[%s17111_s23 + $0x50] sm:$0xff] %v12537_v49  ;;  %v12535_v37 = vmax.f32 %v12503_v44, 0.0  ;;  %v12506_v4 = vadd.f32 %v22265_v9, %v12466_v11  ;;  %v12464_v30 = vadd.f32 %v12363_v38, %v11934_v45  ;;  %v11939_v32 = vadd.f32 %v16330_v33, %v11409_v17  ;;  %v23197_v38 = vld [vmem:[#allocation64_spill] sm:$0xff]  ;;  %v23198_v44 = vld [vmem:[#allocation62_spill] sm:$0xff] }
 0x440   : > { %v11846_v10 = vpop.f32.mrf.mxu1  ;;  %v12376_v57 = vpop.f32.mrf.mxu0  ;;  %v11412_v49 = vadd.f32 %v23197_v38, %v11023_v12  ;;  %v23199_v11 = vld [vmem:[#allocation32_spill] sm:$0xff] }
 0x441   : > { %12567 = vst [vmem:[%s17111_s23 + $0x40] sm:$0xff] %v12535_v37  ;;  %v12538_v20 = vmax.f32 %v12506_v4, 0.0  ;;  %v12504_v31 = vadd.f32 %v22265_v9, %v12464_v30  ;;  %v12469_v36 = vadd.f32 %v16378_v19, %v11939_v32  ;;  %v11937_v39 = vadd.f32 %v11846_v10, %v11407_v42  ;;  %v23200_v30 = vld [vmem:[#allocation68_spill] sm:$0xff] }
 0x442   : > { %v16331_v58 = vpop.f32.mrf.mxu1  ;;  %v16379_v50 = vpop.f32.mrf.mxu0  ;;  %v11026_v45 = vadd.f32 %v23199_v11, %v23198_v44  ;;  %v11417_v32 = vadd.f32 %v23200_v30, %v11028_v7 }
 0x443   : > { %12570 = vst [vmem:[%s17111_s23 + $0x58] sm:$0xff] %v12538_v20  ;;  %v12536_v3 = vmax.f32 %v12504_v31, 0.0  ;;  %v12509_v23 = vadd.f32 %v22265_v9, %v12469_v36  ;;  %v12467_v59 = vadd.f32 %v12376_v57, %v11937_v39  ;;  %v11940_v24 = vadd.f32 %v16331_v58, %v11410_v1  ;;  %v23201_v1 = vld [vmem:[#allocation67_spill] sm:$0xff] }
 0x444   : > { %v11849_v0 = vpop.f32.mrf.mxu1  ;;  %v12379_v51 = vpop.f32.mrf.mxu0  ;;  %v11029_v10 = vadd.f32 %v23202_v46, %v23201_v1  ;;  %v11415_v58 = vadd.f32 %v23203_v25, %v11026_v45 }
 0x445   : > { %12568 = vst [vmem:[%s17111_s23 + $0x48] sm:$0xff] %v12536_v3  ;;  %v12541_v47 = vmax.f32 %v12509_v23, 0.0  ;;  %v12507_v63 = vadd.f32 %v22265_v9, %v12467_v59  ;;  %v12470_v28 = vadd.f32 %v16379_v50, %v11940_v24  ;;  %v11938_v22 = vadd.f32 %v11849_v0, %v11408_v55  ;;  %v23204_v50 = vld [vmem:[#allocation52_spill] sm:$0xff]  ;;  %v23205_v3 = vld [vmem:[#allocation74_spill] sm:$0xff]  ;;  %v23206_v0 = vld [vmem:[#allocation73_spill] sm:$0xff] }
 0x446   : > { %v16382_v29 = vpop.f32.mrf.mxu0  ;;  %v11027_v23 = vadd.f32 %v23205_v3, %v23204_v50 }
 0x447   : > { %v16334_v40 = vpop.f32.mrf.mxu1  ;;  %12573 = vst [vmem:[%s17111_s23 + $0x70] sm:$0xff] %v12541_v47  ;;  %v12539_v18 = vmax.f32 %v12507_v63, 0.0  ;;  %v12510_v54 = vadd.f32 %v22265_v9, %v12470_v28  ;;  %v12468_v43 = vadd.f32 %v12379_v51, %v11938_v22  ;;  %v11418_v51 = vadd.f32 %v23206_v0, %v11029_v10  ;;  %v23207_v47 = vld [vmem:[#allocation54_spill] sm:$0xff]  ;;  %v23208_v63 = vld [vmem:[#allocation47_spill] sm:$0xff] }
 0x448   : > { %v11943_v34 = vadd.f32 %v16334_v40, %v11413_v27  ;;  %v12392_v61 = vpop.f32.mrf.mxu0  ;;  %v11032_v28 = vadd.f32 %v23208_v63, %v23207_v47  ;;  %v23209_v40 = vld [vmem:[#allocation22_spill] sm:$0xff] }
 0x449   : > { %v11862_v5 = vpop.f32.mrf.mxu1  ;;  %12571 = vst [vmem:[%s17111_s23 + $0x60] sm:$0xff] %v12539_v18  ;;  %v12542_v8 = vmax.f32 %v12510_v54, 0.0  ;;  %v12508_v17 = vadd.f32 %v22265_v9, %v12468_v43  ;;  %v23210_v18 = vld [vmem:[#allocation70_spill] sm:$0xff]  ;;  %v23211_v54 = vld [vmem:[#allocation44_spill] sm:$0xff] }
 0x44a   : > { %v12473_v56 = vadd.f32 %v16382_v29, %v11943_v34  ;;  %v11941_v2 = vadd.f32 %v11862_v5, %v11411_v53  ;;  %v16383_v13 = vpop.f32.mrf.mxu0  ;;  %v11416_v29 = vadd.f32 %v23209_v40, %v11027_v23  ;;  %v11030_v43 = vadd.f32 %v23211_v54, %v23210_v18  ;;  %v23212_v5 = vld [vmem:[#allocation35_spill] sm:$0xff] }
 0x44b   : > { %v16335_v42 = vpop.f32.mrf.mxu1  ;;  %12574 = vst [vmem:[%s17111_s23 + $0x78] sm:$0xff] %v12542_v8  ;;  %v12540_v33 = vmax.f32 %v12508_v17, 0.0  ;;  %v23213_v8 = vld [vmem:[#allocation71_spill] sm:$0xff] }
 0x44c   : > { %v12513_v19 = vadd.f32 %v22265_v9, %v12473_v56  ;;  %v12471_v37 = vadd.f32 %v12392_v61, %v11941_v2  ;;  %v11944_v4 = vadd.f32 %v16335_v42, %v11414_v14  ;;  %v12395_v20 = vpop.f32.mrf.mxu0  ;;  %v11421_v61 = vadd.f32 %v23212_v5, %v11032_v28  ;;  %v23214_v17 = vld [vmem:[#allocation23_spill] sm:$0xff] }
 0x44d   : > { %v11865_v57 = vpop.f32.mrf.mxu1  ;;  %12572 = vst [vmem:[%s17111_s23 + $0x68] sm:$0xff] %v12540_v33  ;;  %v11033_v56 = vadd.f32 %v23214_v17, %v23213_v8  ;;  %v23215_v42 = vld [vmem:[#allocation55_spill] sm:$0xff]  ;;  %v23228_v8 = vld [vmem:[#allocation48_spill] sm:$0xff] }
 0x44e   : > { %v12545_v31 = vmax.f32 %v12513_v19, 0.0  ;;  %v12511_v36 = vadd.f32 %v22265_v9, %v12471_v37  ;;  %v12474_v39 = vadd.f32 %v16383_v13, %v11944_v4  ;;  %v11942_v55 = vadd.f32 %v11865_v57, %v11412_v49  ;;  %v16386_v24 = vpop.f32.mrf.mxu0  ;;  %v23216_v33 = vld [vmem:[#allocation59_spill] sm:$0xff]  ;;  %v23217_v19 = vld [vmem:[#allocation45_spill] sm:$0xff]  ;;  %v23218_v57 = vld [vmem:[#allocation56_spill] sm:$0xff] }
 0x44f   : > { %v16338_v59 = vpop.f32.mrf.mxu1  ;;  %v11419_v13 = vadd.f32 %v23215_v42, %v11030_v43  ;;  %v11031_v37 = vadd.f32 %v23217_v19, %v23216_v33  ;;  %v23226_v43 = vld [vmem:[#allocation57_spill] sm:$0xff] }
 0x450   : > { %12577 = vst [vmem:[%s17111_s23 + $0x90] sm:$0xff] %v12545_v31  ;;  %v12543_v27 = vmax.f32 %v12511_v36, 0.0  ;;  %v12514_v15 = vadd.f32 %v22265_v9, %v12474_v39  ;;  %v12472_v60 = vadd.f32 %v12395_v20, %v11942_v55  ;;  %v11947_v6 = vadd.f32 %v16338_v59, %v11417_v32  ;;  %v12408_v52 = vpop.f32.mrf.mxu0  ;;  %v23219_v31 = vld [vmem:[#allocation25_spill] sm:$0xff]  ;;  %v23221_v59 = vld [vmem:[#allocation20_spill] sm:$0xff] }
 0x451   : > { %v11878_v22 = vpop.f32.mrf.mxu1  ;;  %v11422_v20 = vadd.f32 %v23218_v57, %v11033_v56  ;;  %v23220_v36 = vld [vmem:[#allocation41_spill] sm:$0xff] }
 0x452   : > { %12575 = vst [vmem:[%s17111_s23 + $0x80] sm:$0xff] %v12543_v27  ;;  %v12546_v53 = vmax.f32 %v12514_v15, 0.0  ;;  %v12512_v48 = vadd.f32 %v22265_v9, %v12472_v60  ;;  %v12477_v16 = vadd.f32 %v16386_v24, %v11947_v6  ;;  %v11945_v12 = vadd.f32 %v11878_v22, %v11415_v58  ;;  %v16387_v41 = vpop.f32.mrf.mxu0  ;;  %v23222_v27 = vld [vmem:[#allocation40_spill] sm:$0xff]  ;;  %v23223_v15 = vld [vmem:[#allocation27_spill] sm:$0xff]  ;;  %v23224_v22 = vld [vmem:[#allocation42_spill] sm:$0xff] }
 0x453   : > { %v16339_v34 = vpop.f32.mrf.mxu1  ;;  %v11036_v39 = vadd.f32 %v23220_v36, %v23219_v31  ;;  %v11420_v24 = vadd.f32 %v23221_v59, %v11031_v37  ;;  %v11034_v60 = vadd.f32 %v23223_v15, %v23222_v27 }
 0x454   : > { %12578 = vst [vmem:[%s17111_s23 + $0x98] sm:$0xff] %v12546_v53  ;;  %v12544_v14 = vmax.f32 %v12512_v48, 0.0  ;;  %v12517_v21 = vadd.f32 %v22265_v9, %v12477_v16  ;;  %v12475_v62 = vadd.f32 %v12408_v52, %v11945_v12  ;;  %v11948_v7 = vadd.f32 %v16339_v34, %v11418_v51  ;;  %v12411_v38 = vpop.f32.mrf.mxu0  ;;  %v23225_v53 = vld [vmem:[#allocation76_spill] sm:$0xff] }
 0x455   : > { %v11881_v2 = vpop.f32.mrf.mxu1  ;;  %v11425_v52 = vadd.f32 %v23224_v22, %v11036_v39  ;;  %v11037_v48 = vadd.f32 %v22247_v35, %v23225_v53  ;;  %v11423_v34 = vadd.f32 %v23226_v43, %v11034_v60 }
 0x456   : > { %12576 = vst [vmem:[%s17111_s23 + $0x88] sm:$0xff] %v12544_v14  ;;  %v12549_v49 = vmax.f32 %v12517_v21, 0.0  ;;  %v12515_v44 = vadd.f32 %v22265_v9, %v12475_v62  ;;  %v12478_v11 = vadd.f32 %v16387_v41, %v11948_v7  ;;  %v11946_v45 = vadd.f32 %v11881_v2, %v11416_v29  ;;  %v16390_v30 = vpop.f32.mrf.mxu0  ;;  %v23227_v41 = vld [vmem:[#allocation28_spill] sm:$0xff] }
 0x457   : > { %v16342_v4 = vpop.f32.mrf.mxu1  ;;  %v11035_v14 = vadd.f32 %v22252_v26, %v23227_v41  ;;  %v11426_v17 = vadd.f32 %v23228_v8, %v11037_v48 }
 0x458   : > { %12581 = vst [vmem:[%s17111_s23 + $0xb0] sm:$0xff] %v12549_v49  ;;  %v12547_v32 = vmax.f32 %v12515_v44, 0.0  ;;  %v12518_v1 = vadd.f32 %v22265_v9, %v12478_v11  ;;  %v12476_v46 = vadd.f32 %v12411_v38, %v11946_v45  ;;  %v11951_v10 = vadd.f32 %v16342_v4, %v11421_v61  ;;  %v12424_v25 = vpop.f32.mrf.mxu0  ;;  %v23229_v11 = vld [vmem:[#allocation21_spill] sm:$0xff] }
 0x459   : > { %v11894_v55 = vpop.f32.mrf.mxu1  ;;  %v11424_v45 = vadd.f32 %v23229_v11, %v11035_v14 }
 0x45a   : > { %12579 = vst [vmem:[%s17111_s23 + $0xa0] sm:$0xff] %v12547_v32  ;;  %v12550_v58 = vmax.f32 %v12518_v1, 0.0  ;;  %v12516_v50 = vadd.f32 %v22265_v9, %v12476_v46  ;;  %v12481_v3 = vadd.f32 %v16390_v30, %v11951_v10  ;;  %v11949_v23 = vadd.f32 %v11894_v55, %v11419_v13  ;;  %v16391_v0 = vpop.f32.mrf.mxu0 }
 0x45b   : > { %v16343_v6 = vpop.f32.mrf.mxu1 }
 0x45c   : > { %12582 = vst [vmem:[%s17111_s23 + $0xb8] sm:$0xff] %v12550_v58  ;;  %v12548_v51 = vmax.f32 %v12516_v50, 0.0  ;;  %v12521_v47 = vadd.f32 %v22265_v9, %v12481_v3  ;;  %v12479_v63 = vadd.f32 %v12424_v25, %v11949_v23  ;;  %v11952_v28 = vadd.f32 %v16343_v6, %v11422_v20  ;;  %v12427_v12 = vpop.f32.mrf.mxu0 }
 0x45d   : > { %v11897_v16 = vpop.f32.mrf.mxu1 }
 0x45e   : > { %12580 = vst [vmem:[%s17111_s23 + $0xa8] sm:$0xff] %v12548_v51  ;;  %v12553_v40 = vmax.f32 %v12521_v47, 0.0  ;;  %v12519_v29 = vadd.f32 %v22265_v9, %v12479_v63  ;;  %v12482_v18 = vadd.f32 %v16391_v0, %v11952_v28  ;;  %v11950_v54 = vadd.f32 %v11897_v16, %v11420_v24  ;;  %v16394_v62 = vpop.f32.mrf.mxu0 }
 0x45f   : > { %v16346_v21 = vpop.f32.mrf.mxu1 }
 0x460   : > { %12585 = vst [vmem:[%s17111_s23 + $0xd0] sm:$0xff] %v12553_v40  ;;  %v12551_v7 = vmax.f32 %v12519_v29, 0.0  ;;  %v12522_v35 = vadd.f32 %v22265_v9, %v12482_v18  ;;  %v12480_v5 = vadd.f32 %v12427_v12, %v11950_v54  ;;  %v11955_v61 = vadd.f32 %v16346_v21, %v11425_v52  ;;  %v12440_v2 = vpop.f32.mrf.mxu0 }
 0x461   : > { %v11910_v56 = vpop.f32.mrf.mxu1 }
 0x462   : > { %12583 = vst [vmem:[%s17111_s23 + $0xc0] sm:$0xff] %v12551_v7  ;;  %v12554_v38 = vmax.f32 %v12522_v35, 0.0  ;;  %v12520_v49 = vadd.f32 %v22265_v9, %v12480_v5  ;;  %v12485_v44 = vadd.f32 %v16394_v62, %v11955_v61  ;;  %v11953_v26 = vadd.f32 %v11910_v56, %v11423_v34  ;;  %v16395_v13 = vpop.f32.mrf.mxu0 }
 0x463   : > { %v16347_v42 = vpop.f32.mrf.mxu1 }
 0x464   : > { %12586 = vst [vmem:[%s17111_s23 + $0xd8] sm:$0xff] %v12554_v38  ;;  %v12552_v33 = vmax.f32 %v12520_v49, 0.0  ;;  %v12525_v19 = vadd.f32 %v22265_v9, %v12485_v44  ;;  %v12483_v37 = vadd.f32 %v12440_v2, %v11953_v26  ;;  %v11956_v4 = vadd.f32 %v16347_v42, %v11426_v17  ;;  %v12443_v57 = vpop.f32.mrf.mxu0 }
 0x465   : > { %v11913_v30 = vpop.f32.mrf.mxu1 }
 0x466   : > { %12584 = vst [vmem:[%s17111_s23 + $0xc8] sm:$0xff] %v12552_v33  ;;  %v12557_v32 = vmax.f32 %v12525_v19, 0.0  ;;  %v12523_v1 = vadd.f32 %v22265_v9, %v12483_v37  ;;  %v12486_v46 = vadd.f32 %v16395_v13, %v11956_v4  ;;  %v11954_v10 = vadd.f32 %v11913_v30, %v11424_v45 }
 0x468   : > { %12589 = vst [vmem:[%s17111_s23 + $0xf0] sm:$0xff] %v12557_v32  ;;  %v12555_v20 = vmax.f32 %v12523_v1, 0.0  ;;  %v12526_v31 = vadd.f32 %v22265_v9, %v12486_v46  ;;  %v12484_v36 = vadd.f32 %v12443_v57, %v11954_v10 }
 0x46a   : > { %12587 = vst [vmem:[%s17111_s23 + $0xe0] sm:$0xff] %v12555_v20  ;;  %v12558_v39 = vmax.f32 %v12526_v31, 0.0  ;;  %v12524_v55 = vadd.f32 %v22265_v9, %v12484_v36 }
 0x46c   : > { %12590 = vst [vmem:[%s17111_s23 + $0xf8] sm:$0xff] %v12558_v39  ;;  %v12556_v25 = vmax.f32 %v12524_v55, 0.0 }
 0x46e   : > { %12588 = vst [vmem:[%s17111_s23 + $0xe8] sm:$0xff] %v12556_v25 }
 0x46f   : > { %16894 = shalt.err (!%p16891_p11)
}
 0x470   : > { %s16895_s28 = scalar_lea.hbm %s22418_s6, 4096  ;;  %s16899_s18 = scalar_lea.hbm %s22474_s3, 8192 }
 0x471   : > { %p16896_p13 = scmp.ne.s32.totalorder %s22418_s6, %s16895_s28  ;;  %p16900_p7 = scmp.lt.s32.totalorder %s22418_s6, %s22474_s3 }
 0x472   : > { %p16901_p9 = scmp.lt.s32.totalorder %s16899_s18, %s16895_s28 }
 0x473   : > { %p16897_p0 = pnand %p16896_p13, %p23230_p2 }
 0x474   : > { %p16902_p12 = por %p16901_p9, %p16900_p7 }
 0x475   : > { %p16898_p6 = pneg %p16897_p0 }
 0x477   : > { %p16903_p1 = pnand %p16902_p12, %p16898_p6 }
 0x479   : > { %16906 = shalt.err (!%p16903_p1)
}
 0x47a   : > { %s16977_s23 = smov 128   ;;  %s16978_s29 = smov 8  }
 0x47b   : > { %16420 = dma.vmem_to_hbm [thread:$0]  (%p23230_p2), %s22420_s30, 4096, %s22418_s6, %s22426_s15, %s16977_s23, %s16977_s23, %s16978_s29  }
 0x47c PF: > { %p16437_p5 = scmp.ge.s32.totalorder %s16967_s17, 2  ;;  %s12623_s26 = sand.u32 1, %s16947_s12  }
 0x47d   : > { %p23231_p3 = scmp.ne.s32.totalorder %s22534_s24, 0  ;;  %s12624_s4 = scalar_lea.sflag [#allocation6], %s12623_s26 }
 0x47f   : > { %p16430_p4 = pnand %p16437_p5, %p23231_p3 }
 0x481   : > { %p16431_p8 = pneg %p16430_p4 }
 0x483   : > { %16942 = dma.done.wait (%p16431_p8), %s12624_s4, 4096  }
 0x484   : > { %16944 = vsyncadd (%p16431_p8), %s12624_s4, 4294963200  ;;  %s18_s17 = sadd.s32 1, %s16967_s17   ;;  %s23232_s12 = smov %s16951_s13 }
 0x485   : > { %p15_p10 = scmp.ge.s32.totalorder %s18_s17, 4   ;;  %s23233_s13 = smov %s16955_s14 }
 0x486   : > { %s23234_s14 = smov %s17052_s25  ;;  %s23235_s15 = smov %s16963_s16 }
 0x487   : > { %s23236_s16 = smov %s23238_s20  ;;  %17 = sbr.rel (!%p15_p10) target bundleno = 6 (0x6), region = 123 }
 0x48c   :  { %12629 = vsyncpa [#allocation5], 1 }
 0x48d   :  { %12631 = vsyncpa [#allocation5 + $0x1], 1 }
 0x48e   :  { %12632 = vsyncpa [#allocation8], 1 }
 0x48f   :  { %12633 = vsyncpa [#allocation6], 1 }
 0x490   :  { %12635 = vsyncpa [#allocation6 + $0x1], 1 }
 0x491   :  { %12636 = vsyncmov [#allocation3] }
 0x494   :  { %s12637_s22 = vpop.sfrf %12636 }
 0x495   :  { %p14592_p2 = scmp.ne.s32.totalorder %s12637_s22, 0 }
 0x497   :  { %12641 = shalt.err (%p14592_p2)  }
 0x498   :  { %12643 = vsyncmov [#allocation3 + $0x1] }
 0x49b   :  { %s12644_s24 = vpop.sfrf %12643 }
 0x49c   :  { %p14593_p11 = scmp.ne.s32.totalorder %s12644_s24, 0 }
 0x49e   :  { %12648 = shalt.err (%p14593_p11)  }

</bundles_post_ra>
